<compile_context>
chip_gen: v5e
topology: v5e:2x2
jax: 0.10.0
libtpu: 0.0.40
codegen_flags: <defaults>
</compile_context>

<pallas_src>
import functools

import numpy as np
import jax
import jax.numpy as jnp
from jax.experimental import pallas as pl
from jax.experimental.pallas import tpu as pltpu

KSIZE = 5                                              # TCN kernel_size
RF_X = 1 + 2 * (KSIZE - 1) * 1 + 2 * (KSIZE - 1) * 2   # receptive field = 25


def _round_up(v, m):
    return (v + m - 1) // m * m


def _multi_gait_kernel(x_ref, onehot_ref,
                       w1a_ref, b1a_ref, w1b_ref, b1b_ref, wd1_ref, bd1_ref,
                       w2a_ref, b2a_ref, w2b_ref, b2b_ref, wd2_ref, bd2_ref,
                       wh1_ref, bh1_ref, wh2_ref, bh2_ref,
                       out_ref, *, t_orig):
    f32, bf16 = jnp.float32, jnp.bfloat16
    x = x_ref[...]                                   # (Bt, 25, Cin) bf16
    bt, rf, cin = x.shape
    w1 = rf - (KSIZE - 1)                            # 21
    w2 = w1 - (KSIZE - 1)                            # 17
    w3 = w2 - 2 * (KSIZE - 1)                        # 9

    def conv(h_bf, w_ref, b_ref, dilation, w_out):
        """Causal dilated conv over a window as ONE im2col matmul (f32 acc)."""
        c = h_bf.shape[-1]
        cols = jnp.concatenate(
            [h_bf[:, k * dilation:k * dilation + w_out, :] for k in range(KSIZE)],
            axis=-1)                                 # (Bt, w_out, K*c)
        acc = jnp.dot(cols.reshape(bt * w_out, KSIZE * c), w_ref[...],
                      preferred_element_type=f32) + b_ref[...]
        return acc.reshape(bt, w_out, -1)

    def zero_leading(a, n_bad):
        """Zero window rows that map to t < 0 (causal zero history)."""
        if n_bad <= 0:
            return a
        row = jax.lax.broadcasted_iota(jnp.int32, (a.shape[1], a.shape[2]), 0)
        return jnp.where((row >= n_bad)[None], a, 0.0)

    # ---- temporal block 1 (dilation 1, Cin -> C1P) ----
    h1 = jnp.maximum(conv(x, w1a_ref, b1a_ref, 1, w1), 0.0)          # (Bt,21,C1P)
    h1 = zero_leading(h1, w1 - t_orig)
    h2 = jnp.maximum(conv(h1.astype(bf16), w1b_ref, b1b_ref, 1, w2), 0.0)
    xr = x[:, rf - w2:, :]                                           # (Bt,17,Cin)
    res1 = (jnp.dot(xr.reshape(bt * w2, cin), wd1_ref[...],
                    preferred_element_type=f32)
            + bd1_ref[...]).reshape(bt, w2, -1)
    blk1 = zero_leading(jnp.maximum(h2 + res1, 0.0), w2 - t_orig)    # (Bt,17,C1P)
    blk1_bf = blk1.astype(bf16)

    # ---- temporal block 2 (dilation 2, C1P -> C2P), last time step only ----
    g1 = jnp.maximum(conv(blk1_bf, w2a_ref, b2a_ref, 2, w3), 0.0)    # (Bt,9,C2P)
    g1 = zero_leading(g1, w3 - t_orig)
    g2 = jnp.maximum(conv(g1.astype(bf16), w2b_ref, b2b_ref, 2, 1), 0.0)
    res2 = jnp.dot(blk1_bf[:, w2 - 1, :], wd2_ref[...],
                   preferred_element_type=f32) + bd2_ref[...]        # (Bt,C2P)
    feat = jnp.maximum(g2[:, 0, :] + res2, 0.0)                      # (Bt,C2P)

    # ---- fused per-task prediction heads ----
    z = jnp.tanh(jnp.dot(feat.astype(bf16), wh1_ref[...],
                         preferred_element_type=f32) + bh1_ref[...])  # (Bt,H*C1P)
    y = jnp.dot(z.astype(bf16), wh2_ref[...],
                preferred_element_type=f32) + bh2_ref[...]            # (Bt,H*OUT)
    onehot = onehot_ref[...]                                          # (Bt,H) f32
    n_heads = onehot.shape[1]
    n_out = out_ref.shape[1]
    out = jnp.zeros((bt, n_out), f32)
    for h in range(n_heads):
        out = out + onehot[:, h:h + 1] * y[:, h * n_out:(h + 1) * n_out]
    out_ref[...] = out.astype(out_ref.dtype)


def multi_gait_adapter(x_btc, task_labels, head_ids, params, out_features,
                       b_tile=8):
    """x_btc: (B, T, Cin) f32; task_labels: (B,) int32; params: flat tuple."""
    (w1a, b1a, w1b, b1b, wd1, bd1,
     w2a, b2a, w2b, b2b, wd2, bd2,
     wh1, bh1, wh2, bh2) = params
    B, T, cin = x_btc.shape
    n_heads = len(head_ids)
    c1, c2 = wd1.shape[1], wd2.shape[1]
    c1p, c2p = _round_up(c1, 128), _round_up(c2, 128)
    bf16 = jnp.bfloat16

    # -- only the last RF_X time steps feed blk2[:, -1]; zero-pad if T < RF_X --
    if T >= RF_X:
        x_win = x_btc[:, T - RF_X:, :]
    else:
        x_win = jnp.pad(x_btc, ((0, 0), (RF_X - T, 0), (0, 0)))

    # -- pad channels to lane-dense widths; fold conv taps into (K*Cin, Cout) --
    def conv_w(w, cin_p, cout_p):
        k, ci, co = w.shape
        wp = jnp.pad(w, ((0, 0), (0, cin_p - ci), (0, cout_p - co)))
        return wp.reshape(k * cin_p, cout_p).astype(bf16)

    def pad_cols(a, n):
        return jnp.pad(a, [(0, 0)] * (a.ndim - 1) + [(0, n - a.shape[-1])])

    W1A, B1A = conv_w(w1a, cin, c1p), pad_cols(b1a, c1p)
    W1B, B1B = conv_w(w1b, c1p, c1p), pad_cols(b1b, c1p)
    WD1, BD1 = pad_cols(wd1, c1p).astype(bf16), pad_cols(bd1, c1p)
    W2A, B2A = conv_w(w2a, c1p, c2p), pad_cols(b2a, c2p)
    W2B, B2B = conv_w(w2b, c2p, c2p), pad_cols(b2b, c2p)
    WD2 = jnp.pad(wd2, ((0, c1p - c1), (0, c2p - c2))).astype(bf16)
    BD2 = pad_cols(bd2, c2p)

    # -- fuse the H heads: (C2P, H*C1P) first layer; block-diag second layer --
    WH1 = jnp.pad(wh1, ((0, 0), (0, c2p - c2), (0, c1p - c1)))     # (H,C2P,C1P)
    WH1 = jnp.transpose(WH1, (1, 0, 2)).reshape(c2p, n_heads * c1p).astype(bf16)
    BH1 = pad_cols(bh1, c1p).reshape(1, n_heads * c1p)
    WH2 = jnp.zeros((n_heads * c1p, n_heads * out_features), jnp.float32)
    for h in range(n_heads):
        WH2 = WH2.at[h * c1p:h * c1p + c1,
                     h * out_features:(h + 1) * out_features].set(wh2[h])
    WH2 = WH2.astype(bf16)
    BH2 = bh2.reshape(1, n_heads * out_features)

    onehot = (task_labels[:, None] ==
              jnp.asarray(head_ids, jnp.int32)[None, :]).astype(jnp.float32)

    # -- batch tiling: pad B up to a multiple of the tile --
    b_tile = max(8, _round_up(min(b_tile, B), 8))
    bp = _round_up(B, b_tile)
    if bp != B:
        x_win = jnp.pad(x_win, ((0, bp - B), (0, 0), (0, 0)))
        onehot = jnp.pad(onehot, ((0, bp - B), (0, 0)))
    x_win = x_win.astype(bf16)

    args = (x_win, onehot, W1A, B1A, W1B, B1B, WD1, BD1,
            W2A, B2A, W2B, B2B, WD2, BD2, WH1, BH1, WH2, BH2)

    def resident(a):                 # full-array block, stays resident in VMEM
        return pl.BlockSpec(a.shape, lambda i: (0,) * a.ndim)

    in_specs = ([pl.BlockSpec((b_tile, RF_X, cin), lambda i: (i, 0, 0)),
                 pl.BlockSpec((b_tile, n_heads), lambda i: (i, 0))]
                + [resident(a) for a in args[2:]])
    out_specs = pl.BlockSpec((b_tile, out_features), lambda i: (i, 0))

    out = pl.pallas_call(
        functools.partial(_multi_gait_kernel, t_orig=min(T, RF_X)),
        grid=(bp // b_tile,),
        out_shape=jax.ShapeDtypeStruct((bp, out_features), jnp.float32),
        in_specs=in_specs,
        out_specs=out_specs,
        compiler_params=pltpu.CompilerParams(
            dimension_semantics=("parallel",),
            vmem_limit_bytes=32 * 1024 * 1024),
    )(*args)
    return out[:B]


# ---------------- pure-JAX f32 reference (for correctness check) ----------------
def reference_forward(x_btc, task_labels, head_ids, params, out_features):
    (w1a, b1a, w1b, b1b, wd1, bd1,
     w2a, b2a, w2b, b2b, wd2, bd2,
     wh1, bh1, wh2, bh2) = params

    def cconv(h, w, b, d):
        K = w.shape[0]
        B, T, _ = h.shape
        acc = jnp.zeros((B, T, w.shape[2]), jnp.float32)
        for k in range(K):
            s = (K - 1 - k) * d
            hs = jnp.pad(h, ((0, 0), (s, 0), (0, 0)))[:, :T, :]
            acc = acc + jnp.einsum('btc,cd->btd', hs, w[k])
        return acc + b[None]

    h = jnp.maximum(cconv(x_btc, w1a, b1a, 1), 0.0)
    h = jnp.maximum(cconv(h, w1b, b1b, 1), 0.0)
    blk1 = jnp.maximum(h + jnp.einsum('btc,cd->btd', x_btc, wd1) + bd1[None], 0.0)
    g = jnp.maximum(cconv(blk1, w2a, b2a, 2), 0.0)
    g = jnp.maximum(cconv(g, w2b, b2b, 2), 0.0)
    blk2 = jnp.maximum(g + jnp.einsum('btc,cd->btd', blk1, wd2) + bd2[None], 0.0)
    feat = blk2[:, -1, :]
    onehot = (task_labels[:, None] == jnp.asarray(head_ids, jnp.int32)[None, :]
              ).astype(jnp.float32)
    out = jnp.zeros((x_btc.shape[0], out_features), jnp.float32)
    for hh in range(wh1.shape[0]):
        z = jnp.tanh(feat @ wh1[hh] + bh1[hh])
        out = out + onehot[:, hh:hh + 1] * (z @ wh2[hh] + bh2[hh])
    return out


if __name__ == "__main__":
    CIN, C1, C2 = 4, 100, 200
    N_HEADS, OUT_FEATURES = 3, 1
    head_ids = list(range(1, N_HEADS + 1))

    key = jax.random.PRNGKey(0)
    ks = jax.random.split(key, 20)
    r = lambda k, shape, s=0.1: jax.random.normal(k, shape, jnp.float32) * s

    # TCN block 1 (Cin -> C1, dilation 1)
    w1a, b1a = r(ks[0], (KSIZE, CIN, C1)), r(ks[1], (1, C1))
    w1b, b1b = r(ks[2], (KSIZE, C1, C1)), r(ks[3], (1, C1))
    wd1, bd1 = r(ks[4], (CIN, C1)), r(ks[5], (1, C1))
    # TCN block 2 (C1 -> C2, dilation 2)
    w2a, b2a = r(ks[6], (KSIZE, C1, C2)), r(ks[7], (1, C2))
    w2b, b2b = r(ks[8], (KSIZE, C2, C2)), r(ks[9], (1, C2))
    wd2, bd2 = r(ks[10], (C1, C2)), r(ks[11], (1, C2))
    # Prediction heads. The module initializes them as identical deep-copies;
    # we use distinct per-head weights (as after training) to exercise routing.
    wh1 = r(ks[12], (N_HEADS, C2, C1))
    bh1 = r(ks[13], (N_HEADS, 1, C1))
    wh2 = r(ks[14], (N_HEADS, C1, OUT_FEATURES))
    bh2 = r(ks[15], (N_HEADS, 1, OUT_FEATURES))

    params = (w1a, b1a, w1b, b1b, wd1, bd1,
              w2a, b2a, w2b, b2b, wd2, bd2,
              wh1, bh1, wh2, bh2)

    # Two configs: T < receptive field (exercises causal-history masking) and
    # T > receptive field with a non-multiple-of-tile batch (exercises the grid).
    for (B, T, kx, kl) in [(8, 16, ks[16], ks[17]), (20, 40, ks[18], ks[19])]:
        x_ncw = jax.random.normal(kx, (B, CIN, T), jnp.float32)   # PyTorch NCW
        x_btc = jnp.transpose(x_ncw, (0, 2, 1))                   # kernel layout
        task_labels = jax.random.randint(kl, (B,), 1, N_HEADS + 1, jnp.int32)

        out = multi_gait_adapter(x_btc, task_labels, head_ids, params,
                                 OUT_FEATURES)
        out = jax.block_until_ready(out)

        ref = reference_forward(x_btc, task_labels, head_ids, params,
                                OUT_FEATURES)
        # bf16 MXU operands (f32 accumulation) vs. an f32 reference -> 2e-2 tol.
        np.testing.assert_allclose(np.asarray(out), np.asarray(ref),
                                   rtol=2e-2, atol=2e-2)
    print("KERNEL_OK")
</pallas_src>

<mosaic_0001>
module attributes {stable_mosaic.version = 11 : i64} {
  func.func @_multi_gait_kernel(%arg0: i32, %arg1: memref<8x25x4xbf16, #tpu.memory_space<vmem>>, %arg2: memref<8x3xf32, #tpu.memory_space<vmem>>, %arg3: memref<20x128xbf16, #tpu.memory_space<vmem>>, %arg4: memref<1x128xf32, #tpu.memory_space<vmem>>, %arg5: memref<640x128xbf16, #tpu.memory_space<vmem>>, %arg6: memref<1x128xf32, #tpu.memory_space<vmem>>, %arg7: memref<4x128xbf16, #tpu.memory_space<vmem>>, %arg8: memref<1x128xf32, #tpu.memory_space<vmem>>, %arg9: memref<640x256xbf16, #tpu.memory_space<vmem>>, %arg10: memref<1x256xf32, #tpu.memory_space<vmem>>, %arg11: memref<1280x256xbf16, #tpu.memory_space<vmem>>, %arg12: memref<1x256xf32, #tpu.memory_space<vmem>>, %arg13: memref<128x256xbf16, #tpu.memory_space<vmem>>, %arg14: memref<1x256xf32, #tpu.memory_space<vmem>>, %arg15: memref<256x384xbf16, #tpu.memory_space<vmem>>, %arg16: memref<1x384xf32, #tpu.memory_space<vmem>>, %arg17: memref<384x3xbf16, #tpu.memory_space<vmem>>, %arg18: memref<1x3xf32, #tpu.memory_space<vmem>>, %arg19: memref<8x1xf32, #tpu.memory_space<vmem>>) attributes {dimension_semantics = [#tpu.dimension_semantics<parallel>], iteration_bounds = array<i64: 1>, scalar_prefetch = 0 : i64, scratch_operands = 0 : i64, tpu.core_type = #tpu.core_type<tc>, window_params = [{transform_indices = @transform_0, window_bounds = array<i64: 8, 25, 4>}, {transform_indices = @transform_1, window_bounds = array<i64: 8, 3>}, {pipeline_mode = #tpu.pipeline_mode<synchronous>, transform_indices = @transform_2, window_bounds = array<i64: 20, 128>}, {pipeline_mode = #tpu.pipeline_mode<synchronous>, transform_indices = @transform_3, window_bounds = array<i64: 1, 128>}, {pipeline_mode = #tpu.pipeline_mode<synchronous>, transform_indices = @transform_4, window_bounds = array<i64: 640, 128>}, {pipeline_mode = #tpu.pipeline_mode<synchronous>, transform_indices = @transform_5, window_bounds = array<i64: 1, 128>}, {pipeline_mode = #tpu.pipeline_mode<synchronous>, transform_indices = @transform_6, window_bounds = array<i64: 4, 128>}, {pipeline_mode = #tpu.pipeline_mode<synchronous>, transform_indices = @transform_7, window_bounds = array<i64: 1, 128>}, {pipeline_mode = #tpu.pipeline_mode<synchronous>, transform_indices = @transform_8, window_bounds = array<i64: 640, 256>}, {pipeline_mode = #tpu.pipeline_mode<synchronous>, transform_indices = @transform_9, window_bounds = array<i64: 1, 256>}, {pipeline_mode = #tpu.pipeline_mode<synchronous>, transform_indices = @transform_10, window_bounds = array<i64: 1280, 256>}, {pipeline_mode = #tpu.pipeline_mode<synchronous>, transform_indices = @transform_11, window_bounds = array<i64: 1, 256>}, {pipeline_mode = #tpu.pipeline_mode<synchronous>, transform_indices = @transform_12, window_bounds = array<i64: 128, 256>}, {pipeline_mode = #tpu.pipeline_mode<synchronous>, transform_indices = @transform_13, window_bounds = array<i64: 1, 256>}, {pipeline_mode = #tpu.pipeline_mode<synchronous>, transform_indices = @transform_14, window_bounds = array<i64: 256, 384>}, {pipeline_mode = #tpu.pipeline_mode<synchronous>, transform_indices = @transform_15, window_bounds = array<i64: 1, 384>}, {pipeline_mode = #tpu.pipeline_mode<synchronous>, transform_indices = @transform_16, window_bounds = array<i64: 384, 3>}, {pipeline_mode = #tpu.pipeline_mode<synchronous>, transform_indices = @transform_17, window_bounds = array<i64: 1, 3>}, {transform_indices = @transform_18, window_bounds = array<i64: 8, 1>}]} {
    %c0 = arith.constant 0 : index
    %c0_0 = arith.constant 0 : index
    %c0_1 = arith.constant 0 : index
    %0 = vector.load %arg1[%c0, %c0_0, %c0_1] : memref<8x25x4xbf16, #tpu.memory_space<vmem>>, vector<8x25x4xbf16>
    %1 = vector.extract_strided_slice %0 {offsets = [0, 0, 0], sizes = [8, 21, 4], strides = [1, 1, 1]} : vector<8x25x4xbf16> to vector<8x21x4xbf16>
    %2 = vector.extract_strided_slice %0 {offsets = [0, 1, 0], sizes = [8, 21, 4], strides = [1, 1, 1]} : vector<8x25x4xbf16> to vector<8x21x4xbf16>
    %3 = vector.extract_strided_slice %0 {offsets = [0, 2, 0], sizes = [8, 21, 4], strides = [1, 1, 1]} : vector<8x25x4xbf16> to vector<8x21x4xbf16>
    %4 = vector.extract_strided_slice %0 {offsets = [0, 3, 0], sizes = [8, 21, 4], strides = [1, 1, 1]} : vector<8x25x4xbf16> to vector<8x21x4xbf16>
    %5 = vector.extract_strided_slice %0 {offsets = [0, 4, 0], sizes = [8, 21, 4], strides = [1, 1, 1]} : vector<8x25x4xbf16> to vector<8x21x4xbf16>
    %6 = tpu.concatenate %1, %2, %3, %4, %5 in 2 : vector<8x21x4xbf16>, vector<8x21x4xbf16>, vector<8x21x4xbf16>, vector<8x21x4xbf16>, vector<8x21x4xbf16> -> vector<8x21x20xbf16>
    %7 = vector.shape_cast %6 : vector<8x21x20xbf16> to vector<168x20xbf16>
    %c0_2 = arith.constant 0 : index
    %c0_3 = arith.constant 0 : index
    %8 = vector.load %arg3[%c0_2, %c0_3] : memref<20x128xbf16, #tpu.memory_space<vmem>>, vector<20x128xbf16>
    %cst = arith.constant dense<0.000000e+00> : vector<168x128xf32>
    %9 = tpu.matmul %7, %8, %cst {dimension_numbers = #tpu.dot_dimension_numbers<[1], [0], [0], [1], [0, 0, 1, 1], [], []>} : vector<168x20xbf16>, vector<20x128xbf16>, vector<168x128xf32> -> vector<168x128xf32>
    %c0_4 = arith.constant 0 : index
    %c0_5 = arith.constant 0 : index
    %10 = vector.load %arg4[%c0_4, %c0_5] : memref<1x128xf32, #tpu.memory_space<vmem>>, vector<1x128xf32>
    %11 = vector.broadcast %10 : vector<1x128xf32> to vector<168x128xf32>
    %12 = arith.addf %9, %11 : vector<168x128xf32>
    %13 = vector.shape_cast %12 : vector<168x128xf32> to vector<8x21x128xf32>
    %cst_6 = arith.constant 0.000000e+00 : f32
    %14 = vector.broadcast %cst_6 : f32 to vector<8x21x128xf32>
    %15 = arith.maximumf %13, %14 : vector<8x21x128xf32>
    %16 = tpu.iota {dimensions = array<i32: 0>} : vector<21x128xi32>
    %c5_i32 = arith.constant 5 : i32
    %17 = vector.broadcast %c5_i32 : i32 to vector<21x128xi32>
    %18 = arith.cmpi sge, %16, %17 : vector<21x128xi32>
    %19 = vector.shape_cast %18 : vector<21x128xi1> to vector<1x21x128xi1>
    %cst_7 = arith.constant 0.000000e+00 : f32
    %20 = vector.shape_cast %19 : vector<1x21x128xi1> to vector<1x21x128xi1>
    %21 = vector.broadcast %20 : vector<1x21x128xi1> to vector<8x21x128xi1>
    %22 = vector.broadcast %cst_7 : f32 to vector<8x21x128xf32>
    %23 = arith.select %21, %15, %22 : vector<8x21x128xi1>, vector<8x21x128xf32>
    %24 = arith.truncf %23 : vector<8x21x128xf32> to vector<8x21x128xbf16>
    %25 = vector.extract_strided_slice %24 {offsets = [0, 0, 0], sizes = [8, 17, 128], strides = [1, 1, 1]} : vector<8x21x128xbf16> to vector<8x17x128xbf16>
    %26 = vector.extract_strided_slice %24 {offsets = [0, 1, 0], sizes = [8, 17, 128], strides = [1, 1, 1]} : vector<8x21x128xbf16> to vector<8x17x128xbf16>
    %27 = vector.extract_strided_slice %24 {offsets = [0, 2, 0], sizes = [8, 17, 128], strides = [1, 1, 1]} : vector<8x21x128xbf16> to vector<8x17x128xbf16>
    %28 = vector.extract_strided_slice %24 {offsets = [0, 3, 0], sizes = [8, 17, 128], strides = [1, 1, 1]} : vector<8x21x128xbf16> to vector<8x17x128xbf16>
    %29 = vector.extract_strided_slice %24 {offsets = [0, 4, 0], sizes = [8, 17, 128], strides = [1, 1, 1]} : vector<8x21x128xbf16> to vector<8x17x128xbf16>
    %30 = tpu.concatenate %25, %26, %27, %28, %29 in 2 : vector<8x17x128xbf16>, vector<8x17x128xbf16>, vector<8x17x128xbf16>, vector<8x17x128xbf16>, vector<8x17x128xbf16> -> vector<8x17x640xbf16>
    %31 = vector.shape_cast %30 : vector<8x17x640xbf16> to vector<136x640xbf16>
    %c0_8 = arith.constant 0 : index
    %c0_9 = arith.constant 0 : index
    %32 = vector.load %arg5[%c0_8, %c0_9] : memref<640x128xbf16, #tpu.memory_space<vmem>>, vector<640x128xbf16>
    %cst_10 = arith.constant dense<0.000000e+00> : vector<136x128xf32>
    %33 = tpu.matmul %31, %32, %cst_10 {dimension_numbers = #tpu.dot_dimension_numbers<[1], [0], [0], [1], [0, 0, 1, 1], [], []>} : vector<136x640xbf16>, vector<640x128xbf16>, vector<136x128xf32> -> vector<136x128xf32>
    %c0_11 = arith.constant 0 : index
    %c0_12 = arith.constant 0 : index
    %34 = vector.load %arg6[%c0_11, %c0_12] : memref<1x128xf32, #tpu.memory_space<vmem>>, vector<1x128xf32>
    %35 = vector.broadcast %34 : vector<1x128xf32> to vector<136x128xf32>
    %36 = arith.addf %33, %35 : vector<136x128xf32>
    %37 = vector.shape_cast %36 : vector<136x128xf32> to vector<8x17x128xf32>
    %cst_13 = arith.constant 0.000000e+00 : f32
    %38 = vector.broadcast %cst_13 : f32 to vector<8x17x128xf32>
    %39 = arith.maximumf %37, %38 : vector<8x17x128xf32>
    %40 = vector.extract_strided_slice %0 {offsets = [0, 8, 0], sizes = [8, 17, 4], strides = [1, 1, 1]} : vector<8x25x4xbf16> to vector<8x17x4xbf16>
    %41 = vector.shape_cast %40 : vector<8x17x4xbf16> to vector<136x4xbf16>
    %c0_14 = arith.constant 0 : index
    %c0_15 = arith.constant 0 : index
    %42 = vector.load %arg7[%c0_14, %c0_15] : memref<4x128xbf16, #tpu.memory_space<vmem>>, vector<4x128xbf16>
    %cst_16 = arith.constant dense<0.000000e+00> : vector<136x128xf32>
    %43 = tpu.matmul %41, %42, %cst_16 {dimension_numbers = #tpu.dot_dimension_numbers<[1], [0], [0], [1], [0, 0, 1, 1], [], []>} : vector<136x4xbf16>, vector<4x128xbf16>, vector<136x128xf32> -> vector<136x128xf32>
    %c0_17 = arith.constant 0 : index
    %c0_18 = arith.constant 0 : index
    %44 = vector.load %arg8[%c0_17, %c0_18] : memref<1x128xf32, #tpu.memory_space<vmem>>, vector<1x128xf32>
    %45 = vector.broadcast %44 : vector<1x128xf32> to vector<136x128xf32>
    %46 = arith.addf %43, %45 : vector<136x128xf32>
    %47 = vector.shape_cast %46 : vector<136x128xf32> to vector<8x17x128xf32>
    %48 = arith.addf %39, %47 : vector<8x17x128xf32>
    %cst_19 = arith.constant 0.000000e+00 : f32
    %49 = vector.broadcast %cst_19 : f32 to vector<8x17x128xf32>
    %50 = arith.maximumf %48, %49 : vector<8x17x128xf32>
    %51 = tpu.iota {dimensions = array<i32: 0>} : vector<17x128xi32>
    %c1_i32 = arith.constant 1 : i32
    %52 = vector.broadcast %c1_i32 : i32 to vector<17x128xi32>
    %53 = arith.cmpi sge, %51, %52 : vector<17x128xi32>
    %54 = vector.shape_cast %53 : vector<17x128xi1> to vector<1x17x128xi1>
    %cst_20 = arith.constant 0.000000e+00 : f32
    %55 = vector.shape_cast %54 : vector<1x17x128xi1> to vector<1x17x128xi1>
    %56 = vector.broadcast %55 : vector<1x17x128xi1> to vector<8x17x128xi1>
    %57 = vector.broadcast %cst_20 : f32 to vector<8x17x128xf32>
    %58 = arith.select %56, %50, %57 : vector<8x17x128xi1>, vector<8x17x128xf32>
    %59 = arith.truncf %58 : vector<8x17x128xf32> to vector<8x17x128xbf16>
    %60 = vector.extract_strided_slice %59 {offsets = [0, 0, 0], sizes = [8, 9, 128], strides = [1, 1, 1]} : vector<8x17x128xbf16> to vector<8x9x128xbf16>
    %61 = vector.extract_strided_slice %59 {offsets = [0, 2, 0], sizes = [8, 9, 128], strides = [1, 1, 1]} : vector<8x17x128xbf16> to vector<8x9x128xbf16>
    %62 = vector.extract_strided_slice %59 {offsets = [0, 4, 0], sizes = [8, 9, 128], strides = [1, 1, 1]} : vector<8x17x128xbf16> to vector<8x9x128xbf16>
    %63 = vector.extract_strided_slice %59 {offsets = [0, 6, 0], sizes = [8, 9, 128], strides = [1, 1, 1]} : vector<8x17x128xbf16> to vector<8x9x128xbf16>
    %64 = vector.extract_strided_slice %59 {offsets = [0, 8, 0], sizes = [8, 9, 128], strides = [1, 1, 1]} : vector<8x17x128xbf16> to vector<8x9x128xbf16>
    %65 = tpu.concatenate %60, %61, %62, %63, %64 in 2 : vector<8x9x128xbf16>, vector<8x9x128xbf16>, vector<8x9x128xbf16>, vector<8x9x128xbf16>, vector<8x9x128xbf16> -> vector<8x9x640xbf16>
    %66 = vector.shape_cast %65 : vector<8x9x640xbf16> to vector<72x640xbf16>
    %c0_21 = arith.constant 0 : index
    %c0_22 = arith.constant 0 : index
    %67 = vector.load %arg9[%c0_21, %c0_22] : memref<640x256xbf16, #tpu.memory_space<vmem>>, vector<640x256xbf16>
    %cst_23 = arith.constant dense<0.000000e+00> : vector<72x256xf32>
    %68 = tpu.matmul %66, %67, %cst_23 {dimension_numbers = #tpu.dot_dimension_numbers<[1], [0], [0], [1], [0, 0, 1, 1], [], []>} : vector<72x640xbf16>, vector<640x256xbf16>, vector<72x256xf32> -> vector<72x256xf32>
    %c0_24 = arith.constant 0 : index
    %c0_25 = arith.constant 0 : index
    %69 = vector.load %arg10[%c0_24, %c0_25] : memref<1x256xf32, #tpu.memory_space<vmem>>, vector<1x256xf32>
    %70 = vector.broadcast %69 : vector<1x256xf32> to vector<72x256xf32>
    %71 = arith.addf %68, %70 : vector<72x256xf32>
    %72 = vector.shape_cast %71 : vector<72x256xf32> to vector<8x9x256xf32>
    %cst_26 = arith.constant 0.000000e+00 : f32
    %73 = vector.broadcast %cst_26 : f32 to vector<8x9x256xf32>
    %74 = arith.maximumf %72, %73 : vector<8x9x256xf32>
    %75 = arith.truncf %74 : vector<8x9x256xf32> to vector<8x9x256xbf16>
    %76 = vector.extract_strided_slice %75 {offsets = [0, 0, 0], sizes = [8, 1, 256], strides = [1, 1, 1]} : vector<8x9x256xbf16> to vector<8x1x256xbf16>
    %77 = vector.extract_strided_slice %75 {offsets = [0, 2, 0], sizes = [8, 1, 256], strides = [1, 1, 1]} : vector<8x9x256xbf16> to vector<8x1x256xbf16>
    %78 = vector.extract_strided_slice %75 {offsets = [0, 4, 0], sizes = [8, 1, 256], strides = [1, 1, 1]} : vector<8x9x256xbf16> to vector<8x1x256xbf16>
    %79 = vector.extract_strided_slice %75 {offsets = [0, 6, 0], sizes = [8, 1, 256], strides = [1, 1, 1]} : vector<8x9x256xbf16> to vector<8x1x256xbf16>
    %80 = vector.extract_strided_slice %75 {offsets = [0, 8, 0], sizes = [8, 1, 256], strides = [1, 1, 1]} : vector<8x9x256xbf16> to vector<8x1x256xbf16>
    %81 = tpu.concatenate %76, %77, %78, %79, %80 in 2 : vector<8x1x256xbf16>, vector<8x1x256xbf16>, vector<8x1x256xbf16>, vector<8x1x256xbf16>, vector<8x1x256xbf16> -> vector<8x1x1280xbf16>
    %82 = vector.shape_cast %81 : vector<8x1x1280xbf16> to vector<8x1280xbf16>
    %c0_27 = arith.constant 0 : index
    %c0_28 = arith.constant 0 : index
    %83 = vector.load %arg11[%c0_27, %c0_28] : memref<1280x256xbf16, #tpu.memory_space<vmem>>, vector<1280x256xbf16>
    %cst_29 = arith.constant dense<0.000000e+00> : vector<8x256xf32>
    %84 = tpu.matmul %82, %83, %cst_29 {dimension_numbers = #tpu.dot_dimension_numbers<[1], [0], [0], [1], [0, 0, 1, 1], [], []>} : vector<8x1280xbf16>, vector<1280x256xbf16>, vector<8x256xf32> -> vector<8x256xf32>
    %c0_30 = arith.constant 0 : index
    %c0_31 = arith.constant 0 : index
    %85 = vector.load %arg12[%c0_30, %c0_31] : memref<1x256xf32, #tpu.memory_space<vmem>>, vector<1x256xf32>
    %86 = vector.broadcast %85 : vector<1x256xf32> to vector<8x256xf32>
    %87 = arith.addf %84, %86 : vector<8x256xf32>
    %88 = vector.shape_cast %87 : vector<8x256xf32> to vector<8x1x256xf32>
    %cst_32 = arith.constant 0.000000e+00 : f32
    %89 = vector.broadcast %cst_32 : f32 to vector<8x1x256xf32>
    %90 = arith.maximumf %88, %89 : vector<8x1x256xf32>
    %91 = vector.extract_strided_slice %59 {offsets = [0, 16, 0], sizes = [8, 1, 128], strides = [1, 1, 1]} : vector<8x17x128xbf16> to vector<8x1x128xbf16>
    %92 = vector.shape_cast %91 : vector<8x1x128xbf16> to vector<8x128xbf16>
    %c0_33 = arith.constant 0 : index
    %c0_34 = arith.constant 0 : index
    %93 = vector.load %arg13[%c0_33, %c0_34] : memref<128x256xbf16, #tpu.memory_space<vmem>>, vector<128x256xbf16>
    %cst_35 = arith.constant dense<0.000000e+00> : vector<8x256xf32>
    %94 = tpu.matmul %92, %93, %cst_35 {dimension_numbers = #tpu.dot_dimension_numbers<[1], [0], [0], [1], [0, 0, 1, 1], [], []>} : vector<8x128xbf16>, vector<128x256xbf16>, vector<8x256xf32> -> vector<8x256xf32>
    %c0_36 = arith.constant 0 : index
    %c0_37 = arith.constant 0 : index
    %95 = vector.load %arg14[%c0_36, %c0_37] : memref<1x256xf32, #tpu.memory_space<vmem>>, vector<1x256xf32>
    %96 = vector.broadcast %95 : vector<1x256xf32> to vector<8x256xf32>
    %97 = arith.addf %94, %96 : vector<8x256xf32>
    %98 = vector.shape_cast %90 : vector<8x1x256xf32> to vector<8x256xf32>
    %99 = arith.addf %98, %97 : vector<8x256xf32>
    %cst_38 = arith.constant 0.000000e+00 : f32
    %100 = vector.broadcast %cst_38 : f32 to vector<8x256xf32>
    %101 = arith.maximumf %99, %100 : vector<8x256xf32>
    %102 = arith.truncf %101 : vector<8x256xf32> to vector<8x256xbf16>
    %c0_39 = arith.constant 0 : index
    %c0_40 = arith.constant 0 : index
    %103 = vector.load %arg15[%c0_39, %c0_40] : memref<256x384xbf16, #tpu.memory_space<vmem>>, vector<256x384xbf16>
    %cst_41 = arith.constant dense<0.000000e+00> : vector<8x384xf32>
    %104 = tpu.matmul %102, %103, %cst_41 {dimension_numbers = #tpu.dot_dimension_numbers<[1], [0], [0], [1], [0, 0, 1, 1], [], []>} : vector<8x256xbf16>, vector<256x384xbf16>, vector<8x384xf32> -> vector<8x384xf32>
    %c0_42 = arith.constant 0 : index
    %c0_43 = arith.constant 0 : index
    %105 = vector.load %arg16[%c0_42, %c0_43] : memref<1x384xf32, #tpu.memory_space<vmem>>, vector<1x384xf32>
    %106 = vector.broadcast %105 : vector<1x384xf32> to vector<8x384xf32>
    %107 = arith.addf %104, %106 : vector<8x384xf32>
    %108 = math.tanh %107 : vector<8x384xf32>
    %109 = arith.truncf %108 : vector<8x384xf32> to vector<8x384xbf16>
    %c0_44 = arith.constant 0 : index
    %c0_45 = arith.constant 0 : index
    %110 = vector.load %arg17[%c0_44, %c0_45] : memref<384x3xbf16, #tpu.memory_space<vmem>>, vector<384x3xbf16>
    %cst_46 = arith.constant dense<0.000000e+00> : vector<8x3xf32>
    %111 = tpu.matmul %109, %110, %cst_46 {dimension_numbers = #tpu.dot_dimension_numbers<[1], [0], [0], [1], [0, 0, 1, 1], [], []>} : vector<8x384xbf16>, vector<384x3xbf16>, vector<8x3xf32> -> vector<8x3xf32>
    %c0_47 = arith.constant 0 : index
    %c0_48 = arith.constant 0 : index
    %112 = vector.load %arg18[%c0_47, %c0_48] : memref<1x3xf32, #tpu.memory_space<vmem>>, vector<1x3xf32>
    %113 = vector.broadcast %112 : vector<1x3xf32> to vector<8x3xf32>
    %114 = arith.addf %111, %113 : vector<8x3xf32>
    %c0_49 = arith.constant 0 : index
    %c0_50 = arith.constant 0 : index
    %115 = vector.load %arg2[%c0_49, %c0_50] : memref<8x3xf32, #tpu.memory_space<vmem>>, vector<8x3xf32>
    %cst_51 = arith.constant 0.000000e+00 : f32
    %116 = vector.broadcast %cst_51 : f32 to vector<8x1xf32>
    %117 = vector.extract_strided_slice %115 {offsets = [0, 0], sizes = [8, 1], strides = [1, 1]} : vector<8x3xf32> to vector<8x1xf32>
    %118 = vector.extract_strided_slice %114 {offsets = [0, 0], sizes = [8, 1], strides = [1, 1]} : vector<8x3xf32> to vector<8x1xf32>
    %119 = arith.mulf %117, %118 : vector<8x1xf32>
    %120 = arith.addf %116, %119 : vector<8x1xf32>
    %121 = vector.extract_strided_slice %115 {offsets = [0, 1], sizes = [8, 1], strides = [1, 1]} : vector<8x3xf32> to vector<8x1xf32>
    %122 = vector.extract_strided_slice %114 {offsets = [0, 1], sizes = [8, 1], strides = [1, 1]} : vector<8x3xf32> to vector<8x1xf32>
    %123 = arith.mulf %121, %122 : vector<8x1xf32>
    %124 = arith.addf %120, %123 : vector<8x1xf32>
    %125 = vector.extract_strided_slice %115 {offsets = [0, 2], sizes = [8, 1], strides = [1, 1]} : vector<8x3xf32> to vector<8x1xf32>
    %126 = vector.extract_strided_slice %114 {offsets = [0, 2], sizes = [8, 1], strides = [1, 1]} : vector<8x3xf32> to vector<8x1xf32>
    %127 = arith.mulf %125, %126 : vector<8x1xf32>
    %128 = arith.addf %124, %127 : vector<8x1xf32>
    %c0_52 = arith.constant 0 : index
    %c0_53 = arith.constant 0 : index
    %129 = vector.load %arg19[%c0_52, %c0_53] : memref<8x1xf32, #tpu.memory_space<vmem>>, vector<8x1xf32>
    tpu.vector_store %arg19[%c0_52, %c0_53], %128 {strides = array<i32>} : memref<8x1xf32, #tpu.memory_space<vmem>>, vector<8x1xf32>,
    return
  }
  func.func @transform_0(%arg0: i32) -> (i32, i32, i32) {
    %c0_i32 = arith.constant 0 : i32
    %c0_i32_0 = arith.constant 0 : i32
    %c0_i32_1 = arith.constant 0 : i32
    return %arg0, %c0_i32, %c0_i32_0 : i32, i32, i32
  }
  func.func @transform_1(%arg0: i32) -> (i32, i32) {
    %c0_i32 = arith.constant 0 : i32
    %c0_i32_0 = arith.constant 0 : i32
    return %arg0, %c0_i32 : i32, i32
  }
  func.func @transform_2(%arg0: i32) -> (i32, i32) {
    %c0_i32 = arith.constant 0 : i32
    %c0_i32_0 = arith.constant 0 : i32
    %c0_i32_1 = arith.constant 0 : i32
    return %c0_i32, %c0_i32_0 : i32, i32
  }
  func.func @transform_3(%arg0: i32) -> (i32, i32) {
    %c0_i32 = arith.constant 0 : i32
    %c0_i32_0 = arith.constant 0 : i32
    %c0_i32_1 = arith.constant 0 : i32
    return %c0_i32, %c0_i32_0 : i32, i32
  }
  func.func @transform_4(%arg0: i32) -> (i32, i32) {
    %c0_i32 = arith.constant 0 : i32
    %c0_i32_0 = arith.constant 0 : i32
    %c0_i32_1 = arith.constant 0 : i32
    return %c0_i32, %c0_i32_0 : i32, i32
  }
  func.func @transform_5(%arg0: i32) -> (i32, i32) {
    %c0_i32 = arith.constant 0 : i32
    %c0_i32_0 = arith.constant 0 : i32
    %c0_i32_1 = arith.constant 0 : i32
    return %c0_i32, %c0_i32_0 : i32, i32
  }
  func.func @transform_6(%arg0: i32) -> (i32, i32) {
    %c0_i32 = arith.constant 0 : i32
    %c0_i32_0 = arith.constant 0 : i32
    %c0_i32_1 = arith.constant 0 : i32
    return %c0_i32, %c0_i32_0 : i32, i32
  }
  func.func @transform_7(%arg0: i32) -> (i32, i32) {
    %c0_i32 = arith.constant 0 : i32
    %c0_i32_0 = arith.constant 0 : i32
    %c0_i32_1 = arith.constant 0 : i32
    return %c0_i32, %c0_i32_0 : i32, i32
  }
  func.func @transform_8(%arg0: i32) -> (i32, i32) {
    %c0_i32 = arith.constant 0 : i32
    %c0_i32_0 = arith.constant 0 : i32
    %c0_i32_1 = arith.constant 0 : i32
    return %c0_i32, %c0_i32_0 : i32, i32
  }
  func.func @transform_9(%arg0: i32) -> (i32, i32) {
    %c0_i32 = arith.constant 0 : i32
    %c0_i32_0 = arith.constant 0 : i32
    %c0_i32_1 = arith.constant 0 : i32
    return %c0_i32, %c0_i32_0 : i32, i32
  }
  func.func @transform_10(%arg0: i32) -> (i32, i32) {
    %c0_i32 = arith.constant 0 : i32
    %c0_i32_0 = arith.constant 0 : i32
    %c0_i32_1 = arith.constant 0 : i32
    return %c0_i32, %c0_i32_0 : i32, i32
  }
  func.func @transform_11(%arg0: i32) -> (i32, i32) {
    %c0_i32 = arith.constant 0 : i32
    %c0_i32_0 = arith.constant 0 : i32
    %c0_i32_1 = arith.constant 0 : i32
    return %c0_i32, %c0_i32_0 : i32, i32
  }
  func.func @transform_12(%arg0: i32) -> (i32, i32) {
    %c0_i32 = arith.constant 0 : i32
    %c0_i32_0 = arith.constant 0 : i32
    %c0_i32_1 = arith.constant 0 : i32
    return %c0_i32, %c0_i32_0 : i32, i32
  }
  func.func @transform_13(%arg0: i32) -> (i32, i32) {
    %c0_i32 = arith.constant 0 : i32
    %c0_i32_0 = arith.constant 0 : i32
    %c0_i32_1 = arith.constant 0 : i32
    return %c0_i32, %c0_i32_0 : i32, i32
  }
  func.func @transform_14(%arg0: i32) -> (i32, i32) {
    %c0_i32 = arith.constant 0 : i32
    %c0_i32_0 = arith.constant 0 : i32
    %c0_i32_1 = arith.constant 0 : i32
    return %c0_i32, %c0_i32_0 : i32, i32
  }
  func.func @transform_15(%arg0: i32) -> (i32, i32) {
    %c0_i32 = arith.constant 0 : i32
    %c0_i32_0 = arith.constant 0 : i32
    %c0_i32_1 = arith.constant 0 : i32
    return %c0_i32, %c0_i32_0 : i32, i32
  }
  func.func @transform_16(%arg0: i32) -> (i32, i32) {
    %c0_i32 = arith.constant 0 : i32
    %c0_i32_0 = arith.constant 0 : i32
    %c0_i32_1 = arith.constant 0 : i32
    return %c0_i32, %c0_i32_0 : i32, i32
  }
  func.func @transform_17(%arg0: i32) -> (i32, i32) {
    %c0_i32 = arith.constant 0 : i32
    %c0_i32_0 = arith.constant 0 : i32
    %c0_i32_1 = arith.constant 0 : i32
    return %c0_i32, %c0_i32_0 : i32, i32
  }
  func.func @transform_18(%arg0: i32) -> (i32, i32) {
    %c0_i32 = arith.constant 0 : i32
    %c0_i32_0 = arith.constant 0 : i32
    return %arg0, %c0_i32 : i32, i32
  }
}

</mosaic_0001>

<bundles_post_ra>
// kernel: tpu_custom_call.1
= control target key start
LH: loop header
LB: loop body
LE: loop exit
PB: predicated region body
PF: predicated region fallthrough
CT: control target
= control target key end

     0   :  { %s17725_s0 = inlined_call_operand.vmem [shape: bf16[8,25,4], index: 0, kind: input, shape index: {}]   ;;  %s17726_s1 = inlined_call_operand.vmem [shape: f32[8,3], index: 1, kind: input, shape index: {}]   ;;  %s17727_s2 = inlined_call_operand.vmem [shape: bf16[20,128], index: 2, kind: input, shape index: {}]   ;;  %s17728_s3 = inlined_call_operand.vmem [shape: f32[1,128], index: 3, kind: input, shape index: {}]   ;;  %s17729_s4 = inlined_call_operand.vmem [shape: bf16[640,128], index: 4, kind: input, shape index: {}]   ;;  %s17730_s5 = inlined_call_operand.vmem [shape: f32[1,128], index: 5, kind: input, shape index: {}]   ;;  %s17731_s6 = inlined_call_operand.vmem [shape: bf16[4,128], index: 6, kind: input, shape index: {}]   ;;  %s17732_s7 = inlined_call_operand.vmem [shape: f32[1,128], index: 7, kind: input, shape index: {}]   ;;  %s17733_s8 = inlined_call_operand.hbm [shape: bf16[640,256], index: 8, kind: input, shape index: {}]   ;;  %s17734_s9 = inlined_call_operand.vmem [shape: f32[1,256], index: 9, kind: input, shape index: {}]   ;;  %s17735_s10 = inlined_call_operand.hbm [shape: bf16[1280,256], index: 10, kind: input, shape index: {}]   ;;  %s17736_s11 = inlined_call_operand.vmem [shape: f32[1,256], index: 11, kind: input, shape index: {}]   ;;  %s17737_s12 = inlined_call_operand.hbm [shape: bf16[128,256], index: 12, kind: input, shape index: {}]   ;;  %s17738_s13 = inlined_call_operand.vmem [shape: f32[1,256], index: 13, kind: input, shape index: {}]   ;;  %s17739_s14 = inlined_call_operand.hbm [shape: bf16[256,384], index: 14, kind: input, shape index: {}]   ;;  %s17740_s15 = inlined_call_operand.vmem [shape: f32[1,384], index: 15, kind: input, shape index: {}]   ;;  %s17741_s16 = inlined_call_operand.vmem [shape: bf16[384,3], index: 16, kind: input, shape index: {}]   ;;  %s17742_s17 = inlined_call_operand.vmem [shape: f32[1,3], index: 17, kind: input, shape index: {}]   ;;  %s17743_s18 = inlined_call_operand.vmem [shape: f32[8,1], index: 18, kind: output, shape index: {}]  }
   0x1   :  { %17796 = sst [smem:[#allocation46_spill]] %s17725_s0 }
   0x2   :  { %17797 = sst [smem:[#allocation47_spill]] %s17726_s1 }
   0x3   :  { %17798 = sst [smem:[#allocation48_spill]] %s17727_s2 }
   0x4   :  { %23 = vsyncpa [#allocation3], 0 }
   0x5   :  { %24 = vsyncpa [#allocation5], 0 }
   0x6   :  { %25 = vsyncpa [#allocation8], 0  ;;  %s61_s29 = sshll.u32 %s17735_s10, 4  ;;  %s12993_s30 = smov [#allocation4]   ;;  %s62_s29 = int_to_ptr.hbm [resolvable:$true] %s61_s29 }
   0x7   :  { %s63_s0 = sshll.u32 %s12993_s30, 4  ;;  %s46_s20 = sshll.u32 %s17733_s8, 4  ;;  %s64_s0 = int_to_ptr.vmem [resolvable:$true] %s63_s0  ;;  %s47_s20 = int_to_ptr.hbm [resolvable:$true] %s46_s20 }
   0x8   :  { %s12994_s21 = smov 128   ;;  %s12995_s22 = smov 8  }
   0x9   :  { %69 = dma.hbm_to_vmem [thread:$0]  %s62_s29, 20480, %s64_s0, [#allocation5], %s12994_s21, %s12994_s21, %s12995_s22  }
   0xa   :  { %s12996_s2 = smov [#allocation2]   ;;  %s76_s26 = sshll.u32 %s17737_s12, 4  ;;  %s77_s26 = int_to_ptr.hbm [resolvable:$true] %s76_s26 }
   0xb   :  { %s48_s23 = sshll.u32 %s12996_s2, 4  ;;  %s91_s28 = sshll.u32 %s17739_s14, 4  ;;  %s49_s23 = int_to_ptr.vmem [resolvable:$true] %s48_s23  ;;  %s92_s28 = int_to_ptr.hbm [resolvable:$true] %s91_s28 }
   0xc   :  { %54 = dma.hbm_to_vmem [thread:$0]  %s47_s20, 10240, %s49_s23, [#allocation3], %s12994_s21, %s12994_s21, %s12995_s22  }
   0xd   :  { %s12997_s8 = smov [#allocation6]   ;;  %s12998_s29 = smov [#allocation7]  }
   0xe   :  { %s78_s30 = sshll.u32 %s12997_s8, 4  ;;  %s93_s0 = sshll.u32 %s12998_s29, 4  ;;  %s79_s30 = int_to_ptr.vmem [resolvable:$true] %s78_s30  ;;  %s94_s0 = int_to_ptr.vmem [resolvable:$true] %s93_s0 }
   0xf   :  { %84 = dma.hbm_to_vmem [thread:$0]  %s77_s26, 2048, %s79_s30, [#allocation5], %s12994_s21, %s12994_s21, %s12995_s22  }
  0x10   :  { %s12999_s19 = smov 192   ;;  %s13000_s1 = smov 12  }
  0x11   :  { %99 = dma.hbm_to_vmem [thread:$0]  %s92_s28, 6144, %s94_s0, [#allocation8], %s12999_s19, %s12999_s19, %s13000_s1  }
  0x12   :  { %12987 = dma.done.wait [#allocation3], 10240  }
  0x13   :  { %12988 = vsyncadd [#allocation3], 4294957056 }
  0x14   :  { %12989 = dma.done.wait [#allocation5], 22528  }
  0x15   :  { %12990 = vsyncadd [#allocation5], 4294944768 }
  0x16   :  { %12991 = dma.done.wait [#allocation8], 6144  }
  0x17   :  { %12992 = vsyncadd [#allocation8], 4294961152  ;;  %s17799_s20 = sld [smem:[#allocation46_spill]]  ;;  %vm17759_vm0 = vcmask 1045504   ;;  %vm372_vm1 = vcmask 1046528   ;;  %s13001_s25 = smov 16  }
  0x18   :  { %vm17758_vm2 = vsmask.f32 6400  ;;  %vm17756_vm3 = vsmask.f32 7424  ;;  %vm2647_vm4 = vcmask 1043459   ;;  %s13002_s29 = smov 4  }
  0x19   :  { %vm2642_vm5 = vcmask 1040384   ;;  %s17808_s8 = sld [smem:[#allocation48_spill]]  ;;  %vm1296_vm6 = vcmask 1041408   ;;  %vm17755_vm7 = vcmask 31744   ;;  %vm665_vm8 = vcmask 97280   ;;  %s13003_s27 = smov 126  }
  0x1a   :  { %vm632_vm9 = vcmask 64512   ;;  %vm698_vm10 = vcmask 130048   ;;  %vm1273_vm11 = vcmask 162816   ;;  %vm17760_vm13 = vcmask 1042432  }
  0x1b   :  { %vm17770_vm14 = vcmask 1041409   ;;  %vm17769_vm15 = vcmask 1042434  }
  0x1d   :  { %v13119_v0 = vld [vmem:[%s17799_s20] sm:$0xff]  ;;  %v125_v1 = vld [vmem:[%s17799_s20 + $0x8] sm:$0xf]  ;;  %v126_v2 = vld [vmem:[%s17799_s20 + $0xc] sm:$0x1] }
  0x1e   :  { %v181_v3 = vunpack.c.l.b16 %v125_v1  ;;  %v526_v4 = vunpack.c.l.b16 %v126_v2  ;;  %v543_v6 = vrot.slane %v13119_v0, 2  ;;  %v373_v9 = vrot.slane %v13119_v0, 1  ;;  %v13145_v15 = vld [vmem:[%s17799_s20 + $0x10] sm:$0xff]  ;;  %v129_v20 = vld [vmem:[%s17799_s20 + $0x18] sm:$0xf]  ;;  %v13197_v63 = vld [vmem:[%s17799_s20 + $0x20] sm:$0xff] }
  0x1f   :  { %v221_v10 = vshrl.u32 %v13119_v0, 16  ;;  %v223_v13 = vshll.u32 %v13119_v0, 16  ;;  %v184_v27 = vunpack.c.l.b16 %v129_v20  ;;  %v236_v28 = vshrl.u32 %v13145_v15, 16  ;;  %v130_v40 = vld [vmem:[%s17799_s20 + $0x1c] sm:$0x1] }
  0x20   :  { %v13127_v5 = vpack.c.b16 %v526_v4, %v181_v3  ;;  %v13130_v7 = vpack.c.b16 %v181_v3, %v181_v3  ;;  %v238_v30 = vshll.u32 %v13145_v15, 16  ;;  %v376_v32 = vrot.slane %v13145_v15, 1  ;;  %v133_v58 = vld [vmem:[%s17799_s20 + $0x28] sm:$0xf] }
  0x21   :  { %v430_v18 = vrot.slane %v221_v10, 1  ;;  %v431_v19 = vrot.slane %v223_v13, 2  ;;  %v225_v22 = vrot.slane %v223_v13, 1  ;;  %v13155_v31 = vpack.c.b16 %v184_v27, %v184_v27 }
  0x22   :  { %v544_v8 = vrot.slane %v13127_v5, 2  ;;  %v374_v12 = vrot.slane %v13130_v7, 1  ;;  %v228_v14 = vshll.u32 %v13130_v7, 16  ;;  %v232_v17 = vshrl.u32 %v13130_v7, 16 }
  0x23   :  { %v432_v23 = vor.u32 %v431_v19, %v430_v18  ;;  %v226_v26 = vor.u32 %v225_v22, %v221_v10  ;;  %v437_v33 = vrot.slane %v236_v28, 1  ;;  %v438_v36 = vrot.slane %v238_v30, 2  ;;  %v137_v18 = vld [vmem:[%s17799_s20 + $0x38] sm:$0xf]  ;;  %v13225_v22 = vld [vmem:[%s17799_s20 + $0x30] sm:$0xff] }
  0x24   :  { %v545_v11 = vsel %vm17759_vm0, %v543_v6, %v544_v8  ;;  %v375_v16 = vsel %vm372_vm1, %v373_v9, %v374_v12  ;;  %v434_v21 = vrot.slane %v228_v14, 2  ;;  %v433_v24 = vrot.slane %v232_v17, 1 }
  0x25   :  { %567 = vrot.lane.b32.xlu1 %v545_v11, %s13001_s25  ;;  %397 = vrot.lane.b32.xlu0 %v375_v16, %s12995_s22  ;;  %v230_v25 = vrot.slane %v228_v14, 1  ;;  %v377_v37 = vrot.slane %v13155_v31, 1  ;;  %v243_v38 = vshll.u32 %v13155_v31, 16  ;;  %v247_v39 = vshrl.u32 %v13155_v31, 16 }
  0x26   :  { %v435_v29 = vor.u32 %v434_v21, %v433_v24  ;;  %v13167_v41 = vrot.slane %v129_v20, 3  ;;  %v4567_v42 = vrot.slane %v130_v40, 3  ;;  %v439_v44 = vor.u32 %v438_v36, %v437_v33 }
  0x27   :  { %v231_v35 = vsel %vm17756_vm3, %v226_v26, %v230_v25  ;;  %v378_v43 = vsel %vm372_vm1, %v376_v32, %v377_v37  ;;  %v440_v45 = vrot.slane %v247_v39, 1  ;;  %v441_v46 = vrot.slane %v243_v38, 2 }
  0x28   :  { %v436_v34 = vsel %vm17758_vm2, %v432_v23, %v435_v29  ;;  %17800 = vst [vmem:[#allocation12_spill] sm:$0xff] %v13167_v41  ;;  %401 = vrot.lane.b32.xlu2 %v378_v43, %s12995_s22  ;;  %v527_v47 = vunpack.c.l.b16 %v130_v40  ;;  %v13174_v48 = vsel %vm2647_vm4, %v129_v20, %v13167_v41  ;;  %v13178_v51 = vsel %vm2642_vm5, %v130_v40, %v4567_v42 }
  0x29   :  { %17801 = vst [vmem:[#allocation13_spill] sm:$0xff] %v13174_v48  ;;  %v442_v49 = vor.u32 %v441_v46, %v440_v45  ;;  %v17749_v50 = vrot.slane %v13174_v48, 3  ;;  %v234_v53 = vor.u32 %v232_v17, %v230_v25  ;;  %v240_v57 = vrot.slane %v238_v30, 1 }
  0x2a   :  { %17802 = vst [vmem:[#allocation14_spill] sm:$0xff] %v13178_v51  ;;  %v535_v55 = vpack.c.b16 %v527_v47, %v184_v27  ;;  %v546_v59 = vrot.slane %v13145_v15, 2  ;;  %v245_v62 = vrot.slane %v243_v38, 1  ;;  %v187_v1 = vunpack.c.l.b16 %v133_v58 }
  0x2b   :  { %v443_v52 = vsel %vm17758_vm2, %v439_v44, %v442_v49  ;;  %v13183_v54 = vunpack.i.h.s16 %v17749_v50  ;;  %v241_v61 = vor.u32 %v240_v57, %v236_v28  ;;  %v253_v6 = vshll.u32 %v13197_v63, 16  ;;  %v138_v28 = vld [vmem:[%s17799_s20 + $0x3c] sm:$0x1] }
  0x2c   :  { %v547_v60 = vrot.slane %v535_v55, 2  ;;  %v13202_v4 = vpack.c.b16 %v187_v1, %v187_v1  ;;  %v251_v9 = vshrl.u32 %v13197_v63, 16  ;;  %v249_v13 = vor.u32 %v247_v39, %v245_v62 }
  0x2d   :  { %486 = vrot.lane.b32.xlu1 %v436_v34, %s13000_s1  ;;  %340 = vrot.lane.b32.xlu0 %v231_v35, %s13002_s29  ;;  %17803 = vst [vmem:[#allocation15_spill] sm:$0xff] %v13183_v54  ;;  %v246_v3 = vsel %vm17756_vm3, %v241_v61, %v245_v62  ;;  %v255_v10 = vrot.slane %v253_v6, 1  ;;  %v190_v23 = vunpack.c.l.b16 %v137_v18  ;;  %v445_v25 = vrot.slane %v253_v6, 2  ;;  %v141_v62 = vld [vmem:[%s17799_s20 + $0x48] sm:$0xf] }
  0x2e   :  { %v548_v2 = vsel %vm17759_vm0, %v546_v59, %v547_v60  ;;  %v258_v11 = vshll.u32 %v13202_v4, 16  ;;  %v262_v19 = vshrl.u32 %v13202_v4, 16  ;;  %v444_v24 = vrot.slane %v251_v9, 1 }
  0x2f   :  { %v256_v16 = vor.u32 %v255_v10, %v251_v9  ;;  %v549_v5 = vrot.slane %v13197_v63, 2  ;;  %v4573_v30 = vrot.slane %v138_v28, 3  ;;  %v13234_v32 = vpack.c.b16 %v190_v23, %v190_v23 }
  0x30   :  { %399 = vrot.lane.b32.xlu2 %v374_v12, %s12995_s22  ;;  %v134_v12 = vld [vmem:[%s17799_s20 + $0x2c] sm:$0x1]  ;;  %v260_v17 = vrot.slane %v258_v11, 1  ;;  %v447_v26 = vrot.slane %v262_v19, 1  ;;  %v448_v27 = vrot.slane %v258_v11, 2  ;;  %v268_v33 = vshll.u32 %v13225_v22, 16 }
  0x31   :  { %v528_v14 = vunpack.c.l.b16 %v134_v12  ;;  %v446_v35 = vor.u32 %v445_v25, %v444_v24  ;;  %v379_v39 = vrot.slane %v13197_v63, 1  ;;  %v13247_v40 = vsel %vm2642_vm5, %v138_v28, %v4573_v30 }
  0x32   :  { %v261_v21 = vsel %vm17756_vm3, %v256_v16, %v260_v17  ;;  %v449_v36 = vor.u32 %v448_v27, %v447_v26  ;;  %17806 = vst [vmem:[#allocation18_spill] sm:$0xff] %v13247_v40  ;;  %v266_v42 = vshrl.u32 %v13225_v22, 16  ;;  %v270_v43 = vrot.slane %v268_v33, 1 }
  0x33   :  { %v536_v20 = vpack.c.b16 %v528_v14, %v187_v1  ;;  %v273_v44 = vshll.u32 %v13234_v32, 16  ;;  %v380_v46 = vrot.slane %v13202_v4, 1  ;;  %v264_v58 = vor.u32 %v262_v19, %v260_v17 }
  0x34   :  { %v450_v47 = vsel %vm17758_vm2, %v446_v35, %v449_v36  ;;  %v382_v59 = vrot.slane %v13225_v22, 1  ;;  %v529_v61 = vunpack.c.l.b16 %v138_v28  ;;  %v451_v6 = vrot.slane %v266_v42, 1  ;;  %v13297_v28 = vld [vmem:[%s17799_s20 + $0x58] sm:$0xf]  ;;  %v13302_v35 = vld [vmem:[%s17799_s20 + $0x50] sm:$0xff] }
  0x35   :  { %490 = vrot.lane.b32.xlu1 %v443_v52, %s13000_s1  ;;  %342 = vrot.lane.b32.xlu0 %v234_v53, %s13002_s29  ;;  %v381_v52 = vsel %vm372_vm1, %v379_v39, %v380_v46  ;;  %v271_v53 = vor.u32 %v270_v43, %v266_v42  ;;  %v275_v55 = vrot.slane %v273_v44, 1  ;;  %v452_v9 = vrot.slane %v268_v33, 2  ;;  %v142_v43 = vld [vmem:[%s17799_s20 + $0x4c] sm:$0x1] }
  0x36   :  { %v193_v10 = vunpack.c.l.b16 %v141_v62  ;;  %v455_v12 = vrot.slane %v273_v44, 2 }
  0x37   :  { %v276_v57 = vsel %vm17756_vm3, %v271_v53, %v275_v55  ;;  %v453_v17 = vor.u32 %v452_v9, %v451_v6 }
  0x38   :  { %344 = vrot.lane.b32.xlu2 %v246_v3, %s13002_s29  ;;  %v277_v3 = vshrl.u32 %v13234_v32, 16  ;;  %v13283_v19 = vpack.c.b16 %v193_v10, %v193_v10 }
  0x3a   :  { %v454_v11 = vrot.slane %v277_v3, 1  ;;  %v279_v16 = vor.u32 %v277_v3, %v275_v55  ;;  %v288_v26 = vshll.u32 %v13283_v19, 16  ;;  %v292_v27 = vshrl.u32 %v13283_v19, 16 }
  0x3c   :  { %v461_v30 = vrot.slane %v292_v27, 1  ;;  %v462_v33 = vrot.slane %v288_v26, 2  ;;  %v290_v55 = vrot.slane %v288_v26, 1 }
  0x3d   :  { %488 = vrot.lane.b32.xlu1 %v435_v29, %s13000_s1  ;;  %571 = vrot.lane.b32.xlu0 %v548_v2, %s13001_s25  ;;  %v13232_v29 = vrot.slane %v137_v18, 3  ;;  %v537_v2 = vpack.c.b16 %v529_v61, %v190_v23 }
  0x3e   :  { %v13306_v42 = vor.u32 %v462_v33, %v461_v30  ;;  %v989_v30 = vld [vmem:[%s17808_s8 + $0x8] sm:$0x3] }
  0x3f   :  { %17804 = vst [vmem:[#allocation16_spill] sm:$0xff] %v13232_v29  ;;  %v13240_v34 = vsel %vm2647_vm4, %v137_v18, %v13232_v29  ;;  %v553_v14 = vrot.slane %v537_v2, 2  ;;  %v13281_v18 = vld [vmem:[%s17799_s20 + $0x40] sm:$0xff] }
  0x40   :  { %569 = vrot.lane.b32.xlu2 %v544_v8, %s13001_s25  ;;  %v550_v8 = vrot.slane %v536_v20, 2  ;;  %17805 = vst [vmem:[#allocation17_spill] sm:$0xff] %v13240_v34  ;;  %v456_v20 = vor.u32 %v455_v12, %v454_v11  ;;  %v281_v24 = vshrl.u32 %v13281_v18, 16  ;;  %v283_v25 = vshll.u32 %v13281_v18, 16 }
  0x42   :  { %v551_v38 = vsel %vm17759_vm0, %v549_v5, %v550_v8  ;;  %v457_v23 = vsel %vm17758_vm2, %v453_v17, %v456_v20  ;;  %v458_v5 = vrot.slane %v281_v24, 1 }
  0x45   :  { %403 = vrot.lane.b32.xlu1 %v377_v37, %s12995_s22  ;;  %346 = vrot.lane.b32.xlu0 %v249_v13, %s13002_s29  ;;  %v17747_v37 = vrot.slane %v13240_v34, 3  ;;  %v552_v13 = vrot.slane %v13225_v22, 2 }
  0x47   :  { %v13253_v45 = vunpack.i.h.s16 %v17747_v37 }
  0x48   :  { %492 = vrot.lane.b32.xlu2 %v442_v49, %s13000_s1 }
  0x49   :  { %17807 = vst [vmem:[#allocation19_spill] sm:$0xff] %v13253_v45 }
  0x4d   :  { %348 = vrot.lane.b32.xlu1 %v261_v21, %s13002_s29  ;;  %573 = vrot.lane.b32.xlu0 %v547_v60, %s13001_s25  ;;  %v383_v60 = vrot.slane %v13234_v32, 1  ;;  %v554_v21 = vsel %vm17759_vm0, %v552_v13, %v553_v14 }
  0x4f   :  { %v384_v1 = vsel %vm372_vm1, %v382_v59, %v383_v60  ;;  %v296_v59 = vshrl.u32 %v13302_v35, 16 }
  0x50   :  { %405 = vrot.lane.b32.xlu2 %v381_v52, %s12995_s22  ;;  %v386_v52 = vrot.slane %v13283_v19, 1 }
  0x51   :  { %v465_v17 = vrot.slane %v296_v59, 1 }
  0x55   :  { %575 = vrot.lane.b32.xlu1 %v551_v38, %s13001_s25  ;;  %494 = vrot.lane.b32.xlu0 %v450_v47, %s13000_s1  ;;  %v285_v38 = vrot.slane %v283_v25, 1  ;;  %v385_v47 = vrot.slane %v13281_v18, 1 }
  0x57   :  { %v286_v53 = vor.u32 %v285_v38, %v281_v24  ;;  %v1269_v38 = vunpack.c.l.b16 %v989_v30 }
  0x58   :  { %350 = vrot.lane.b32.xlu2 %v264_v58, %s13002_s29 }
  0x59   :  { %v291_v2 = vsel %vm17756_vm3, %v286_v53, %v290_v55 }
  0x5d   :  { %352 = vrot.lane.b32.xlu1 %v276_v57, %s13002_s29  ;;  %407 = vrot.lane.b32.xlu0 %v380_v46, %s12995_s22  ;;  %v298_v46 = vshll.u32 %v13302_v35, 16  ;;  %v530_v57 = vunpack.c.l.b16 %v142_v43  ;;  %v294_v43 = vor.u32 %v292_v27, %v290_v55  ;;  %v13367_v55 = vld [vmem:[%s17799_s20 + $0x60] sm:$0xff] }
  0x5f   :  { %v300_v61 = vrot.slane %v298_v46, 1  ;;  %v538_v3 = vpack.c.b16 %v530_v57, %v193_v10  ;;  %v149_v57 = vld [vmem:[%s17799_s20 + $0x68] sm:$0xf] }
  0x60   :  { %496 = vrot.lane.b32.xlu2 %v449_v36, %s13000_s1  ;;  %v196_v36 = vunpack.c.l.b16 %v13297_v28 }
  0x61   :  { %v301_v9 = vor.u32 %v300_v61, %v296_v59  ;;  %v556_v13 = vrot.slane %v538_v3, 2  ;;  %v199_v59 = vunpack.c.l.b16 %v149_v57 }
  0x62   :  { %v13312_v44 = vpack.c.b16 %v196_v36, %v196_v36 }
  0x63   :  { %v13378_v3 = vpack.c.b16 %v199_v59, %v199_v59 }
  0x64   :  { %v303_v62 = vshll.u32 %v13312_v44, 16  ;;  %v389_v6 = vrot.slane %v13312_v44, 1  ;;  %v307_v12 = vshrl.u32 %v13312_v44, 16 }
  0x65   :  { %577 = vrot.lane.b32.xlu1 %v550_v8, %s13001_s25  ;;  %409 = vrot.lane.b32.xlu0 %v384_v1, %s12995_s22  ;;  %v459_v8 = vrot.slane %v283_v25, 2  ;;  %v387_v1 = vsel %vm372_vm1, %v385_v47, %v386_v52  ;;  %v146_v25 = vld [vmem:[%s17799_s20 + $0x5c] sm:$0x1]  ;;  %v1271_v47 = vpack.c.b16 %v1269_v38, %v1269_v38 }
  0x66   :  { %v305_v11 = vrot.slane %v303_v62, 1 }
  0x67   :  { %v460_v39 = vor.u32 %v459_v8, %v458_v5  ;;  %v531_v8 = vunpack.c.l.b16 %v146_v25  ;;  %v1298_v53 = vsel %vm1296_vm6, %v1271_v47, 0 }
  0x68   :  { %498 = vrot.lane.b32.xlu2 %v457_v23, %s13000_s1  ;;  %v306_v10 = vsel %vm17756_vm3, %v301_v9, %v305_v11  ;;  %v469_v23 = vrot.slane %v303_v62, 2  ;;  %1306 = vmatpush.bf16.msra.mxu0 %v1298_v53 }
  0x69   :  { %v464_v58 = vsel %vm17758_vm2, %v460_v39, %v13306_v42 }
  0x6d   :  { %354 = vrot.lane.b32.xlu1 %v279_v16, %s13002_s29  ;;  %579 = vrot.lane.b32.xlu0 %v554_v21, %s13001_s25  ;;  %v468_v21 = vrot.slane %v307_v12, 1 }
  0x6f   :  { %v470_v5 = vor.u32 %v469_v23, %v468_v21  ;;  %v309_v23 = vor.u32 %v307_v12, %v305_v11  ;;  %v13414_v12 = vld [vmem:[%s17799_s20 + $0x78] sm:$0xf] }
  0x70   :  { %411 = vrot.lane.b32.xlu2 %v383_v60, %s12995_s22  ;;  %v388_v60 = vrot.slane %v13302_v35, 1 }
  0x72   :  { %v390_v16 = vsel %vm372_vm1, %v388_v60, %v389_v6  ;;  %v313_v60 = vshll.u32 %v13367_v55, 16 }
  0x75   :  { %581 = vrot.lane.b32.xlu1 %v553_v14, %s13001_s25  ;;  %500 = vrot.lane.b32.xlu0 %v456_v20, %s13000_s1  ;;  %v555_v14 = vrot.slane %v13281_v18, 2  ;;  %v466_v20 = vrot.slane %v298_v46, 2  ;;  %v13349_v46 = vpack.c.b16 %v531_v8, %v196_v36  ;;  %v12485_v36 = vld [vmem:[%s17808_s8] sm:$0xff] }
  0x76   :  { %1307 = vmatpush.bf16.msra.mxu0 %v12485_v36  ;;  %v13429_v36 = vld [vmem:[%s17799_s20 + $0x70] sm:$0xff] }
  0x77   :  { %v557_v24 = vsel %vm17759_vm0, %v555_v14, %v556_v13  ;;  %v467_v26 = vor.u32 %v466_v20, %v465_v17  ;;  %v559_v27 = vrot.slane %v13349_v46, 2  ;;  %v315_v17 = vrot.slane %v313_v60, 1 }
  0x78   :  { %356 = vrot.lane.b32.xlu2 %v291_v2, %s13002_s29  ;;  %v4579_v2 = vrot.slane %v146_v25, 3  ;;  %v318_v20 = vshll.u32 %v13378_v3, 16 }
  0x79   :  { %v471_v39 = vsel %vm17758_vm2, %v467_v26, %v470_v5  ;;  %v392_v26 = vrot.slane %v13378_v3, 1 }
  0x7d   :  { %502 = vrot.lane.b32.xlu1 %v464_v58, %s13000_s1  ;;  %413 = vrot.lane.b32.xlu0 %v387_v1, %s12995_s22  ;;  %v558_v58 = vrot.slane %v13302_v35, 2  ;;  %v13376_v1 = vrot.slane %v13297_v28, 3 }
  0x7f   :  { %v560_v61 = vsel %vm17759_vm0, %v558_v58, %v559_v27  ;;  %17809 = vst [vmem:[#allocation20_spill] sm:$0xff] %v13376_v1 }
  0x80   :  { %583 = vrot.lane.b32.xlu2 %v557_v24, %s13001_s25  ;;  %v391_v24 = vrot.slane %v13367_v55, 1 }
  0x82   :  { %v13345_v33 = vpop.permute.xlu2 %401 }
  0x85   :  { %417 = vrot.lane.b32.xlu1 %v390_v16, %s12995_s22  ;;  %360 = vrot.lane.b32.xlu0 %v306_v10, %s13002_s29  ;;  %v311_v16 = vshrl.u32 %v13367_v55, 16  ;;  %v13392_v10 = vsel %vm2642_vm5, %v146_v25, %v4579_v2  ;;  %v322_v2 = vshrl.u32 %v13378_v3, 16 }
  0x86   :  { %17811 = vst [vmem:[#allocation22_spill] sm:$0xff] %v13392_v10 }
  0x87   :  { %v316_v38 = vor.u32 %v315_v17, %v311_v16 }
  0x88   :  { %358 = vrot.lane.b32.xlu2 %v294_v43, %s13002_s29 }
  0x8d   :  { %415 = vrot.lane.b32.xlu1 %v386_v52, %s12995_s22  ;;  %506 = vrot.lane.b32.xlu0 %v471_v39, %s13000_s1  ;;  %v13362_v52 = vpop.permute.xlu2 %399  ;;  %v320_v39 = vrot.slane %v318_v20, 1 }
  0x8f   :  { %v321_v58 = vsel %vm17756_vm3, %v316_v38, %v320_v39  ;;  %v475_v38 = vrot.slane %v322_v2, 1 }
  0x90   :  { %587 = vrot.lane.b32.xlu2 %v560_v61, %s13001_s25 }
  0x95   :  { %585 = vrot.lane.b32.xlu1 %v556_v13, %s13001_s25  ;;  %504 = vrot.lane.b32.xlu0 %v13306_v42, %s13000_s1  ;;  %v13385_v13 = vsel %vm2647_vm4, %v13297_v28, %v13376_v1  ;;  %v13387_v14 = vpop.permute.xlu2 %344  ;;  %v150_v28 = vld [vmem:[%s17799_s20 + $0x6c] sm:$0x1] }
  0x96   :  { %17810 = vst [vmem:[#allocation21_spill] sm:$0xff] %v13385_v13  ;;  %v17746_v42 = vrot.slane %v13385_v13, 3  ;;  %v532_v30 = vunpack.c.l.b16 %v150_v28 }
  0x97   :  { %v568_v62 = vpop.permute.xlu1 %567  ;;  %v398_v9 = vpop.permute.xlu0 %397 }
  0x98   :  { %v13397_v21 = vunpack.i.h.s16 %v17746_v42  ;;  %362 = vrot.lane.b32.xlu2 %v309_v23, %s13002_s29  ;;  %v13422_v53 = vpack.c.b16 %v532_v30, %v199_v59  ;;  %v561_v59 = vrot.slane %v13367_v55, 2  ;;  %v472_v23 = vrot.slane %v311_v16, 1 }
  0x99   :  { %v473_v16 = vrot.slane %v313_v60, 2 }
  0x9a   :  { %17812 = vst [vmem:[#allocation23_spill] sm:$0xff] %v13397_v21  ;;  %v562_v30 = vrot.slane %v13422_v53, 2 }
  0x9c   :  { %v563_v42 = vsel %vm17759_vm0, %v561_v59, %v562_v30 }
  0x9d   :  { %508 = vrot.lane.b32.xlu1 %v470_v5, %s13000_s1  ;;  %419 = vrot.lane.b32.xlu0 %v389_v6, %s12995_s22  ;;  %v393_v6 = vsel %vm372_vm1, %v391_v24, %v392_v26  ;;  %v570_v43 = vpop.permute.xlu2 %569 }
  0x9f   :  { %v487_v8 = vpop.permute.xlu1 %486  ;;  %v341_v11 = vpop.permute.xlu0 %340 }
  0xa0   :  { %v601_v5 = vsel %vm17755_vm7, %v13119_v0, %v341_v11  ;;  %v13432_v0 = vunpack.c.l.b16 %v13414_v12  ;;  %v476_v11 = vrot.slane %v318_v20, 2  ;;  %589 = vrot.lane.b32.xlu2 %v559_v27, %s13001_s25  ;;  %v326_v27 = vshrl.u32 %v13429_v36, 16 }
  0xa1   :  { %v634_v47 = vsel %vm632_vm9, %v601_v5, %v398_v9 }
  0xa2   :  { %v667_v57 = vsel %vm665_vm8, %v634_v47, %v487_v8  ;;  %v13442_v5 = vpack.c.b16 %v13432_v0, %v13432_v0  ;;  %v477_v49 = vor.u32 %v476_v11, %v475_v38  ;;  %v479_v38 = vrot.slane %v326_v27, 1 }
  0xa3   :  { %v700_v61 = vsel %vm698_vm10, %v667_v57, %v568_v62 }
  0xa4   :  { %v747_v9 = vrot.slane %v700_v61, 1  ;;  %v748_v17 = vrot.slane %v700_v61, 2  ;;  %v749_v28 = vrot.slane %v700_v61, 3  ;;  %1079 = vst [vmem:[#allocation1] ss:$9 sm:$0xff] %v700_v61  ;;  %v750_v24 = vrot.slane %v700_v61, 4 }
  0xa5   :  { %421 = vrot.lane.b32.xlu1 %v393_v6, %s12995_s22  ;;  %364 = vrot.lane.b32.xlu0 %v321_v58, %s13002_s29  ;;  %v751_v62 = vrot.slane %v700_v61, 5  ;;  %v328_v6 = vshll.u32 %v13429_v36, 16  ;;  %v752_v47 = vrot.slane %v700_v61, 6  ;;  %v324_v58 = vor.u32 %v322_v2, %v320_v39  ;;  %v13448_v20 = vpop.permute.xlu2 %492 }
  0xa6   :  { %1082 = vst [vmem:[#allocation1 + $0x1] ss:$9 sm:$0xff] %v747_v9  ;;  %v753_v25 = vrot.slane %v700_v61, 7  ;;  %v474_v9 = vor.u32 %v473_v16, %v472_v23  ;;  %v333_v39 = vshll.u32 %v13442_v5, 16  ;;  %v605_v61 = vsel %vm17755_vm7, %v13145_v15, %v13387_v14 }
  0xa7   :  { %v491_v8 = vpop.permute.xlu1 %490  ;;  %1085 = vst [vmem:[#allocation1 + $0x2] ss:$9 sm:$0xff] %v748_v17  ;;  %v343_v57 = vpop.permute.xlu0 %342  ;;  %v330_v60 = vrot.slane %v328_v6, 1  ;;  %v337_v59 = vshrl.u32 %v13442_v5, 16  ;;  %v480_v11 = vrot.slane %v328_v6, 2 }
  0xa8   :  { %1088 = vst [vmem:[#allocation1 + $0x3] ss:$9 sm:$0xff] %v749_v28  ;;  %v603_v46 = vsel %vm17755_vm7, %v13130_v7, %v343_v57  ;;  %v478_v2 = vsel %vm17758_vm2, %v474_v9, %v477_v49  ;;  %v638_v28 = vsel %vm632_vm9, %v605_v61, %v13345_v33  ;;  %v13469_v23 = vrot.slane %v333_v39, 1 }
  0xa9   :  { %1091 = vst [vmem:[#allocation1 + $0x4] ss:$9 sm:$0xff] %v750_v24  ;;  %v636_v17 = vsel %vm632_vm9, %v603_v46, %v13362_v52  ;;  %v331_v14 = vor.u32 %v330_v60, %v326_v27  ;;  %510 = vrot.lane.b32.xlu2 %v478_v2, %s13000_s1  ;;  %v482_v33 = vrot.slane %v337_v59, 1  ;;  %v483_v16 = vrot.slane %v333_v39, 2 }
  0xaa   :  { %1094 = vst [vmem:[#allocation1 + $0x5] ss:$9 sm:$0xff] %v751_v62 }
  0xab   :  { %1097 = vst [vmem:[#allocation1 + $0x6] ss:$9 sm:$0xff] %v752_v47  ;;  %v336_v46 = vsel %vm17756_vm3, %v331_v14, %v13469_v23 }
  0xac   :  { %1100 = vst [vmem:[#allocation1 + $0x7] ss:$9 sm:$0xff] %v753_v25  ;;  %v671_v25 = vsel %vm665_vm8, %v638_v28, %v491_v8  ;;  %v481_v28 = vor.u32 %v480_v11, %v479_v38  ;;  %v394_v11 = vrot.slane %v13429_v36, 1 }
  0xad   :  { %366 = vrot.lane.b32.xlu1 %v324_v58, %s13002_s29  ;;  %591 = vrot.lane.b32.xlu0 %v563_v42, %s13001_s25  ;;  %v13479_v47 = vpop.permute.xlu2 %405 }
  0xaf   :  { %v489_v7 = vpop.permute.xlu1 %488  ;;  %v572_v24 = vpop.permute.xlu0 %571 }
  0xb0   :  { %v669_v15 = vsel %vm665_vm8, %v636_v17, %v489_v7  ;;  %v13475_v62 = vsel %vm698_vm10, %v671_v25, %v572_v24 }
  0xb1   :  { %v702_v42 = vsel %vm698_vm10, %v669_v15, %v570_v43  ;;  %v756_v57 = vrot.slane %v13475_v62, 1  ;;  %v757_v58 = vrot.slane %v13475_v62, 2  ;;  %v758_v8 = vrot.slane %v13475_v62, 3  ;;  %423 = vrot.lane.b32.xlu2 %v392_v26, %s12995_s22 }
  0xb2   :  { %v754_v52 = vrot.slane %v702_v42, 1  ;;  %v759_v43 = vrot.slane %v13475_v62, 4  ;;  %v841_v6 = vunpack.i.h.s16 %v13475_v62  ;;  %v755_v9 = vrot.slane %v702_v42, 2 }
  0xb3   :  { %v1101_v27 = vld [vmem:[#allocation1] sm:$0xff]  ;;  %v843_v60 = vunpack.i.h.s16 %v756_v57  ;;  %v845_v61 = vunpack.i.h.s16 %v757_v58  ;;  %v847_v39 = vunpack.i.h.s16 %v758_v8  ;;  %v760_v7 = vrot.slane %v13475_v62, 5 }
  0xb4   :  { %v849_v2 = vunpack.i.h.s16 %v759_v43  ;;  %10853 = vmatmul.msk.bf16.vlgmr.msra.gmra.mxu0 %vm1273_vm11, %v1101_v27  ;;  %v10806_v17 = vpack.i.b16 %v756_v57, %v841_v6  ;;  %1103 = vst [vmem:[#allocation1] ss:$9 sm:$0xff] %v702_v42  ;;  %v13491_v15 = vor.u32 %v483_v16, %v482_v33  ;;  %v10805_v42 = vpack.i.b16 %v13475_v62, %v755_v9 }
  0xb5   :  { %512 = vrot.lane.b32.xlu1 %v477_v49, %s13000_s1  ;;  %v10807_v25 = vpack.i.b16 %v757_v58, %v843_v60  ;;  %v10808_v24 = vpack.i.b16 %v758_v8, %v845_v61  ;;  %v10809_v37 = vpack.i.b16 %v759_v43, %v847_v39  ;;  %1105 = vst [vmem:[#allocation1 + $0x1] ss:$9 sm:$0xff] %v754_v52  ;;  %v154_v49 = vld [vmem:[%s17799_s20 + $0x7c] sm:$0x1]  ;;  %v13504_v33 = vpop.permute.xlu2 %350  ;;  %v395_v16 = vrot.slane %v13442_v5, 1 }
  0xb6   :  { %v10810_v56 = vpack.i.b16 %v760_v7, %v849_v2  ;;  %1109 = vst [vmem:[#allocation1 + $0x3] ss:$9 sm:$0xff] %v10806_v17  ;;  %368 = vrot.lane.b32.xlu0 %v336_v46, %s13002_s29  ;;  %v485_v52 = vsel %vm17758_vm2, %v481_v28, %v13491_v15  ;;  %v533_v57 = vunpack.c.l.b16 %v154_v49  ;;  %v761_v58 = vrot.slane %v13475_v62, 6 }
  0xb7   :  { %v404_v14 = vpop.permute.xlu1 %403  ;;  %1111 = vst [vmem:[#allocation1 + $0x4] ss:$9 sm:$0xff] %v10807_v25  ;;  %v347_v38 = vpop.permute.xlu0 %346  ;;  %v762_v8 = vrot.slane %v13475_v62, 7  ;;  %v13512_v43 = vrot.slane %v13414_v12, 3  ;;  %v4585_v6 = vrot.slane %v154_v49, 3  ;;  %v851_v9 = vunpack.i.h.s16 %v760_v7 }
  0xb8   :  { %1113 = vst [vmem:[#allocation1 + $0x5] ss:$9 sm:$0xff] %v10808_v24  ;;  %v607_v26 = vsel %vm17755_vm7, %v13155_v31, %v347_v38  ;;  %v541_v62 = vpack.c.b16 %v533_v57, %v13432_v0  ;;  %v853_v60 = vunpack.i.h.s16 %v761_v58  ;;  %v564_v7 = vrot.slane %v13429_v36, 2 }
  0xb9   :  { %1115 = vst [vmem:[#allocation1 + $0x6] ss:$9 sm:$0xff] %v10809_v37  ;;  %v396_v37 = vsel %vm372_vm1, %v394_v11, %v395_v16  ;;  %v640_v31 = vsel %vm632_vm9, %v607_v26, %v404_v14  ;;  %v13520_v46 = vsel %vm2647_vm4, %v13414_v12, %v13512_v43  ;;  %v855_v61 = vunpack.i.h.s16 %v762_v8 }
  0xba   :  { %1117 = vst [vmem:[#allocation1 + $0x7] ss:$9 sm:$0xff] %v10810_v56  ;;  %v17748_v27 = vrot.slane %v13520_v46, 3  ;;  %425 = vrot.lane.b32.xlu2 %v396_v37, %s12995_s22  ;;  %v673_v39 = vsel %vm665_vm8, %v640_v31, %v13448_v20  ;;  %v13531_v12 = vsel %vm2642_vm5, %v154_v49, %v4585_v6  ;;  %v10811_v17 = vpack.i.b16 %v761_v58, %v851_v9 }
  0xbb   :  { %17813 = vst [vmem:[#allocation24_spill] sm:$0xff] %v13512_v43  ;;  %v565_v14 = vrot.slane %v541_v62, 2  ;;  %v10812_v49 = vpack.i.b16 %v762_v8, %v853_v60  ;;  %v339_v38 = vor.u32 %v337_v59, %v13469_v23 }
  0xbc   :  { %1107 = vst [vmem:[#allocation1 + $0x2] ss:$9 sm:$0xff] %v10805_v42  ;;  %v13535_v0 = vunpack.i.h.s16 %v17748_v27 }
  0xbd   :  { %514 = vrot.lane.b32.xlu1 %v485_v52, %s13000_s1  ;;  %17814 = vst [vmem:[#allocation25_spill] sm:$0xff] %v13520_v46  ;;  %v566_v58 = vsel %vm17759_vm0, %v564_v7, %v565_v14 }
  0xbe   :  { %593 = vrot.lane.b32.xlu0 %v562_v30, %s13001_s25  ;;  %17815 = vst [vmem:[#allocation26_spill] sm:$0xff] %v13531_v12  ;;  %v497_v30 = vpop.permute.xlu2 %496 }
  0xbf   :  { %v349_v56 = vpop.permute.xlu1 %348  ;;  %v574_v2 = vpop.permute.xlu0 %573  ;;  %17816 = vst [vmem:[#allocation27_spill] sm:$0xff] %v13535_v0 }
  0xc0   :  { %v706_v53 = vsel %vm698_vm10, %v673_v39, %v574_v2  ;;  %v609_v20 = vsel %vm17755_vm7, %v13197_v63, %v349_v56 }
  0xc1   :  { %v763_v28 = vrot.slane %v706_v53, 1  ;;  %v857_v25 = vunpack.i.h.s16 %v706_v53  ;;  %v10813_v24 = vpack.i.b16 %v706_v53, %v855_v61  ;;  %v764_v52 = vrot.slane %v706_v53, 2 }
  0xc2   :  { %v642_v8 = vsel %vm632_vm9, %v609_v20, %v13479_v47  ;;  %595 = vrot.lane.b32.xlu2 %v566_v58, %s13001_s25  ;;  %v611_v47 = vsel %vm17755_vm7, %v13202_v4, %v13504_v33 }
  0xc3   :  { %v1118_v42 = vld [vmem:[#allocation1] sm:$0xff]  ;;  %v859_v26 = vunpack.i.h.s16 %v763_v28  ;;  %v10814_v57 = vpack.i.b16 %v763_v28, %v857_v25 }
  0xc4   :  { %1120 = vst [vmem:[#allocation1] ss:$9 sm:$0xff] %v10811_v17  ;;  %10854 = vmatmul.msk.bf16.gmra.mxu0 %vm1273_vm11, %v1118_v42 }
  0xc5   :  { %427 = vrot.lane.b32.xlu1 %v395_v16, %s12995_s22  ;;  %1122 = vst [vmem:[#allocation1 + $0x1] ss:$9 sm:$0xff] %v10812_v49  ;;  %v10815_v63 = vpack.i.b16 %v764_v52, %v859_v26 }
  0xc6   :  { %1124 = vst [vmem:[#allocation1 + $0x2] ss:$9 sm:$0xff] %v10813_v24  ;;  %370 = vrot.lane.b32.xlu0 %v339_v38, %s13002_s29  ;;  %v499_v6 = vpop.permute.xlu2 %498 }
  0xc7   :  { %v576_v59 = vpop.permute.xlu1 %575  ;;  %1126 = vst [vmem:[#allocation1 + $0x3] ss:$9 sm:$0xff] %v10814_v57  ;;  %v495_v23 = vpop.permute.xlu0 %494 }
  0xc8   :  { %1128 = vst [vmem:[#allocation1 + $0x4] ss:$9 sm:$0xff] %v10815_v63  ;;  %v675_v16 = vsel %vm665_vm8, %v642_v8, %v495_v23 }
  0xc9   :  { %v708_v37 = vsel %vm698_vm10, %v675_v16, %v576_v59 }
  0xca   :  { %v765_v9 = vrot.slane %v708_v37, 1  ;;  %v766_v31 = vrot.slane %v708_v37, 2  ;;  %1130 = vst [vmem:[#allocation1 + $0x5] ss:$9 sm:$0xff] %v708_v37  ;;  %516 = vrot.lane.b32.xlu2 %v13491_v15, %s13000_s1  ;;  %v767_v39 = vrot.slane %v708_v37, 3  ;;  %v768_v2 = vrot.slane %v708_v37, 4 }
  0xcb   :  { %v769_v17 = vrot.slane %v708_v37, 5  ;;  %v770_v25 = vrot.slane %v708_v37, 6  ;;  %v771_v24 = vrot.slane %v708_v37, 7 }
  0xcc   :  { %1132 = vst [vmem:[#allocation1 + $0x6] ss:$9 sm:$0xff] %v765_v9 }
  0xcd   :  { %1134 = vst [vmem:[#allocation1 + $0x7] ss:$9 sm:$0xff] %v766_v31 }
  0xce   :  { %597 = vrot.lane.b32.xlu0 %v565_v14, %s13001_s25  ;;  %v412_v60 = vpop.permute.xlu2 %411 }
  0xcf   :  { %v353_v56 = vpop.permute.xlu1 %352  ;;  %v408_v62 = vpop.permute.xlu0 %407 }
  0xd0   :  { %v644_v61 = vsel %vm632_vm9, %v611_v47, %v408_v62  ;;  %v613_v42 = vsel %vm17755_vm7, %v13225_v22, %v353_v56 }
  0xd1   :  { %v677_v53 = vsel %vm665_vm8, %v644_v61, %v497_v30 }
  0xd4   :  { %v1135_v7 = vld [vmem:[#allocation1] sm:$0xff] }
  0xd5   :  { %1137 = vst [vmem:[#allocation1] ss:$9 sm:$0xff] %v767_v39  ;;  %10855 = vmatmul.msk.bf16.gmra.mxu0 %vm1273_vm11, %v1135_v7 }
  0xd6   :  { %1139 = vst [vmem:[#allocation1 + $0x1] ss:$9 sm:$0xff] %v768_v2  ;;  %v357_v14 = vpop.permute.xlu2 %356 }
  0xd7   :  { %v578_v28 = vpop.permute.xlu1 %577  ;;  %1141 = vst [vmem:[#allocation1 + $0x2] ss:$9 sm:$0xff] %v769_v17  ;;  %v410_v33 = vpop.permute.xlu0 %409 }
  0xd8   :  { %v710_v15 = vsel %vm698_vm10, %v677_v53, %v578_v28  ;;  %1143 = vst [vmem:[#allocation1 + $0x3] ss:$9 sm:$0xff] %v770_v25  ;;  %v646_v30 = vsel %vm632_vm9, %v613_v42, %v410_v33 }
  0xd9   :  { %v772_v4 = vrot.slane %v710_v15, 1  ;;  %1145 = vst [vmem:[#allocation1 + $0x4] ss:$9 sm:$0xff] %v771_v24  ;;  %v679_v49 = vsel %vm665_vm8, %v646_v30, %v499_v6  ;;  %v773_v52 = vrot.slane %v710_v15, 2 }
  0xda   :  { %1147 = vst [vmem:[#allocation1 + $0x5] ss:$9 sm:$0xff] %v710_v15 }
  0xdb   :  { %1149 = vst [vmem:[#allocation1 + $0x6] ss:$9 sm:$0xff] %v772_v4 }
  0xde   :  { %v584_v57 = vpop.permute.xlu2 %583 }
  0xdf   :  { %v355_v20 = vpop.permute.xlu1 %354  ;;  %v580_v38 = vpop.permute.xlu0 %579 }
  0xe0   :  { %v712_v26 = vsel %vm698_vm10, %v679_v49, %v580_v38  ;;  %v615_v63 = vsel %vm17755_vm7, %v13234_v32, %v355_v20  ;;  %v617_v20 = vsel %vm17755_vm7, %v13281_v18, %v357_v14 }
  0xe1   :  { %v10816_v58 = vpack.i.b16 %v712_v26, %v773_v52  ;;  %v774_v8 = vrot.slane %v712_v26, 1  ;;  %v776_v59 = vrot.slane %v712_v26, 3  ;;  %v777_v22 = vrot.slane %v712_v26, 4 }
  0xe2   :  { %v775_v16 = vrot.slane %v712_v26, 2  ;;  %v883_v37 = vunpack.i.h.s16 %v712_v26  ;;  %v648_v9 = vsel %vm632_vm9, %v615_v63, %v412_v60  ;;  %v778_v31 = vrot.slane %v712_v26, 5 }
  0xe3   :  { %1151 = vst [vmem:[#allocation1 + $0x7] ss:$9 sm:$0xff] %v10816_v58  ;;  %v885_v6 = vunpack.i.h.s16 %v774_v8  ;;  %v889_v47 = vunpack.i.h.s16 %v776_v59  ;;  %v779_v62 = vrot.slane %v712_v26, 6  ;;  %v891_v39 = vunpack.i.h.s16 %v777_v22 }
  0xe4   :  { %v780_v2 = vrot.slane %v712_v26, 7  ;;  %v887_v7 = vunpack.i.h.s16 %v775_v16  ;;  %v10817_v17 = vpack.i.b16 %v774_v8, %v883_v37  ;;  %v893_v25 = vunpack.i.h.s16 %v778_v31 }
  0xe5   :  { %v10818_v53 = vpack.i.b16 %v775_v16, %v885_v6  ;;  %v10820_v15 = vpack.i.b16 %v777_v22, %v889_v47  ;;  %v895_v24 = vunpack.i.h.s16 %v779_v62  ;;  %v10821_v4 = vpack.i.b16 %v778_v31, %v891_v39 }
  0xe6   :  { %v13573_v61 = vpop.permute.xlu2 %358  ;;  %v897_v33 = vunpack.i.h.s16 %v780_v2  ;;  %v10819_v30 = vpack.i.b16 %v776_v59, %v887_v7  ;;  %v10822_v49 = vpack.i.b16 %v779_v62, %v893_v25 }
  0xe7   :  { %v582_v23 = vpop.permute.xlu1 %581  ;;  %v501_v56 = vpop.permute.xlu0 %500  ;;  %v10823_v26 = vpack.i.b16 %v780_v2, %v895_v24  ;;  %v619_v24 = vsel %vm17755_vm7, %v13283_v19, %v13573_v61 }
  0xe8   :  { %v681_v32 = vsel %vm665_vm8, %v648_v9, %v501_v56 }
  0xe9   :  { %v714_v60 = vsel %vm698_vm10, %v681_v32, %v582_v23 }
  0xea   :  { %v1152_v28 = vld [vmem:[#allocation1] sm:$0xff]  ;;  %v10824_v38 = vpack.i.b16 %v714_v60, %v897_v33  ;;  %v781_v8 = vrot.slane %v714_v60, 1  ;;  %v899_v59 = vunpack.i.h.s16 %v714_v60  ;;  %v782_v37 = vrot.slane %v714_v60, 2 }
  0xeb   :  { %1154 = vst [vmem:[#allocation1] ss:$9 sm:$0xff] %v10817_v17  ;;  %10856 = vmatmul.msk.bf16.gmra.mxu0 %vm1273_vm11, %v1152_v28 }
  0xec   :  { %1156 = vst [vmem:[#allocation1 + $0x1] ss:$9 sm:$0xff] %v10818_v53  ;;  %v901_v16 = vunpack.i.h.s16 %v781_v8  ;;  %v10825_v9 = vpack.i.b16 %v781_v8, %v899_v59 }
  0xed   :  { %1160 = vst [vmem:[#allocation1 + $0x3] ss:$9 sm:$0xff] %v10820_v15 }
  0xee   :  { %1162 = vst [vmem:[#allocation1 + $0x4] ss:$9 sm:$0xff] %v10821_v4  ;;  %v588_v58 = vpop.permute.xlu2 %587  ;;  %v10826_v31 = vpack.i.b16 %v782_v37, %v901_v16 }
  0xef   :  { %v503_v42 = vpop.permute.xlu1 %502  ;;  %v414_v52 = vpop.permute.xlu0 %413  ;;  %1158 = vst [vmem:[#allocation1 + $0x2] ss:$9 sm:$0xff] %v10819_v30 }
  0xf0   :  { %1164 = vst [vmem:[#allocation1 + $0x5] ss:$9 sm:$0xff] %v10822_v49  ;;  %v650_v63 = vsel %vm632_vm9, %v617_v20, %v414_v52 }
  0xf1   :  { %1166 = vst [vmem:[#allocation1 + $0x6] ss:$9 sm:$0xff] %v10823_v26  ;;  %v683_v22 = vsel %vm665_vm8, %v650_v63, %v503_v42 }
  0xf2   :  { %1168 = vst [vmem:[#allocation1 + $0x7] ss:$9 sm:$0xff] %v10824_v38  ;;  %v716_v18 = vsel %vm698_vm10, %v683_v22, %v584_v57 }
  0xf3   :  { %v783_v56 = vrot.slane %v716_v18, 1  ;;  %v784_v62 = vrot.slane %v716_v18, 2  ;;  %v785_v39 = vrot.slane %v716_v18, 3  ;;  %v786_v32 = vrot.slane %v716_v18, 4 }
  0xf4   :  { %v787_v57 = vrot.slane %v716_v18, 5  ;;  %v788_v38 = vrot.slane %v716_v18, 6  ;;  %v789_v63 = vrot.slane %v716_v18, 7 }
  0xf6   :  { %v363_v47 = vpop.permute.xlu2 %362 }
  0xf7   :  { %v418_v23 = vpop.permute.xlu1 %417  ;;  %v361_v14 = vpop.permute.xlu0 %360 }
  0xf8   :  { %v621_v2 = vsel %vm17755_vm7, %v13302_v35, %v361_v14  ;;  %v623_v14 = vsel %vm17755_vm7, %v13312_v44, %v363_v47 }
  0xf9   :  { %v1169_v6 = vld [vmem:[#allocation1] sm:$0xff]  ;;  %v654_v17 = vsel %vm632_vm9, %v621_v2, %v418_v23 }
  0xfa   :  { %1171 = vst [vmem:[#allocation1] ss:$9 sm:$0xff] %v10825_v9 }
  0xfb   :  { %1173 = vst [vmem:[#allocation1 + $0x1] ss:$9 sm:$0xff] %v10826_v31  ;;  %10857 = vmatmul.msk.bf16.gmra.mxu0 %vm1273_vm11, %v1169_v6 }
  0xfc   :  { %1175 = vst [vmem:[#allocation1 + $0x2] ss:$9 sm:$0xff] %v716_v18 }
  0xfd   :  { %1177 = vst [vmem:[#allocation1 + $0x3] ss:$9 sm:$0xff] %v783_v56 }
  0xfe   :  { %1179 = vst [vmem:[#allocation1 + $0x4] ss:$9 sm:$0xff] %v784_v62  ;;  %v590_v4 = vpop.permute.xlu2 %589 }
  0xff   :  { %v416_v7 = vpop.permute.xlu1 %415  ;;  %v507_v53 = vpop.permute.xlu0 %506  ;;  %1181 = vst [vmem:[#allocation1 + $0x5] ss:$9 sm:$0xff] %v785_v39 }
 0x100   :  { %v687_v28 = vsel %vm665_vm8, %v654_v17, %v507_v53  ;;  %1183 = vst [vmem:[#allocation1 + $0x6] ss:$9 sm:$0xff] %v786_v32  ;;  %v652_v20 = vsel %vm632_vm9, %v619_v24, %v416_v7 }
 0x101   :  { %v13589_v25 = vsel %vm698_vm10, %v687_v28, %v588_v58  ;;  %1185 = vst [vmem:[#allocation1 + $0x7] ss:$9 sm:$0xff] %v787_v57 }
 0x102   :  { %v792_v35 = vrot.slane %v13589_v25, 1  ;;  %v793_v15 = vrot.slane %v13589_v25, 2  ;;  %v925_v60 = vunpack.i.h.s16 %v13589_v25  ;;  %v794_v52 = vrot.slane %v13589_v25, 3 }
 0x103   :  { %v795_v31 = vrot.slane %v13589_v25, 4  ;;  %v796_v62 = vrot.slane %v13589_v25, 5  ;;  %v797_v2 = vrot.slane %v13589_v25, 6  ;;  %v798_v47 = vrot.slane %v13589_v25, 7 }
 0x104   :  { %v927_v33 = vunpack.i.h.s16 %v792_v35  ;;  %v929_v30 = vunpack.i.h.s16 %v793_v15  ;;  %v10828_v26 = vpack.i.b16 %v792_v35, %v925_v60  ;;  %v931_v44 = vunpack.i.h.s16 %v794_v52 }
 0x105   :  { %v933_v7 = vunpack.i.h.s16 %v795_v31  ;;  %v935_v57 = vunpack.i.h.s16 %v796_v62  ;;  %v937_v53 = vunpack.i.h.s16 %v797_v2 }
 0x106   :  { %v10829_v22 = vpack.i.b16 %v793_v15, %v927_v33  ;;  %v10830_v61 = vpack.i.b16 %v794_v52, %v929_v30  ;;  %v511_v18 = vpop.permute.xlu2 %510  ;;  %v10831_v35 = vpack.i.b16 %v795_v31, %v931_v44  ;;  %v939_v15 = vunpack.i.h.s16 %v798_v47 }
 0x107   :  { %v586_v42 = vpop.permute.xlu1 %585  ;;  %v505_v49 = vpop.permute.xlu0 %504 }
 0x108   :  { %v685_v58 = vsel %vm665_vm8, %v652_v20, %v505_v49  ;;  %v1186_v8 = vld [vmem:[#allocation1] sm:$0xff]  ;;  %v10833_v20 = vpack.i.b16 %v797_v2, %v935_v57 }
 0x109   :  { %v718_v19 = vsel %vm698_vm10, %v685_v58, %v586_v42  ;;  %1188 = vst [vmem:[#allocation1] ss:$9 sm:$0xff] %v788_v38  ;;  %v10832_v42 = vpack.i.b16 %v796_v62, %v933_v7  ;;  %v10834_v38 = vpack.i.b16 %v798_v47, %v937_v53 }
 0x10a   :  { %v791_v59 = vrot.slane %v718_v19, 2  ;;  %1190 = vst [vmem:[#allocation1 + $0x1] ss:$9 sm:$0xff] %v789_v63  ;;  %v790_v23 = vrot.slane %v718_v19, 1 }
 0x10b   :  { %1198 = vst [vmem:[#allocation1 + $0x5] ss:$9 sm:$0xff] %v10828_v26  ;;  %10858 = vmatmul.msk.bf16.gmra.mxu0 %vm1273_vm11, %v1186_v8 }
 0x10c   :  { %1200 = vst [vmem:[#allocation1 + $0x6] ss:$9 sm:$0xff] %v10829_v22  ;;  %v10827_v16 = vpack.i.b16 %v13589_v25, %v791_v59 }
 0x10d   :  { %1202 = vst [vmem:[#allocation1 + $0x7] ss:$9 sm:$0xff] %v10830_v61 }
 0x10e   :  { %1192 = vst [vmem:[#allocation1 + $0x2] ss:$9 sm:$0xff] %v718_v19  ;;  %v424_v30 = vpop.permute.xlu2 %423 }
 0x10f   :  { %v509_v37 = vpop.permute.xlu1 %508  ;;  %v420_v9 = vpop.permute.xlu0 %419  ;;  %1194 = vst [vmem:[#allocation1 + $0x3] ss:$9 sm:$0xff] %v790_v23 }
 0x110   :  { %v656_v6 = vsel %vm632_vm9, %v623_v14, %v420_v9  ;;  %1196 = vst [vmem:[#allocation1 + $0x4] ss:$9 sm:$0xff] %v10827_v16 }
 0x111   :  { %v689_v56 = vsel %vm665_vm8, %v656_v6, %v509_v37 }
 0x112   :  { %v722_v39 = vsel %vm698_vm10, %v689_v56, %v590_v4 }
 0x113   :  { %v799_v32 = vrot.slane %v722_v39, 1  ;;  %v941_v28 = vunpack.i.h.s16 %v722_v39  ;;  %v800_v4 = vrot.slane %v722_v39, 2  ;;  %v10835_v49 = vpack.i.b16 %v722_v39, %v939_v15 }
 0x115   :  { %v943_v24 = vunpack.i.h.s16 %v799_v32  ;;  %v10836_v52 = vpack.i.b16 %v799_v32, %v941_v28 }
 0x117   :  { %v422_v17 = vpop.permute.xlu1 %421  ;;  %v365_v60 = vpop.permute.xlu0 %364  ;;  %v1203_v33 = vld [vmem:[#allocation1] sm:$0xff]  ;;  %v10837_v26 = vpack.i.b16 %v800_v4, %v943_v24 }
 0x118   :  { %1205 = vst [vmem:[#allocation1] ss:$9 sm:$0xff] %v10831_v35  ;;  %v625_v25 = vsel %vm17755_vm7, %v13367_v55, %v365_v60  ;;  %v426_v55 = vpop.permute.xlu2 %425 }
 0x119   :  { %1207 = vst [vmem:[#allocation1 + $0x1] ss:$9 sm:$0xff] %v10832_v42  ;;  %v658_v58 = vsel %vm632_vm9, %v625_v25, %v422_v17 }
 0x11a   :  { %1209 = vst [vmem:[#allocation1 + $0x2] ss:$9 sm:$0xff] %v10833_v20  ;;  %v691_v8 = vsel %vm665_vm8, %v658_v58, %v511_v18 }
 0x11b   :  { %1211 = vst [vmem:[#allocation1 + $0x3] ss:$9 sm:$0xff] %v10834_v38  ;;  %10859 = vmatmul.msk.bf16.gmra.mxu0 %vm1273_vm11, %v1203_v33 }
 0x11c   :  { %1213 = vst [vmem:[#allocation1 + $0x4] ss:$9 sm:$0xff] %v10835_v49 }
 0x11d   :  { %1215 = vst [vmem:[#allocation1 + $0x5] ss:$9 sm:$0xff] %v10836_v52 }
 0x11e   :  { %1217 = vst [vmem:[#allocation1 + $0x6] ss:$9 sm:$0xff] %v10837_v26 }
 0x11f   :  { %v367_v63 = vpop.permute.xlu1 %366  ;;  %v592_v22 = vpop.permute.xlu0 %591 }
 0x120   :  { %v724_v19 = vsel %vm698_vm10, %v691_v8, %v592_v22  ;;  %v627_v9 = vsel %vm17755_vm7, %v13378_v3, %v367_v63  ;;  %v596_v62 = vpop.permute.xlu2 %595 }
 0x121   :  { %1219 = vst [vmem:[#allocation1 + $0x7] ss:$9 sm:$0xff] %v724_v19  ;;  %v801_v59 = vrot.slane %v724_v19, 1  ;;  %v802_v23 = vrot.slane %v724_v19, 2  ;;  %v803_v37 = vrot.slane %v724_v19, 3  ;;  %v804_v31 = vrot.slane %v724_v19, 4 }
 0x122   :  { %v805_v6 = vrot.slane %v724_v19, 5  ;;  %v806_v56 = vrot.slane %v724_v19, 6  ;;  %v807_v39 = vrot.slane %v724_v19, 7  ;;  %v660_v2 = vsel %vm632_vm9, %v627_v9, %v424_v30 }
 0x127   :  { %v513_v61 = vpop.permute.xlu1 %512 }
 0x128   :  { %v1220_v16 = vld [vmem:[#allocation1] sm:$0xff]  ;;  %v369_v14 = vpop.permute.xlu0 %368  ;;  %v693_v32 = vsel %vm665_vm8, %v660_v2, %v513_v61 }
 0x129   :  { %1222 = vst [vmem:[#allocation1] ss:$9 sm:$0xff] %v801_v59  ;;  %v629_v18 = vsel %vm17755_vm7, %v13429_v36, %v369_v14 }
 0x12a   :  { %1224 = vst [vmem:[#allocation1 + $0x1] ss:$9 sm:$0xff] %v802_v23  ;;  %v662_v44 = vsel %vm632_vm9, %v629_v18, %v426_v55  ;;  %v517_v23 = vpop.permute.xlu2 %516 }
 0x12b   :  { %1226 = vst [vmem:[#allocation1 + $0x2] ss:$9 sm:$0xff] %v803_v37  ;;  %10860 = vmatmul.msk.bf16.gmra.mxu0 %vm1273_vm11, %v1220_v16 }
 0x12c   :  { %1228 = vst [vmem:[#allocation1 + $0x3] ss:$9 sm:$0xff] %v804_v31 }
 0x12d   :  { %1230 = vst [vmem:[#allocation1 + $0x4] ss:$9 sm:$0xff] %v805_v6 }
 0x12e   :  { %1232 = vst [vmem:[#allocation1 + $0x5] ss:$9 sm:$0xff] %v806_v56 }
 0x12f   :  { %v515_v47 = vpop.permute.xlu1 %514  ;;  %1234 = vst [vmem:[#allocation1 + $0x6] ss:$9 sm:$0xff] %v807_v39  ;;  %v13638_v39 = vld [vmem:[%s17728_s3] ss:$0 sm:$0xff] }
 0x130   :  { %v695_v3 = vsel %vm665_vm8, %v662_v44, %v515_v47  ;;  %v594_v7 = vpop.permute.xlu0 %593 }
 0x131   :  { %v728_v36 = vsel %vm698_vm10, %v695_v3, %v596_v62  ;;  %v726_v57 = vsel %vm698_vm10, %v693_v32, %v594_v7  ;;  %v1309_v3 = vpop.f32.mrf.mxu0 }
 0x132   :  { %v810_v17 = vrot.slane %v728_v36, 1  ;;  %1236 = vst [vmem:[#allocation1 + $0x7] ss:$9 sm:$0xff] %v726_v57  ;;  %v811_v53 = vrot.slane %v728_v36, 2  ;;  %v812_v28 = vrot.slane %v728_v36, 3  ;;  %v813_v35 = vrot.slane %v728_v36, 4 }
 0x133   :  { %v809_v15 = vrot.slane %v726_v57, 2  ;;  %v814_v60 = vrot.slane %v728_v36, 5  ;;  %v967_v33 = vunpack.i.h.s16 %v728_v36  ;;  %v808_v4 = vrot.slane %v726_v57, 1 }
 0x134   :  { %v969_v24 = vunpack.i.h.s16 %v810_v17  ;;  %v971_v42 = vunpack.i.h.s16 %v811_v53  ;;  %v973_v30 = vunpack.i.h.s16 %v812_v28  ;;  %v975_v20 = vunpack.i.h.s16 %v813_v35 }
 0x135   :  { %v10838_v38 = vpack.i.b16 %v728_v36, %v809_v15  ;;  %v977_v26 = vunpack.i.h.s16 %v814_v60  ;;  %v10839_v58 = vpack.i.b16 %v810_v17, %v967_v33  ;;  %v815_v55 = vrot.slane %v728_v36, 6 }
 0x136   :  { %v10840_v52 = vpack.i.b16 %v811_v53, %v969_v24  ;;  %v10841_v63 = vpack.i.b16 %v812_v28, %v971_v42  ;;  %v10842_v19 = vpack.i.b16 %v813_v35, %v973_v30  ;;  %v10843_v61 = vpack.i.b16 %v814_v60, %v975_v20 }
 0x137   :  { %v428_v22 = vpop.permute.xlu1 %427  ;;  %v10844_v16 = vpack.i.b16 %v815_v55, %v977_v26  ;;  %v816_v37 = vrot.slane %v728_v36, 7  ;;  %v979_v31 = vunpack.i.h.s16 %v815_v55  ;;  %v1310_v57 = vadd.f32 %v13638_v39, %v1309_v3 }
 0x138   :  { %v371_v49 = vpop.permute.xlu0 %370 }
 0x139   :  { %v1237_v25 = vld [vmem:[#allocation1] sm:$0xff]  ;;  %v631_v8 = vsel %vm17755_vm7, %v13442_v5, %v371_v49  ;;  %v981_v6 = vunpack.i.h.s16 %v816_v37  ;;  %v10845_v2 = vpack.i.b16 %v816_v37, %v979_v31  ;;  %v1384_v17 = vrot.slane %v1310_v57, 1 }
 0x13a   :  { %1239 = vst [vmem:[#allocation1] ss:$9 sm:$0xff] %v808_v4  ;;  %v664_v59 = vsel %vm632_vm9, %v631_v8, %v428_v22  ;;  %v1385_v53 = vrot.slane %v1310_v57, 2  ;;  %v1386_v28 = vrot.slane %v1310_v57, 3  ;;  %v1387_v35 = vrot.slane %v1310_v57, 4 }
 0x13b   :  { %1241 = vst [vmem:[#allocation1 + $0x1] ss:$9 sm:$0xff] %v10838_v38  ;;  %10861 = vmatmul.msk.bf16.gmra.mxu0 %vm1273_vm11, %v1237_v25  ;;  %v697_v14 = vsel %vm665_vm8, %v664_v59, %v517_v23  ;;  %v1678_v15 = vmax.f32 %v1310_v57, 0.0  ;;  %v1388_v24 = vrot.slane %v1310_v57, 5  ;;  %v1679_v60 = vmax.f32 %v1384_v17, 0.0  ;;  %v1311_v38 = vpop.f32.mrf.mxu0 }
 0x13c   :  { %1243 = vst [vmem:[#allocation1 + $0x2] ss:$9 sm:$0xff] %v10839_v58  ;;  %v1389_v42 = vrot.slane %v1310_v57, 6  ;;  %v1680_v30 = vmax.f32 %v1385_v53, 0.0  ;;  %v1390_v4 = vrot.slane %v1310_v57, 7  ;;  %v1681_v20 = vmax.f32 %v1386_v28, 0.0 }
 0x13d   :  { %1245 = vst [vmem:[#allocation1 + $0x3] ss:$9 sm:$0xff] %v10840_v52  ;;  %v1682_v49 = vmax.f32 %v1387_v35, 0.0  ;;  %v1683_v25 = vmax.f32 %v1388_v24, 0.0  ;;  %v1312_v58 = vadd.f32 %v13638_v39, %v1311_v38  ;;  %vm17768_vm8 = vcmask 1044484  }
 0x13e   :  { %1247 = vst [vmem:[#allocation1 + $0x4] ss:$9 sm:$0xff] %v10841_v63  ;;  %v1684_v52 = vmax.f32 %v1389_v42, 0.0  ;;  %v1685_v26 = vmax.f32 %v1390_v4, 0.0  ;;  %vm17767_vm9 = vcmask 1045509   ;;  %vm17785_vm7 = vcmask 1043458  }
 0x13f   :  { %1249 = vst [vmem:[#allocation1 + $0x5] ss:$9 sm:$0xff] %v10842_v19  ;;  %v1391_v63 = vrot.slane %v1312_v58, 1  ;;  %v1392_v8 = vrot.slane %v1312_v58, 2  ;;  %v1393_v22 = vrot.slane %v1312_v58, 3  ;;  %v1394_v19 = vrot.slane %v1312_v58, 4 }
 0x140   :  { %1251 = vst [vmem:[#allocation1 + $0x6] ss:$9 sm:$0xff] %v10843_v61  ;;  %v598_v5 = vpop.permute.xlu0 %597  ;;  %v1686_v55 = vmax.f32 %v1312_v58, 0.0  ;;  %v1395_v61 = vrot.slane %v1312_v58, 5  ;;  %v1397_v37 = vrot.slane %v1312_v58, 7 }
 0x141   :  { %1253 = vst [vmem:[#allocation1 + $0x7] ss:$9 sm:$0xff] %v10844_v16  ;;  %v730_v9 = vsel %vm698_vm10, %v697_v14, %v598_v5  ;;  %v1687_v59 = vmax.f32 %v1391_v63, 0.0  ;;  %v1396_v16 = vrot.slane %v1312_v58, 6  ;;  %v1688_v14 = vmax.f32 %v1392_v8, 0.0 }
 0x142   :  { %v817_v18 = vrot.slane %v730_v9, 1  ;;  %v983_v56 = vunpack.i.h.s16 %v730_v9  ;;  %v10846_v62 = vpack.i.b16 %v730_v9, %v981_v6  ;;  %v818_v44 = vrot.slane %v730_v9, 2 }
 0x143   :  { %v1689_v5 = vmax.f32 %v1393_v22, 0.0  ;;  %v1690_v9 = vmax.f32 %v1394_v19, 0.0  ;;  %v1691_v31 = vmax.f32 %v1395_v61, 0.0  ;;  %v1692_v6 = vmax.f32 %v1396_v16, 0.0 }
 0x144   :  { %v985_v47 = vunpack.i.h.s16 %v817_v18  ;;  %v10847_v32 = vpack.i.b16 %v817_v18, %v983_v56  ;;  %v1314_v18 = vpop.f32.mrf.mxu0  ;;  %v1693_v56 = vmax.f32 %v1397_v37, 0.0  ;;  %vm17766_vm10 = vcmask 1046534  }
 0x146   :  { %v10848_v7 = vpack.i.b16 %v818_v44, %v985_v47 }
 0x148   :  { %v1254_v36 = vld [vmem:[#allocation1] sm:$0xff] }
 0x149   :  { %1256 = vst [vmem:[#allocation1] ss:$9 sm:$0xff] %v10845_v2 }
 0x14a   :  { %1258 = vst [vmem:[#allocation1 + $0x1] ss:$9 sm:$0xff] %v10846_v62  ;;  %v1315_v62 = vadd.f32 %v13638_v39, %v1314_v18 }
 0x14b   :  { %1260 = vst [vmem:[#allocation1 + $0x2] ss:$9 sm:$0xff] %v10847_v32  ;;  %10862 = vmatmul.msk.bf16.gmra.mxu0 %vm1273_vm11, %v1254_v36 }
 0x14c   :  { %1262 = vst [vmem:[#allocation1 + $0x3] ss:$9 sm:$0xff] %v10848_v7  ;;  %v1398_v2 = vrot.slane %v1315_v62, 1  ;;  %v1399_v44 = vrot.slane %v1315_v62, 2  ;;  %v1400_v47 = vrot.slane %v1315_v62, 3  ;;  %v1401_v3 = vrot.slane %v1315_v62, 4  ;;  %v1316_v28 = vpop.f32.mrf.mxu0 }
 0x14d   :  { %v1694_v36 = vmax.f32 %v1315_v62, 0.0  ;;  %v1402_v35 = vrot.slane %v1315_v62, 5  ;;  %v1403_v24 = vrot.slane %v1315_v62, 6 }
 0x14e   :  { %v1695_v32 = vmax.f32 %v1398_v2, 0.0  ;;  %v1696_v57 = vmax.f32 %v1399_v44, 0.0  ;;  %v1697_v17 = vmax.f32 %v1400_v47, 0.0  ;;  %v1698_v53 = vmax.f32 %v1401_v3, 0.0 }
 0x153   :  { %v1263_v33 = vld [vmem:[#allocation1] sm:$0xff] }
 0x154   :  { %2027 = vst [vmem:[#allocation1] ss:$9 sm:$0xff] %v1678_v15  ;;  %v1317_v15 = vadd.f32 %v13638_v39, %v1316_v28  ;;  %v1319_v22 = vpop.f32.mrf.mxu0 }
 0x155   :  { %2029 = vst [vmem:[#allocation1 + $0x1] ss:$9 sm:$0xff] %v1679_v60  ;;  %v1404_v60 = vrot.slane %v1315_v62, 7 }
 0x156   :  { %2031 = vst [vmem:[#allocation1 + $0x2] ss:$9 sm:$0xff] %v1680_v30  ;;  %v1405_v42 = vrot.slane %v1317_v15, 1  ;;  %v1700_v30 = vmax.f32 %v1403_v24, 0.0  ;;  %v1408_v38 = vrot.slane %v1317_v15, 4  ;;  %v1409_v19 = vrot.slane %v1317_v15, 5 }
 0x157   :  { %2033 = vst [vmem:[#allocation1 + $0x3] ss:$9 sm:$0xff] %v1681_v20  ;;  %v1406_v20 = vrot.slane %v1317_v15, 2  ;;  %v1410_v61 = vrot.slane %v1317_v15, 6 }
 0x158   :  { %2035 = vst [vmem:[#allocation1 + $0x4] ss:$9 sm:$0xff] %v1682_v49  ;;  %v1701_v49 = vmax.f32 %v1404_v60, 0.0  ;;  %v1706_v8 = vmax.f32 %v1408_v38, 0.0  ;;  %v1707_v16 = vmax.f32 %v1409_v19, 0.0 }
 0x159   :  { %2037 = vst [vmem:[#allocation1 + $0x5] ss:$9 sm:$0xff] %v1683_v25  ;;  %v1407_v25 = vrot.slane %v1317_v15, 3  ;;  %v1704_v58 = vmax.f32 %v1406_v20, 0.0  ;;  %v1708_v37 = vmax.f32 %v1410_v61, 0.0 }
 0x15a   :  { %2039 = vst [vmem:[#allocation1 + $0x6] ss:$9 sm:$0xff] %v1684_v52  ;;  %v1702_v52 = vmax.f32 %v1317_v15, 0.0 }
 0x15b   :  { %2041 = vst [vmem:[#allocation1 + $0x7] ss:$9 sm:$0xff] %v1685_v26  ;;  %10863 = vmatmul.msk.bf16.gmra.mxu0 %vm1273_vm11, %v1263_v33  ;;  %v1699_v33 = vmax.f32 %v1402_v35, 0.0  ;;  %v1703_v26 = vmax.f32 %v1405_v42, 0.0  ;;  %v1705_v63 = vmax.f32 %v1407_v25, 0.0  ;;  %vm17771_vm11 = vcmask 1042433  }
 0x15c   :  { %v1321_v3 = vpop.f32.mrf.mxu0 }
 0x162   :  { %v13644_v23 = vld [vmem:[#allocation1] sm:$0xff] }
 0x163   :  { %2043 = vst [vmem:[#allocation1] ss:$9 sm:$0xff] %v1686_v55  ;;  %v1320_v55 = vadd.f32 %v13638_v39, %v1319_v22 }
 0x164   :  { %2044 = vst [vmem:[#allocation1 + $0x1] ss:$9 sm:$0xff] %v1687_v59  ;;  %v1411_v59 = vrot.slane %v1317_v15, 7 }
 0x165   :  { %2045 = vst [vmem:[#allocation1 + $0x2] ss:$9 sm:$0xff] %v1688_v14  ;;  %v1412_v14 = vrot.slane %v1320_v55, 1  ;;  %v1414_v18 = vrot.slane %v1320_v55, 3 }
 0x166   :  { %2046 = vst [vmem:[#allocation1 + $0x3] ss:$9 sm:$0xff] %v1689_v5 }
 0x167   :  { %2047 = vst [vmem:[#allocation1 + $0x4] ss:$9 sm:$0xff] %v1690_v9  ;;  %v1413_v9 = vrot.slane %v1320_v55, 2  ;;  %v1711_v62 = vmax.f32 %v1412_v14, 0.0  ;;  %v1713_v44 = vmax.f32 %v1414_v18, 0.0 }
 0x168   :  { %2048 = vst [vmem:[#allocation1 + $0x5] ss:$9 sm:$0xff] %v1691_v31  ;;  %v1709_v31 = vmax.f32 %v1411_v59, 0.0 }
 0x169   :  { %2049 = vst [vmem:[#allocation1 + $0x6] ss:$9 sm:$0xff] %v1692_v6  ;;  %v1415_v6 = vrot.slane %v1320_v55, 4  ;;  %v1712_v2 = vmax.f32 %v1413_v9, 0.0 }
 0x16a   :  { %2050 = vst [vmem:[#allocation1 + $0x7] ss:$9 sm:$0xff] %v1693_v56  ;;  %v1710_v56 = vmax.f32 %v1320_v55, 0.0 }
 0x16b   :  { %v1714_v47 = vmax.f32 %v1415_v6, 0.0 }
 0x171   :  { %v13647_v7 = vld [vmem:[#allocation1] sm:$0xff] }
 0x172   :  { %2052 = vst [vmem:[#allocation1] ss:$9 sm:$0xff] %v1694_v36  ;;  %v1416_v36 = vrot.slane %v1320_v55, 5 }
 0x173   :  { %2053 = vst [vmem:[#allocation1 + $0x1] ss:$9 sm:$0xff] %v1695_v32  ;;  %v1322_v32 = vadd.f32 %v13638_v39, %v1321_v3 }
 0x174   :  { %2054 = vst [vmem:[#allocation1 + $0x2] ss:$9 sm:$0xff] %v1696_v57  ;;  %v1417_v57 = vrot.slane %v1320_v55, 6 }
 0x175   :  { %2055 = vst [vmem:[#allocation1 + $0x3] ss:$9 sm:$0xff] %v1697_v17  ;;  %v1418_v17 = vrot.slane %v1320_v55, 7  ;;  %v1419_v28 = vrot.slane %v1322_v32, 1  ;;  %v1718_v60 = vmax.f32 %v1322_v32, 0.0  ;;  %v1420_v42 = vrot.slane %v1322_v32, 2 }
 0x176   :  { %2056 = vst [vmem:[#allocation1 + $0x4] ss:$9 sm:$0xff] %v1698_v53  ;;  %v1715_v53 = vmax.f32 %v1416_v36, 0.0  ;;  %v1716_v35 = vmax.f32 %v1417_v57, 0.0  ;;  %v1421_v20 = vrot.slane %v1322_v32, 3  ;;  %v1423_v25 = vrot.slane %v1322_v32, 5 }
 0x177   :  { %v1717_v24 = vmax.f32 %v1418_v17, 0.0 }
 0x178   :  { %v1723_v19 = vmax.f32 %v1423_v25, 0.0 }
 0x17d   :  { %v13650_v4 = vld [vmem:[#allocation1] sm:$0xff] }
 0x17e   :  { %2058 = vst [vmem:[#allocation1] ss:$9 sm:$0xff] %v1699_v33  ;;  %v1719_v33 = vmax.f32 %v1419_v28, 0.0 }
 0x17f   :  { %2059 = vst [vmem:[#allocation1 + $0x1] ss:$9 sm:$0xff] %v1700_v30  ;;  %v1324_v30 = vpop.f32.mrf.mxu0 }
 0x180   :  { %2060 = vst [vmem:[#allocation1 + $0x2] ss:$9 sm:$0xff] %v1701_v49  ;;  %v1422_v49 = vrot.slane %v1322_v32, 4  ;;  %v1325_v38 = vadd.f32 %v13638_v39, %v1324_v30 }
 0x181   :  { %2061 = vst [vmem:[#allocation1 + $0x3] ss:$9 sm:$0xff] %v1702_v52  ;;  %v1424_v52 = vrot.slane %v1322_v32, 6 }
 0x182   :  { %2062 = vst [vmem:[#allocation1 + $0x4] ss:$9 sm:$0xff] %v1703_v26  ;;  %v1720_v26 = vmax.f32 %v1420_v42, 0.0  ;;  %v1722_v22 = vmax.f32 %v1422_v49, 0.0  ;;  %v1426_v55 = vrot.slane %v1325_v38, 1  ;;  %v1429_v18 = vrot.slane %v1325_v38, 4 }
 0x183   :  { %2063 = vst [vmem:[#allocation1 + $0x5] ss:$9 sm:$0xff] %v1704_v58  ;;  %v1425_v58 = vrot.slane %v1322_v32, 7  ;;  %v1724_v61 = vmax.f32 %v1424_v52, 0.0  ;;  %v1430_v6 = vrot.slane %v1325_v38, 5 }
 0x184   :  { %2064 = vst [vmem:[#allocation1 + $0x6] ss:$9 sm:$0xff] %v1705_v63  ;;  %v1721_v63 = vmax.f32 %v1421_v20, 0.0  ;;  %v1727_v14 = vmax.f32 %v1426_v55, 0.0  ;;  %v1730_v36 = vmax.f32 %v1429_v18, 0.0 }
 0x185   :  { %2065 = vst [vmem:[#allocation1 + $0x7] ss:$9 sm:$0xff] %v1706_v8  ;;  %v1725_v59 = vmax.f32 %v1425_v58, 0.0  ;;  %v1731_v32 = vmax.f32 %v1430_v6, 0.0 }
 0x187   :  { %v1326_v9 = vpop.f32.mrf.mxu0 }
 0x18c   :  { %v13653_v5 = vld [vmem:[#allocation1] sm:$0xff] }
 0x18d   :  { %2067 = vst [vmem:[#allocation1] ss:$9 sm:$0xff] %v1707_v16  ;;  %v1726_v16 = vmax.f32 %v1325_v38, 0.0 }
 0x18e   :  { %2068 = vst [vmem:[#allocation1 + $0x1] ss:$9 sm:$0xff] %v1708_v37  ;;  %v1427_v37 = vrot.slane %v1325_v38, 2 }
 0x18f   :  { %2069 = vst [vmem:[#allocation1 + $0x2] ss:$9 sm:$0xff] %v1709_v31  ;;  %v1428_v31 = vrot.slane %v1325_v38, 3 }
 0x190   :  { %2070 = vst [vmem:[#allocation1 + $0x3] ss:$9 sm:$0xff] %v1710_v56  ;;  %v1327_v56 = vadd.f32 %v13638_v39, %v1326_v9 }
 0x191   :  { %2071 = vst [vmem:[#allocation1 + $0x4] ss:$9 sm:$0xff] %v1711_v62  ;;  %v1431_v62 = vrot.slane %v1325_v38, 6 }
 0x192   :  { %2072 = vst [vmem:[#allocation1 + $0x5] ss:$9 sm:$0xff] %v1712_v2  ;;  %v1728_v2 = vmax.f32 %v1427_v37, 0.0  ;;  %v1433_v57 = vrot.slane %v1327_v56, 1  ;;  %v1734_v28 = vmax.f32 %v1327_v56, 0.0  ;;  %v1437_v42 = vrot.slane %v1327_v56, 5 }
 0x193   :  { %2073 = vst [vmem:[#allocation1 + $0x6] ss:$9 sm:$0xff] %v1713_v44  ;;  %v1432_v44 = vrot.slane %v1325_v38, 7  ;;  %v1732_v17 = vmax.f32 %v1431_v62, 0.0  ;;  %v1438_v30 = vrot.slane %v1327_v56, 6 }
 0x194   :  { %2074 = vst [vmem:[#allocation1 + $0x7] ss:$9 sm:$0xff] %v1714_v47  ;;  %v1729_v47 = vmax.f32 %v1428_v31, 0.0  ;;  %v1739_v52 = vmax.f32 %v1437_v42, 0.0 }
 0x195   :  { %v1740_v58 = vmax.f32 %v1438_v30, 0.0 }
 0x19b   :  { %v13656_v15 = vld [vmem:[#allocation1] sm:$0xff] }
 0x19c   :  { %2076 = vst [vmem:[#allocation1] ss:$9 sm:$0xff] %v1715_v53  ;;  %v1733_v53 = vmax.f32 %v1432_v44, 0.0 }
 0x19d   :  { %2077 = vst [vmem:[#allocation1 + $0x1] ss:$9 sm:$0xff] %v1716_v35  ;;  %v1735_v35 = vmax.f32 %v1433_v57, 0.0 }
 0x19e   :  { %2078 = vst [vmem:[#allocation1 + $0x2] ss:$9 sm:$0xff] %v1717_v24  ;;  %v1434_v24 = vrot.slane %v1327_v56, 2 }
 0x19f   :  { %2079 = vst [vmem:[#allocation1 + $0x3] ss:$9 sm:$0xff] %v1718_v60  ;;  %v1435_v60 = vrot.slane %v1327_v56, 3 }
 0x1a0   :  { %2080 = vst [vmem:[#allocation1 + $0x4] ss:$9 sm:$0xff] %v1719_v33  ;;  %v1436_v33 = vrot.slane %v1327_v56, 4  ;;  %v1736_v20 = vmax.f32 %v1434_v24, 0.0 }
 0x1a1   :  { %v1737_v49 = vmax.f32 %v1435_v60, 0.0 }
 0x1a2   :  { %v1738_v38 = vmax.f32 %v1436_v33, 0.0 }
 0x1a7   :  { %v13659_v8 = vld [vmem:[#allocation1] sm:$0xff] }
 0x1a8   :  { %2082 = vst [vmem:[#allocation1] ss:$9 sm:$0xff] %v1720_v26  ;;  %v1329_v26 = vpop.f32.mrf.mxu0 }
 0x1a9   :  { %2083 = vst [vmem:[#allocation1 + $0x1] ss:$9 sm:$0xff] %v1721_v63  ;;  %v1330_v63 = vadd.f32 %v13638_v39, %v1329_v26 }
 0x1aa   :  { %2084 = vst [vmem:[#allocation1 + $0x2] ss:$9 sm:$0xff] %v1722_v22  ;;  %v1439_v22 = vrot.slane %v1327_v56, 7 }
 0x1ab   :  { %2085 = vst [vmem:[#allocation1 + $0x3] ss:$9 sm:$0xff] %v1723_v19  ;;  %v1440_v19 = vrot.slane %v1330_v63, 1  ;;  %v1441_v55 = vrot.slane %v1330_v63, 2  ;;  %v1742_v37 = vmax.f32 %v1330_v63, 0.0  ;;  %v1444_v9 = vrot.slane %v1330_v63, 5 }
 0x1ac   :  { %2086 = vst [vmem:[#allocation1 + $0x4] ss:$9 sm:$0xff] %v1724_v61  ;;  %v1741_v61 = vmax.f32 %v1439_v22, 0.0  ;;  %v1445_v18 = vrot.slane %v1330_v63, 6 }
 0x1ad   :  { %2087 = vst [vmem:[#allocation1 + $0x5] ss:$9 sm:$0xff] %v1725_v59  ;;  %v1442_v59 = vrot.slane %v1330_v63, 3  ;;  %v1743_v31 = vmax.f32 %v1440_v19, 0.0  ;;  %v1744_v6 = vmax.f32 %v1441_v55, 0.0  ;;  %v1747_v44 = vmax.f32 %v1444_v9, 0.0 }
 0x1ae   :  { %2088 = vst [vmem:[#allocation1 + $0x6] ss:$9 sm:$0xff] %v1726_v16 }
 0x1af   :  { %2089 = vst [vmem:[#allocation1 + $0x7] ss:$9 sm:$0xff] %v1727_v14  ;;  %v1443_v14 = vrot.slane %v1330_v63, 4  ;;  %v1745_v62 = vmax.f32 %v1442_v59, 0.0 }
 0x1b0   :  { %v1331_v56 = vpop.f32.mrf.mxu0 }
 0x1b6   :  { %v13662_v3 = vld [vmem:[#allocation1] sm:$0xff] }
 0x1b7   :  { %2091 = vst [vmem:[#allocation1] ss:$9 sm:$0xff] %v1728_v2  ;;  %v1746_v2 = vmax.f32 %v1443_v14, 0.0 }
 0x1b8   :  { %2092 = vst [vmem:[#allocation1 + $0x1] ss:$9 sm:$0xff] %v1729_v47  ;;  %v1748_v47 = vmax.f32 %v1445_v18, 0.0 }
 0x1b9   :  { %2093 = vst [vmem:[#allocation1 + $0x2] ss:$9 sm:$0xff] %v1730_v36  ;;  %v1332_v36 = vadd.f32 %v13638_v39, %v1331_v56 }
 0x1ba   :  { %2094 = vst [vmem:[#allocation1 + $0x3] ss:$9 sm:$0xff] %v1731_v32  ;;  %v1446_v32 = vrot.slane %v1330_v63, 7 }
 0x1bb   :  { %2095 = vst [vmem:[#allocation1 + $0x4] ss:$9 sm:$0xff] %v1732_v17  ;;  %v1447_v57 = vrot.slane %v1332_v36, 1  ;;  %v1448_v17 = vrot.slane %v1332_v36, 2  ;;  %v1450_v24 = vrot.slane %v1332_v36, 4  ;;  %v1750_v60 = vmax.f32 %v1332_v36, 0.0 }
 0x1bc   :  { %2096 = vst [vmem:[#allocation1 + $0x5] ss:$9 sm:$0xff] %v1733_v53  ;;  %v1749_v53 = vmax.f32 %v1446_v32, 0.0  ;;  %v1451_v33 = vrot.slane %v1332_v36, 5  ;;  %v1452_v30 = vrot.slane %v1332_v36, 6  ;;  %v1453_v22 = vrot.slane %v1332_v36, 7 }
 0x1bd   :  { %2097 = vst [vmem:[#allocation1 + $0x6] ss:$9 sm:$0xff] %v1734_v28  ;;  %v1449_v28 = vrot.slane %v1332_v36, 3  ;;  %v1751_v42 = vmax.f32 %v1447_v57, 0.0 }
 0x1be   :  { %2098 = vst [vmem:[#allocation1 + $0x7] ss:$9 sm:$0xff] %v1735_v35  ;;  %v1755_v26 = vmax.f32 %v1451_v33, 0.0  ;;  %v1757_v59 = vmax.f32 %v1453_v22, 0.0 }
 0x1c5   :  { %v13664_v25 = vld [vmem:[#allocation1] sm:$0xff] }
 0x1c6   :  { %2100 = vst [vmem:[#allocation1] ss:$9 sm:$0xff] %v1736_v20  ;;  %v1752_v20 = vmax.f32 %v1448_v17, 0.0 }
 0x1c7   :  { %2101 = vst [vmem:[#allocation1 + $0x1] ss:$9 sm:$0xff] %v1737_v49  ;;  %v1334_v49 = vpop.f32.mrf.mxu0 }
 0x1c8   :  { %2102 = vst [vmem:[#allocation1 + $0x2] ss:$9 sm:$0xff] %v1738_v38  ;;  %v1753_v38 = vmax.f32 %v1449_v28, 0.0  ;;  %v1335_v63 = vadd.f32 %v13638_v39, %v1334_v49 }
 0x1c9   :  { %2103 = vst [vmem:[#allocation1 + $0x3] ss:$9 sm:$0xff] %v1739_v52  ;;  %v1754_v52 = vmax.f32 %v1450_v24, 0.0 }
 0x1ca   :  { %2104 = vst [vmem:[#allocation1 + $0x4] ss:$9 sm:$0xff] %v1740_v58  ;;  %v1756_v58 = vmax.f32 %v1452_v30, 0.0  ;;  %v1454_v19 = vrot.slane %v1335_v63, 1  ;;  %v1456_v14 = vrot.slane %v1335_v63, 3  ;;  %v1758_v9 = vmax.f32 %v1335_v63, 0.0 }
 0x1cb   :  { %v1460_v36 = vrot.slane %v1335_v63, 7 }
 0x1cf   :  { %v1336_v55 = vpop.f32.mrf.mxu0 }
 0x1d0   :  { %v1337_v56 = vadd.f32 %v13638_v39, %v1336_v55 }
 0x1d1   :  { %v13667_v16 = vld [vmem:[#allocation1] sm:$0xff] }
 0x1d2   :  { %2106 = vst [vmem:[#allocation1] ss:$9 sm:$0xff] %v1741_v61  ;;  %v1455_v61 = vrot.slane %v1335_v63, 2  ;;  %v1462_v24 = vrot.slane %v1337_v56, 2  ;;  %v1463_v33 = vrot.slane %v1337_v56, 3  ;;  %v1467_v22 = vrot.slane %v1337_v56, 7 }
 0x1d3   :  { %2107 = vst [vmem:[#allocation1 + $0x1] ss:$9 sm:$0xff] %v1742_v37 }
 0x1d4   :  { %2108 = vst [vmem:[#allocation1 + $0x2] ss:$9 sm:$0xff] %v1743_v31  ;;  %v1759_v31 = vmax.f32 %v1454_v19, 0.0  ;;  %v1760_v18 = vmax.f32 %v1455_v61, 0.0 }
 0x1d5   :  { %2109 = vst [vmem:[#allocation1 + $0x3] ss:$9 sm:$0xff] %v1744_v6  ;;  %v1761_v6 = vmax.f32 %v1456_v14, 0.0 }
 0x1d6   :  { %2110 = vst [vmem:[#allocation1 + $0x4] ss:$9 sm:$0xff] %v1745_v62  ;;  %v1457_v62 = vrot.slane %v1335_v63, 4 }
 0x1d7   :  { %2111 = vst [vmem:[#allocation1 + $0x5] ss:$9 sm:$0xff] %v1746_v2  ;;  %v1339_v2 = vpop.f32.mrf.mxu0 }
 0x1d8   :  { %2112 = vst [vmem:[#allocation1 + $0x6] ss:$9 sm:$0xff] %v1747_v44  ;;  %v1458_v44 = vrot.slane %v1335_v63, 5  ;;  %v1762_v32 = vmax.f32 %v1457_v62, 0.0 }
 0x1d9   :  { %2113 = vst [vmem:[#allocation1 + $0x7] ss:$9 sm:$0xff] %v1748_v47  ;;  %v1459_v47 = vrot.slane %v1335_v63, 6  ;;  %v1466_v63 = vrot.slane %v1337_v56, 6 }
 0x1da   :  { %v1763_v57 = vmax.f32 %v1458_v44, 0.0 }
 0x1db   :  { %v1764_v28 = vmax.f32 %v1459_v47, 0.0 }
 0x1df   :  { %v1341_v49 = vpop.f32.mrf.mxu0 }
 0x1e0   :  { %v13670_v35 = vld [vmem:[#allocation1] sm:$0xff] }
 0x1e1   :  { %2115 = vst [vmem:[#allocation1] ss:$9 sm:$0xff] %v1749_v53  ;;  %v1461_v53 = vrot.slane %v1337_v56, 1 }
 0x1e2   :  { %2116 = vst [vmem:[#allocation1 + $0x1] ss:$9 sm:$0xff] %v1750_v60  ;;  %v1765_v60 = vmax.f32 %v1460_v36, 0.0 }
 0x1e3   :  { %2117 = vst [vmem:[#allocation1 + $0x2] ss:$9 sm:$0xff] %v1751_v42  ;;  %v1766_v42 = vmax.f32 %v1337_v56, 0.0  ;;  %v1767_v30 = vmax.f32 %v1461_v53, 0.0 }
 0x1e4   :  { %2118 = vst [vmem:[#allocation1 + $0x3] ss:$9 sm:$0xff] %v1752_v20  ;;  %v1768_v20 = vmax.f32 %v1462_v24, 0.0  ;;  %v1342_v24 = vadd.f32 %v13638_v39, %v1341_v49 }
 0x1e5   :  { %2119 = vst [vmem:[#allocation1 + $0x4] ss:$9 sm:$0xff] %v1753_v38  ;;  %v1769_v38 = vmax.f32 %v1463_v33, 0.0 }
 0x1e6   :  { %2120 = vst [vmem:[#allocation1 + $0x5] ss:$9 sm:$0xff] %v1754_v52  ;;  %v1464_v52 = vrot.slane %v1337_v56, 4  ;;  %v1480_v49 = vrot.slane %v1342_v24, 6 }
 0x1e7   :  { %2121 = vst [vmem:[#allocation1 + $0x6] ss:$9 sm:$0xff] %v1755_v26  ;;  %v1465_v26 = vrot.slane %v1337_v56, 5  ;;  %v1344_v14 = vpop.f32.mrf.mxu0 }
 0x1e8   :  { %2122 = vst [vmem:[#allocation1 + $0x7] ss:$9 sm:$0xff] %v1756_v58  ;;  %v1340_v58 = vadd.f32 %v13638_v39, %v1339_v2  ;;  %v1770_v19 = vmax.f32 %v1464_v52, 0.0  ;;  %v1475_v52 = vrot.slane %v1342_v24, 1 }
 0x1e9   :  { %v1771_v55 = vmax.f32 %v1465_v26, 0.0  ;;  %v1476_v26 = vrot.slane %v1342_v24, 2 }
 0x1ea   :  { %v1774_v62 = vmax.f32 %v1340_v58, 0.0  ;;  %v1471_v56 = vrot.slane %v1340_v58, 4  ;;  %v1474_v53 = vrot.slane %v1340_v58, 7 }
 0x1ef   :  { %v13673_v37 = vld [vmem:[#allocation1] sm:$0xff]  ;;  %v1346_v36 = vpop.f32.mrf.mxu0 }
 0x1f0   :  { %2124 = vst [vmem:[#allocation1] ss:$9 sm:$0xff] %v1757_v59  ;;  %v1468_v59 = vrot.slane %v1340_v58, 1 }
 0x1f1   :  { %2125 = vst [vmem:[#allocation1 + $0x1] ss:$9 sm:$0xff] %v1758_v9  ;;  %v1772_v9 = vmax.f32 %v1466_v63, 0.0  ;;  %v1477_v63 = vrot.slane %v1342_v24, 3 }
 0x1f2   :  { %2126 = vst [vmem:[#allocation1 + $0x2] ss:$9 sm:$0xff] %v1759_v31  ;;  %v1469_v31 = vrot.slane %v1340_v58, 2  ;;  %v1775_v44 = vmax.f32 %v1468_v59, 0.0 }
 0x1f3   :  { %2127 = vst [vmem:[#allocation1 + $0x3] ss:$9 sm:$0xff] %v1760_v18  ;;  %v1773_v18 = vmax.f32 %v1467_v22, 0.0  ;;  %v1479_v22 = vrot.slane %v1342_v24, 5 }
 0x1f4   :  { %2128 = vst [vmem:[#allocation1 + $0x4] ss:$9 sm:$0xff] %v1761_v6  ;;  %v1470_v6 = vrot.slane %v1340_v58, 3  ;;  %v1776_v47 = vmax.f32 %v1469_v31, 0.0  ;;  %v1785_v31 = vmax.f32 %v1477_v63, 0.0 }
 0x1f6   :  { %v1777_v2 = vmax.f32 %v1470_v6, 0.0  ;;  %v1345_v6 = vadd.f32 %v13638_v39, %v1344_v14 }
 0x1fb   :  { %v13676_v17 = vld [vmem:[#allocation1] sm:$0xff] }
 0x1fc   :  { %2130 = vst [vmem:[#allocation1] ss:$9 sm:$0xff] %v1762_v32  ;;  %v1472_v32 = vrot.slane %v1340_v58, 5 }
 0x1fd   :  { %2131 = vst [vmem:[#allocation1 + $0x1] ss:$9 sm:$0xff] %v1763_v57  ;;  %v1473_v57 = vrot.slane %v1340_v58, 6  ;;  %v1478_v58 = vrot.slane %v1342_v24, 4 }
 0x1fe   :  { %2132 = vst [vmem:[#allocation1 + $0x2] ss:$9 sm:$0xff] %v1764_v28  ;;  %v1778_v28 = vmax.f32 %v1471_v56, 0.0  ;;  %v1790_v56 = vmax.f32 %v1345_v6, 0.0 }
 0x1ff   :  { %2133 = vst [vmem:[#allocation1 + $0x3] ss:$9 sm:$0xff] %v1765_v60  ;;  %v1779_v60 = vmax.f32 %v1472_v32, 0.0  ;;  %v1482_v32 = vrot.slane %v1345_v6, 1 }
 0x200   :  { %2134 = vst [vmem:[#allocation1 + $0x4] ss:$9 sm:$0xff] %v1766_v42  ;;  %v1780_v42 = vmax.f32 %v1473_v57, 0.0  ;;  %v1483_v57 = vrot.slane %v1345_v6, 2 }
 0x201   :  { %2135 = vst [vmem:[#allocation1 + $0x5] ss:$9 sm:$0xff] %v1767_v30  ;;  %v1781_v30 = vmax.f32 %v1474_v53, 0.0  ;;  %v1484_v53 = vrot.slane %v1345_v6, 3  ;;  %v1791_v14 = vmax.f32 %v1482_v32, 0.0 }
 0x202   :  { %2136 = vst [vmem:[#allocation1 + $0x6] ss:$9 sm:$0xff] %v1768_v20  ;;  %v1782_v20 = vmax.f32 %v1342_v24, 0.0 }
 0x203   :  { %2137 = vst [vmem:[#allocation1 + $0x7] ss:$9 sm:$0xff] %v1769_v38  ;;  %v13684_v38 = vpop.f32.mrf.mxu0 }
 0x20a   :  { %v13679_v61 = vld [vmem:[#allocation1] sm:$0xff] }
 0x20b   :  { %2139 = vst [vmem:[#allocation1] ss:$9 sm:$0xff] %v1770_v19  ;;  %v1783_v19 = vmax.f32 %v1475_v52, 0.0  ;;  %v1488_v52 = vrot.slane %v1345_v6, 7 }
 0x20c   :  { %2140 = vst [vmem:[#allocation1 + $0x1] ss:$9 sm:$0xff] %v1771_v55  ;;  %v1784_v55 = vmax.f32 %v1476_v26, 0.0  ;;  %v1793_v26 = vmax.f32 %v1484_v53, 0.0 }
 0x20d   :  { %2141 = vst [vmem:[#allocation1 + $0x2] ss:$9 sm:$0xff] %v1772_v9  ;;  %v1481_v9 = vrot.slane %v1342_v24, 7 }
 0x20e   :  { %2142 = vst [vmem:[#allocation1 + $0x3] ss:$9 sm:$0xff] %v1773_v18  ;;  %v1786_v18 = vmax.f32 %v1478_v58, 0.0  ;;  %v1347_v58 = vadd.f32 %v13638_v39, %v1346_v36 }
 0x20f   :  { %2143 = vst [vmem:[#allocation1 + $0x4] ss:$9 sm:$0xff] %v1774_v62  ;;  %v1787_v62 = vmax.f32 %v1479_v22, 0.0 }
 0x210   :  { %2144 = vst [vmem:[#allocation1 + $0x5] ss:$9 sm:$0xff] %v1775_v44  ;;  %v13689_v44 = vpop.f32.mrf.mxu0 }
 0x211   :  { %2145 = vst [vmem:[#allocation1 + $0x6] ss:$9 sm:$0xff] %v1776_v47  ;;  %v1788_v47 = vmax.f32 %v1480_v49, 0.0  ;;  %v1797_v49 = vmax.f32 %v1488_v52, 0.0  ;;  %v1494_v52 = vrot.slane %v1347_v58, 6 }
 0x212   :  { %2146 = vst [vmem:[#allocation1 + $0x7] ss:$9 sm:$0xff] %v1777_v2  ;;  %v1789_v2 = vmax.f32 %v1481_v9, 0.0 }
 0x218   :  { %v13691_v24 = vpop.f32.mrf.mxu0 }
 0x219   :  { %v13682_v33 = vld [vmem:[#allocation1] sm:$0xff] }
 0x21a   :  { %2148 = vst [vmem:[#allocation1] ss:$9 sm:$0xff] %v1778_v28  ;;  %v1485_v28 = vrot.slane %v1345_v6, 4 }
 0x21b   :  { %2149 = vst [vmem:[#allocation1 + $0x1] ss:$9 sm:$0xff] %v1779_v60  ;;  %v1486_v60 = vrot.slane %v1345_v6, 5 }
 0x21c   :  { %2150 = vst [vmem:[#allocation1 + $0x2] ss:$9 sm:$0xff] %v1780_v42  ;;  %v1487_v42 = vrot.slane %v1345_v6, 6  ;;  %v1794_v63 = vmax.f32 %v1485_v28, 0.0  ;;  %v1490_v6 = vrot.slane %v1347_v58, 2 }
 0x21d   :  { %2151 = vst [vmem:[#allocation1 + $0x3] ss:$9 sm:$0xff] %v1781_v30  ;;  %v1792_v30 = vmax.f32 %v1483_v57, 0.0  ;;  %v1795_v22 = vmax.f32 %v1486_v60, 0.0 }
 0x21e   :  { %2152 = vst [vmem:[#allocation1 + $0x4] ss:$9 sm:$0xff] %v1782_v20  ;;  %v1800_v32 = vmax.f32 %v1490_v6, 0.0 }
 0x220   :  { %v13696_v9 = vpop.f32.mrf.mxu0 }
 0x225   :  { %v13686_v59 = vld [vmem:[#allocation1] sm:$0xff] }
 0x226   :  { %2154 = vst [vmem:[#allocation1] ss:$9 sm:$0xff] %v1783_v19  ;;  %v1796_v19 = vmax.f32 %v1487_v42, 0.0  ;;  %v1350_v42 = vadd.f32 %v13638_v39, %v13684_v38 }
 0x227   :  { %2155 = vst [vmem:[#allocation1 + $0x1] ss:$9 sm:$0xff] %v1784_v55  ;;  %v1798_v55 = vmax.f32 %v1347_v58, 0.0 }
 0x228   :  { %2156 = vst [vmem:[#allocation1 + $0x2] ss:$9 sm:$0xff] %v1785_v31  ;;  %v1489_v31 = vrot.slane %v1347_v58, 1 }
 0x229   :  { %2157 = vst [vmem:[#allocation1 + $0x3] ss:$9 sm:$0xff] %v1786_v18  ;;  %v1846_v18 = vlaneseq }
 0x22a   :  { %2158 = vst [vmem:[#allocation1 + $0x4] ss:$9 sm:$0xff] %v1787_v62  ;;  %v1491_v62 = vrot.slane %v1347_v58, 3 }
 0x22b   :  { %2159 = vst [vmem:[#allocation1 + $0x5] ss:$9 sm:$0xff] %v1788_v47  ;;  %v1492_v47 = vrot.slane %v1347_v58, 4  ;;  %v13698_v36 = vshrl.u32 %v1846_v18, 7 }
 0x22c   :  { %2160 = vst [vmem:[#allocation1 + $0x6] ss:$9 sm:$0xff] %v1789_v2  ;;  %v1493_v2 = vrot.slane %v1347_v58, 5  ;;  %v1801_v53 = vmax.f32 %v1491_v62, 0.0 }
 0x22d   :  { %2161 = vst [vmem:[#allocation1 + $0x7] ss:$9 sm:$0xff] %v1790_v56  ;;  %v1799_v56 = vmax.f32 %v1489_v31, 0.0  ;;  %v1802_v28 = vmax.f32 %v1492_v47, 0.0  ;;  %vm17757_vm12 = vcmp.ge.s32.totalorder %v13698_v36, 5  ;;  %v1497_v31 = vrot.slane %v1350_v42, 2 }
 0x22e   :  { %v1803_v60 = vmax.f32 %v1493_v2, 0.0  ;;  %v1498_v47 = vrot.slane %v1350_v42, 3 }
 0x234   :  { %v13693_v20 = vld [vmem:[#allocation1] sm:$0xff] }
 0x235   :  { %2163 = vst [vmem:[#allocation1] ss:$9 sm:$0xff] %v1791_v14  ;;  %v13702_v14 = vpop.f32.mrf.mxu0 }
 0x236   :  { %2164 = vst [vmem:[#allocation1 + $0x1] ss:$9 sm:$0xff] %v1792_v30  ;;  %v2250_v30 = vsel %vm17757_vm12, %v13644_v23, 0.0  ;;  %v1499_v23 = vrot.slane %v1350_v42, 4 }
 0x237   :  { %2165 = vst [vmem:[#allocation1 + $0x2] ss:$9 sm:$0xff] %v1793_v26  ;;  %v2275_v26 = vpack.c.bf16 %v13647_v7, %v13647_v7  ;;  %v1500_v7 = vrot.slane %v1350_v42, 5 }
 0x238   :  { %2166 = vst [vmem:[#allocation1 + $0x3] ss:$9 sm:$0xff] %v1794_v63  ;;  %v1495_v63 = vrot.slane %v1347_v58, 7 }
 0x239   :  { %2167 = vst [vmem:[#allocation1 + $0x4] ss:$9 sm:$0xff] %v1795_v22  ;;  %v2276_v22 = vpack.c.bf16 %v13650_v4, %v13650_v4  ;;  %v2323_v6 = vunpack.c.l.b16 %v2275_v26 }
 0x23a   :  { %2168 = vst [vmem:[#allocation1 + $0x5] ss:$9 sm:$0xff] %v1796_v19  ;;  %v2274_v19 = vpack.c.bf16 %v2250_v30, %v2250_v30  ;;  %v1805_v62 = vmax.f32 %v1495_v63, 0.0  ;;  %v1810_v30 = vmax.f32 %v1499_v23, 0.0  ;;  %v2253_v23 = vsel %vm17757_vm12, %v13653_v5, 0.0 }
 0x23b   :  { %2169 = vst [vmem:[#allocation1 + $0x6] ss:$9 sm:$0xff] %v1797_v49  ;;  %v1496_v49 = vrot.slane %v1350_v42, 1  ;;  %v2324_v2 = vunpack.c.l.b16 %v2276_v22  ;;  %vm2660_vm12 = vcmask 1043457  }
 0x23c   :  { %2170 = vst [vmem:[#allocation1 + $0x7] ss:$9 sm:$0xff] %v1798_v55  ;;  %v1804_v55 = vmax.f32 %v1494_v52, 0.0  ;;  %v1811_v52 = vmax.f32 %v1500_v7, 0.0 }
 0x23d   :  { %v1361_v18 = vpop.f32.mrf.mxu0  ;;  %v1807_v58 = vmax.f32 %v1496_v49, 0.0 }
 0x243   :  { %v13700_v57 = vld [vmem:[#allocation1] sm:$0xff] }
 0x244   :  { %2172 = vst [vmem:[#allocation1] ss:$9 sm:$0xff] %v1799_v56  ;;  %v1806_v56 = vmax.f32 %v1350_v42, 0.0 }
 0x245   :  { %2173 = vst [vmem:[#allocation1 + $0x1] ss:$9 sm:$0xff] %v1800_v32  ;;  %v2322_v32 = vunpack.c.l.b16 %v2274_v19  ;;  %v13725_v19 = vadd.f32 %v13638_v39, %v13689_v44  ;;  %v2278_v44 = vpack.c.bf16 %v13656_v15, %v13656_v15 }
 0x246   :  { %2174 = vst [vmem:[#allocation1 + $0x2] ss:$9 sm:$0xff] %v1801_v53  ;;  %v1808_v53 = vmax.f32 %v1497_v31, 0.0  ;;  %v1502_v31 = vrot.slane %v1350_v42, 7 }
 0x247   :  { %2175 = vst [vmem:[#allocation1 + $0x3] ss:$9 sm:$0xff] %v1802_v28  ;;  %v13716_v4 = vpack.c.b16 %v2323_v6, %v2322_v32  ;;  %v1809_v28 = vmax.f32 %v1498_v47, 0.0  ;;  %v1504_v39 = vrot.slane %v13725_v19, 2  ;;  %v1506_v5 = vrot.slane %v13725_v19, 4 }
 0x248   :  { %2176 = vst [vmem:[#allocation1 + $0x4] ss:$9 sm:$0xff] %v1803_v60  ;;  %v13718_v60 = vpack.c.b16 %v2324_v2, %v2324_v2  ;;  %v1503_v2 = vrot.slane %v13725_v19, 1  ;;  %v1813_v7 = vmax.f32 %v1502_v31, 0.0  ;;  %v1507_v15 = vrot.slane %v13725_v19, 5 }
 0x249   :  { %v2365_v26 = vshll.u32 %v13716_v4, 16  ;;  %v2363_v22 = vshrl.u32 %v13716_v4, 16  ;;  %v1816_v0 = vmax.f32 %v1504_v39, 0.0 }
 0x24a   :  { %v2374_v63 = vshrl.u32 %v13718_v60, 16  ;;  %v2370_v49 = vshll.u32 %v13718_v60, 16  ;;  %v2475_v6 = vrot.slane %v13718_v60, 1  ;;  %v2555_v11 = vrot.slane %v13718_v60, 2 }
 0x24b   :  { %v2367_v18 = vrot.slane %v2365_v26, 1  ;;  %v2498_v47 = vrot.slane %v2363_v22, 1 }
 0x24c   :  { %v2583_v31 = vrot.slane %v2475_v6, 6 }
 0x24d   :  { %v2368_v50 = vor.u32 %v2367_v18, %v2363_v22  ;;  %v1819_v18 = vmax.f32 %v1507_v15, 0.0 }
 0x24f   :  { %v13714_v38 = vld [vmem:[#allocation1] sm:$0xff] }
 0x250   :  { %2178 = vst [vmem:[#allocation1] ss:$9 sm:$0xff] %v1804_v55  ;;  %v1501_v55 = vrot.slane %v1350_v42, 6  ;;  %v2582_v42 = vrot.slane %v2374_v63, 7 }
 0x251   :  { %2179 = vst [vmem:[#allocation1 + $0x1] ss:$9 sm:$0xff] %v1805_v62  ;;  %v2501_v62 = vrot.slane %v2374_v63, 1  ;;  %v1815_v63 = vmax.f32 %v1503_v2, 0.0  ;;  %v1818_v2 = vmax.f32 %v1506_v5, 0.0 }
 0x252   :  { %2180 = vst [vmem:[#allocation1 + $0x2] ss:$9 sm:$0xff] %v1806_v56  ;;  %v2502_v56 = vrot.slane %v2370_v49, 2  ;;  %v1812_v32 = vmax.f32 %v1501_v55, 0.0  ;;  %v2277_v55 = vpack.c.bf16 %v2253_v23, %v2253_v23  ;;  %v2474_v23 = vrot.slane %v13716_v4, 1 }
 0x253   :  { %2181 = vst [vmem:[#allocation1 + $0x3] ss:$9 sm:$0xff] %v1807_v58 }
 0x254   :  { %2182 = vst [vmem:[#allocation1 + $0x4] ss:$9 sm:$0xff] %v1808_v53  ;;  %v1505_v53 = vrot.slane %v13725_v19, 3  ;;  %v2503_v27 = vor.u32 %v2502_v56, %v2501_v62  ;;  %v2325_v43 = vunpack.c.l.b16 %v2277_v55  ;;  %v2585_v56 = vrot.slane %v2555_v11, 4 }
 0x255   :  { %2183 = vst [vmem:[#allocation1 + $0x5] ss:$9 sm:$0xff] %v1809_v28  ;;  %v2372_v28 = vrot.slane %v2370_v49, 1  ;;  %v2584_v49 = vrot.slane %v2501_v62, 5  ;;  %v2476_v62 = vsel %vm372_vm1, %v2474_v23, %v2475_v6 }
 0x256   :  { %2184 = vst [vmem:[#allocation1 + $0x6] ss:$9 sm:$0xff] %v1810_v30  ;;  %v2499_v30 = vrot.slane %v2365_v26, 2  ;;  %v2326_v26 = vunpack.c.l.b16 %v2278_v44  ;;  %v1817_v12 = vmax.f32 %v1505_v53, 0.0  ;;  %v1509_v53 = vrot.slane %v13725_v19, 7 }
 0x257   :  { %2185 = vst [vmem:[#allocation1 + $0x7] ss:$9 sm:$0xff] %v1811_v52  ;;  %v1814_v52 = vmax.f32 %v13725_v19, 0.0  ;;  %v2373_v46 = vsel %vm17756_vm3, %v2368_v50, %v2372_v28  ;;  %vm17772_vm3 = vcmask 1044483  }
 0x258   :  { %v2500_v22 = vor.u32 %v2499_v30, %v2498_v47  ;;  %v13751_v44 = vpack.c.b16 %v2326_v26, %v2325_v43 }
 0x25a   :  { %v2504_v50 = vsel %vm17758_vm2, %v2500_v22, %v2503_v27  ;;  %v13766_v27 = vrot.slane %v2476_v62, 6  ;;  %vm17781_vm2 = vcmask 1046533   ;;  %v2377_v28 = vshrl.u32 %v13751_v44, 16 }
 0x25b   :  { %v2580_v47 = vrot.slane %v2504_v50, 5  ;;  %v2557_v21 = vrot.slane %v13751_v44, 2 }
 0x25e   :  { %v13736_v58 = vld [vmem:[#allocation1] sm:$0xff] }
 0x25f   :  { %2187 = vst [vmem:[#allocation1] ss:$9 sm:$0xff] %v1812_v32  ;;  %v2717_v32 = vsel %vm2642_vm5, %v13718_v60, %v2582_v42  ;;  %v2722_v42 = vsel %vm2647_vm4, %v2584_v49, %v2585_v56 }
 0x260   :  { %2188 = vst [vmem:[#allocation1 + $0x1] ss:$9 sm:$0xff] %v1813_v7  ;;  %v2554_v7 = vrot.slane %v13716_v4, 2  ;;  %v2719_v39 = vsel %vm1296_vm6, %v2717_v32, %v2583_v31 }
 0x261   :  { %2189 = vst [vmem:[#allocation1 + $0x2] ss:$9 sm:$0xff] %v1814_v52 }
 0x262   :  { %2190 = vst [vmem:[#allocation1 + $0x3] ss:$9 sm:$0xff] %v1815_v63  ;;  %v2556_v60 = vsel %vm17759_vm0, %v2554_v7, %v2555_v11  ;;  %v13760_v11 = vld [vmem:[%s17728_s3] ss:$0 sm:$0xff]  ;;  %vm2679_vm0 = vcmask 1045507  }
 0x263   :  { %2191 = vst [vmem:[#allocation1 + $0x4] ss:$9 sm:$0xff] %v1816_v0  ;;  %v2578_v0 = vrot.slane %v2373_v46, 7  ;;  %v13764_v43 = vadd.f32 %v13760_v11, %v13691_v24  ;;  %v1508_v46 = vrot.slane %v13725_v19, 6  ;;  %v2581_v6 = vrot.slane %v2556_v60, 4 }
 0x264   :  { %2192 = vst [vmem:[#allocation1 + $0x5] ss:$9 sm:$0xff] %v1817_v12  ;;  %v2279_v12 = vpack.c.bf16 %v13659_v8, %v13659_v8  ;;  %v13770_v8 = vsel %vm17760_vm13, %v2719_v39, %v2722_v42  ;;  %v2379_v24 = vshll.u32 %v13751_v44, 16  ;;  %vm2670_vm13 = vcmask 1044482  }
 0x265   :  { %2193 = vst [vmem:[#allocation1 + $0x6] ss:$9 sm:$0xff] %v1818_v2  ;;  %v2644_v30 = vsel %vm2642_vm5, %v13716_v4, %v2578_v0  ;;  %v2655_v5 = vsel %vm17770_vm14, %v13716_v4, %v2578_v0  ;;  %v2665_v55 = vsel %vm17769_vm15, %v13716_v4, %v2578_v0  ;;  %v2674_v15 = vsel %vm2647_vm4, %v13716_v4, %v2578_v0 }
 0x266   :  { %2194 = vst [vmem:[#allocation1 + $0x7] ss:$9 sm:$0xff] %v1819_v18  ;;  %v2327_v52 = vunpack.c.l.b16 %v2279_v12  ;;  %v1510_v19 = vrot.slane %v13764_v43, 1  ;;  %v2683_v63 = vsel %vm17768_vm8, %v13716_v4, %v2578_v0  ;;  %v2692_v31 = vsel %vm17767_vm9, %v13716_v4, %v2578_v0 }
 0x267   :  { %v1820_v26 = vmax.f32 %v1508_v46, 0.0  ;;  %v1511_v49 = vrot.slane %v13764_v43, 2  ;;  %v2650_v32 = vsel %vm2647_vm4, %v2580_v47, %v2581_v6  ;;  %v2659_v23 = vsel %vm17768_vm8, %v2580_v47, %v2581_v6 }
 0x268   :  { %v2700_v7 = vsel %vm17766_vm10, %v13716_v4, %v2578_v0  ;;  %v1821_v2 = vmax.f32 %v1509_v53, 0.0  ;;  %v2381_v22 = vrot.slane %v2379_v24, 1  ;;  %v13795_v18 = vrot.slane %v2377_v28, 1 }
 0x269   :  { %v13797_v62 = vrot.slane %v2379_v24, 2  ;;  %v1822_v60 = vmax.f32 %v13764_v43, 0.0  ;;  %v13800_v39 = vpack.c.b16 %v2327_v52, %v2327_v52  ;;  %v2669_v42 = vsel %vm17767_vm9, %v2580_v47, %v2581_v6 }
 0x26a   :  { %v2678_v50 = vsel %vm17766_vm10, %v2580_v47, %v2581_v6  ;;  %v1823_v12 = vmax.f32 %v1510_v19, 0.0  ;;  %v13805_v46 = vsel %vm372_vm1, %v2581_v6, %v2580_v47  ;;  %v13808_v53 = vsel %vm2642_vm5, %v2580_v47, %v2581_v6 }
 0x26b   :  { %v13811_v24 = vsel %vm17770_vm14, %v2580_v47, %v2581_v6  ;;  %v2477_v52 = vrot.slane %v13751_v44, 1  ;;  %v2708_v10 = vsel %vm372_vm1, %v2578_v0, %v13716_v4  ;;  %v13818_v19 = vsel %vm17769_vm15, %v2580_v47, %v2581_v6 }
 0x26c   :  { %v2646_v1 = vsel %vm1296_vm6, %v2644_v30, %v13766_v27  ;;  %vm2688_vm10 = vcmask 1046532   ;;  %vm2696_vm9 = vcmask 1044480   ;;  %v2667_v4 = vsel %vm17785_vm7, %v2665_v55, %v13766_v27 }
 0x26d   :  { %v13793_v56 = vld [vmem:[#allocation1] sm:$0xff]  ;;  %v2676_v0 = vsel %vm17772_vm3, %v2674_v15, %v13766_v27  ;;  %vm17817_vm8 = vcmask 1045508   ;;  %vm2704_vm15 = vcmask 1045505   ;;  %vm17780_vm14 = vcmask 1046530  }
 0x26e   :  { %2196 = vst [vmem:[#allocation1] ss:$9 sm:$0xff] %v1820_v26  ;;  %v1824_v26 = vmax.f32 %v1511_v49, 0.0  ;;  %v2657_v49 = vsel %vm17771_vm11, %v2655_v5, %v13766_v27  ;;  %v2685_v6 = vsel %vm17817_vm8, %v2683_v63, %v13766_v27  ;;  %v2388_v47 = vshrl.u32 %v13800_v39, 16 }
 0x26f   :  { %2197 = vst [vmem:[#allocation1 + $0x1] ss:$9 sm:$0xff] %v1821_v2  ;;  %v2382_v2 = vor.u32 %v2381_v22, %v2377_v28  ;;  %v2694_v28 = vsel %vm17781_vm2, %v2692_v31, %v13766_v27  ;;  %vm17818_vm11 = vcmask 1045504   ;;  %v1512_v5 = vrot.slane %v13764_v43, 3 }
 0x270   :  { %2198 = vst [vmem:[#allocation1 + $0x2] ss:$9 sm:$0xff] %v1822_v60  ;;  %v2384_v60 = vshll.u32 %v13800_v39, 16  ;;  %v2702_v30 = vsel %vm17818_vm11, %v13766_v27, %v2700_v7  ;;  %v2478_v55 = vrot.slane %v13800_v39, 1  ;;  %v2558_v22 = vrot.slane %v13800_v39, 2 }
 0x271   :  { %2199 = vst [vmem:[#allocation1 + $0x3] ss:$9 sm:$0xff] %v1823_v12  ;;  %vm17819_vm3 = vcmask 1046529   ;;  %v1513_v63 = vrot.slane %v13764_v43, 4  ;;  %vm17820_vm8 = vcmask 1042432   ;;  %v1514_v31 = vrot.slane %v13764_v43, 5 }
 0x272   :  { %2200 = vst [vmem:[#allocation1 + $0x4] ss:$9 sm:$0xff] %v1824_v26  ;;  %v2710_v15 = vsel %vm17819_vm3, %v13766_v27, %v2708_v10  ;;  %v13845_v12 = vsel %vm17820_vm8, %v2646_v1, %v2650_v32  ;;  %v13848_v26 = vsel %vm2660_vm12, %v2657_v49, %v2659_v23  ;;  %v13853_v7 = vadd.f32 %v13760_v11, %v13696_v9  ;;  %vm17821_vm3 = vmmov %vm17818_vm11 }
 0x273   :  { %v2386_v13 = vrot.slane %v2384_v60, 1  ;;  %v13856_v45 = vsel %vm2670_vm13, %v2667_v4, %v2669_v42  ;;  %v13859_v10 = vsel %vm2679_vm0, %v2676_v0, %v2678_v50  ;;  %v1515_v27 = vrot.slane %v13764_v43, 6 }
 0x274   :  { %v2508_v1 = vrot.slane %v2388_v47, 1  ;;  %v2509_v32 = vrot.slane %v2384_v60, 2  ;;  %v1516_v23 = vrot.slane %v13764_v43, 7  ;;  %v1825_v49 = vmax.f32 %v1512_v5, 0.0 }
 0x275   :  { %v2479_v40 = vsel %vm372_vm1, %v2477_v52, %v2478_v55  ;;  %v2559_v34 = vsel %vm17821_vm3, %v2557_v21, %v2558_v22  ;;  %v2590_v9 = vrot.slane %v2388_v47, 7  ;;  %v1826_v29 = vmax.f32 %v1513_v63, 0.0 }
 0x276   :  { %vm17822_vm11 = vcmp.ge.s32.totalorder %v13698_v36, 5  ;;  %v2591_v50 = vrot.slane %v2478_v55, 6  ;;  %v1827_v4 = vmax.f32 %v1514_v31, 0.0  ;;  %v1517_v60 = vrot.slane %v13853_v7, 1 }
 0x277   :  { %v2256_v42 = vsel %vm17822_vm11, %v13662_v3, 0.0  ;;  %v2593_v0 = vrot.slane %v2558_v22, 4  ;;  %vm17823_vm8 = vsmask.f32 7424  ;;  %v1828_v5 = vmax.f32 %v1515_v27, 0.0 }
 0x278   :  { %v2387_v43 = vsel %vm17823_vm8, %v2382_v2, %v2386_v13  ;;  %v1518_v21 = vrot.slane %v13853_v7, 2  ;;  %v2510_v52 = vor.u32 %v2509_v32, %v2508_v1  ;;  %v13873_v47 = vrot.slane %v2479_v40, 6 }
 0x279   :  { %v13865_v54 = vld [vmem:[#allocation1] sm:$0xff]  ;;  %v13875_v63 = vrot.slane %v2559_v34, 4  ;;  %v1829_v51 = vmax.f32 %v1516_v23, 0.0  ;;  %v2280_v3 = vpack.c.bf16 %v2256_v42, %v2256_v42  ;;  %v2281_v55 = vpack.c.bf16 %v13664_v25, %v13664_v25 }
 0x27a   :  { %2202 = vst [vmem:[#allocation1] ss:$9 sm:$0xff] %v1825_v49  ;;  %v2592_v31 = vrot.slane %v2508_v1, 5  ;;  %v1830_v22 = vmax.f32 %v13853_v7, 0.0  ;;  %v13884_v13 = vsel %vm2688_vm10, %v2685_v6, %v13805_v46  ;;  %v13888_v34 = vsel %vm2696_vm9, %v13808_v53, %v2694_v28 }
 0x27b   :  { %2203 = vst [vmem:[#allocation1 + $0x1] ss:$9 sm:$0xff] %v1826_v29  ;;  %v2777_v29 = vsel %vm2642_vm5, %v13800_v39, %v2590_v9  ;;  %v1831_v40 = vmax.f32 %v1517_v60, 0.0  ;;  %v2586_v2 = vrot.slane %v2387_v43, 7  ;;  %v13892_v25 = vsel %vm2704_vm15, %v13811_v24, %v2702_v30 }
 0x27c   :  { %2204 = vst [vmem:[#allocation1 + $0x2] ss:$9 sm:$0xff] %v1827_v4  ;;  %v13896_v27 = vsel %vm17780_vm14, %v13818_v19, %v2710_v15  ;;  %v1832_v39 = vmax.f32 %v1518_v21, 0.0  ;;  %v17824_v46 = vor.u32 %v13797_v62, %v13795_v18  ;;  %vm17825_vm3 = vsmask.f32 6400 }
 0x27d   :  { %2205 = vst [vmem:[#allocation1 + $0x3] ss:$9 sm:$0xff] %v1828_v5  ;;  %v2328_v24 = vunpack.c.l.b16 %v2280_v3  ;;  %v2329_v30 = vunpack.c.l.b16 %v2281_v55  ;;  %v2779_v1 = vsel %vm1296_vm6, %v2777_v29, %v2591_v50  ;;  %v2782_v15 = vsel %vm2647_vm4, %v2592_v31, %v2593_v0 }
 0x27e   :  { %2206 = vst [vmem:[#allocation1 + $0x4] ss:$9 sm:$0xff] %v1829_v51  ;;  %v2511_v6 = vsel %vm17825_vm3, %v17824_v46, %v2510_v52  ;;  %v2726_v49 = vsel %vm2642_vm5, %v13751_v44, %v2586_v2  ;;  %vm17826_vm11 = vcmask 1041409   ;;  %v1519_v42 = vrot.slane %v13853_v7, 3 }
 0x27f   :  { %2207 = vst [vmem:[#allocation1 + $0x5] ss:$9 sm:$0xff] %v1830_v22  ;;  %v2588_v23 = vrot.slane %v2511_v6, 5  ;;  %v2734_v9 = vsel %vm17826_vm11, %v13751_v44, %v2586_v2  ;;  %v2282_v50 = vpack.c.bf16 %v13667_v16, %v13667_v16  ;;  %vm17827_vm8 = vcmask 1042434  }
 0x280   :  { %2208 = vst [vmem:[#allocation1 + $0x6] ss:$9 sm:$0xff] %v1831_v40  ;;  %v2740_v4 = vsel %vm17827_vm8, %v13751_v44, %v2586_v2  ;;  %v2746_v60 = vsel %vm2647_vm4, %v13751_v44, %v2586_v2  ;;  %v1520_v0 = vrot.slane %v13853_v7, 4  ;;  %v13923_v43 = vpack.c.b16 %v2329_v30, %v2328_v24 }
 0x281   :  { %2209 = vst [vmem:[#allocation1 + $0x7] ss:$9 sm:$0xff] %v1832_v39  ;;  %vm17828_vm3 = vcmask 1044484   ;;  %v1521_v21 = vrot.slane %v13853_v7, 5  ;;  %v13930_v52 = vadd.f32 %v13760_v11, %v13702_v14  ;;  %vm17829_vm11 = vcmask 1045509  }
 0x282   :  { %v2752_v5 = vsel %vm17828_vm3, %v13751_v44, %v2586_v2  ;;  %v2758_v16 = vsel %vm17829_vm11, %v13751_v44, %v2586_v2  ;;  %vm17830_vm8 = vcmask 1046534   ;;  %v2770_v55 = vsel %vm372_vm1, %v2586_v2, %v13751_v44 }
 0x283   :  { %v2764_v3 = vsel %vm17830_vm8, %v13751_v44, %v2586_v2  ;;  %v1522_v31 = vrot.slane %v13853_v7, 6  ;;  %vm17831_vm14 = vcmask 1042432   ;;  %v2728_v29 = vsel %vm1296_vm6, %v2726_v49, %v13873_v47 }
 0x284   :  { %v13940_v22 = vsel %vm17831_vm14, %v2779_v1, %v2782_v15  ;;  %v1523_v14 = vrot.slane %v13853_v7, 7  ;;  %v1833_v11 = vmax.f32 %v1519_v42, 0.0  ;;  %v2330_v40 = vunpack.c.l.b16 %v2282_v50 }
 0x285   :  { %vm17832_vm3 = vcmask 1042433   ;;  %v2741_v46 = vsel %vm17785_vm7, %v2740_v4, %v13873_v47  ;;  %v1834_v6 = vmax.f32 %v1520_v0, 0.0  ;;  %v2391_v2 = vshrl.u32 %v13923_v43, 16 }
 0x286   :  { %v2735_v39 = vsel %vm17832_vm3, %v2734_v9, %v13873_v47  ;;  %v2393_v24 = vshll.u32 %v13923_v43, 16  ;;  %v1835_v30 = vmax.f32 %v1521_v21, 0.0  ;;  %v1524_v1 = vrot.slane %v13930_v52, 1 }
 0x287   :  { %v2480_v7 = vrot.slane %v13923_v43, 1  ;;  %vm17833_vm14 = vcmask 1044483   ;;  %v1836_v49 = vmax.f32 %v1522_v31, 0.0  ;;  %v1525_v9 = vrot.slane %v13930_v52, 2 }
 0x288   :  { %v13949_v44 = vld [vmem:[#allocation1] sm:$0xff]  ;;  %v2747_v15 = vsel %vm17833_vm14, %v2746_v60, %v13873_v47  ;;  %v2560_v42 = vrot.slane %v13923_v43, 2  ;;  %v2731_v50 = vsel %vm2647_vm4, %v2588_v23, %v13875_v63  ;;  %vm17834_vm11 = vcmask 1044484  }
 0x289   :  { %2211 = vst [vmem:[#allocation1] ss:$9 sm:$0xff] %v1833_v11  ;;  %v2736_v4 = vsel %vm17834_vm11, %v2588_v23, %v13875_v63  ;;  %v1837_v0 = vmax.f32 %v1523_v14, 0.0  ;;  %v13963_v21 = vpack.c.b16 %v2330_v40, %v2330_v40  ;;  %vm17835_vm8 = vcmask 1045509  }
 0x28a   :  { %2212 = vst [vmem:[#allocation1 + $0x1] ss:$9 sm:$0xff] %v1834_v6  ;;  %v2742_v11 = vsel %vm17835_vm8, %v2588_v23, %v13875_v63  ;;  %vm17836_vm3 = vcmask 1046534   ;;  %v1838_v31 = vmax.f32 %v13930_v52, 0.0  ;;  %v2395_v6 = vrot.slane %v2393_v24, 1 }
 0x28b   :  { %2213 = vst [vmem:[#allocation1 + $0x2] ss:$9 sm:$0xff] %v1835_v30  ;;  %v2748_v60 = vsel %vm17836_vm3, %v2588_v23, %v13875_v63  ;;  %v13970_v32 = vrot.slane %v2391_v2, 1  ;;  %v13972_v62 = vrot.slane %v2393_v24, 2  ;;  %v1839_v18 = vmax.f32 %v1524_v1, 0.0 }
 0x28c   :  { %2214 = vst [vmem:[#allocation1 + $0x3] ss:$9 sm:$0xff] %v1836_v49  ;;  %vm17837_vm14 = vcmask 1045508   ;;  %v2754_v40 = vsel %vm372_vm1, %v13875_v63, %v2588_v23  ;;  %v2759_v30 = vsel %vm17781_vm2, %v2758_v16, %v13873_v47  ;;  %v1840_v19 = vmax.f32 %v1525_v9, 0.0 }
 0x28d   :  { %2215 = vst [vmem:[#allocation1 + $0x4] ss:$9 sm:$0xff] %v1837_v0  ;;  %v2753_v14 = vsel %vm17837_vm14, %v2752_v5, %v13873_v47  ;;  %v2760_v49 = vsel %vm2642_vm5, %v2588_v23, %v13875_v63  ;;  %vm17838_vm11 = vcmask 1045504   ;;  %vm17839_vm8 = vcmask 1041409  }
 0x28e   :  { %2216 = vst [vmem:[#allocation1 + $0x5] ss:$9 sm:$0xff] %v1838_v31  ;;  %v2765_v24 = vsel %vm17838_vm11, %v13873_v47, %v2764_v3  ;;  %v2766_v1 = vsel %vm17839_vm8, %v2588_v23, %v13875_v63  ;;  %vm17840_vm3 = vcmask 1046529   ;;  %v2398_v0 = vshll.u32 %v13963_v21, 16 }
 0x28f   :  { %v2771_v5 = vsel %vm17840_vm3, %v13873_v47, %v2770_v55  ;;  %2217 = vst [vmem:[#allocation1 + $0x6] ss:$9 sm:$0xff] %v1839_v18  ;;  %vm17841_vm14 = vcmask 1042434   ;;  %vm17842_vm2 = vcmask 1042432   ;;  %v13995_v31 = vsel %vm2660_vm12, %v2735_v39, %v2736_v4 }
 0x290   :  { %v2772_v16 = vsel %vm17841_vm14, %v2588_v23, %v13875_v63  ;;  %v13992_v9 = vsel %vm17842_vm2, %v2728_v29, %v2731_v50  ;;  %2218 = vst [vmem:[#allocation1 + $0x7] ss:$9 sm:$0xff] %v1840_v19  ;;  %v2402_v3 = vshrl.u32 %v13963_v21, 16  ;;  %v2481_v28 = vrot.slane %v13963_v21, 1 }
 0x291   :  { %v2396_v51 = vor.u32 %v2395_v6, %v2391_v2  ;;  %v2514_v47 = vor.u32 %v13972_v62, %v13970_v32  ;;  %v2561_v18 = vrot.slane %v13963_v21, 2  ;;  %v14003_v55 = vsel %vm2670_vm13, %v2741_v46, %v2742_v11 }
 0x292   :  { %v14006_v63 = vsel %vm2679_vm0, %v2747_v15, %v2748_v60  ;;  %v1526_v23 = vrot.slane %v13930_v52, 3  ;;  %v14010_v19 = vsel %vm2688_vm10, %v2753_v14, %v2754_v40  ;;  %v14013_v29 = vsel %vm2696_vm9, %v2760_v49, %v2759_v30 }
 0x293   :  { %v14016_v39 = vsel %vm2704_vm15, %v2766_v1, %v2765_v24  ;;  %v1527_v62 = vrot.slane %v13930_v52, 4  ;;  %vm17843_vm2 = vcmp.ge.s32.totalorder %v13698_v36, 5  ;;  %v2400_v46 = vrot.slane %v2398_v0, 1 }
 0x294   :  { %v2259_v32 = vsel %vm17843_vm2, %v13670_v35, 0.0  ;;  %vm17844_vm11 = vcmask 1046530   ;;  %v1528_v15 = vrot.slane %v13930_v52, 5  ;;  %v2284_v50 = vpack.c.bf16 %v13673_v37, %v13673_v37 }
 0x295   :  { %v14023_v2 = vsel %vm17844_vm11, %v2772_v16, %v2771_v5  ;;  %v2482_v4 = vsel %vm372_vm1, %v2480_v7, %v2481_v28  ;;  %v2515_v11 = vrot.slane %v2402_v3, 1  ;;  %v1529_v60 = vrot.slane %v13930_v52, 6 }
 0x296   :  { %v2516_v6 = vrot.slane %v2398_v0, 2  ;;  %vm17845_vm8 = vcmask 1045504   ;;  %v1530_v40 = vrot.slane %v13930_v52, 7  ;;  %v1841_v35 = vmax.f32 %v1526_v23, 0.0 }
 0x297   :  { %v2562_v14 = vsel %vm17845_vm8, %v2560_v42, %v2561_v18  ;;  %v2283_v30 = vpack.c.bf16 %v2259_v32, %v2259_v32  ;;  %v2598_v49 = vrot.slane %v2402_v3, 7  ;;  %v2599_v24 = vrot.slane %v2481_v28, 6  ;;  %v14032_v5 = vld [vmem:[#allocation1] sm:$0xff] }
 0x298   :  { %v1842_v1 = vmax.f32 %v1527_v62, 0.0  ;;  %17846 = vst [vmem:[#allocation28_spill] sm:$0xff] %v14032_v5  ;;  %v2601_v16 = vrot.slane %v2561_v18, 4  ;;  %v2739_v37 = vrot.slane %v13995_v31, 1  ;;  %v2745_v7 = vrot.slane %v14003_v55, 2 }
 0x299   :  { %v1843_v53 = vmax.f32 %v1528_v15, 0.0  ;;  %2220 = vst [vmem:[#allocation1] ss:$9 sm:$0xff] %v1841_v35  ;;  %v2332_v48 = vunpack.c.l.b16 %v2284_v50  ;;  %v2751_v0 = vrot.slane %v14006_v63, 3  ;;  %v2757_v42 = vrot.slane %v14010_v19, 4 }
 0x29a   :  { %v1844_v52 = vmax.f32 %v1529_v60, 0.0  ;;  %2221 = vst [vmem:[#allocation1 + $0x1] ss:$9 sm:$0xff] %v1842_v1  ;;  %v2763_v3 = vrot.slane %v14013_v29, 5  ;;  %v2769_v28 = vrot.slane %v14016_v39, 6  ;;  %v2775_v23 = vrot.slane %v14023_v2, 7 }
 0x29b   :  { %v1845_v18 = vmax.f32 %v1530_v40, 0.0  ;;  %2222 = vst [vmem:[#allocation1 + $0x2] ss:$9 sm:$0xff] %v1843_v53  ;;  %v2331_v31 = vunpack.c.l.b16 %v2283_v30  ;;  %v2517_v62 = vor.u32 %v2516_v6, %v2515_v11  ;;  %v14041_v55 = vrot.slane %v2482_v4, 6 }
 0x29c   :  { %v3163_v32 = vunpack.i.h.s16 %v13992_v9  ;;  %2223 = vst [vmem:[#allocation1 + $0x3] ss:$9 sm:$0xff] %v1844_v52  ;;  %v2285_v63 = vpack.c.bf16 %v13676_v17, %v13676_v17  ;;  %v14046_v19 = vrot.slane %v2562_v14, 4  ;;  %v2600_v15 = vrot.slane %v2515_v11, 5 }
 0x29d   :  { %v2837_v29 = vsel %vm2642_vm5, %v13963_v21, %v2598_v49  ;;  %2224 = vst [vmem:[#allocation1 + $0x4] ss:$9 sm:$0xff] %v1845_v18  ;;  %v14050_v39 = vpack.c.b16 %v2332_v48, %v2331_v31  ;;  %vm17847_vm3 = vsmask.f32 7424  ;;  %v3165_v2 = vunpack.i.h.s16 %v2739_v37 }
 0x29e   :  { %v2401_v53 = vsel %vm17847_vm3, %v2396_v51, %v2400_v46  ;;  %v3167_v50 = vunpack.i.h.s16 %v2745_v7  ;;  %v3169_v60 = vunpack.i.h.s16 %v2751_v0  ;;  %v3171_v6 = vunpack.i.h.s16 %v2757_v42 }
 0x29f   :  { %v3173_v40 = vunpack.i.h.s16 %v2763_v3  ;;  %vm17848_vm14 = vsmask.f32 6400  ;;  %v2839_v11 = vsel %vm1296_vm6, %v2837_v29, %v2599_v24  ;;  %v3175_v14 = vunpack.i.h.s16 %v2769_v28 }
 0x2a0   :  { %v2518_v17 = vsel %vm17848_vm14, %v2514_v47, %v2517_v62  ;;  %v14057_v35 = vunpack.i.h.s16 %v2775_v23  ;;  %v2333_v21 = vunpack.c.l.b16 %v2285_v63  ;;  %v2842_v48 = vsel %vm2647_vm4, %v2600_v15, %v2601_v16 }
 0x2a1   :  { %v2594_v30 = vrot.slane %v2401_v53, 7  ;;  %v14060_v51 = vpack.i.b16 %v2739_v37, %v3163_v32  ;;  %v2405_v46 = vshrl.u32 %v14050_v39, 16  ;;  %v2407_v49 = vshll.u32 %v14050_v39, 16 }
 0x2a2   :  { %v14064_v1 = vpack.i.b16 %v2745_v7, %v3165_v2  ;;  %v14066_v52 = vpack.i.b16 %v2751_v0, %v3167_v50  ;;  %v2596_v47 = vrot.slane %v2518_v17, 5  ;;  %v14068_v18 = vpack.i.b16 %v2757_v42, %v3169_v60 }
 0x2a3   :  { %v14070_v24 = vpack.i.b16 %v2763_v3, %v3171_v6  ;;  %v14072_v31 = vpack.i.b16 %v2769_v28, %v3173_v40  ;;  %v2483_v16 = vrot.slane %v14050_v39, 1  ;;  %vm17849_vm2 = vcmask 1042432  }
 0x2a4   :  { %v14076_v37 = vsel %vm17849_vm2, %v2839_v11, %v2842_v48  ;;  %v14078_v62 = vpack.i.b16 %v2775_v23, %v3175_v14  ;;  %v14082_v32 = vld [vmem:[#allocation1] sm:$0xff]  ;;  %v14084_v0 = vpack.c.b16 %v2333_v21, %v2333_v21  ;;  %v2563_v42 = vrot.slane %v14050_v39, 2 }
 0x2a5   :  { %17850 = vst [vmem:[#allocation29_spill] sm:$0xff] %v14082_v32  ;;  %v2786_v3 = vsel %vm2642_vm5, %v13923_v43, %v2594_v30  ;;  %vm17851_vm11 = vcmask 1041409   ;;  %v2409_v63 = vrot.slane %v2407_v49, 1  ;;  %v14092_v23 = vrot.slane %v2405_v46, 1 }
 0x2a6   :  { %v2794_v28 = vsel %vm17851_vm11, %v13923_v43, %v2594_v30  ;;  %3434 = vst [vmem:[#allocation1] ss:$9 sm:$0xff] %v13845_v12  ;;  %vm17852_vm8 = vcmask 1042434   ;;  %v2806_v29 = vsel %vm2647_vm4, %v13923_v43, %v2594_v30  ;;  %v17853_v53 = vrot.slane %v13848_v26, 1 }
 0x2a7   :  { %v2800_v15 = vsel %vm17852_vm8, %v13923_v43, %v2594_v30  ;;  %v14100_v2 = vrot.slane %v2407_v49, 2  ;;  %v14104_v50 = vsel %vm2647_vm4, %v2596_v47, %v14046_v19  ;;  %vm17854_vm3 = vcmask 1044484  }
 0x2a8   :  { %3437 = vst [vmem:[#allocation1 + $0x1] ss:$9 sm:$0xff] %v17853_v53  ;;  %v2796_v12 = vsel %vm17854_vm3, %v2596_v47, %v14046_v19  ;;  %vm17855_vm14 = vcmask 1045509   ;;  %v17856_v6 = vrot.slane %v13856_v45, 2  ;;  %vm17857_vm2 = vcmp.ge.s32.totalorder %v13698_v36, 5  ;;  %vm17859_vm8 = vmmov %vm17854_vm3 }
 0x2a9   :  { %v2802_v60 = vsel %vm17855_vm14, %v2596_v47, %v14046_v19  ;;  %v2262_v26 = vsel %vm17857_vm2, %v13679_v61, 0.0  ;;  %vm17858_vm11 = vcmask 1046534   ;;  %v2812_v17 = vsel %vm17859_vm8, %v13923_v43, %v2594_v30  ;;  %vm17861_vm3 = vmmov %vm17855_vm14 }
 0x2aa   :  { %3440 = vst [vmem:[#allocation1 + $0x2] ss:$9 sm:$0xff] %v17856_v6  ;;  %v2808_v40 = vsel %vm17858_vm11, %v2596_v47, %v14046_v19  ;;  %v2814_v11 = vsel %vm372_vm1, %v14046_v19, %v2596_v47  ;;  %v17860_v14 = vrot.slane %v13859_v10, 3  ;;  %v2287_v45 = vpack.c.bf16 %v13682_v33, %v13682_v33  ;;  %vm17863_vm14 = vmmov %vm17858_vm11 }
 0x2ab   :  { %v2412_v21 = vshll.u32 %v14084_v0, 16  ;;  %v2484_v48 = vrot.slane %v14084_v0, 1  ;;  %v2818_v61 = vsel %vm17861_vm3, %v13923_v43, %v2594_v30  ;;  %v17862_v49 = vrot.slane %v13884_v13, 4 }
 0x2ac   :  { %3443 = vst [vmem:[#allocation1 + $0x3] ss:$9 sm:$0xff] %v17860_v14  ;;  %v2416_v53 = vshrl.u32 %v14084_v0, 16  ;;  %v2820_v6 = vsel %vm2642_vm5, %v2596_v47, %v14046_v19  ;;  %v2824_v10 = vsel %vm17863_vm14, %v13923_v43, %v2594_v30  ;;  %vm17864_vm2 = vcmask 1041409  }
 0x2ad   :  { %3446 = vst [vmem:[#allocation1 + $0x4] ss:$9 sm:$0xff] %v17862_v49  ;;  %v2826_v33 = vsel %vm17864_vm2, %v2596_v47, %v14046_v19  ;;  %v17865_v14 = vrot.slane %v13888_v34, 5  ;;  %v2286_v7 = vpack.c.bf16 %v2262_v26, %v2262_v26  ;;  %v2564_v4 = vrot.slane %v14084_v0, 2 }
 0x2ae   :  { %v2830_v13 = vsel %vm372_vm1, %v2594_v30, %v13923_v43  ;;  %vm17866_vm11 = vcmask 1042434   ;;  %v17867_v41 = vrot.slane %v13892_v25, 6  ;;  %v2410_v32 = vor.u32 %v2409_v63, %v2405_v46 }
 0x2af   :  { %3449 = vst [vmem:[#allocation1 + $0x5] ss:$9 sm:$0xff] %v17865_v14  ;;  %v2832_v49 = vsel %vm17866_vm11, %v2596_v47, %v14046_v19  ;;  %v2521_v5 = vor.u32 %v14100_v2, %v14092_v23  ;;  %v2788_v34 = vsel %vm1296_vm6, %v2786_v3, %v14041_v55  ;;  %vm17868_vm8 = vcmask 1042433  }
 0x2b0   :  { %3452 = vst [vmem:[#allocation1 + $0x6] ss:$9 sm:$0xff] %v17867_v41  ;;  %v2795_v26 = vsel %vm17868_vm8, %v2794_v28, %v14041_v55  ;;  %v17869_v14 = vrot.slane %v13896_v27, 7  ;;  %v2335_v43 = vunpack.c.l.b16 %v2287_v45  ;;  %v2414_v30 = vrot.slane %v2412_v21, 1 }
 0x2b1   :  { %v2485_v19 = vsel %vm372_vm1, %v2483_v16, %v2484_v48  ;;  %v2801_v41 = vsel %vm17785_vm7, %v2800_v15, %v14041_v55  ;;  %v14158_v25 = vrot.slane %v2416_v53, 1  ;;  %v2523_v46 = vrot.slane %v2412_v21, 2 }
 0x2b2   :  { %3455 = vst [vmem:[#allocation1 + $0x7] ss:$9 sm:$0xff] %v17869_v14  ;;  %vm17870_vm3 = vcmask 1044483   ;;  %vm17871_vm14 = vcmask 1045508   ;;  %v2334_v28 = vunpack.c.l.b16 %v2286_v7  ;;  %vm17872_vm2 = vcmask 1045504   ;;  %v12493_v7 = vld [vmem:[%s17729_s4 + $0x38] sm:$0xff] }
 0x2b3   :  { %v2807_v47 = vsel %vm17870_vm3, %v2806_v29, %v14041_v55  ;;  %v2813_v3 = vsel %vm17871_vm14, %v2812_v17, %v14041_v55  ;;  %v2565_v27 = vsel %vm17872_vm2, %v2563_v42, %v2564_v4  ;;  %v2606_v63 = vrot.slane %v2416_v53, 7  ;;  %vm17874_vm8 = vmmov %vm17872_vm2  ;;  %v12501_v42 = vld [vmem:[%s17729_s4 + $0x78] sm:$0xff]  ;;  %3906 = vmatpush.bf16.msra.mxu1 %v12493_v7  ;;  %v12491_v7 = vld [vmem:[%s17729_s4 + $0x28] sm:$0xff] }
 0x2b4   :  { %v2607_v23 = vrot.slane %v2484_v48, 6  ;;  %vm17873_vm11 = vcmask 1046533   ;;  %v2825_v15 = vsel %vm17874_vm8, %v14041_v55, %v2824_v10  ;;  %vm17875_vm7 = vcmask 1046529   ;;  %v12509_v29 = vld [vmem:[%s17729_s4 + $0xb8] sm:$0xff]  ;;  %3959 = vmatpush.bf16.msra.mxu2 %v12501_v42  ;;  %v12499_v42 = vld [vmem:[%s17729_s4 + $0x68] sm:$0xff] }
 0x2b5   :  { %v2819_v16 = vsel %vm17873_vm11, %v2818_v61, %v14041_v55  ;;  %v2831_v2 = vsel %vm17875_vm7, %v14041_v55, %v2830_v13  ;;  %v14172_v45 = vsel %vm2660_vm12, %v2795_v26, %v2796_v12  ;;  %v14183_v17 = vpack.c.b16 %v2335_v43, %v2334_v28  ;;  %4012 = vmatpush.bf16.msra.mxu3 %v12509_v29  ;;  %v12508_v28 = vld [vmem:[%s17729_s4 + $0xb0] sm:$0xff] }
 0x2b6   :  { %v14186_v21 = vsel %vm2670_vm13, %v2801_v41, %v2802_v60  ;;  %v14189_v55 = vsel %vm2679_vm0, %v2807_v47, %v2808_v40  ;;  %v14192_v12 = vsel %vm2688_vm10, %v2813_v3, %v2814_v11  ;;  %v2288_v48 = vpack.c.bf16 %v13686_v59, %v13686_v59  ;;  %v12500_v3 = vld [vmem:[%s17729_s4 + $0x70] sm:$0xff] }
 0x2b7   :  { %v2609_v61 = vrot.slane %v2564_v4, 4  ;;  %vm17876_vm7 = vsmask.f32 7424  ;;  %v2524_v10 = vor.u32 %v2523_v46, %v14158_v25  ;;  %v14198_v13 = vrot.slane %v2485_v19, 6  ;;  %v12492_v19 = vld [vmem:[%s17729_s4 + $0x30] sm:$0xff] }
 0x2b8   :  { %v2415_v53 = vsel %vm17876_vm7, %v2410_v32, %v2414_v30  ;;  %v14200_v60 = vrot.slane %v2565_v27, 4  ;;  %v14203_v40 = vsel %vm2696_vm9, %v2820_v6, %v2819_v16  ;;  %v14206_v11 = vsel %vm2704_vm15, %v2826_v33, %v2825_v15  ;;  %3907 = vmatpush.bf16.msra.mxu1 %v12492_v19  ;;  %3960 = vmatpush.bf16.msra.mxu2 %v12500_v3  ;;  %v12505_v6 = vld [vmem:[%s17729_s4 + $0x98] sm:$0xff] }
 0x2b9   :  { %v14208_v26 = vld [vmem:[#allocation1] sm:$0xff]  ;;  %v14210_v59 = vld [vmem:[#allocation1 + $0x9] sm:$0xff]  ;;  %v14212_v4 = vld [vmem:[#allocation1 + $0x12] sm:$0xff]  ;;  %v2608_v32 = vrot.slane %v14158_v25, 5  ;;  %vm17877_vm3 = vcmask 1046530   ;;  %v2421_v41 = vshll.u32 %v14183_v17, 16  ;;  %v2897_v25 = vsel %vm2642_vm5, %v14084_v0, %v2606_v63  ;;  %4013 = vmatpush.bf16.msra.mxu3 %v12508_v28 }
 0x2ba   :  { %v14216_v14 = vsel %vm17877_vm3, %v2832_v49, %v2831_v2  ;;  %v14220_v30 = vld [vmem:[#allocation1 + $0x1b] sm:$0xff]  ;;  %v14222_v33 = vld [vmem:[#allocation1 + $0x24] sm:$0xff]  ;;  %v2602_v46 = vrot.slane %v2415_v53, 7  ;;  %vm17879_vm14 = vcmask 1042432   ;;  %v17880_v47 = vpack.i.b16 %v13992_v9, %v13770_v8 }
 0x2bb   :  { %17878 = vst [vmem:[#allocation30_spill] sm:$0xff] %v14222_v33  ;;  %v14232_v49 = vsel %vm17879_vm14, %v2788_v34, %v14104_v50  ;;  %v2336_v27 = vunpack.c.l.b16 %v2288_v48  ;;  %v2419_v0 = vshrl.u32 %v14183_v17, 16  ;;  %vm17881_vm2 = vsmask.f32 6400 }
 0x2bc   :  { %3462 = vst [vmem:[#allocation1] ss:$9 sm:$0xff] %v17880_v47  ;;  %v2525_v63 = vsel %vm17881_vm2, %v2521_v5, %v2524_v10  ;;  %v2486_v15 = vrot.slane %v14183_v17, 1  ;;  %v2899_v2 = vsel %vm1296_vm6, %v2897_v25, %v2607_v23  ;;  %v2846_v48 = vsel %vm2642_vm5, %v14050_v39, %v2602_v46  ;;  %3908 = vmatpush.bf16.msra.mxu1 %v12491_v7 }
 0x2bd   :  { %3464 = vst [vmem:[#allocation1 + $0x1] ss:$9 sm:$0xff] %v14060_v51  ;;  %v2902_v51 = vsel %vm2647_vm4, %v2608_v32, %v2609_v61  ;;  %v2604_v29 = vrot.slane %v2525_v63, 5  ;;  %vm17882_vm11 = vcmask 1041409   ;;  %v14271_v61 = vpack.c.b16 %v2336_v27, %v2336_v27  ;;  %3961 = vmatpush.bf16.msra.mxu2 %v12499_v42 }
 0x2be   :  { %3466 = vst [vmem:[#allocation1 + $0x2] ss:$9 sm:$0xff] %v14064_v1  ;;  %v2423_v1 = vrot.slane %v2421_v41, 1  ;;  %v2854_v23 = vsel %vm17882_vm11, %v14050_v39, %v2602_v46  ;;  %v14275_v53 = vrot.slane %v2419_v0, 1  ;;  %vm17883_vm8 = vcmask 1042434  }
 0x2bf   :  { %3468 = vst [vmem:[#allocation1 + $0x3] ss:$9 sm:$0xff] %v14066_v52  ;;  %v12507_v52 = vld [vmem:[%s17729_s4 + $0xa8] sm:$0xff]  ;;  %v2860_v10 = vsel %vm17883_vm8, %v14050_v39, %v2602_v46  ;;  %v2866_v32 = vsel %vm2647_vm4, %v14050_v39, %v2602_v46  ;;  %vm17884_vm7 = vcmask 1044484   ;;  %vm17885_vm3 = vcmask 1045509  }
 0x2c0   :  { %3470 = vst [vmem:[#allocation1 + $0x4] ss:$9 sm:$0xff] %v14068_v18  ;;  %v14282_v18 = vrot.slane %v2421_v41, 2  ;;  %v2872_v19 = vsel %vm17884_vm7, %v14050_v39, %v2602_v46  ;;  %v2878_v25 = vsel %vm17885_vm3, %v14050_v39, %v2602_v46  ;;  %vm17886_vm14 = vcmask 1046534   ;;  %vm17889_vm8 = vmmov %vm17884_vm7  ;;  %4014 = vmatpush.bf16.msra.mxu3 %v12507_v52 }
 0x2c1   :  { %3472 = vst [vmem:[#allocation1 + $0x5] ss:$9 sm:$0xff] %v14070_v24  ;;  %v2884_v47 = vsel %vm17886_vm14, %v14050_v39, %v2602_v46  ;;  %v2890_v3 = vsel %vm372_vm1, %v2602_v46, %v14050_v39  ;;  %vm17887_vm2 = vcmask 1042432   ;;  %v14298_v41 = vsel %vm1296_vm6, %v2846_v48, %v14198_v13  ;;  %v12498_v39 = vld [vmem:[%s17729_s4 + $0x60] sm:$0xff] }
 0x2c2   :  { %3474 = vst [vmem:[#allocation1 + $0x6] ss:$9 sm:$0xff] %v14072_v31  ;;  %v14294_v24 = vsel %vm17887_vm2, %v2899_v2, %v2902_v51  ;;  %vm17888_vm11 = vcmask 1042433   ;;  %v12490_v31 = vld [vmem:[%s17729_s4 + $0x20] sm:$0xff]  ;;  %v2851_v46 = vsel %vm2647_vm4, %v2604_v29, %v14200_v60  ;;  %v2856_v27 = vsel %vm17889_vm8, %v2604_v29, %v14200_v60  ;;  %3962 = vmatpush.bf16.msra.mxu2 %v12498_v39  ;;  %v12497_v39 = vld [vmem:[%s17729_s4 + $0x58] sm:$0xff] }
 0x2c3   :  { %v2855_v28 = vsel %vm17888_vm11, %v2854_v23, %v14198_v13  ;;  %3476 = vst [vmem:[#allocation1 + $0x7] ss:$9 sm:$0xff] %v14078_v62  ;;  %vm17890_vm7 = vcmask 1043458   ;;  %v2862_v62 = vsel %vm17885_vm3, %v2604_v29, %v14200_v60  ;;  %v12506_v2 = vld [vmem:[%s17729_s4 + $0xa0] sm:$0xff]  ;;  %v2426_v51 = vshll.u32 %v14271_v61, 16  ;;  %3909 = vmatpush.bf16.msra.mxu1 %v12490_v31 }
 0x2c4   :  { %v2861_v63 = vsel %vm17890_vm7, %v2860_v10, %v14198_v13  ;;  %v2430_v7 = vshrl.u32 %v14271_v61, 16  ;;  %v2487_v42 = vrot.slane %v14271_v61, 1  ;;  %vm17891_vm14 = vcmask 1044483   ;;  %4015 = vmatpush.bf16.msra.mxu3 %v12506_v2 }
 0x2c5   :  { %v2867_v48 = vsel %vm17891_vm14, %v2866_v32, %v14198_v13  ;;  %v2567_v23 = vrot.slane %v14271_v61, 2  ;;  %vm17892_vm2 = vcmask 1046534   ;;  %vm17893_vm11 = vcmask 1045508  }
 0x2c6   :  { %v2868_v10 = vsel %vm17892_vm2, %v2604_v29, %v14200_v60  ;;  %v2873_v52 = vsel %vm17893_vm11, %v2872_v19, %v14198_v13  ;;  %v2874_v16 = vsel %vm372_vm1, %v14200_v60, %v2604_v29  ;;  %vm17894_vm8 = vcmask 1046533   ;;  %v12489_v19 = vld [vmem:[%s17729_s4 + $0x18] sm:$0xff]  ;;  %3963 = vmatpush.bf16.msra.mxu2 %v12497_v39  ;;  %v12488_v39 = vld [vmem:[%s17729_s4 + $0x10] sm:$0xff] }
 0x2c7   :  { %v2879_v34 = vsel %vm17894_vm8, %v2878_v25, %v14198_v13  ;;  %v2880_v9 = vsel %vm2642_vm5, %v2604_v29, %v14200_v60  ;;  %vm17895_vm7 = vcmask 1045504   ;;  %vm17896_vm3 = vcmask 1041409   ;;  %3910 = vmatpush.bf16.msra.mxu1 %v12489_v19 }
 0x2c8   :  { %v2885_v32 = vsel %vm17895_vm7, %v14198_v13, %v2884_v47  ;;  %v2886_v31 = vsel %vm17896_vm3, %v2604_v29, %v14200_v60  ;;  %v2424_v25 = vor.u32 %v2423_v1, %v2419_v0  ;;  %vm17897_vm14 = vcmask 1046529   ;;  %vm17901_vm8 = vmmov %vm17895_vm7  ;;  %4016 = vmatpush.bf16.msra.mxu3 %v12505_v6 }
 0x2c9   :  { %v2891_v47 = vsel %vm17897_vm14, %v14198_v13, %v2890_v3  ;;  %vm17898_vm2 = vcmask 1042434   ;;  %vm17899_vm11 = vcmp.ge.s32.totalorder %v13698_v36, 5  ;;  %v2428_v5 = vrot.slane %v2426_v51, 1 }
 0x2ca   :  { %v2892_v50 = vsel %vm17898_vm2, %v2604_v29, %v14200_v60  ;;  %v2265_v43 = vsel %vm17899_vm11, %v13693_v20, 0.0  ;;  %v2488_v0 = vsel %vm372_vm1, %v2486_v15, %v2487_v42  ;;  %v14363_v1 = vrot.slane %v2430_v7, 1  ;;  %v14373_v8 = vld [vmem:[#allocation1] sm:$0xff]  ;;  %v14375_v20 = vld [vmem:[#allocation1 + $0x9] sm:$0xff]  ;;  %v14377_v33 = vld [vmem:[#allocation1 + $0x12] sm:$0xff] }
 0x2cb   :  { %v2530_v13 = vrot.slane %v2426_v51, 2  ;;  %v17900_v60 = vrot.slane %v14183_v17, 2  ;;  %v2614_v3 = vrot.slane %v2430_v7, 7  ;;  %v14371_v2 = vsel %vm2660_vm12, %v2855_v28, %v2856_v27  ;;  %v14390_v28 = vld [vmem:[#allocation1 + $0x1b] sm:$0xff]  ;;  %v14392_v27 = vld [vmem:[#allocation1 + $0x24] sm:$0xff]  ;;  %3911 = vmatpush.bf16.msra.mxu1 %v12488_v39 }
 0x2cc   :  { %v2290_v15 = vpack.c.bf16 %v13700_v57, %v13700_v57  ;;  %v14382_v51 = vsel %vm2670_vm13, %v2861_v63, %v2862_v62  ;;  %v14385_v19 = vsel %vm2679_vm0, %v2867_v48, %v2868_v10  ;;  %v14388_v7 = vsel %vm2688_vm10, %v2873_v52, %v2874_v16  ;;  %v12496_v48 = vld [vmem:[%s17729_s4 + $0x50] sm:$0xff]  ;;  %3485 = vst [vmem:[#allocation1 + $0x1] ss:$9 sm:$0xff] %v14232_v49 }
 0x2cd   :  { %v14368_v29 = vsel %vm17901_vm8, %v17900_v60, %v2567_v23  ;;  %v2289_v60 = vpack.c.bf16 %v2265_v43, %v2265_v43  ;;  %v2291_v57 = vpack.c.bf16 %v13714_v38, %v13714_v38  ;;  %v2615_v63 = vrot.slane %v2487_v42, 6  ;;  %v12504_v43 = vld [vmem:[%s17729_s4 + $0x90] sm:$0xff]  ;;  %3964 = vmatpush.bf16.msra.mxu2 %v12496_v48 }
 0x2ce   :  { %v14400_v62 = vsel %vm2696_vm9, %v2880_v9, %v2879_v34  ;;  %v17902_v16 = vpack.i.b16 %v13940_v22, %v14057_v35  ;;  %v2617_v10 = vrot.slane %v2567_v23, 4  ;;  %vm17903_vm7 = vcmask 1042432   ;;  %4017 = vmatpush.bf16.msra.mxu3 %v12504_v43 }
 0x2cf   :  { %v14413_v38 = vsel %vm17903_vm7, %v14298_v41, %v2851_v46  ;;  %v14416_v9 = vsel %vm2704_vm15, %v2886_v31, %v2885_v32  ;;  %vm17904_vm3 = vcmask 1046530   ;;  %v2531_v35 = vor.u32 %v2530_v13, %v14363_v1  ;;  %v12487_v32 = vld [vmem:[%s17729_s4 + $0x8] sm:$0xff] }
 0x2d0   :  { %3483 = vst [vmem:[#allocation1] ss:$9 sm:$0xff] %v17902_v16  ;;  %v14419_v22 = vsel %vm17904_vm3, %v2892_v50, %v2891_v47  ;;  %v2859_v6 = vrot.slane %v14371_v2, 1  ;;  %v2865_v34 = vrot.slane %v14382_v51, 2  ;;  %v2871_v42 = vrot.slane %v14385_v19, 3  ;;  %3912 = vmatpush.bf16.msra.mxu1 %v12487_v32 }
 0x2d1   :  { %v17905_v41 = vrot.slane %v14172_v45, 1  ;;  %v2338_v46 = vunpack.c.l.b16 %v2290_v15  ;;  %vm17906_vm14 = vsmask.f32 7424  ;;  %v2877_v50 = vrot.slane %v14388_v7, 4  ;;  %v12495_v45 = vld [vmem:[%s17729_s4 + $0x48] sm:$0xff] }
 0x2d2   :  { %v2429_v23 = vsel %vm17906_vm14, %v2424_v25, %v2428_v5  ;;  %v2883_v49 = vrot.slane %v14400_v62, 5  ;;  %v17907_v52 = vrot.slane %v14186_v21, 2  ;;  %v2337_v31 = vunpack.c.l.b16 %v2289_v60  ;;  %v12503_v21 = vld [vmem:[%s17729_s4 + $0x88] sm:$0xff]  ;;  %3965 = vmatpush.bf16.msra.mxu2 %v12495_v45 }
 0x2d3   :  { %3487 = vst [vmem:[#allocation1 + $0x2] ss:$9 sm:$0xff] %v17905_v41  ;;  %v2339_v47 = vunpack.c.l.b16 %v2291_v57  ;;  %v14439_v13 = vrot.slane %v2488_v0, 6  ;;  %v2889_v5 = vrot.slane %v14416_v9, 6  ;;  %v17908_v25 = vrot.slane %v14189_v55, 3  ;;  %4018 = vmatpush.bf16.msra.mxu3 %v12503_v21 }
 0x2d4   :  { %3489 = vst [vmem:[#allocation1 + $0x3] ss:$9 sm:$0xff] %v17907_v52  ;;  %v2616_v2 = vrot.slane %v14363_v1, 5  ;;  %v2957_v15 = vsel %vm2642_vm5, %v14271_v61, %v2614_v3  ;;  %v2895_v51 = vrot.slane %v14419_v22, 7  ;;  %v3197_v0 = vunpack.i.h.s16 %v14413_v38 }
 0x2d5   :  { %3491 = vst [vmem:[#allocation1 + $0x4] ss:$9 sm:$0xff] %v17908_v25  ;;  %v17909_v19 = vrot.slane %v14192_v12, 4  ;;  %v17910_v55 = vor.u32 %v14282_v18, %v14275_v53  ;;  %vm17911_vm2 = vsmask.f32 6400  ;;  %v14458_v39 = vrot.slane %v2429_v23, 7 }
 0x2d6   :  { %v3199_v60 = vunpack.i.h.s16 %v2859_v6  ;;  %v3201_v1 = vunpack.i.h.s16 %v2865_v34  ;;  %v17912_v57 = vrot.slane %v14203_v40, 5  ;;  %v14462_v61 = vpack.c.b16 %v2338_v46, %v2337_v31  ;;  %v12486_v53 = vld [vmem:[%s17729_s4] sm:$0xff] }
 0x2d7   :  { %3493 = vst [vmem:[#allocation1 + $0x5] ss:$9 sm:$0xff] %v17909_v19  ;;  %v2532_v7 = vsel %vm17911_vm2, %v17910_v55, %v2531_v35  ;;  %v3203_v3 = vunpack.i.h.s16 %v2871_v42  ;;  %v3205_v62 = vunpack.i.h.s16 %v2877_v50  ;;  %v3207_v12 = vunpack.i.h.s16 %v2883_v49  ;;  %v12494_v18 = vld [vmem:[%s17729_s4 + $0x40] sm:$0xff]  ;;  %3913 = vmatpush.bf16.msra.mxu1 %v12486_v53 }
 0x2d8   :  { %3495 = vst [vmem:[#allocation1 + $0x6] ss:$9 sm:$0xff] %v17912_v57  ;;  %v17913_v16 = vrot.slane %v14206_v11, 6  ;;  %v14472_v48 = vpack.c.b16 %v2339_v47, %v2339_v47  ;;  %v14475_v40 = vrot.slane %v14368_v29, 4  ;;  %v3209_v43 = vunpack.i.h.s16 %v2889_v5  ;;  %v12502_v11 = vld [vmem:[%s17729_s4 + $0x80] sm:$0xff]  ;;  %3966 = vmatpush.bf16.msra.mxu2 %v12494_v18 }
 0x2d9   :  { %v10873_v9 = vpack.i.b16 %v14413_v38, %v14076_v37  ;;  %v14483_v22 = vsel %vm1296_vm6, %v2957_v15, %v2615_v63  ;;  %v14486_v35 = vsel %vm2647_vm4, %v2616_v2, %v2617_v10  ;;  %v14488_v41 = vrot.slane %v2532_v7, 5  ;;  %4019 = vmatpush.bf16.msra.mxu3 %v12502_v11 }
 0x2da   :  { %3497 = vst [vmem:[#allocation1 + $0x7] ss:$9 sm:$0xff] %v17913_v16  ;;  %v14490_v46 = vunpack.i.h.s16 %v2895_v51  ;;  %vm17914_vm11 = vcmask 1041409   ;;  %v10874_v29 = vpack.i.b16 %v2859_v6, %v3197_v0  ;;  %v10875_v38 = vpack.i.b16 %v2865_v34, %v3199_v60  ;;  %3914 = vmatmul.bf16.vlgmr.msra.gmra.mxu1 %v14208_v26 }
 0x2db   :  { %v2914_v37 = vsel %vm17914_vm11, %v14183_v17, %v14458_v39  ;;  %v10876_v23 = vpack.i.b16 %v2871_v42, %v3201_v1  ;;  %v2435_v52 = vshll.u32 %v14462_v61, 16  ;;  %v10877_v63 = vpack.i.b16 %v2877_v50, %v3203_v3  ;;  %3967 = vmatmul.bf16.vlgmr.msra.gmra.mxu2 %v14210_v59 }
 0x2dc   :  { %v10878_v32 = vpack.i.b16 %v2883_v49, %v3205_v62  ;;  %v14496_v45 = vpack.i.b16 %v2889_v5, %v3207_v12  ;;  %v2440_v10 = vshll.u32 %v14472_v48, 16  ;;  %v2444_v31 = vshrl.u32 %v14472_v48, 16  ;;  %4020 = vmatmul.bf16.vlgmr.msra.gmra.mxu3 %v14212_v4 }
 0x2dd   :  { %v2906_v47 = vsel %vm2642_vm5, %v14183_v17, %v14458_v39  ;;  %v14503_v25 = vpack.i.b16 %v2895_v51, %v3209_v43  ;;  %vm17915_vm8 = vcmask 1042433   ;;  %vm17916_vm7 = vcmask 1044484  }
 0x2de   :  { %v2915_v6 = vsel %vm17915_vm8, %v2914_v37, %v14439_v13  ;;  %v2916_v34 = vsel %vm17916_vm7, %v14488_v41, %v14475_v40  ;;  %vm17917_vm3 = vcmask 1042434   ;;  %v10881_v50 = vpack.i.b16 %v14294_v24, %v14490_v46  ;;  %vm17918_vm14 = vmmov %vm17916_vm7 }
 0x2df   :  { %v2920_v42 = vsel %vm17917_vm3, %v14183_v17, %v14458_v39  ;;  %v2433_v49 = vshrl.u32 %v14462_v61, 16  ;;  %v2489_v26 = vrot.slane %v14462_v61, 1  ;;  %v2569_v5 = vrot.slane %v14462_v61, 2 }
 0x2e0   :  { %v2926_v21 = vsel %vm2647_vm4, %v14183_v17, %v14458_v39  ;;  %v2437_v0 = vrot.slane %v2435_v52, 1  ;;  %v2908_v59 = vsel %vm1296_vm6, %v2906_v47, %v14439_v13  ;;  %v2911_v19 = vsel %vm2647_vm4, %v14488_v41, %v14475_v40 }
 0x2e1   :  { %v14523_v2 = vld [vmem:[#allocation1] sm:$0xff]  ;;  %v14525_v15 = vld [vmem:[#allocation1 + $0x9] sm:$0xff]  ;;  %v14527_v51 = vld [vmem:[#allocation1 + $0x12] sm:$0xff]  ;;  %v2932_v55 = vsel %vm17918_vm14, %v14183_v17, %v14458_v39  ;;  %v14544_v1 = vrot.slane %v2444_v31, 1  ;;  %v2537_v57 = vrot.slane %v2440_v10, 2  ;;  %v14547_v3 = vsel %vm2660_vm12, %v2915_v6, %v2916_v34 }
 0x2e2   :  { %v14537_v7 = vld [vmem:[#allocation1 + $0x1b] sm:$0xff]  ;;  %v14539_v60 = vld [vmem:[#allocation1 + $0x24] sm:$0xff]  ;;  %vm17919_vm2 = vcmask 1043458   ;;  %v17920_v12 = vrot.slane %v14216_v14, 7  ;;  %v2442_v16 = vrot.slane %v2440_v10, 1  ;;  %vm17921_vm11 = vcmask 1045509  }
 0x2e3   :  { %v2921_v62 = vsel %vm17919_vm2, %v2920_v42, %v14439_v13  ;;  %v2922_v53 = vsel %vm17921_vm11, %v14488_v41, %v14475_v40  ;;  %vm17922_vm8 = vcmask 1044483   ;;  %vm17923_vm7 = vcmask 1046534   ;;  %3506 = vst [vmem:[#allocation1 + $0x1] ss:$9 sm:$0xff] %v10873_v9  ;;  %vm17926_vm2 = vmmov %vm17921_vm11 }
 0x2e4   :  { %3504 = vst [vmem:[#allocation1] ss:$9 sm:$0xff] %v17920_v12  ;;  %v2927_v4 = vsel %vm17922_vm8, %v2926_v21, %v14439_v13  ;;  %v2928_v18 = vsel %vm17923_vm7, %v14488_v41, %v14475_v40  ;;  %v2533_v43 = vrot.slane %v2433_v49, 1  ;;  %v2534_v11 = vrot.slane %v2435_v52, 2  ;;  %vm17927_vm11 = vmmov %vm17923_vm7 }
 0x2e5   :  { %vm17924_vm3 = vcmask 1045508   ;;  %v2934_v14 = vsel %vm372_vm1, %v14475_v40, %v14488_v41  ;;  %3508 = vst [vmem:[#allocation1 + $0x2] ss:$9 sm:$0xff] %v10874_v29  ;;  %v2438_v10 = vor.u32 %v2437_v0, %v2433_v49  ;;  %vm17925_vm14 = vcmask 1042432  }
 0x2e6   :  { %v2933_v37 = vsel %vm17924_vm3, %v2932_v55, %v14439_v13  ;;  %v14567_v47 = vsel %vm17925_vm14, %v2908_v59, %v2911_v19  ;;  %v2919_v6 = vrot.slane %v14547_v3, 1  ;;  %v2938_v9 = vsel %vm17926_vm2, %v14183_v17, %v14458_v39  ;;  %3510 = vst [vmem:[#allocation1 + $0x3] ss:$9 sm:$0xff] %v10875_v38 }
 0x2e7   :  { %v2538_v52 = vor.u32 %v2537_v57, %v14544_v1  ;;  %v14575_v34 = vsel %vm2670_vm13, %v2921_v62, %v2922_v53  ;;  %v14578_v42 = vsel %vm2679_vm0, %v2927_v4, %v2928_v18  ;;  %v2944_v29 = vsel %vm17927_vm11, %v14183_v17, %v14458_v39  ;;  %3512 = vst [vmem:[#allocation1 + $0x4] ss:$9 sm:$0xff] %v10876_v23 }
 0x2e8   :  { %v2490_v49 = vrot.slane %v14472_v48, 1  ;;  %vm17928_vm8 = vsmask.f32 7424  ;;  %v14586_v0 = vsel %vm2688_vm10, %v2933_v37, %v2934_v14  ;;  %v2950_v38 = vsel %vm372_vm1, %v14458_v39, %v14183_v17  ;;  %3514 = vst [vmem:[#allocation1 + $0x5] ss:$9 sm:$0xff] %v10877_v63 }
 0x2e9   :  { %v2443_v21 = vsel %vm17928_vm8, %v2438_v10, %v2442_v16  ;;  %v2570_v59 = vrot.slane %v14472_v48, 2  ;;  %v2535_v19 = vor.u32 %v2534_v11, %v2533_v43  ;;  %vm17929_vm7 = vcmask 1046533   ;;  %3516 = vst [vmem:[#allocation1 + $0x6] ss:$9 sm:$0xff] %v10878_v32 }
 0x2ea   :  { %v2939_v55 = vsel %vm17929_vm7, %v2938_v9, %v14439_v13  ;;  %v2940_v23 = vsel %vm2642_vm5, %v14488_v41, %v14475_v40  ;;  %v2925_v57 = vrot.slane %v14575_v34, 2  ;;  %v2931_v62 = vrot.slane %v14578_v42, 3  ;;  %3518 = vst [vmem:[#allocation1 + $0x7] ss:$9 sm:$0xff] %v14496_v45  ;;  %3919 = vmatmul.bf16.gmra.mxu1 %v14373_v8 }
 0x2eb   :  { %vm17930_vm3 = vcmask 1045504   ;;  %vm17931_vm14 = vcmask 1041409   ;;  %vm17932_vm2 = vsmask.f32 6400  ;;  %v14606_v63 = vrot.slane %v2443_v21, 7  ;;  %3972 = vmatmul.bf16.gmra.mxu2 %v14375_v20 }
 0x2ec   :  { %v2945_v12 = vsel %vm17930_vm3, %v14439_v13, %v2944_v29  ;;  %v2946_v17 = vsel %vm17931_vm14, %v14488_v41, %v14475_v40  ;;  %v2539_v39 = vsel %vm17932_vm2, %v2535_v19, %v2538_v52  ;;  %vm17933_vm11 = vcmask 1046529   ;;  %4025 = vmatmul.bf16.gmra.mxu3 %v14377_v33 }
 0x2ed   :  { %v2951_v32 = vsel %vm17933_vm11, %v14439_v13, %v2950_v38  ;;  %vm17934_vm8 = vcmask 1042434   ;;  %vm17935_vm7 = vcmp.ge.s32.totalorder %v13698_v36, 5  ;;  %v2491_v4 = vsel %vm372_vm1, %v2489_v26, %v2490_v49 }
 0x2ee   :  { %v2952_v16 = vsel %vm17934_vm8, %v14488_v41, %v14475_v40  ;;  %v2268_v53 = vsel %vm17935_vm7, %v13736_v58, 0.0  ;;  %v2937_v18 = vrot.slane %v14586_v0, 4  ;;  %v14619_v45 = vsel %vm2696_vm9, %v2940_v23, %v2939_v55 }
 0x2ef   :  { %v2571_v43 = vsel %vm17930_vm3, %v2569_v5, %v2570_v59  ;;  %v2622_v13 = vrot.slane %v2444_v31, 7  ;;  %v2623_v11 = vrot.slane %v2490_v49, 6  ;;  %v14625_v37 = vsel %vm2704_vm15, %v2946_v17, %v2945_v12 }
 0x2f0   :  { %v2293_v40 = vpack.c.bf16 %v13793_v56, %v13793_v56  ;;  %v14629_v58 = vrot.slane %v2570_v59, 4  ;;  %v14631_v41 = vrot.slane %v2539_v39, 5  ;;  %vm17936_vm14 = vcmask 1046530  }
 0x2f1   :  { %v14634_v26 = vsel %vm17936_vm14, %v2952_v16, %v2951_v32  ;;  %v2292_v14 = vpack.c.bf16 %v2268_v53, %v2268_v53  ;;  %v2294_v5 = vpack.c.bf16 %v13865_v54, %v13865_v54  ;;  %v2943_v31 = vrot.slane %v14619_v45, 5  ;;  %v14659_v38 = vld [vmem:[#allocation1] sm:$0xff]  ;;  %v14661_v59 = vld [vmem:[#allocation1 + $0x9] sm:$0xff] }
 0x2f2   :  { %vm17937_vm2 = vcmask 1041409   ;;  %v2619_v56 = vrot.slane %v2491_v4, 6  ;;  %v2621_v9 = vrot.slane %v2571_v43, 4  ;;  %v2949_v52 = vrot.slane %v14625_v37, 6  ;;  %v14671_v23 = vld [vmem:[#allocation1 + $0x1b] sm:$0xff]  ;;  %v14673_v12 = vld [vmem:[#allocation1 + $0x24] sm:$0xff] }
 0x2f3   :  { %v2974_v10 = vsel %vm17937_vm2, %v14462_v61, %v14606_v63  ;;  %vm17938_vm11 = vcmask 1042432   ;;  %v2955_v54 = vrot.slane %v14634_v26, 7  ;;  %v2966_v49 = vsel %vm2642_vm5, %v14462_v61, %v14606_v63 }
 0x2f4   :  { %v14647_v29 = vsel %vm17938_vm11, %v14483_v22, %v14486_v35  ;;  %v2980_v8 = vsel %vm17934_vm8, %v14462_v61, %v14606_v63  ;;  %v3017_v21 = vsel %vm2642_vm5, %v14472_v48, %v2622_v13  ;;  %v14663_v22 = vld [vmem:[#allocation1 + $0x12] sm:$0xff]  ;;  %v2341_v20 = vunpack.c.l.b16 %v2293_v40 }
 0x2f5   :  { %vm17939_vm7 = vcmask 1042433   ;;  %vm17940_vm3 = vcmask 1044484   ;;  %v2986_v55 = vsel %vm2647_vm4, %v14462_v61, %v14606_v63  ;;  %v2340_v48 = vunpack.c.l.b16 %v2292_v14  ;;  %3525 = vst [vmem:[#allocation1] ss:$9 sm:$0xff] %v14503_v25 }
 0x2f6   :  { %v2975_v35 = vsel %vm17939_vm7, %v2974_v10, %v2619_v56  ;;  %v2976_v19 = vsel %vm17940_vm3, %v14631_v41, %v2621_v9  ;;  %v2342_v17 = vunpack.c.l.b16 %v2294_v5  ;;  %v2624_v39 = vrot.slane %v14544_v1, 5  ;;  %vm17941_vm14 = vmmov %vm17940_vm3  ;;  %3527 = vst [vmem:[#allocation1 + $0x1] ss:$9 sm:$0xff] %v10881_v50  ;;  %v17950_v10 = vld [vmem:[#allocation28_spill] sm:$0xff] }
 0x2f7   :  { %v2992_v32 = vsel %vm17941_vm14, %v14462_v61, %v14606_v63  ;;  %v2968_v16 = vsel %vm1296_vm6, %v2966_v49, %v2619_v56  ;;  %vm17942_vm2 = vcmask 1043458   ;;  %vm17943_vm11 = vcmask 1045509   ;;  %3529 = vst [vmem:[#allocation1 + $0x2] ss:$9 sm:$0xff] %v14567_v47 }
 0x2f8   :  { %v2981_v53 = vsel %vm17942_vm2, %v2980_v8, %v2619_v56  ;;  %v2982_v4 = vsel %vm17943_vm11, %v14631_v41, %v2621_v9  ;;  %v14686_v45 = vsel %vm1296_vm6, %v3017_v21, %v2623_v11  ;;  %v2971_v33 = vsel %vm2647_vm4, %v14631_v41, %v2621_v9  ;;  %vm17947_vm14 = vmmov %vm17943_vm11  ;;  %3531 = vst [vmem:[#allocation1 + $0x3] ss:$9 sm:$0xff] %v2919_v6  ;;  %v17951_v8 = vld [vmem:[#allocation29_spill] sm:$0xff] }
 0x2f9   :  { %v14694_v43 = vsel %vm2660_vm12, %v2975_v35, %v2976_v19  ;;  %vm17944_vm8 = vcmask 1044483   ;;  %vm17945_vm7 = vcmask 1046534   ;;  %v14700_v40 = vpack.c.b16 %v2341_v20, %v2340_v48  ;;  %3533 = vst [vmem:[#allocation1 + $0x4] ss:$9 sm:$0xff] %v2925_v57 }
 0x2fa   :  { %v2987_v25 = vsel %vm17944_vm8, %v2986_v55, %v2619_v56  ;;  %v2988_v13 = vsel %vm17945_vm7, %v14631_v41, %v2621_v9  ;;  %vm17946_vm3 = vcmask 1045508   ;;  %v2994_v24 = vsel %vm372_vm1, %v2621_v9, %v14631_v41  ;;  %vm17949_vm11 = vmmov %vm17945_vm7  ;;  %3535 = vst [vmem:[#allocation1 + $0x5] ss:$9 sm:$0xff] %v2931_v62  ;;  %3924 = vmatmul.bf16.gmra.mxu1 %v14523_v2 }
 0x2fb   :  { %v2993_v11 = vsel %vm17946_vm3, %v2992_v32, %v2619_v56  ;;  %v2998_v46 = vsel %vm17947_vm14, %v14462_v61, %v14606_v63  ;;  %vm17948_vm2 = vcmp.ge.s32.totalorder %v13698_v36, 5  ;;  %v14713_v14 = vpack.c.b16 %v2342_v17, %v2342_v17  ;;  %3537 = vst [vmem:[#allocation1 + $0x6] ss:$9 sm:$0xff] %v2937_v18  ;;  %3977 = vmatmul.bf16.gmra.mxu2 %v14525_v15 }
 0x2fc   :  { %v2271_v50 = vsel %vm17948_vm2, %v13949_v44, 0.0  ;;  %v14716_v47 = vsel %vm2670_vm13, %v2981_v53, %v2982_v4  ;;  %v3004_v5 = vsel %vm17949_vm11, %v14462_v61, %v14606_v63  ;;  %v2296_v3 = vpack.c.bf16 %v17950_v10, %v17950_v10  ;;  %3539 = vst [vmem:[#allocation1 + $0x7] ss:$9 sm:$0xff] %v2943_v31  ;;  %4030 = vmatmul.bf16.gmra.mxu3 %v14527_v51 }
 0x2fd   :  { %v2979_v6 = vrot.slane %v14694_v43, 1  ;;  %v14727_v49 = vsel %vm2679_vm0, %v2987_v25, %v2988_v13  ;;  %v3010_v44 = vsel %vm372_vm1, %v14606_v63, %v14462_v61  ;;  %v2297_v21 = vpack.c.bf16 %v17951_v8, %v17951_v8 }
 0x2fe   :  { %v14737_v34 = vsel %vm2688_vm10, %v2993_v11, %v2994_v24  ;;  %vm17952_vm8 = vcmask 1046533   ;;  %v3000_v20 = vsel %vm2642_vm5, %v14631_v41, %v2621_v9  ;;  %v2295_v35 = vpack.c.bf16 %v2271_v50, %v2271_v50 }
 0x2ff   :  { %v2999_v57 = vsel %vm17952_vm8, %v2998_v46, %v2619_v56  ;;  %v2449_v61 = vshll.u32 %v14700_v40, 16  ;;  %vm17953_vm7 = vcmask 1045504   ;;  %vm17954_vm3 = vcmask 1041409  }
 0x300   :  { %v3005_v42 = vsel %vm17953_vm7, %v2619_v56, %v3004_v5  ;;  %v3006_v62 = vsel %vm17954_vm3, %v14631_v41, %v2621_v9  ;;  %v2454_v63 = vshll.u32 %v14713_v14, 16  ;;  %v2458_v19 = vshrl.u32 %v14713_v14, 16 }
 0x301   :  { %vm17955_vm14 = vcmask 1046529   ;;  %vm17956_vm2 = vcmask 1042434   ;;  %v2344_v0 = vunpack.c.l.b16 %v2296_v3  ;;  %v2447_v18 = vshrl.u32 %v14700_v40, 16 }
 0x302   :  { %v3011_v55 = vsel %vm17955_vm14, %v2619_v56, %v3010_v44  ;;  %v3012_v48 = vsel %vm17956_vm2, %v14631_v41, %v2621_v9  ;;  %vm17957_vm11 = vcmask 1042432   ;;  %v2985_v32 = vrot.slane %v14716_v47, 2 }
 0x303   :  { %v2972_v17 = vsel %vm17957_vm11, %v2968_v16, %v2971_v33  ;;  %v2345_v53 = vunpack.c.l.b16 %v2297_v21  ;;  %v2991_v4 = vrot.slane %v14727_v49, 3  ;;  %v2997_v31 = vrot.slane %v14737_v34, 4  ;;  %v14780_v44 = vld [vmem:[#allocation1] sm:$0xff]  ;;  %v14782_v2 = vld [vmem:[#allocation1 + $0x9] sm:$0xff]  ;;  %v14784_v8 = vld [vmem:[#allocation1 + $0x12] sm:$0xff] }
 0x304   :  { %v3001_v43 = vsel %vm2696_vm9, %v3000_v20, %v2999_v57  ;;  %v2343_v25 = vunpack.c.l.b16 %v2295_v35  ;;  %v2451_v13 = vrot.slane %v2449_v61, 1  ;;  %v14760_v56 = vsel %vm2704_vm15, %v3006_v62, %v3005_v42  ;;  %v14787_v20 = vld [vmem:[#allocation1 + $0x1b] sm:$0xff]  ;;  %v14789_v35 = vld [vmem:[#allocation1 + $0x24] sm:$0xff]  ;;  %vm17962_vm2 = vmmov %vm17957_vm11 }
 0x305   :  { %vm17958_vm8 = vcmask 1046530   ;;  %v14767_v9 = vrot.slane %v2458_v19, 1  ;;  %v2544_v16 = vrot.slane %v2454_v63, 2  ;;  %v3231_v33 = vunpack.i.h.s16 %v2972_v17  ;;  %3546 = vst [vmem:[#allocation1] ss:$9 sm:$0xff] %v2949_v52 }
 0x306   :  { %v14763_v41 = vsel %vm17958_vm8, %v3012_v48, %v3011_v55  ;;  %v3233_v11 = vunpack.i.h.s16 %v2979_v6  ;;  %v14770_v24 = vpack.c.b16 %v2344_v0, %v2343_v25  ;;  %v2456_v46 = vrot.slane %v2454_v63, 1  ;;  %3548 = vst [vmem:[#allocation1 + $0x1] ss:$9 sm:$0xff] %v2955_v54 }
 0x307   :  { %v2540_v50 = vrot.slane %v2447_v18, 1  ;;  %v2541_v47 = vrot.slane %v2449_v61, 2  ;;  %v14773_v5 = vpack.c.b16 %v2345_v53, %v2345_v53  ;;  %v3003_v10 = vrot.slane %v3001_v43, 5 }
 0x308   :  { %v3009_v3 = vrot.slane %v14760_v56, 6  ;;  %v3022_v49 = vsel %vm2647_vm4, %v2624_v39, %v14629_v58  ;;  %v2452_v21 = vor.u32 %v2451_v13, %v2447_v18  ;;  %v3015_v34 = vrot.slane %v14763_v41, 7 }
 0x309   :  { %v3235_v15 = vunpack.i.h.s16 %v2985_v32  ;;  %v3237_v57 = vunpack.i.h.s16 %v2991_v4  ;;  %v2545_v1 = vor.u32 %v2544_v16, %v14767_v9  ;;  %v3239_v58 = vunpack.i.h.s16 %v2997_v31 }
 0x30a   :  { %v10882_v39 = vpack.i.b16 %v2972_v17, %v14647_v29  ;;  %v10883_v61 = vpack.i.b16 %v2979_v6, %v3231_v33  ;;  %vm17959_vm7 = vsmask.f32 7424  ;;  %v2463_v62 = vshll.u32 %v14770_v24, 16  ;;  %3929 = vmatmul.bf16.gmra.mxu1 %v14659_v38 }
 0x30b   :  { %v2457_v42 = vsel %vm17959_vm7, %v2452_v21, %v2456_v46  ;;  %v2542_v63 = vor.u32 %v2541_v47, %v2540_v50  ;;  %v10884_v55 = vpack.i.b16 %v2985_v32, %v3233_v11  ;;  %v2468_v51 = vshll.u32 %v14773_v5, 16  ;;  %3982 = vmatmul.bf16.gmra.mxu2 %v14661_v59 }
 0x30c   :  { %v2472_v48 = vshrl.u32 %v14773_v5, 16  ;;  %v2493_v0 = vrot.slane %v14713_v14, 1  ;;  %v2573_v29 = vrot.slane %v14713_v14, 2  ;;  %3550 = vst [vmem:[#allocation1 + $0x2] ss:$9 sm:$0xff] %v10882_v39  ;;  %v2492_v37 = vrot.slane %v14700_v40, 1  ;;  %4035 = vmatmul.bf16.gmra.mxu3 %v14663_v22 }
 0x30d   :  { %v3241_v52 = vunpack.i.h.s16 %v3003_v10  ;;  %v10885_v6 = vpack.i.b16 %v2991_v4, %v3235_v15  ;;  %v10886_v18 = vpack.i.b16 %v2997_v31, %v3237_v57  ;;  %3552 = vst [vmem:[#allocation1 + $0x3] ss:$9 sm:$0xff] %v10883_v61  ;;  %v2461_v17 = vshrl.u32 %v14770_v24, 16 }
 0x30e   :  { %vm17960_vm3 = vsmask.f32 6400  ;;  %v2572_v54 = vrot.slane %v14700_v40, 2  ;;  %v14808_v32 = vrot.slane %v2457_v42, 7  ;;  %3554 = vst [vmem:[#allocation1 + $0x4] ss:$9 sm:$0xff] %v10884_v55  ;;  %v3243_v43 = vunpack.i.h.s16 %v3009_v3 }
 0x30f   :  { %v2546_v26 = vsel %vm17960_vm3, %v2542_v63, %v2545_v1  ;;  %v2465_v53 = vrot.slane %v2463_v62, 1  ;;  %v14810_v25 = vunpack.i.h.s16 %v3015_v34  ;;  %v10887_v13 = vpack.i.b16 %v3003_v10, %v3239_v58  ;;  %3556 = vst [vmem:[#allocation1 + $0x5] ss:$9 sm:$0xff] %v10885_v6 }
 0x310   :  { %v2494_v4 = vsel %vm372_vm1, %v2492_v37, %v2493_v0  ;;  %v14817_v31 = vrot.slane %v2472_v48, 1  ;;  %v2551_v56 = vrot.slane %v2468_v51, 2  ;;  %vm17961_vm14 = vcmask 1045504   ;;  %3558 = vst [vmem:[#allocation1 + $0x6] ss:$9 sm:$0xff] %v10886_v18 }
 0x311   :  { %v2574_v41 = vsel %vm17961_vm14, %v2572_v54, %v2573_v29  ;;  %v2470_v16 = vrot.slane %v2468_v51, 1  ;;  %v14822_v33 = vrot.slane %v2546_v26, 5  ;;  %v3023_v11 = vsel %vm17962_vm2, %v14686_v45, %v3022_v49  ;;  %3560 = vst [vmem:[#allocation1 + $0x7] ss:$9 sm:$0xff] %v10887_v13 }
 0x312   :  { %v10888_v46 = vpack.i.b16 %v3009_v3, %v3241_v52  ;;  %v2547_v50 = vrot.slane %v2461_v17, 1  ;;  %v2548_v47 = vrot.slane %v2463_v62, 2  ;;  %v3026_v10 = vsel %vm2642_vm5, %v14700_v40, %v14808_v32 }
 0x313   :  { %vm17963_vm11 = vcmask 1041409   ;;  %v2466_v15 = vor.u32 %v2465_v53, %v2461_v17  ;;  %v14832_v57 = vrot.slane %v2494_v4, 6  ;;  %v14834_v1 = vrot.slane %v2574_v41, 4 }
 0x314   :  { %v3034_v21 = vsel %vm17963_vm11, %v14700_v40, %v14808_v32  ;;  %v10889_v58 = vpack.i.b16 %v3015_v34, %v3243_v43  ;;  %v2552_v45 = vor.u32 %v2551_v56, %v14817_v31  ;;  %vm17964_vm8 = vcmask 1042434  }
 0x315   :  { %v3040_v3 = vsel %vm17964_vm8, %v14700_v40, %v14808_v32  ;;  %v3046_v49 = vsel %vm2647_vm4, %v14700_v40, %v14808_v32  ;;  %v10890_v39 = vpack.i.b16 %v3023_v11, %v14810_v25  ;;  %v2471_v61 = vsel %vm17959_vm7, %v2466_v15, %v2470_v16 }
 0x316   :  { %v3028_v42 = vsel %vm1296_vm6, %v3026_v10, %v14832_v57  ;;  %vm17965_vm3 = vcmask 1042433   ;;  %vm17966_vm14 = vcmask 1044484   ;;  %v2496_v63 = vrot.slane %v14773_v5, 1 }
 0x317   :  { %v3035_v34 = vsel %vm17965_vm3, %v3034_v21, %v14832_v57  ;;  %v3036_v62 = vsel %vm17966_vm14, %v14822_v33, %v14834_v1  ;;  %v2549_v55 = vor.u32 %v2548_v47, %v2547_v50  ;;  %v2576_v51 = vrot.slane %v14773_v5, 2  ;;  %vm17967_vm2 = vmmov %vm17966_vm14 }
 0x318   :  { %v3052_v37 = vsel %vm17967_vm2, %v14700_v40, %v14808_v32  ;;  %vm17968_vm11 = vcmask 1043458   ;;  %vm17969_vm8 = vcmask 1045509   ;;  %vm17970_vm7 = vcmask 1044483   ;;  %v14874_v43 = vld [vmem:[#allocation1] sm:$0xff]  ;;  %v14876_v25 = vld [vmem:[#allocation1 + $0x9] sm:$0xff]  ;;  %v14878_v13 = vld [vmem:[#allocation1 + $0x12] sm:$0xff] }
 0x319   :  { %v3041_v52 = vsel %vm17968_vm11, %v3040_v3, %v14832_v57  ;;  %v3042_v6 = vsel %vm17969_vm8, %v14822_v33, %v14834_v1  ;;  %v3047_v18 = vsel %vm17970_vm7, %v3046_v49, %v14832_v57  ;;  %vm17971_vm3 = vcmask 1046534   ;;  %v14889_v16 = vld [vmem:[#allocation1 + $0x1b] sm:$0xff]  ;;  %v14891_v11 = vld [vmem:[#allocation1 + $0x24] sm:$0xff] }
 0x31a   :  { %v3048_v17 = vsel %vm17971_vm3, %v14822_v33, %v14834_v1  ;;  %v2495_v26 = vrot.slane %v14770_v24, 1  ;;  %vm17972_vm14 = vsmask.f32 6400  ;;  %v2575_v54 = vrot.slane %v14770_v24, 2  ;;  %3567 = vst [vmem:[#allocation1] ss:$9 sm:$0xff] %v10888_v46  ;;  %3934 = vmatmul.bf16.gmra.mxu1 %v14780_v44 }
 0x31b   :  { %v2553_v38 = vsel %vm17972_vm14, %v2549_v55, %v2552_v45  ;;  %v14872_v53 = vrot.slane %v2471_v61, 7  ;;  %v3031_v4 = vsel %vm2647_vm4, %v14822_v33, %v14834_v1  ;;  %v3037_v59 = vsel %vm2660_vm12, %v3035_v34, %v3036_v62  ;;  %3569 = vst [vmem:[#allocation1 + $0x1] ss:$9 sm:$0xff] %v10889_v58  ;;  %3987 = vmatmul.bf16.gmra.mxu2 %v14782_v2 }
 0x31c   :  { %vm17973_vm2 = vcmask 1045508   ;;  %v3054_v41 = vsel %vm372_vm1, %v14834_v1, %v14822_v33  ;;  %v2497_v50 = vsel %vm372_vm1, %v2495_v26, %v2496_v63  ;;  %vm17974_vm11 = vcmask 1045504   ;;  %3571 = vst [vmem:[#allocation1 + $0x2] ss:$9 sm:$0xff] %v10890_v39  ;;  %4040 = vmatmul.bf16.gmra.mxu3 %v14784_v8 }
 0x31d   :  { %v3053_v56 = vsel %vm17973_vm2, %v3052_v37, %v14832_v57  ;;  %v2577_v47 = vsel %vm17974_vm11, %v2575_v54, %v2576_v51  ;;  %v2630_v10 = vrot.slane %v2458_v19, 7  ;;  %v3043_v21 = vsel %vm2670_vm13, %v3041_v52, %v3042_v6 }
 0x31e   :  { %v2631_v15 = vrot.slane %v2493_v0, 6  ;;  %v2632_v45 = vrot.slane %v14767_v9, 5  ;;  %v14906_v22 = vrot.slane %v2553_v38, 5  ;;  %v3049_v3 = vsel %vm2679_vm0, %v3047_v18, %v3048_v17 }
 0x31f   :  { %vm17975_vm8 = vcmask 1042432   ;;  %v3039_v61 = vrot.slane %v3037_v59, 1  ;;  %v3055_v34 = vsel %vm2688_vm10, %v3053_v56, %v3054_v41  ;;  %vm17976_vm7 = vcmask 1041409  }
 0x320   :  { %v3032_v49 = vsel %vm17975_vm8, %v3028_v42, %v3031_v4  ;;  %v3094_v19 = vsel %vm17976_vm7, %v14770_v24, %v14872_v53  ;;  %v14914_v46 = vrot.slane %v2497_v50, 6  ;;  %v14916_v0 = vrot.slane %v2577_v47, 4 }
 0x321   :  { %v3045_v9 = vrot.slane %v3043_v21, 2  ;;  %vm17977_vm3 = vcmask 1042434   ;;  %3573 = vst [vmem:[#allocation1 + $0x3] ss:$9 sm:$0xff] %v3032_v49  ;;  %v3051_v58 = vrot.slane %v3049_v3, 3  ;;  %vm17978_vm14 = vcmask 1045509  }
 0x322   :  { %v3100_v62 = vsel %vm17977_vm3, %v14770_v24, %v14872_v53  ;;  %v3058_v42 = vsel %vm17978_vm14, %v14700_v40, %v14808_v32  ;;  %v3077_v55 = vsel %vm2642_vm5, %v14713_v14, %v2630_v10  ;;  %v3106_v39 = vsel %vm2647_vm4, %v14770_v24, %v14872_v53  ;;  %3575 = vst [vmem:[#allocation1 + $0x4] ss:$9 sm:$0xff] %v3039_v61  ;;  %vm17983_vm3 = vmmov %vm17978_vm14 }
 0x323   :  { %v3057_v37 = vrot.slane %v3055_v34, 4  ;;  %v3086_v52 = vsel %vm2642_vm5, %v14770_v24, %v14872_v53  ;;  %vm17979_vm2 = vcmask 1042433   ;;  %vm17980_vm11 = vcmask 1044484   ;;  %3577 = vst [vmem:[#allocation1 + $0x5] ss:$9 sm:$0xff] %v3045_v9 }
 0x324   :  { %v3095_v6 = vsel %vm17979_vm2, %v3094_v19, %v14914_v46  ;;  %v3096_v18 = vsel %vm17980_vm11, %v14906_v22, %v14916_v0  ;;  %vm17981_vm8 = vcmask 1046534   ;;  %v3070_v26 = vsel %vm372_vm1, %v14808_v32, %v14700_v40  ;;  %3579 = vst [vmem:[#allocation1 + $0x6] ss:$9 sm:$0xff] %v3051_v58 }
 0x325   :  { %v3064_v17 = vsel %vm17981_vm8, %v14700_v40, %v14808_v32  ;;  %vm17982_vm7 = vcmask 1043458   ;;  %v3102_v54 = vsel %vm17983_vm3, %v14906_v22, %v14916_v0  ;;  %vm17984_vm14 = vcmask 1046533   ;;  %vm17986_vm11 = vmmov %vm17981_vm8  ;;  %3581 = vst [vmem:[#allocation1 + $0x7] ss:$9 sm:$0xff] %v3057_v37 }
 0x326   :  { %v3101_v38 = vsel %vm17982_vm7, %v3100_v62, %v14914_v46  ;;  %v3059_v4 = vsel %vm17984_vm14, %v3058_v42, %v14832_v57  ;;  %v3060_v59 = vsel %vm2642_vm5, %v14822_v33, %v14834_v1  ;;  %vm17985_vm2 = vcmask 1044483  }
 0x327   :  { %v3107_v56 = vsel %vm17985_vm2, %v3106_v39, %v14914_v46  ;;  %v3108_v40 = vsel %vm17986_vm11, %v14906_v22, %v14916_v0  ;;  %vm17987_vm8 = vcmask 1041409   ;;  %v3088_v41 = vsel %vm1296_vm6, %v3086_v52, %v14914_v46 }
 0x328   :  { %v3066_v32 = vsel %vm17987_vm8, %v14822_v33, %v14834_v1  ;;  %v3091_v50 = vsel %vm2647_vm4, %v14906_v22, %v14916_v0  ;;  %v3097_v47 = vsel %vm2660_vm12, %v3095_v6, %v3096_v18  ;;  %vm17988_vm7 = vcmask 1045504  }
 0x329   :  { %v3065_v10 = vsel %vm17988_vm7, %v14832_v57, %v3064_v17  ;;  %vm17989_vm3 = vcmask 1046529   ;;  %vm17990_vm14 = vcmask 1042434   ;;  %v3103_v49 = vsel %vm2670_vm13, %v3101_v38, %v3102_v54 }
 0x32a   :  { %v3071_v21 = vsel %vm17989_vm3, %v14832_v57, %v3070_v26  ;;  %v3072_v3 = vsel %vm17990_vm14, %v14822_v33, %v14834_v1  ;;  %v3109_v61 = vsel %vm2679_vm0, %v3107_v56, %v3108_v40  ;;  %vm17991_vm2 = vcmask 1044484   ;;  %3939 = vmatmul.bf16.gmra.mxu1 %v14874_v43 }
 0x32b   :  { %v3112_v34 = vsel %vm17991_vm2, %v14770_v24, %v14872_v53  ;;  %v2633_v19 = vrot.slane %v2573_v29, 4  ;;  %v3061_v9 = vsel %vm2696_vm9, %v3060_v59, %v3059_v4  ;;  %vm17992_vm11 = vcmask 1042432   ;;  %3992 = vmatmul.bf16.gmra.mxu2 %v14876_v25 }
 0x32c   :  { %v3092_v62 = vsel %vm17992_vm11, %v3088_v41, %v3091_v50  ;;  %v3099_v57 = vrot.slane %v3097_v47, 1  ;;  %v3067_v58 = vsel %vm2704_vm15, %v3066_v32, %v3065_v10  ;;  %vm17993_vm8 = vcmask 1046530   ;;  %v14997_v6 = vld [vmem:[#allocation1] sm:$0xff]  ;;  %v14999_v44 = vld [vmem:[#allocation1 + $0x9] sm:$0xff]  ;;  %vm17997_vm2 = vmmov %vm17992_vm11  ;;  %4045 = vmatmul.bf16.gmra.mxu3 %v14878_v13 }
 0x32d   :  { %v3073_v33 = vsel %vm17993_vm8, %v3072_v3, %v3071_v21  ;;  %v3079_v1 = vsel %vm1296_vm6, %v3077_v55, %v2631_v15  ;;  %v3105_v42 = vrot.slane %v3103_v49, 2  ;;  %v3082_v39 = vsel %vm2647_vm4, %v2632_v45, %v2633_v19  ;;  %v15001_v45 = vld [vmem:[#allocation1 + $0x12] sm:$0xff]  ;;  %v15006_v2 = vld [vmem:[#allocation1 + $0x1b] sm:$0xff]  ;;  %v15008_v54 = vld [vmem:[#allocation1 + $0x24] sm:$0xff] }
 0x32e   :  { %v3111_v37 = vrot.slane %v3109_v61, 3  ;;  %vm17994_vm7 = vcmask 1045508   ;;  %v3114_v29 = vsel %vm372_vm1, %v14916_v0, %v14906_v22  ;;  %v3063_v52 = vrot.slane %v3061_v9, 5  ;;  %v128_v13 = vld [vmem:[%s17799_s20 + $0x14] sm:$0xf] }
 0x32f   :  { %v3113_v14 = vsel %vm17994_vm7, %v3112_v34, %v14914_v46  ;;  %vm17995_vm3 = vcmask 1045509   ;;  %v3265_v55 = vunpack.i.h.s16 %v3092_v62  ;;  %v3069_v18 = vrot.slane %v3067_v58, 6 }
 0x330   :  { %v3118_v15 = vsel %vm17995_vm3, %v14770_v24, %v14872_v53  ;;  %v3075_v17 = vrot.slane %v3073_v33, 7  ;;  %vm17996_vm14 = vcmask 1046534   ;;  %v3267_v38 = vunpack.i.h.s16 %v3099_v57  ;;  %3588 = vst [vmem:[#allocation1] ss:$9 sm:$0xff] %v3063_v52 }
 0x331   :  { %v3124_v26 = vsel %vm17996_vm14, %v14770_v24, %v14872_v53  ;;  %v3083_v4 = vsel %vm17997_vm2, %v3079_v1, %v3082_v39  ;;  %v3115_v59 = vsel %vm2688_vm10, %v3113_v14, %v3114_v29  ;;  %v3130_v56 = vsel %vm372_vm1, %v14872_v53, %v14770_v24  ;;  %3590 = vst [vmem:[#allocation1 + $0x1] ss:$9 sm:$0xff] %v3069_v18 }
 0x332   :  { %v3269_v40 = vunpack.i.h.s16 %v3105_v42  ;;  %vm17998_vm11 = vcmask 1046533   ;;  %v3120_v41 = vsel %vm2642_vm5, %v14906_v22, %v14916_v0  ;;  %v3271_v50 = vunpack.i.h.s16 %v3111_v37  ;;  %3592 = vst [vmem:[#allocation1 + $0x2] ss:$9 sm:$0xff] %v3075_v17 }
 0x333   :  { %v3119_v32 = vsel %vm17998_vm11, %v3118_v15, %v14914_v46  ;;  %v10891_v47 = vpack.i.b16 %v3092_v62, %v3083_v4  ;;  %vm17999_vm8 = vcmask 1045504   ;;  %vm18000_vm7 = vcmask 1041409   ;;  %v12877_v4 = vld [vmem:[%s17799_s20 + $0x8] sm:$0xf] }
 0x334   :  { %v3125_v8 = vsel %vm17999_vm8, %v14914_v46, %v3124_v26  ;;  %v3126_v10 = vsel %vm18000_vm7, %v14906_v22, %v14916_v0  ;;  %v10892_v24 = vpack.i.b16 %v3099_v57, %v3265_v55  ;;  %v3117_v53 = vrot.slane %v3115_v59, 4  ;;  %vm18007_vm8 = vmmov %vm18000_vm7 }
 0x335   :  { %vm18001_vm3 = vcmask 1046529   ;;  %vm18002_vm14 = vcmask 1042434   ;;  %v10893_v49 = vpack.i.b16 %v3105_v42, %v3267_v38  ;;  %3594 = vst [vmem:[#allocation1 + $0x3] ss:$9 sm:$0xff] %v10891_v47  ;;  %v3121_v61 = vsel %vm2696_vm9, %v3120_v41, %v3119_v32  ;;  %vm18005_vm9 = vmmov %vm18000_vm7 }
 0x336   :  { %v3131_v21 = vsel %vm18001_vm3, %v14914_v46, %v3130_v56  ;;  %v3132_v3 = vsel %vm18002_vm14, %v14906_v22, %v14916_v0  ;;  %v10894_v34 = vpack.i.b16 %v3111_v37, %v3269_v40  ;;  %3596 = vst [vmem:[#allocation1 + $0x4] ss:$9 sm:$0xff] %v10892_v24  ;;  %v3127_v19 = vsel %vm2704_vm15, %v3126_v10, %v3125_v8  ;;  %vm18006_vm11 = vmmov %vm18002_vm14 }
 0x337   :  { %v10895_v9 = vpack.i.b16 %v3117_v53, %v3271_v50  ;;  %3598 = vst [vmem:[#allocation1 + $0x5] ss:$9 sm:$0xff] %v10893_v49  ;;  %v2638_v62 = vrot.slane %v2472_v48, 7  ;;  %vm18003_vm2 = vcmask 1046530   ;;  %v3123_v46 = vrot.slane %v3121_v61, 5  ;;  %vm18008_vm7 = vmmov %vm18006_vm11 }
 0x338   :  { %v3133_v57 = vsel %vm18003_vm2, %v3132_v3, %v3131_v21  ;;  %3600 = vst [vmem:[#allocation1 + $0x6] ss:$9 sm:$0xff] %v10894_v34  ;;  %v3129_v58 = vrot.slane %v3127_v19, 6  ;;  %v2639_v22 = vrot.slane %v2496_v63, 6  ;;  %v2640_v0 = vrot.slane %v14817_v31, 5  ;;  %vm18009_vm3 = vmmov %vm18007_vm8 }
 0x339   :  { %3602 = vst [vmem:[#allocation1 + $0x7] ss:$9 sm:$0xff] %v10895_v9  ;;  %v3135_v33 = vrot.slane %v3133_v57, 7  ;;  %v3137_v1 = vsel %vm2642_vm5, %v14773_v5, %v2638_v62  ;;  %v3273_v42 = vunpack.i.h.s16 %v3117_v53  ;;  %v2641_v39 = vrot.slane %v2576_v51, 4  ;;  %v124_v5 = vld [vmem:[%s17799_s20 + $0x4] sm:$0xf]  ;;  %vm18010_vm14 = vmmov %vm18008_vm7 }
 0x33a   :  { %v3275_v48 = vunpack.i.h.s16 %v3123_v46  ;;  %v3277_v37 = vunpack.i.h.s16 %v3129_v58  ;;  %v3139_v14 = vsel %vm1296_vm6, %v3137_v1, %v2639_v22  ;;  %vm18004_vm15 = vcmask 1042432   ;;  %3944 = vmatmul.bf16.gmra.mxu1 %v14997_v6  ;;  %v12878_v6 = vld [vmem:[%s17799_s20 + $0xc] sm:$0x1]  ;;  %vm18012_vm2 = vmmov %vm18009_vm3 }
 0x33b   :  { %v3142_v29 = vsel %vm2647_vm4, %v2640_v0, %v2641_v39  ;;  %v3279_v52 = vunpack.i.h.s16 %v3135_v33  ;;  %v10896_v31 = vpack.i.b16 %v3123_v46, %v3273_v42  ;;  %v4562_v38 = vrot.slane %v124_v5, 3  ;;  %3997 = vmatmul.bf16.gmra.mxu2 %v14999_v44  ;;  %v12879_v39 = vld [vmem:[%s17799_s20 + $0x18] sm:$0xf] }
 0x33c   :  { %v10897_v51 = vpack.i.b16 %v3129_v58, %v3275_v48  ;;  %v3143_v25 = vsel %vm18004_vm15, %v3139_v14, %v3142_v29  ;;  %v10898_v17 = vpack.i.b16 %v3135_v33, %v3277_v37  ;;  %v4563_v59 = vrot.slane %v12877_v4, 3  ;;  %4050 = vmatmul.bf16.gmra.mxu3 %v15001_v45  ;;  %v18011_v48 = vld [vmem:[#allocation12_spill] sm:$0xff]  ;;  %vm18013_vm15 = vmmov %vm18008_vm7 }
 0x33d   :  { %v10899_v26 = vpack.i.b16 %v3143_v25, %v3279_v52  ;;  %v4590_v56 = vsel %vm18005_vm9, %v124_v5, %v4562_v38  ;;  %v4593_v40 = vsel %vm18006_vm11, %v124_v5, %v4562_v38  ;;  %v4596_v32 = vsel %vm2647_vm4, %v124_v5, %v4562_v38  ;;  %vm18016_vm9 = vmmov %vm18012_vm2 }
 0x33e   :  { %v4588_v41 = vsel %vm2642_vm5, %v124_v5, %v4562_v38  ;;  %v4592_v50 = vrot.slane %v4590_v56, 1  ;;  %v4565_v47 = vrot.slane %v128_v13, 3  ;;  %v4603_v8 = vsel %vm18007_vm8, %v12877_v4, %v4563_v59  ;;  %vm18017_vm11 = vmmov %vm18008_vm7 }
 0x33f   :  { %v4595_v53 = vrot.slane %v4593_v40, 2  ;;  %v4606_v21 = vsel %vm18008_vm7, %v12877_v4, %v4563_v59  ;;  %v4598_v34 = vrot.slane %v4596_v32, 3  ;;  %v4609_v19 = vsel %vm2647_vm4, %v12877_v4, %v4563_v59  ;;  %vm18018_vm8 = vmmov %vm18012_vm2 }
 0x340   :  { %v15047_v63 = vld [vmem:[#allocation1] sm:$0xff]  ;;  %v15049_v15 = vld [vmem:[#allocation1 + $0x9] sm:$0xff]  ;;  %v15051_v55 = vld [vmem:[#allocation1 + $0x12] sm:$0xff]  ;;  %v4601_v9 = vsel %vm2642_vm5, %v12877_v4, %v4563_v59  ;;  %v4605_v62 = vrot.slane %v4603_v8, 1  ;;  %v4608_v57 = vrot.slane %v4606_v21, 2  ;;  %v4620_v46 = vsel %vm18009_vm3, %v128_v13, %v4565_v47 }
 0x341   :  { %v15056_v43 = vld [vmem:[#allocation1 + $0x1b] sm:$0xff]  ;;  %v15058_v18 = vld [vmem:[#allocation1 + $0x24] sm:$0xff]  ;;  %v4611_v58 = vrot.slane %v4609_v19, 3  ;;  %v4623_v22 = vsel %vm18010_vm14, %v128_v13, %v4565_v47  ;;  %v4564_v0 = vrot.slane %v12878_v6, 3  ;;  %v4626_v33 = vsel %vm2647_vm4, %v128_v13, %v4565_v47  ;;  %vm18022_vm3 = vmmov %vm18012_vm2 }
 0x342   :  { %3609 = vst [vmem:[#allocation1] ss:$9 sm:$0xff] %v10896_v31  ;;  %v4618_v44 = vsel %vm2642_vm5, %v128_v13, %v4565_v47  ;;  %v4622_v1 = vrot.slane %v4620_v46, 1  ;;  %v4625_v42 = vrot.slane %v4623_v22, 2  ;;  %v4633_v45 = vsel %vm18012_vm2, %v12879_v39, %v18011_v48  ;;  %v12525_v47 = vld [vmem:[%s17729_s4 + $0x138] sm:$0xff]  ;;  %vm18023_vm14 = vmmov %vm18008_vm7 }
 0x343   :  { %3611 = vst [vmem:[#allocation1 + $0x1] ss:$9 sm:$0xff] %v10897_v51  ;;  %v4628_v37 = vrot.slane %v4626_v33, 3  ;;  %v4636_v14 = vsel %vm18013_vm15, %v12879_v39, %v18011_v48  ;;  %v4614_v29 = vsel %vm2642_vm5, %v12878_v6, %v4564_v0  ;;  %v4844_v52 = vunpack.i.h.s16 %v4618_v44  ;;  %v12517_v8 = vld [vmem:[%s17729_s4 + $0xf8] sm:$0xff]  ;;  %4118 = vmatpush.bf16.msrb.mxu2 %v12525_v47  ;;  %v12880_v22 = vld [vmem:[%s17799_s20 + $0x28] sm:$0xf]  ;;  %vm18025_vm15 = vmmov %vm18008_vm7 }
 0x344   :  { %3613 = vst [vmem:[#allocation1 + $0x2] ss:$9 sm:$0xff] %v10898_v17  ;;  %v4846_v31 = vunpack.i.h.s16 %v4622_v1  ;;  %v4631_v5 = vsel %vm2642_vm5, %v12879_v39, %v18011_v48  ;;  %v4635_v51 = vrot.slane %v4633_v45, 1  ;;  %v4848_v25 = vunpack.i.h.s16 %v4625_v42  ;;  %4065 = vmatpush.bf16.msrb.mxu1 %v12517_v8  ;;  %v136_v0 = vld [vmem:[%s17799_s20 + $0x34] sm:$0xf] }
 0x345   :  { %3615 = vst [vmem:[#allocation1 + $0x3] ss:$9 sm:$0xff] %v10899_v26  ;;  %v4638_v17 = vrot.slane %v4636_v14, 2  ;;  %v4850_v26 = vunpack.i.h.s16 %v4628_v37  ;;  %v11060_v38 = vpack.i.b16 %v4618_v44, %v4614_v29  ;;  %v11061_v4 = vpack.i.b16 %v4622_v1, %v4844_v52  ;;  %v12522_v1 = vld [vmem:[%s17729_s4 + $0x120] sm:$0xff] }
 0x346   :  { %v4852_v59 = vunpack.i.h.s16 %v4631_v5  ;;  %v11062_v56 = vpack.i.b16 %v4625_v42, %v4846_v31  ;;  %v4854_v13 = vunpack.i.h.s16 %v4635_v51  ;;  %v11063_v40 = vpack.i.b16 %v4628_v37, %v4848_v25  ;;  %v12514_v42 = vld [vmem:[%s17729_s4 + $0xe0] sm:$0xff] }
 0x347   :  { %v4856_v32 = vunpack.i.h.s16 %v4638_v17  ;;  %v4569_v6 = vrot.slane %v12880_v22, 3  ;;  %v4571_v37 = vrot.slane %v136_v0, 3  ;;  %v18020_v25 = vld [vmem:[#allocation15_spill] sm:$0xff] }
 0x348   :  { %v11066_v21 = vpack.i.b16 %v4638_v17, %v4854_v13 }
 0x349   :  { %v4663_v45 = vsel %vm18018_vm8, %v12880_v22, %v4569_v6  ;;  %v4666_v31 = vsel %vm18008_vm7, %v12880_v22, %v4569_v6  ;;  %v4686_v8 = vsel %vm2647_vm4, %v136_v0, %v4571_v37  ;;  %vm18031_vm8 = vmmov %vm18008_vm7 }
 0x34a   :  { %3949 = vmatmul.bf16.gmra.mxu1 %v15047_v63  ;;  %v12516_v63 = vld [vmem:[%s17729_s4 + $0xf0] sm:$0xff]  ;;  %v4668_v13 = vrot.slane %v4666_v31, 2  ;;  %vm18032_vm7 = vmmov %vm18012_vm2 }
 0x34b   :  { %4002 = vmatmul.bf16.gmra.mxu2 %v15049_v15  ;;  %4066 = vmatpush.bf16.msrb.mxu1 %v12516_v63  ;;  %v12523_v15 = vld [vmem:[%s17729_s4 + $0x128] sm:$0xff] }
 0x34c   :  { %v15073_v10 = vld [vmem:[#allocation1] sm:$0xff]  ;;  %v15075_v24 = vld [vmem:[#allocation1 + $0x9] sm:$0xff]  ;;  %v15078_v3 = vld [vmem:[#allocation1 + $0x12] sm:$0xff]  ;;  %4055 = vmatmul.bf16.gmra.mxu3 %v15051_v55 }
 0x34d   :  { %v15080_v49 = vld [vmem:[#allocation1 + $0x1b] sm:$0xff]  ;;  %v15082_v61 = vld [vmem:[#allocation1 + $0x24] sm:$0xff] }
 0x34e   :  { %5036 = vst [vmem:[#allocation1] ss:$9 sm:$0xff] %v4588_v41 }
 0x34f   :  { %5039 = vst [vmem:[#allocation1 + $0x1] ss:$9 sm:$0xff] %v4592_v50  ;;  %v11064_v50 = vpack.i.b16 %v4631_v5, %v4850_v26  ;;  %v12521_v26 = vld [vmem:[%s17729_s4 + $0x118] sm:$0xff] }
 0x350   :  { %5042 = vst [vmem:[#allocation1 + $0x2] ss:$9 sm:$0xff] %v4595_v53  ;;  %v11065_v53 = vpack.i.b16 %v4635_v51, %v4852_v59  ;;  %v18019_v51 = vld [vmem:[#allocation14_spill] sm:$0xff]  ;;  %v4661_v59 = vsel %vm2642_vm5, %v12880_v22, %v4569_v6 }
 0x351   :  { %5045 = vst [vmem:[#allocation1 + $0x3] ss:$9 sm:$0xff] %v4598_v34  ;;  %v18014_v34 = vld [vmem:[#allocation13_spill] sm:$0xff]  ;;  %v18021_v17 = vpack.i.b16 %v18019_v51, %v18020_v25  ;;  %v4962_v51 = vld [vmem:[%s17731_s6] sm:$0x3] }
 0x352   :  { %5048 = vst [vmem:[#allocation1 + $0x4] ss:$9 sm:$0xff] %v4601_v9  ;;  %v18015_v19 = vrot.slane %v18014_v34, 3 }
 0x353   :  { %5051 = vst [vmem:[#allocation1 + $0x5] ss:$9 sm:$0xff] %v4605_v62  ;;  %v132_v62 = vld [vmem:[%s17799_s20 + $0x24] sm:$0xf] }
 0x354   :  { %5054 = vst [vmem:[#allocation1 + $0x6] ss:$9 sm:$0xff] %v4608_v57  ;;  %v11067_v9 = vpack.i.b16 %v18015_v19, %v4856_v32  ;;  %v12524_v57 = vld [vmem:[%s17729_s4 + $0x130] sm:$0xff]  ;;  %v4568_v46 = vrot.slane %v132_v62, 3  ;;  %v4683_v32 = vsel %vm18023_vm14, %v136_v0, %v4571_v37  ;;  %vm18037_vm14 = vmmov %vm18031_vm8 }
 0x355   :  { %5057 = vst [vmem:[#allocation1 + $0x7] ss:$9 sm:$0xff] %v4611_v58  ;;  %4119 = vmatpush.bf16.msrb.mxu2 %v12524_v57  ;;  %v12515_v58 = vld [vmem:[%s17729_s4 + $0xe8] sm:$0xff] }
 0x356   :  { %v4650_v55 = vsel %vm18016_vm9, %v132_v62, %v4568_v46  ;;  %4067 = vmatpush.bf16.msrb.mxu1 %v12515_v58  ;;  %v4653_v33 = vsel %vm18017_vm11, %v132_v62, %v4568_v46  ;;  %v4656_v44 = vsel %vm2647_vm4, %v132_v62, %v4568_v46  ;;  %v4648_v39 = vsel %vm2642_vm5, %v132_v62, %v4568_v46  ;;  %v12882_v62 = vld [vmem:[%s17799_s20 + $0x38] sm:$0xf]  ;;  %v18024_v57 = vld [vmem:[#allocation16_spill] sm:$0xff]  ;;  %vm18030_vm11 = vmmov %vm18012_vm2 }
 0x357   :  { %v4652_v48 = vrot.slane %v4650_v55, 1  ;;  %v4655_v14 = vrot.slane %v4653_v33, 2  ;;  %v3915_v52 = vpop.f32.mrf.mxu1  ;;  %v4658_v5 = vrot.slane %v4656_v44, 3  ;;  %v4688_v58 = vrot.slane %v4686_v8, 3 }
 0x358   :  { %vm18027_vm9 = vcmask 31744  }
 0x359   :  { %4120 = vmatpush.bf16.msrb.mxu2 %v12523_v15  ;;  %v4669_v15 = vsel %vm2647_vm4, %v12880_v22, %v4569_v6 }
 0x35a   :  { %4068 = vmatpush.bf16.msrb.mxu1 %v12514_v42  ;;  %v12519_v42 = vld [vmem:[%s17729_s4 + $0x108] sm:$0xff]  ;;  %v4671_v6 = vrot.slane %v4669_v15, 3 }
 0x35b   :  { %3954 = vmatmul.bf16.gmra.mxu1 %v15073_v10  ;;  %4007 = vmatmul.bf16.gmra.mxu2 %v15075_v24  ;;  %v12512_v24 = vld [vmem:[%s17729_s4 + $0xd0] sm:$0xff] }
 0x35c   :  { %v15106_v41 = vld [vmem:[#allocation1] sm:$0xff]  ;;  %4060 = vmatmul.bf16.gmra.mxu3 %v15078_v3  ;;  %v4693_v3 = vsel %vm18012_vm2, %v12882_v62, %v18024_v57 }
 0x35d   :  { %5060 = vst [vmem:[#allocation1] ss:$9 sm:$0xff] %v11060_v38  ;;  %4121 = vmatpush.bf16.msrb.mxu2 %v12522_v1  ;;  %v12513_v38 = vld [vmem:[%s17729_s4 + $0xd8] sm:$0xff]  ;;  %v12511_v1 = vld [vmem:[%s17729_s4 + $0xc8] sm:$0xff]  ;;  %v4695_v22 = vrot.slane %v4693_v3, 1 }
 0x35e   :  { %5062 = vst [vmem:[#allocation1 + $0x1] ss:$9 sm:$0xff] %v11061_v4  ;;  %v15166_v4 = vld [vmem:[%s17730_s5] ss:$0 sm:$0xff]  ;;  %4069 = vmatpush.bf16.msrb.mxu1 %v12513_v38  ;;  %v3968_v19 = vpop.f32.mrf.mxu2 }
 0x35f   :  { %5064 = vst [vmem:[#allocation1 + $0x2] ss:$9 sm:$0xff] %v11062_v56  ;;  %v4665_v56 = vrot.slane %v4663_v45, 1  ;;  %v3916_v10 = vadd.f32 %v15166_v4, %v3915_v52  ;;  %v3917_v46 = vpop.f32.mrf.mxu1  ;;  %v4021_v55 = vpop.f32.mrf.mxu3 }
 0x360   :  { %5066 = vst [vmem:[#allocation1 + $0x3] ss:$9 sm:$0xff] %v11063_v40  ;;  %v4680_v40 = vsel %vm18022_vm3, %v136_v0, %v4571_v37  ;;  %v3918_v25 = vadd.f32 %v15166_v4, %v3917_v46  ;;  %vm18036_vm3 = vmmov %vm18012_vm2 }
 0x361   :  { %5068 = vst [vmem:[#allocation1 + $0x4] ss:$9 sm:$0xff] %v11064_v50  ;;  %4122 = vmatpush.bf16.msrb.mxu2 %v12521_v26  ;;  %v12881_v50 = vld [vmem:[%s17799_s20 + $0x2c] sm:$0x1]  ;;  %v4682_v34 = vrot.slane %v4680_v40, 1  ;;  %v3969_v63 = vadd.f32 %v3968_v19, %v3916_v10  ;;  %v12518_v26 = vld [vmem:[%s17729_s4 + $0x100] sm:$0xff]  ;;  %vm18038_vm2 = vmmov %vm18031_vm8 }
 0x362   :  { %5070 = vst [vmem:[#allocation1 + $0x5] ss:$9 sm:$0xff] %v11065_v53  ;;  %v4570_v47 = vrot.slane %v12881_v50, 3  ;;  %v12520_v53 = vld [vmem:[%s17729_s4 + $0x110] sm:$0xff]  ;;  %4070 = vmatpush.bf16.msrb.mxu1 %v12512_v24  ;;  %v5206_v40 = vsel %vm1296_vm6, %v4962_v51, 0 }
 0x363   :  { %5072 = vst [vmem:[#allocation1 + $0x6] ss:$9 sm:$0xff] %v11066_v21  ;;  %v4678_v21 = vsel %vm2642_vm5, %v136_v0, %v4571_v37  ;;  %v15193_v44 = vadd.f32 %v4021_v55, %v3969_v63  ;;  %v4696_v37 = vsel %vm18025_vm15, %v12882_v62, %v18024_v57  ;;  %5215 = vmatpush.bf16.msrb.mxu3 %v5206_v40  ;;  %v140_v19 = vld [vmem:[%s17799_s20 + $0x44] sm:$0xf]  ;;  %v18028_v55 = vld [vmem:[#allocation17_spill] sm:$0xff]  ;;  %vm18039_vm15 = vmmov %vm18027_vm9 }
 0x364   :  { %5074 = vst [vmem:[#allocation1 + $0x7] ss:$9 sm:$0xff] %v11067_v9  ;;  %v4685_v9 = vrot.slane %v4683_v32, 2  ;;  %v4674_v0 = vsel %vm2642_vm5, %v12881_v50, %v4570_v47  ;;  %v4878_v33 = vunpack.i.h.s16 %v4678_v21  ;;  %v4574_v3 = vrot.slane %v140_v19, 3 }
 0x365   :  { %4123 = vmatpush.bf16.msrb.mxu2 %v12520_v53  ;;  %v11069_v52 = vpack.i.b16 %v4678_v21, %v4674_v0  ;;  %v18029_v0 = vrot.slane %v18028_v55, 3 }
 0x366   :  { %v4882_v45 = vunpack.i.h.s16 %v4685_v9  ;;  %4071 = vmatpush.bf16.msrb.mxu1 %v12511_v1  ;;  %v11070_v31 = vpack.i.b16 %v4682_v34, %v4878_v33  ;;  %v3970_v32 = vpop.f32.mrf.mxu2  ;;  %v12883_v1 = vld [vmem:[%s17799_s20 + $0x48] sm:$0xf] }
 0x367   :  { %v3971_v47 = vadd.f32 %v3970_v32, %v3918_v25  ;;  %v3920_v8 = vpop.f32.mrf.mxu1  ;;  %v4023_v53 = vpop.f32.mrf.mxu3 }
 0x368   :  { %v11072_v50 = vpack.i.b16 %v4688_v58, %v4882_v45 }
 0x369   :  { %4124 = vmatpush.bf16.msrb.mxu2 %v12519_v42  ;;  %v15218_v21 = vadd.f32 %v4023_v53, %v3971_v47  ;;  %v4575_v42 = vrot.slane %v12883_v1, 3  ;;  %v12884_v53 = vld [vmem:[%s17799_s20 + $0x4c] sm:$0x1] }
 0x36b   :  { %v15151_v29 = vld [vmem:[#allocation1] sm:$0xff]  ;;  %v4721_v32 = vsel %vm2642_vm5, %v12883_v1, %v4575_v42 }
 0x36c   :  { %5077 = vst [vmem:[#allocation1] ss:$9 sm:$0xff] %v18021_v17  ;;  %v12510_v17 = vld [vmem:[%s17729_s4 + $0xc0] sm:$0xff]  ;;  %11096 = vmatmul.msk.bf16.vlgmr.msrb.gmra.mxu3 %vm18027_vm9, %v15106_v41  ;;  %v144_v41 = vld [vmem:[%s17799_s20 + $0x54] sm:$0xf]  ;;  %vm18041_vm9 = vmmov %vm18036_vm3 }
 0x36d   :  { %5079 = vst [vmem:[#allocation1 + $0x1] ss:$9 sm:$0xff] %v4648_v39  ;;  %v4880_v39 = vunpack.i.h.s16 %v4682_v34  ;;  %4072 = vmatpush.bf16.msrb.mxu1 %v12510_v17  ;;  %4125 = vmatpush.bf16.msrb.mxu2 %v12518_v26  ;;  %v18033_v17 = vld [vmem:[#allocation18_spill] sm:$0xff]  ;;  %v18034_v26 = vld [vmem:[#allocation19_spill] sm:$0xff] }
 0x36e   :  { %5081 = vst [vmem:[#allocation1 + $0x2] ss:$9 sm:$0xff] %v4652_v48  ;;  %v4691_v48 = vsel %vm2642_vm5, %v12882_v62, %v18024_v57  ;;  %v3921_v62 = vadd.f32 %v15166_v4, %v3920_v8  ;;  %v3973_v63 = vpop.f32.mrf.mxu2 }
 0x36f   :  { %5083 = vst [vmem:[#allocation1 + $0x3] ss:$9 sm:$0xff] %v4655_v14  ;;  %v4884_v14 = vunpack.i.h.s16 %v4688_v58  ;;  %v11071_v38 = vpack.i.b16 %v4685_v9, %v4880_v39  ;;  %v18026_v9 = vld [vmem:[#allocation30_spill] sm:$0xff]  ;;  %v4026_v15 = vpop.f32.mrf.mxu3  ;;  %v4710_v39 = vsel %vm18030_vm11, %v140_v19, %v4574_v3  ;;  %vm18042_vm11 = vmmov %vm18039_vm15 }
 0x370   :  { %5085 = vst [vmem:[#allocation1 + $0x4] ss:$9 sm:$0xff] %v4658_v5  ;;  %v4886_v5 = vunpack.i.h.s16 %v4691_v48  ;;  %4073 = vmatmul.bf16.vlgmr.msrb.gmra.mxu1 %v14220_v30  ;;  %4126 = vmatmul.bf16.vlgmr.msrb.gmra.mxu2 %v18026_v9  ;;  %v3974_v46 = vadd.f32 %v3973_v63, %v3921_v62  ;;  %v3922_v30 = vpop.f32.mrf.mxu1  ;;  %v4712_v45 = vrot.slane %v4710_v39, 1  ;;  %v4729_v63 = vsel %vm2647_vm4, %v12883_v1, %v4575_v42 }
 0x371   :  { %5087 = vst [vmem:[#allocation1 + $0x5] ss:$9 sm:$0xff] %v4661_v59  ;;  %v4698_v59 = vrot.slane %v4696_v37, 2  ;;  %v11073_v10 = vpack.i.b16 %v4691_v48, %v4884_v14  ;;  %v4713_v48 = vsel %vm18031_vm8, %v140_v19, %v4574_v3  ;;  %v3923_v14 = vadd.f32 %v15166_v4, %v3922_v30  ;;  %vm18043_vm8 = vmmov %vm18038_vm2 }
 0x372   :  { %5089 = vst [vmem:[#allocation1 + $0x6] ss:$9 sm:$0xff] %v4665_v56  ;;  %v4888_v56 = vunpack.i.h.s16 %v4695_v22  ;;  %v11074_v24 = vpack.i.b16 %v4695_v22, %v4886_v5  ;;  %v15228_v58 = vadd.f32 %v4026_v15, %v3974_v46  ;;  %v4716_v22 = vsel %vm2647_vm4, %v140_v19, %v4574_v3 }
 0x373   :  { %5091 = vst [vmem:[#allocation1 + $0x7] ss:$9 sm:$0xff] %v4668_v13  ;;  %v4890_v57 = vunpack.i.h.s16 %v4698_v59  ;;  %v4715_v5 = vrot.slane %v4713_v48, 2  ;;  %v4718_v25 = vrot.slane %v4716_v22, 3  ;;  %v18040_v48 = vld [vmem:[#allocation20_spill] sm:$0xff] }
 0x374   :  { %v11075_v34 = vpack.i.b16 %v4698_v59, %v4888_v56 }
 0x375   :  { %v11076_v33 = vpack.i.b16 %v18029_v0, %v4890_v57 }
 0x376   :  { %v3975_v51 = vpop.f32.mrf.mxu2 }
 0x377   :  { %v3976_v59 = vadd.f32 %v3975_v51, %v3923_v14  ;;  %v4028_v40 = vpop.f32.mrf.mxu3 }
 0x378   :  { %v3925_v56 = vpop.f32.mrf.mxu1 }
 0x379   :  { %v15250_v47 = vadd.f32 %v4028_v40, %v3976_v59 }
 0x37a   :  { %v15215_v13 = vld [vmem:[#allocation1] sm:$0xff] }
 0x37b   :  { %5094 = vst [vmem:[#allocation1] ss:$9 sm:$0xff] %v4671_v6  ;;  %v4708_v6 = vsel %vm2642_vm5, %v140_v19, %v4574_v3  ;;  %v4726_v19 = vsel %vm18038_vm2, %v12883_v1, %v4575_v42 }
 0x37c   :  { %5096 = vst [vmem:[#allocation1 + $0x1] ss:$9 sm:$0xff] %v11069_v52  ;;  %v4723_v52 = vsel %vm18032_vm7, %v12883_v1, %v4575_v42  ;;  %11097 = vmatmul.msk.bf16.gmra.mxu3 %vm18039_vm15, %v15151_v29  ;;  %v4728_v55 = vrot.slane %v4726_v19, 2  ;;  %v4731_v42 = vrot.slane %v4729_v63, 3  ;;  %vm18046_vm7 = vmmov %vm18042_vm11 }
 0x37d   :  { %5098 = vst [vmem:[#allocation1 + $0x2] ss:$9 sm:$0xff] %v11070_v31  ;;  %v4577_v31 = vrot.slane %v144_v41, 3  ;;  %vm18052_vm15 = vmmov %vm18041_vm9 }
 0x37e   :  { %5100 = vst [vmem:[#allocation1 + $0x3] ss:$9 sm:$0xff] %v11071_v38  ;;  %v18035_v38 = vpack.i.b16 %v18033_v17, %v18034_v26  ;;  %v3978_v3 = vpop.f32.mrf.mxu2 }
 0x37f   :  { %5102 = vst [vmem:[#allocation1 + $0x4] ss:$9 sm:$0xff] %v11072_v50  ;;  %v4725_v50 = vrot.slane %v4723_v52, 1  ;;  %v4740_v8 = vsel %vm18036_vm3, %v144_v41, %v4577_v31  ;;  %v4738_v9 = vsel %vm2642_vm5, %v144_v41, %v4577_v31  ;;  %vm18050_vm3 = vmmov %vm18046_vm7 }
 0x380   :  { %5104 = vst [vmem:[#allocation1 + $0x5] ss:$9 sm:$0xff] %v11073_v10  ;;  %4078 = vmatmul.bf16.gmra.mxu1 %v14390_v28  ;;  %v4743_v10 = vsel %vm18037_vm14, %v144_v41, %v4577_v31  ;;  %4131 = vmatmul.bf16.gmra.mxu2 %v14392_v27  ;;  %v4742_v62 = vrot.slane %v4740_v8, 1  ;;  %v3926_v28 = vadd.f32 %v15166_v4, %v3925_v56  ;;  %v3927_v15 = vpop.f32.mrf.mxu1  ;;  %v4912_v0 = vunpack.i.h.s16 %v4738_v9  ;;  %vm18051_vm14 = vmmov %vm18041_vm9 }
 0x381   :  { %5106 = vst [vmem:[#allocation1 + $0x6] ss:$9 sm:$0xff] %v11074_v24  ;;  %v4576_v24 = vrot.slane %v12884_v53, 3  ;;  %v4745_v57 = vrot.slane %v4743_v10, 2  ;;  %v3928_v17 = vadd.f32 %v15166_v4, %v3927_v15 }
 0x382   :  { %5108 = vst [vmem:[#allocation1 + $0x7] ss:$9 sm:$0xff] %v11075_v34  ;;  %v4746_v34 = vsel %vm2647_vm4, %v144_v41, %v4577_v31  ;;  %v3979_v30 = vadd.f32 %v3978_v3, %v3926_v28  ;;  %v4914_v39 = vunpack.i.h.s16 %v4742_v62  ;;  %v12885_v41 = vld [vmem:[%s17799_s20 + $0x58] sm:$0xf]  ;;  %v11079_v52 = vpack.i.b16 %v4742_v62, %v4912_v0  ;;  %v18044_v0 = vld [vmem:[#allocation21_spill] sm:$0xff] }
 0x383   :  { %v4748_v46 = vrot.slane %v4746_v34, 3  ;;  %v4734_v27 = vsel %vm2642_vm5, %v12884_v53, %v4576_v24  ;;  %v4751_v29 = vsel %vm2642_vm5, %v12885_v41, %v18040_v48  ;;  %v4753_v22 = vsel %vm18041_vm9, %v12885_v41, %v18040_v48  ;;  %vm18053_vm9 = vmmov %vm18038_vm2 }
 0x384   :  { %v11078_v14 = vpack.i.b16 %v4738_v9, %v4734_v27  ;;  %v4755_v31 = vrot.slane %v4753_v22, 1  ;;  %v4756_v24 = vsel %vm18043_vm8, %v12885_v41, %v18040_v48  ;;  %vm18055_vm8 = vmmov %vm18038_vm2 }
 0x385   :  { %v4758_v28 = vrot.slane %v4756_v24, 2 }
 0x387   :  { %v4924_v3 = vunpack.i.h.s16 %v4758_v28 }
 0x388   :  { %v3930_v40 = vpop.f32.mrf.mxu1 }
 0x389   :  { %v15242_v37 = vld [vmem:[#allocation1] sm:$0xff]  ;;  %v3931_v10 = vadd.f32 %v15166_v4, %v3930_v40 }
 0x38a   :  { %5111 = vst [vmem:[#allocation1] ss:$9 sm:$0xff] %v11076_v33  ;;  %v4031_v33 = vpop.f32.mrf.mxu3 }
 0x38b   :  { %5113 = vst [vmem:[#allocation1 + $0x1] ss:$9 sm:$0xff] %v18035_v38  ;;  %v15274_v1 = vadd.f32 %v4031_v33, %v3979_v30  ;;  %v3980_v38 = vpop.f32.mrf.mxu2  ;;  %v18045_v33 = vrot.slane %v18044_v0, 3 }
 0x38c   :  { %5115 = vst [vmem:[#allocation1 + $0x2] ss:$9 sm:$0xff] %v4708_v6  ;;  %v4916_v6 = vunpack.i.h.s16 %v4745_v57  ;;  %v3981_v56 = vadd.f32 %v3980_v38, %v3928_v17  ;;  %11098 = vmatmul.msk.bf16.gmra.mxu3 %vm18042_vm11, %v15215_v13  ;;  %v15294_v13 = vld [vmem:[%s17799_s20 + $0x68] sm:$0xf]  ;;  %v152_v38 = vld [vmem:[%s17799_s20 + $0x74] sm:$0xf]  ;;  %vm18054_vm11 = vmmov %vm18051_vm14 }
 0x38d   :  { %5117 = vst [vmem:[#allocation1 + $0x3] ss:$9 sm:$0xff] %v4712_v45  ;;  %v4918_v45 = vunpack.i.h.s16 %v4748_v46  ;;  %v4581_v15 = vrot.slane %v15294_v13, 3 }
 0x38e   :  { %5119 = vst [vmem:[#allocation1 + $0x4] ss:$9 sm:$0xff] %v4715_v5  ;;  %v4920_v5 = vunpack.i.h.s16 %v4751_v29  ;;  %v11081_v26 = vpack.i.b16 %v4748_v46, %v4916_v6 }
 0x38f   :  { %5121 = vst [vmem:[#allocation1 + $0x5] ss:$9 sm:$0xff] %v4718_v25  ;;  %v11080_v25 = vpack.i.b16 %v4745_v57, %v4914_v39  ;;  %v11082_v59 = vpack.i.b16 %v4751_v29, %v4918_v45  ;;  %v11085_v39 = vpack.i.b16 %v18045_v33, %v4924_v3  ;;  %v4781_v48 = vsel %vm2642_vm5, %v15294_v13, %v4581_v15  ;;  %v18047_v45 = vld [vmem:[#allocation22_spill] sm:$0xff] }
 0x390   :  { %5123 = vst [vmem:[#allocation1 + $0x6] ss:$9 sm:$0xff] %v4721_v32  ;;  %v11083_v32 = vpack.i.b16 %v4755_v31, %v4920_v5  ;;  %4083 = vmatmul.bf16.gmra.mxu1 %v14537_v7  ;;  %4136 = vmatmul.bf16.gmra.mxu2 %v14539_v60  ;;  %v3932_v19 = vpop.f32.mrf.mxu1  ;;  %v4922_v7 = vunpack.i.h.s16 %v4755_v31 }
 0x391   :  { %5125 = vst [vmem:[#allocation1 + $0x7] ss:$9 sm:$0xff] %v4725_v50  ;;  %v3933_v57 = vadd.f32 %v15166_v4, %v3932_v19 }
 0x392   :  { %v4033_v50 = vpop.f32.mrf.mxu3 }
 0x393   :  { %v15279_v8 = vadd.f32 %v4033_v50, %v3981_v56  ;;  %v3983_v53 = vpop.f32.mrf.mxu2 }
 0x394   :  { %v3984_v34 = vadd.f32 %v3983_v53, %v3931_v10 }
 0x398   :  { %v15276_v51 = vld [vmem:[#allocation1] sm:$0xff]  ;;  %v3935_v46 = vpop.f32.mrf.mxu1 }
 0x399   :  { %5128 = vst [vmem:[#allocation1] ss:$9 sm:$0xff] %v4728_v55  ;;  %v11084_v55 = vpack.i.b16 %v4758_v28, %v4922_v7  ;;  %v3936_v29 = vadd.f32 %v15166_v4, %v3935_v46 }
 0x39a   :  { %5130 = vst [vmem:[#allocation1 + $0x1] ss:$9 sm:$0xff] %v4731_v42  ;;  %v4036_v9 = vpop.f32.mrf.mxu3 }
 0x39b   :  { %5132 = vst [vmem:[#allocation1 + $0x2] ss:$9 sm:$0xff] %v11078_v14  ;;  %v15288_v62 = vadd.f32 %v4036_v9, %v3984_v34  ;;  %v3985_v60 = vpop.f32.mrf.mxu2  ;;  %v18048_v14 = vld [vmem:[#allocation23_spill] sm:$0xff] }
 0x39c   :  { %5134 = vst [vmem:[#allocation1 + $0x3] ss:$9 sm:$0xff] %v11079_v52  ;;  %v3986_v63 = vadd.f32 %v3985_v60, %v3933_v57  ;;  %11099 = vmatmul.msk.bf16.gmra.mxu3 %vm18046_vm7, %v15242_v37  ;;  %v12887_v60 = vld [vmem:[%s17799_s20 + $0x6c] sm:$0x1]  ;;  %vm18057_vm7 = vmmov %vm18054_vm11 }
 0x39d   :  { %5136 = vst [vmem:[#allocation1 + $0x4] ss:$9 sm:$0xff] %v11080_v25 }
 0x39e   :  { %5138 = vst [vmem:[#allocation1 + $0x5] ss:$9 sm:$0xff] %v11081_v26 }
 0x39f   :  { %5140 = vst [vmem:[#allocation1 + $0x6] ss:$9 sm:$0xff] %v11082_v59  ;;  %v148_v59 = vld [vmem:[%s17799_s20 + $0x64] sm:$0xf] }
 0x3a0   :  { %5142 = vst [vmem:[#allocation1 + $0x7] ss:$9 sm:$0xff] %v11083_v32  ;;  %4088 = vmatmul.bf16.gmra.mxu1 %v14671_v23  ;;  %4141 = vmatmul.bf16.gmra.mxu2 %v14673_v12  ;;  %v3937_v6 = vpop.f32.mrf.mxu1  ;;  %v18049_v23 = vpack.i.b16 %v18047_v45, %v18048_v14  ;;  %v4580_v40 = vrot.slane %v148_v59, 3  ;;  %v4583_v32 = vrot.slane %v152_v38, 3 }
 0x3a1   :  { %v3938_v31 = vadd.f32 %v15166_v4, %v3937_v6 }
 0x3a2   :  { %v4038_v30 = vpop.f32.mrf.mxu3  ;;  %v4768_v53 = vsel %vm2642_vm5, %v148_v59, %v4580_v40  ;;  %v4770_v24 = vsel %vm18051_vm14, %v148_v59, %v4580_v40  ;;  %v4776_v28 = vsel %vm2647_vm4, %v148_v59, %v4580_v40  ;;  %v4800_v57 = vsel %vm18052_vm15, %v152_v38, %v4583_v32  ;;  %vm18058_vm14 = vmmov %vm18038_vm2 }
 0x3a3   :  { %v15297_v27 = vadd.f32 %v4038_v30, %v3986_v63  ;;  %v3988_v22 = vpop.f32.mrf.mxu2  ;;  %v4772_v19 = vrot.slane %v4770_v24, 1  ;;  %v4803_v3 = vsel %vm18053_vm9, %v152_v38, %v4583_v32  ;;  %v4582_v63 = vrot.slane %v12887_v60, 3 }
 0x3a4   :  { %v3989_v42 = vadd.f32 %v3988_v22, %v3936_v29  ;;  %v4806_v46 = vsel %vm2647_vm4, %v152_v38, %v4583_v32  ;;  %v4783_v30 = vsel %vm18054_vm11, %v15294_v13, %v4581_v15  ;;  %v4802_v0 = vrot.slane %v4800_v57, 1 }
 0x3a5   :  { %v4789_v22 = vsel %vm2647_vm4, %v15294_v13, %v4581_v15  ;;  %v4785_v14 = vrot.slane %v4783_v30, 1  ;;  %vm5788_vm11 = vcmp.ge.s32.totalorder %v13698_v36, 1 }
 0x3a7   :  { %v15303_v41 = vld [vmem:[#allocation1] sm:$0xff] }
 0x3a8   :  { %5145 = vst [vmem:[#allocation1] ss:$9 sm:$0xff] %v11084_v55  ;;  %v3940_v17 = vpop.f32.mrf.mxu1  ;;  %v4798_v55 = vsel %vm2642_vm5, %v152_v38, %v4583_v32  ;;  %v18056_v32 = vld [vmem:[#allocation24_spill] sm:$0xff] }
 0x3a9   :  { %5147 = vst [vmem:[#allocation1 + $0x1] ss:$9 sm:$0xff] %v11085_v39  ;;  %v3941_v56 = vadd.f32 %v15166_v4, %v3940_v17  ;;  %v4786_v39 = vsel %vm18055_vm8, %v15294_v13, %v4581_v15  ;;  %v12888_v15 = vld [vmem:[%s17799_s20 + $0x78] sm:$0xf]  ;;  %vm18073_vm8 = vmmov %vm18057_vm7 }
 0x3aa   :  { %5149 = vst [vmem:[#allocation1 + $0x2] ss:$9 sm:$0xff] %v18049_v23  ;;  %v4041_v12 = vpop.f32.mrf.mxu3  ;;  %v4794_v23 = vsel %vm2642_vm5, %v12887_v60, %v4582_v63  ;;  %v4816_v24 = vsel %vm18058_vm14, %v12888_v15, %v18056_v32 }
 0x3ab   :  { %5159 = vst [vmem:[#allocation1 + $0x7] ss:$9 sm:$0xff] %v4781_v48  ;;  %v15313_v52 = vadd.f32 %v4041_v12, %v3989_v42  ;;  %v3990_v5 = vpop.f32.mrf.mxu2  ;;  %v4805_v48 = vrot.slane %v4803_v3, 2  ;;  %v4808_v42 = vrot.slane %v4806_v46, 3  ;;  %v4946_v12 = vunpack.i.h.s16 %v4798_v55 }
 0x3ac   :  { %v3991_v25 = vadd.f32 %v3990_v5, %v3938_v31  ;;  %11100 = vmatmul.msk.bf16.gmra.mxu3 %vm18050_vm3, %v15276_v51  ;;  %5151 = vst [vmem:[#allocation1 + $0x3] ss:$9 sm:$0xff] %v4768_v53  ;;  %v4778_v51 = vrot.slane %v4776_v28, 3  ;;  %v4788_v5 = vrot.slane %v4786_v39, 2 }
 0x3ad   :  { %5153 = vst [vmem:[#allocation1 + $0x4] ss:$9 sm:$0xff] %v4772_v19  ;;  %v4950_v38 = vunpack.i.h.s16 %v4805_v48  ;;  %v11088_v13 = vpack.i.b16 %v4802_v0, %v4946_v12 }
 0x3ae   :  { %5157 = vst [vmem:[#allocation1 + $0x6] ss:$9 sm:$0xff] %v4778_v51  ;;  %v4818_v51 = vrot.slane %v4816_v24, 2 }
 0x3af   :  { %v11090_v53 = vpack.i.b16 %v4808_v42, %v4950_v38 }
 0x3b0   :  { %4093 = vmatmul.bf16.gmra.mxu1 %v14787_v20  ;;  %4146 = vmatmul.bf16.gmra.mxu2 %v14789_v35  ;;  %v3942_v20 = vpop.f32.mrf.mxu1  ;;  %v4773_v35 = vsel %vm18038_vm2, %v148_v59, %v4580_v40  ;;  %v4952_v59 = vunpack.i.h.s16 %v4808_v42  ;;  %v4958_v60 = vunpack.i.h.s16 %v4818_v51  ;;  %vm18061_vm2 = vmmov %vm18050_vm3  ;;  %v18062_v42 = vld [vmem:[#allocation26_spill] sm:$0xff] }
 0x3b1   :  { %v4775_v9 = vrot.slane %v4773_v35, 2  ;;  %v3943_v33 = vadd.f32 %v15166_v4, %v3942_v20  ;;  %v4813_v20 = vsel %vm18057_vm7, %v12888_v15, %v18056_v32  ;;  %vm18065_vm15 = vmmov %vm18061_vm2 }
 0x3b2   :  { %v4043_v26 = vpop.f32.mrf.mxu3  ;;  %vm18066_vm9 = vmmov %vm18061_vm2 }
 0x3b3   :  { %v15316_v37 = vadd.f32 %v4043_v26, %v3991_v25  ;;  %v3993_v50 = vpop.f32.mrf.mxu2  ;;  %5155 = vst [vmem:[#allocation1 + $0x5] ss:$9 sm:$0xff] %v4775_v9  ;;  %v4948_v25 = vunpack.i.h.s16 %v4802_v0  ;;  %v4791_v26 = vrot.slane %v4789_v22, 3  ;;  %v4815_v9 = vrot.slane %v4813_v20, 1  ;;  %vm18074_vm7 = vmmov %vm18058_vm14 }
 0x3b4   :  { %v3994_v10 = vadd.f32 %v3993_v50, %v3941_v56  ;;  %v11087_v56 = vpack.i.b16 %v4798_v55, %v4794_v23  ;;  %v4811_v50 = vsel %vm2642_vm5, %v12888_v15, %v18056_v32  ;;  %vm18077_vm14 = vcmask 1042433  }
 0x3b5   :  { %v4956_v3 = vunpack.i.h.s16 %v4815_v9 }
 0x3b7   :  { %v11093_v55 = vpack.i.b16 %v4818_v51, %v4956_v3 }
 0x3b8   :  { %v3945_v45 = vpop.f32.mrf.mxu1 }
 0x3ba   :  { %v4046_v34 = vpop.f32.mrf.mxu3  ;;  %v5160_v40 = vld [vmem:[#allocation1] sm:$0xff] }
 0x3bb   :  { %v15333_v7 = vadd.f32 %v4046_v34, %v3994_v10  ;;  %v3995_v29 = vpop.f32.mrf.mxu2  ;;  %5162 = vst [vmem:[#allocation1] ss:$9 sm:$0xff] %v4785_v14  ;;  %v11089_v10 = vpack.i.b16 %v4805_v48, %v4948_v25  ;;  %v11091_v34 = vpack.i.b16 %v4811_v50, %v4952_v59 }
 0x3bc   :  { %v3996_v6 = vadd.f32 %v3995_v29, %v3943_v33  ;;  %11101 = vmatmul.msk.bf16.gmra.mxu3 %vm18050_vm3, %v15303_v41  ;;  %5164 = vst [vmem:[#allocation1 + $0x1] ss:$9 sm:$0xff] %v4788_v5  ;;  %v4954_v41 = vunpack.i.h.s16 %v4811_v50  ;;  %v18059_v33 = vld [vmem:[#allocation25_spill] sm:$0xff]  ;;  %vm18076_vm3 = vcmask 1044484  }
 0x3bd   :  { %5166 = vst [vmem:[#allocation1 + $0x2] ss:$9 sm:$0xff] %v4791_v26  ;;  %v18060_v39 = vrot.slane %v18059_v33, 3 }
 0x3be   :  { %5168 = vst [vmem:[#allocation1 + $0x3] ss:$9 sm:$0xff] %v11087_v56  ;;  %v11092_v46 = vpack.i.b16 %v4815_v9, %v4954_v41 }
 0x3bf   :  { %5170 = vst [vmem:[#allocation1 + $0x4] ss:$9 sm:$0xff] %v11088_v13  ;;  %v11094_v48 = vpack.i.b16 %v18060_v39, %v4958_v60 }
 0x3c0   :  { %4098 = vmatmul.bf16.gmra.mxu1 %v14889_v16  ;;  %4151 = vmatmul.bf16.gmra.mxu2 %v14891_v11  ;;  %v3946_v16 = vadd.f32 %v15166_v4, %v3945_v45  ;;  %v15366_v11 = vpop.f32.mrf.mxu1  ;;  %5172 = vst [vmem:[#allocation1 + $0x5] ss:$9 sm:$0xff] %v11089_v10 }
 0x3c1   :  { %5174 = vst [vmem:[#allocation1 + $0x6] ss:$9 sm:$0xff] %v11090_v53 }
 0x3c2   :  { %v4048_v31 = vpop.f32.mrf.mxu3  ;;  %5176 = vst [vmem:[#allocation1 + $0x7] ss:$9 sm:$0xff] %v11091_v34 }
 0x3c3   :  { %v15350_v17 = vadd.f32 %v4048_v31, %v3996_v6  ;;  %v3998_v35 = vpop.f32.mrf.mxu2  ;;  %v18063_v6 = vld [vmem:[#allocation27_spill] sm:$0xff] }
 0x3c4   :  { %v3999_v19 = vadd.f32 %v3998_v35, %v3946_v16  ;;  %v18064_v45 = vpack.i.b16 %v18062_v42, %v18063_v6 }
 0x3c8   :  { %v3950_v30 = vpop.f32.mrf.mxu1 }
 0x3c9   :  { %v5177_v29 = vld [vmem:[#allocation1] sm:$0xff]  ;;  %v3951_v22 = vadd.f32 %v15166_v4, %v3950_v30 }
 0x3ca   :  { %v4051_v28 = vpop.f32.mrf.mxu3  ;;  %5179 = vst [vmem:[#allocation1] ss:$9 sm:$0xff] %v11092_v46 }
 0x3cb   :  { %v15368_v57 = vadd.f32 %v4051_v28, %v3999_v19  ;;  %v15370_v63 = vpop.f32.mrf.mxu2  ;;  %5181 = vst [vmem:[#allocation1 + $0x1] ss:$9 sm:$0xff] %v11093_v55 }
 0x3cc   :  { %11102 = vmatmul.msk.bf16.gmra.mxu3 %vm18061_vm2, %v5160_v40  ;;  %5183 = vst [vmem:[#allocation1 + $0x2] ss:$9 sm:$0xff] %v11094_v48  ;;  %vm18078_vm2 = vcmask 1043458  }
 0x3cd   :  { %5185 = vst [vmem:[#allocation1 + $0x3] ss:$9 sm:$0xff] %v18064_v45 }
 0x3d0   :  { %4103 = vmatmul.bf16.gmra.mxu1 %v15006_v2  ;;  %4156 = vmatmul.bf16.gmra.mxu2 %v15008_v54  ;;  %v15383_v23 = vpop.f32.mrf.mxu1 }
 0x3d2   :  { %v15372_v0 = vpop.f32.mrf.mxu3 }
 0x3d3   :  { %v4003_v14 = vpop.f32.mrf.mxu2 }
 0x3d4   :  { %v4004_v12 = vadd.f32 %v4003_v14, %v3951_v22  ;;  %v5186_v50 = vld [vmem:[#allocation1] sm:$0xff] }
 0x3d8   :  { %v3955_v54 = vpop.f32.mrf.mxu1 }
 0x3d9   :  { %v3956_v26 = vadd.f32 %v15166_v4, %v3955_v54 }
 0x3da   :  { %v4056_v31 = vpop.f32.mrf.mxu3 }
 0x3db   :  { %v15385_v2 = vadd.f32 %v4056_v31, %v4004_v12  ;;  %v15387_v5 = vpop.f32.mrf.mxu2 }
 0x3dc   :  { %11103 = vmatmul.msk.bf16.gmra.mxu3 %vm18065_vm15, %v5177_v29  ;;  %vm18079_vm15 = vcmask 1045508  }
 0x3e0   :  { %4108 = vmatmul.bf16.gmra.mxu1 %v15056_v43  ;;  %4161 = vmatmul.bf16.gmra.mxu2 %v15058_v18  ;;  %v3957_v59 = vpop.f32.mrf.mxu1  ;;  %v15403_v43 = vld [vmem:[%s17732_s7] ss:$0 sm:$0xff] }
 0x3e2   :  { %v15389_v25 = vpop.f32.mrf.mxu3 }
 0x3e3   :  { %v4008_v38 = vpop.f32.mrf.mxu2 }
 0x3e4   :  { %v4009_v56 = vadd.f32 %v4008_v38, %v3956_v26 }
 0x3ea   :  { %v4061_v40 = vpop.f32.mrf.mxu3 }
 0x3eb   :  { %v15395_v13 = vadd.f32 %v4061_v40, %v4009_v56  ;;  %v4010_v15 = vpop.f32.mrf.mxu2 }
 0x3ec   :  { %11104 = vmatmul.msk.bf16.gmra.mxu3 %vm18066_vm9, %v5186_v50  ;;  %vm18080_vm9 = vmmov %vm18076_vm3 }
 0x3ed   :  { %v4074_v10 = vpop.f32.mrf.mxu1 }
 0x3ee   :  { %v4075_v18 = vadd.f32 %v4074_v10, %v15193_v44 }
 0x3f0   :  { %4113 = vmatmul.bf16.gmra.mxu1 %v15080_v49  ;;  %4166 = vmatmul.bf16.gmra.mxu2 %v15082_v61 }
 0x3f2   :  { %v4063_v32 = vpop.f32.mrf.mxu3 }
 0x3f3   :  { %v4127_v4 = vpop.f32.mrf.mxu2 }
 0x3f4   :  { %v4128_v20 = vadd.f32 %v4127_v4, %v4075_v18 }
 0x3f5   :  { %v4076_v22 = vpop.f32.mrf.mxu1 }
 0x3f6   :  { %v4188_v24 = vrot.slane %v4128_v20, 1  ;;  %v4189_v49 = vrot.slane %v4128_v20, 2  ;;  %v4190_v35 = vrot.slane %v4128_v20, 3  ;;  %v4191_v34 = vrot.slane %v4128_v20, 4 }
 0x3f7   :  { %v4192_v19 = vrot.slane %v4128_v20, 5  ;;  %v4193_v61 = vrot.slane %v4128_v20, 6  ;;  %v4194_v9 = vrot.slane %v4128_v20, 7  ;;  %v4426_v28 = vmax.f32 %v4128_v20, 0.0 }
 0x3f8   :  { %v4427_v51 = vmax.f32 %v4188_v24, 0.0  ;;  %v4428_v41 = vmax.f32 %v4189_v49, 0.0  ;;  %v4429_v3 = vmax.f32 %v4190_v35, 0.0  ;;  %v4430_v60 = vmax.f32 %v4191_v34, 0.0 }
 0x3f9   :  { %v4431_v46 = vmax.f32 %v4192_v19, 0.0  ;;  %v4432_v30 = vmax.f32 %v4193_v61, 0.0  ;;  %v4433_v44 = vmax.f32 %v4194_v9, 0.0  ;;  %v4077_v15 = vadd.f32 %v4076_v22, %v15218_v21 }
 0x3fa   :  { %v5217_v16 = vpop.f32.mrf.mxu3 }
 0x3fb   :  { %v5218_v53 = vadd.f32 %v15403_v43, %v5217_v16  ;;  %v4129_v38 = vpop.f32.mrf.mxu2 }
 0x3fc   :  { %v4130_v20 = vadd.f32 %v4129_v38, %v4077_v15 }
 0x3fd   :  { %v5278_v55 = vrot.slane %v5218_v53, 1  ;;  %v5279_v33 = vrot.slane %v5218_v53, 2  ;;  %v5280_v39 = vrot.slane %v5218_v53, 3  ;;  %v5281_v48 = vrot.slane %v5218_v53, 4 }
 0x3fe   :  { %v5282_v29 = vrot.slane %v5218_v53, 5  ;;  %v5283_v42 = vrot.slane %v5218_v53, 6  ;;  %v5284_v6 = vrot.slane %v5218_v53, 7  ;;  %v5516_v45 = vadd.f32 %v5218_v53, %v4426_v28 }
 0x3ff   :  { %v5517_v14 = vadd.f32 %v5278_v55, %v4427_v51  ;;  %v5518_v12 = vadd.f32 %v5279_v33, %v4428_v41  ;;  %v5519_v31 = vadd.f32 %v5280_v39, %v4429_v3  ;;  %v5520_v54 = vadd.f32 %v5281_v48, %v4430_v60 }
 0x400   :  { %v5521_v26 = vadd.f32 %v5282_v29, %v4431_v46  ;;  %v5522_v59 = vadd.f32 %v5283_v42, %v4432_v30  ;;  %v5652_v56 = vmax.f32 %v5516_v45, 0.0  ;;  %v5523_v32 = vadd.f32 %v5284_v6, %v4433_v44 }
 0x401   :  { %v5653_v40 = vmax.f32 %v5517_v14, 0.0  ;;  %v5654_v50 = vmax.f32 %v5518_v12, 0.0  ;;  %v5655_v10 = vmax.f32 %v5519_v31, 0.0  ;;  %v5656_v4 = vmax.f32 %v5520_v54, 0.0  ;;  %v4079_v54 = vpop.f32.mrf.mxu1 }
 0x402   :  { %v5219_v18 = vpop.f32.mrf.mxu3  ;;  %5933 = vst [vmem:[#allocation1] ss:$9 sm:$0xff] %v5652_v56  ;;  %v5657_v16 = vmax.f32 %v5521_v26, 0.0  ;;  %v5658_v53 = vmax.f32 %v5522_v59, 0.0  ;;  %v4195_v24 = vrot.slane %v4130_v20, 1  ;;  %v4196_v49 = vrot.slane %v4130_v20, 2 }
 0x403   :  { %5935 = vst [vmem:[#allocation1 + $0x1] ss:$9 sm:$0xff] %v5653_v40  ;;  %v4197_v35 = vrot.slane %v4130_v20, 3  ;;  %v5220_v34 = vadd.f32 %v15403_v43, %v5219_v18  ;;  %v5659_v19 = vmax.f32 %v5523_v32, 0.0  ;;  %v4198_v61 = vrot.slane %v4130_v20, 4  ;;  %v4132_v32 = vpop.f32.mrf.mxu2 }
 0x404   :  { %5937 = vst [vmem:[#allocation1 + $0x2] ss:$9 sm:$0xff] %v5654_v50  ;;  %v4199_v21 = vrot.slane %v4130_v20, 5  ;;  %v4435_v9 = vmax.f32 %v4195_v24, 0.0  ;;  %v4200_v28 = vrot.slane %v4130_v20, 6  ;;  %v4434_v51 = vmax.f32 %v4130_v20, 0.0 }
 0x405   :  { %5939 = vst [vmem:[#allocation1 + $0x3] ss:$9 sm:$0xff] %v5655_v10  ;;  %v4436_v41 = vmax.f32 %v4196_v49, 0.0  ;;  %v4201_v3 = vrot.slane %v4130_v20, 7  ;;  %v4437_v60 = vmax.f32 %v4197_v35, 0.0  ;;  %v5285_v46 = vrot.slane %v5220_v34, 1 }
 0x406   :  { %5941 = vst [vmem:[#allocation1 + $0x4] ss:$9 sm:$0xff] %v5656_v4  ;;  %v4438_v30 = vmax.f32 %v4198_v61, 0.0  ;;  %v5286_v44 = vrot.slane %v5220_v34, 2  ;;  %v4439_v55 = vmax.f32 %v4199_v21, 0.0  ;;  %v5287_v33 = vrot.slane %v5220_v34, 3 }
 0x407   :  { %5943 = vst [vmem:[#allocation1 + $0x5] ss:$9 sm:$0xff] %v5657_v16  ;;  %v5525_v39 = vadd.f32 %v5285_v46, %v4435_v9  ;;  %v4440_v48 = vmax.f32 %v4200_v28, 0.0  ;;  %v5288_v29 = vrot.slane %v5220_v34, 4  ;;  %v5524_v22 = vadd.f32 %v5220_v34, %v4434_v51 }
 0x408   :  { %5945 = vst [vmem:[#allocation1 + $0x6] ss:$9 sm:$0xff] %v5658_v53  ;;  %v5526_v42 = vadd.f32 %v5286_v44, %v4436_v41  ;;  %v4441_v6 = vmax.f32 %v4201_v3, 0.0  ;;  %v5289_v45 = vrot.slane %v5220_v34, 5  ;;  %v5527_v14 = vadd.f32 %v5287_v33, %v4437_v60 }
 0x409   :  { %5947 = vst [vmem:[#allocation1 + $0x7] ss:$9 sm:$0xff] %v5659_v19  ;;  %v5290_v12 = vrot.slane %v5220_v34, 6  ;;  %v5528_v31 = vadd.f32 %v5288_v29, %v4438_v30  ;;  %v5291_v26 = vrot.slane %v5220_v34, 7  ;;  %v5661_v59 = vmax.f32 %v5525_v39, 0.0  ;;  %v4081_v28 = vpop.f32.mrf.mxu1 }
 0x40a   :  { %v5529_v38 = vadd.f32 %v5289_v45, %v4439_v55  ;;  %v5660_v40 = vmax.f32 %v5524_v22, 0.0  ;;  %v5662_v15 = vmax.f32 %v5526_v42, 0.0  ;;  %v5663_v18 = vmax.f32 %v5527_v14, 0.0  ;;  %v5222_v35 = vpop.f32.mrf.mxu3 }
 0x40b   :  { %v5530_v56 = vadd.f32 %v5290_v12, %v4440_v48  ;;  %v5531_v10 = vadd.f32 %v5291_v26, %v4441_v6  ;;  %v4080_v4 = vadd.f32 %v4079_v54, %v15228_v58  ;;  %v5664_v20 = vmax.f32 %v5528_v31, 0.0  ;;  %v4134_v30 = vpop.f32.mrf.mxu2 }
 0x40c   :  { %v5665_v16 = vmax.f32 %v5529_v38, 0.0  ;;  %v5223_v19 = vadd.f32 %v15403_v43, %v5222_v35  ;;  %v4082_v48 = vadd.f32 %v4081_v28, %v15250_v47 }
 0x40d   :  { %v4133_v53 = vadd.f32 %v4132_v32, %v4080_v4  ;;  %v5666_v24 = vmax.f32 %v5530_v56, 0.0  ;;  %v5667_v49 = vmax.f32 %v5531_v10, 0.0 }
 0x40e   :  { %v5292_v60 = vrot.slane %v5223_v19, 1  ;;  %v5293_v39 = vrot.slane %v5223_v19, 2  ;;  %v5294_v42 = vrot.slane %v5223_v19, 3  ;;  %v5295_v45 = vrot.slane %v5223_v19, 4 }
 0x40f   :  { %v4442_v34 = vmax.f32 %v4133_v53, 0.0  ;;  %v4202_v61 = vrot.slane %v4133_v53, 1  ;;  %v4203_v58 = vrot.slane %v4133_v53, 2  ;;  %v4204_v9 = vrot.slane %v4133_v53, 3 }
 0x410   :  { %v15409_v50 = vld [vmem:[#allocation1] sm:$0xff]  ;;  %v4205_v51 = vrot.slane %v4133_v53, 4  ;;  %v4206_v41 = vrot.slane %v4133_v53, 5  ;;  %v4207_v55 = vrot.slane %v4133_v53, 6  ;;  %v4208_v29 = vrot.slane %v4133_v53, 7 }
 0x411   :  { %5949 = vst [vmem:[#allocation1] ss:$9 sm:$0xff] %v5660_v40  ;;  %v5532_v21 = vadd.f32 %v5223_v19, %v4442_v34  ;;  %v4443_v3 = vmax.f32 %v4202_v61, 0.0  ;;  %v4444_v33 = vmax.f32 %v4203_v58, 0.0  ;;  %v4445_v22 = vmax.f32 %v4204_v9, 0.0 }
 0x412   :  { %5950 = vst [vmem:[#allocation1 + $0x1] ss:$9 sm:$0xff] %v5661_v59  ;;  %v4446_v6 = vmax.f32 %v4205_v51, 0.0  ;;  %v4135_v14 = vadd.f32 %v4134_v30, %v4082_v48  ;;  %v4447_v12 = vmax.f32 %v4206_v41, 0.0  ;;  %v5296_v31 = vrot.slane %v5223_v19, 5  ;;  %v5224_v32 = vpop.f32.mrf.mxu3  ;;  %v4084_v51 = vpop.f32.mrf.mxu1 }
 0x413   :  { %5951 = vst [vmem:[#allocation1 + $0x2] ss:$9 sm:$0xff] %v5662_v15  ;;  %v5668_v46 = vmax.f32 %v5532_v21, 0.0  ;;  %v5533_v54 = vadd.f32 %v5292_v60, %v4443_v3  ;;  %v4448_v26 = vmax.f32 %v4207_v55, 0.0  ;;  %v5297_v38 = vrot.slane %v5223_v19, 6  ;;  %v4137_v55 = vpop.f32.mrf.mxu2 }
 0x414   :  { %5952 = vst [vmem:[#allocation1 + $0x3] ss:$9 sm:$0xff] %v5663_v18  ;;  %v5534_v59 = vadd.f32 %v5293_v39, %v4444_v33  ;;  %v4449_v56 = vmax.f32 %v4208_v29, 0.0  ;;  %v5298_v40 = vrot.slane %v5223_v19, 7  ;;  %v5535_v15 = vadd.f32 %v5294_v42, %v4445_v22 }
 0x415   :  { %5953 = vst [vmem:[#allocation1 + $0x4] ss:$9 sm:$0xff] %v5664_v20  ;;  %v5536_v10 = vadd.f32 %v5295_v45, %v4446_v6  ;;  %v4450_v18 = vmax.f32 %v4135_v14, 0.0  ;;  %v5537_v47 = vadd.f32 %v5296_v31, %v4447_v12  ;;  %v5669_v4 = vmax.f32 %v5533_v54, 0.0 }
 0x416   :  { %5954 = vst [vmem:[#allocation1 + $0x5] ss:$9 sm:$0xff] %v5665_v16  ;;  %v5538_v20 = vadd.f32 %v5297_v38, %v4448_v26  ;;  %v5670_v16 = vmax.f32 %v5534_v59, 0.0  ;;  %v5671_v35 = vmax.f32 %v5535_v15, 0.0  ;;  %v4209_v61 = vrot.slane %v4135_v14, 1 }
 0x417   :  { %5955 = vst [vmem:[#allocation1 + $0x6] ss:$9 sm:$0xff] %v5666_v24  ;;  %v5225_v24 = vadd.f32 %v15403_v43, %v5224_v32  ;;  %v5672_v34 = vmax.f32 %v5536_v10, 0.0  ;;  %v5673_v19 = vmax.f32 %v5537_v47, 0.0  ;;  %v4210_v58 = vrot.slane %v4135_v14, 2 }
 0x418   :  { %5956 = vst [vmem:[#allocation1 + $0x7] ss:$9 sm:$0xff] %v5667_v49  ;;  %v5539_v49 = vadd.f32 %v5298_v40, %v4449_v56  ;;  %v5674_v9 = vmax.f32 %v5538_v20, 0.0  ;;  %v4211_v28 = vrot.slane %v4135_v14, 3  ;;  %v4212_v3 = vrot.slane %v4135_v14, 4 }
 0x419   :  { %v5540_v21 = vadd.f32 %v5225_v24, %v4450_v18  ;;  %v4213_v60 = vrot.slane %v4135_v14, 5  ;;  %v4214_v33 = vrot.slane %v4135_v14, 6  ;;  %v4452_v39 = vmax.f32 %v4210_v58, 0.0 }
 0x41a   :  { %v5675_v41 = vmax.f32 %v5539_v49, 0.0  ;;  %v4085_v48 = vadd.f32 %v4084_v51, %v15274_v1  ;;  %v4215_v29 = vrot.slane %v4135_v14, 7  ;;  %v4453_v22 = vmax.f32 %v4211_v28, 0.0  ;;  %v5227_v10 = vpop.f32.mrf.mxu3 }
 0x41b   :  { %v5676_v30 = vmax.f32 %v5540_v21, 0.0  ;;  %v5299_v42 = vrot.slane %v5225_v24, 1  ;;  %v4454_v6 = vmax.f32 %v4212_v3, 0.0  ;;  %v5300_v45 = vrot.slane %v5225_v24, 2 }
 0x41c   :  { %v15420_v12 = vadd.f32 %v4137_v55, %v4085_v48  ;;  %v4455_v31 = vmax.f32 %v4213_v60, 0.0  ;;  %v5301_v54 = vrot.slane %v5225_v24, 3  ;;  %v4456_v38 = vmax.f32 %v4214_v33, 0.0  ;;  %v4139_v33 = vpop.f32.mrf.mxu2 }
 0x41d   :  { %v5302_v59 = vrot.slane %v5225_v24, 4  ;;  %v5542_v56 = vadd.f32 %v5300_v45, %v4452_v39  ;;  %v4457_v40 = vmax.f32 %v4215_v29, 0.0  ;;  %v5303_v15 = vrot.slane %v5225_v24, 5 }
 0x41e   :  { %v5543_v32 = vadd.f32 %v5301_v54, %v4453_v22  ;;  %v5304_v18 = vrot.slane %v5225_v24, 6  ;;  %v4458_v14 = vmax.f32 %v15420_v12, 0.0  ;;  %v15424_v47 = vadd.f32 %v15403_v43, %v5227_v10 }
 0x41f   :  { %v15413_v44 = vld [vmem:[#allocation1] sm:$0xff]  ;;  %v5544_v1 = vadd.f32 %v5302_v59, %v4454_v6  ;;  %v5545_v20 = vadd.f32 %v5303_v15, %v4455_v31  ;;  %v4216_v58 = vrot.slane %v15420_v12, 1  ;;  %v4218_v39 = vrot.slane %v15420_v12, 3 }
 0x420   :  { %5958 = vst [vmem:[#allocation1] ss:$9 sm:$0xff] %v5668_v46  ;;  %v4451_v46 = vmax.f32 %v4209_v61, 0.0  ;;  %v5546_v49 = vadd.f32 %v5304_v18, %v4456_v38  ;;  %v5679_v21 = vmax.f32 %v5543_v32, 0.0  ;;  %v5306_v3 = vrot.slane %v15424_v47, 1 }
 0x421   :  { %v5681_v28 = vmax.f32 %v5545_v20, 0.0  ;;  %v4219_v29 = vrot.slane %v15420_v12, 4  ;;  %v4220_v22 = vrot.slane %v15420_v12, 5  ;;  %v4221_v6 = vrot.slane %v15420_v12, 6 }
 0x422   :  { %v5541_v26 = vadd.f32 %v5299_v42, %v4451_v46  ;;  %v5682_v51 = vmax.f32 %v5546_v49, 0.0  ;;  %v4086_v46 = vpop.f32.mrf.mxu1  ;;  %v5307_v31 = vrot.slane %v15424_v47, 2  ;;  %v4461_v38 = vmax.f32 %v4218_v39, 0.0  ;;  %v5229_v15 = vpop.f32.mrf.mxu3 }
 0x423   :  { %v4087_v48 = vadd.f32 %v4086_v46, %v15279_v8  ;;  %v5308_v59 = vrot.slane %v15424_v47, 3  ;;  %v4462_v8 = vmax.f32 %v4219_v29, 0.0  ;;  %v4463_v32 = vmax.f32 %v4220_v22, 0.0 }
 0x424   :  { %v5310_v10 = vrot.slane %v15424_v47, 5  ;;  %v5312_v20 = vrot.slane %v15424_v47, 7  ;;  %v15450_v49 = vadd.f32 %v15403_v43, %v5229_v15 }
 0x425   :  { %v15436_v42 = vadd.f32 %v4139_v33, %v4087_v48  ;;  %v4142_v33 = vpop.f32.mrf.mxu2 }
 0x427   :  { %v15416_v53 = vld [vmem:[#allocation1] sm:$0xff]  ;;  %v4223_v18 = vrot.slane %v15436_v42, 1  ;;  %v4225_v48 = vrot.slane %v15436_v42, 3 }
 0x428   :  { %5960 = vst [vmem:[#allocation1] ss:$9 sm:$0xff] %v5669_v4  ;;  %v5305_v4 = vrot.slane %v5225_v24, 7 }
 0x429   :  { %5961 = vst [vmem:[#allocation1 + $0x1] ss:$9 sm:$0xff] %v5670_v16  ;;  %v5677_v16 = vmax.f32 %v5541_v26, 0.0  ;;  %v4222_v26 = vrot.slane %v15420_v12, 7  ;;  %v4469_v15 = vmax.f32 %v4225_v48, 0.0 }
 0x42a   :  { %5962 = vst [vmem:[#allocation1 + $0x2] ss:$9 sm:$0xff] %v5671_v35  ;;  %v5678_v35 = vmax.f32 %v5542_v56, 0.0  ;;  %v5547_v61 = vadd.f32 %v5305_v4, %v4457_v40  ;;  %v5309_v40 = vrot.slane %v15424_v47, 4 }
 0x42b   :  { %5963 = vst [vmem:[#allocation1 + $0x3] ss:$9 sm:$0xff] %v5672_v34 }
 0x42c   :  { %5964 = vst [vmem:[#allocation1 + $0x4] ss:$9 sm:$0xff] %v5673_v19  ;;  %v5680_v19 = vmax.f32 %v5544_v1, 0.0  ;;  %v5683_v24 = vmax.f32 %v5547_v61, 0.0  ;;  %v4464_v1 = vmax.f32 %v4221_v6, 0.0  ;;  %v4466_v61 = vmax.f32 %v15436_v42, 0.0 }
 0x42d   :  { %5965 = vst [vmem:[#allocation1 + $0x5] ss:$9 sm:$0xff] %v5674_v9  ;;  %v5548_v9 = vadd.f32 %v15424_v47, %v4458_v14  ;;  %v5311_v14 = vrot.slane %v15424_v47, 6  ;;  %v4226_v6 = vrot.slane %v15436_v42, 4 }
 0x42e   :  { %5966 = vst [vmem:[#allocation1 + $0x6] ss:$9 sm:$0xff] %v5675_v41  ;;  %v4459_v41 = vmax.f32 %v4216_v58, 0.0  ;;  %v5556_v47 = vadd.f32 %v15450_v49, %v4466_v61  ;;  %v5318_v61 = vrot.slane %v15450_v49, 6 }
 0x42f   :  { %5967 = vst [vmem:[#allocation1 + $0x7] ss:$9 sm:$0xff] %v5676_v30  ;;  %v5684_v60 = vmax.f32 %v5548_v9, 0.0  ;;  %v4217_v30 = vrot.slane %v15420_v12, 2  ;;  %v4465_v12 = vmax.f32 %v4222_v26, 0.0  ;;  %v5554_v58 = vadd.f32 %v5311_v14, %v4464_v1 }
 0x430   :  { %v5549_v55 = vadd.f32 %v5306_v3, %v4459_v41  ;;  %v5313_v41 = vrot.slane %v15450_v49, 1  ;;  %v4089_v3 = vpop.f32.mrf.mxu1  ;;  %v4228_v26 = vrot.slane %v15436_v42, 6 }
 0x431   :  { %v4460_v45 = vmax.f32 %v4217_v30, 0.0  ;;  %v4224_v30 = vrot.slane %v15436_v42, 2  ;;  %v5690_v39 = vmax.f32 %v5554_v58, 0.0  ;;  %v4090_v29 = vadd.f32 %v4089_v3, %v15288_v62 }
 0x432   :  { %v5685_v54 = vmax.f32 %v5549_v55, 0.0  ;;  %v4470_v62 = vmax.f32 %v4226_v6, 0.0  ;;  %v5319_v58 = vrot.slane %v15450_v49, 7 }
 0x433   :  { %v5550_v4 = vadd.f32 %v5307_v31, %v4460_v45  ;;  %v4227_v45 = vrot.slane %v15436_v42, 5  ;;  %v5692_v31 = vmax.f32 %v5556_v47, 0.0 }
 0x435   :  { %v5686_v9 = vmax.f32 %v5550_v4, 0.0  ;;  %v4472_v4 = vmax.f32 %v4228_v26, 0.0 }
 0x436   :  { %v15426_v34 = vld [vmem:[#allocation1] sm:$0xff] }
 0x437   :  { %5969 = vst [vmem:[#allocation1] ss:$9 sm:$0xff] %v5677_v16  ;;  %v5551_v16 = vadd.f32 %v5308_v59, %v4461_v38  ;;  %v4468_v38 = vmax.f32 %v4224_v30, 0.0 }
 0x438   :  { %5970 = vst [vmem:[#allocation1 + $0x1] ss:$9 sm:$0xff] %v5678_v35  ;;  %v5552_v35 = vadd.f32 %v5309_v40, %v4462_v8  ;;  %v5232_v8 = vpop.f32.mrf.mxu3  ;;  %v4229_v40 = vrot.slane %v15436_v42, 7  ;;  %v5317_v42 = vrot.slane %v15450_v49, 5 }
 0x439   :  { %5971 = vst [vmem:[#allocation1 + $0x2] ss:$9 sm:$0xff] %v5679_v21  ;;  %v5553_v21 = vadd.f32 %v5310_v10, %v4463_v32  ;;  %v5314_v32 = vrot.slane %v15450_v49, 2  ;;  %v4471_v10 = vmax.f32 %v4227_v45, 0.0  ;;  %v15470_v14 = vadd.f32 %v15403_v43, %v5232_v8 }
 0x43a   :  { %5972 = vst [vmem:[#allocation1 + $0x3] ss:$9 sm:$0xff] %v5680_v19  ;;  %v4467_v19 = vmax.f32 %v4223_v18, 0.0  ;;  %v5315_v18 = vrot.slane %v15450_v49, 3 }
 0x43b   :  { %5973 = vst [vmem:[#allocation1 + $0x4] ss:$9 sm:$0xff] %v5681_v28  ;;  %v5555_v28 = vadd.f32 %v5312_v20, %v4465_v12  ;;  %v5689_v46 = vmax.f32 %v5553_v21, 0.0  ;;  %v5316_v12 = vrot.slane %v15450_v49, 4  ;;  %v5558_v20 = vadd.f32 %v5314_v32, %v4468_v38  ;;  %v4144_v38 = vpop.f32.mrf.mxu2 }
 0x43c   :  { %5974 = vst [vmem:[#allocation1 + $0x5] ss:$9 sm:$0xff] %v5682_v51  ;;  %v5687_v51 = vmax.f32 %v5551_v16, 0.0  ;;  %v5557_v55 = vadd.f32 %v5313_v41, %v4467_v19  ;;  %v4473_v16 = vmax.f32 %v4229_v40, 0.0  ;;  %v5562_v41 = vadd.f32 %v5318_v61, %v4472_v4 }
 0x43d   :  { %5975 = vst [vmem:[#allocation1 + $0x6] ss:$9 sm:$0xff] %v5683_v24  ;;  %v5691_v22 = vmax.f32 %v5555_v28, 0.0  ;;  %v5560_v21 = vadd.f32 %v5316_v12, %v4470_v62  ;;  %v5694_v3 = vmax.f32 %v5558_v20, 0.0  ;;  %v5322_v20 = vrot.slane %v15470_v14, 3 }
 0x43e   :  { %5976 = vst [vmem:[#allocation1 + $0x7] ss:$9 sm:$0xff] %v5684_v60  ;;  %v5688_v60 = vmax.f32 %v5552_v35, 0.0  ;;  %v5693_v59 = vmax.f32 %v5557_v55, 0.0  ;;  %v5559_v35 = vadd.f32 %v5315_v18, %v4469_v15  ;;  %v5563_v47 = vadd.f32 %v5319_v58, %v4473_v16 }
 0x43f   :  { %v5696_v55 = vmax.f32 %v5560_v21, 0.0  ;;  %v5324_v21 = vrot.slane %v15470_v14, 5 }
 0x440   :  { %v5234_v18 = vpop.f32.mrf.mxu3 }
 0x441   :  { %v15498_v58 = vadd.f32 %v15403_v43, %v5234_v18 }
 0x445   :  { %v15442_v56 = vld [vmem:[#allocation1] sm:$0xff] }
 0x446   :  { %5978 = vst [vmem:[#allocation1] ss:$9 sm:$0xff] %v5685_v54  ;;  %v15462_v54 = vadd.f32 %v4142_v33, %v4090_v29  ;;  %v5698_v29 = vmax.f32 %v5562_v41, 0.0  ;;  %v5326_v41 = vrot.slane %v15470_v14, 7 }
 0x448   :  { %v4230_v1 = vrot.slane %v15462_v54, 1  ;;  %v4474_v19 = vmax.f32 %v15462_v54, 0.0  ;;  %v4231_v48 = vrot.slane %v15462_v54, 2  ;;  %v4232_v8 = vrot.slane %v15462_v54, 3 }
 0x449   :  { %v4233_v62 = vrot.slane %v15462_v54, 4  ;;  %v4234_v32 = vrot.slane %v15462_v54, 5  ;;  %v4236_v4 = vrot.slane %v15462_v54, 7 }
 0x44a   :  { %v4475_v28 = vmax.f32 %v4230_v1, 0.0  ;;  %v5564_v33 = vadd.f32 %v15470_v14, %v4474_v19  ;;  %v4476_v45 = vmax.f32 %v4231_v48, 0.0  ;;  %v4235_v1 = vrot.slane %v15462_v54, 6  ;;  %v4147_v48 = vpop.f32.mrf.mxu2 }
 0x44b   :  { %v4477_v12 = vmax.f32 %v4232_v8, 0.0  ;;  %v4479_v61 = vmax.f32 %v4234_v32, 0.0  ;;  %v5325_v54 = vrot.slane %v15470_v14, 6 }
 0x44c   :  { %v5700_v6 = vmax.f32 %v5564_v33, 0.0 }
 0x44d   :  { %v15453_v24 = vld [vmem:[#allocation1] sm:$0xff] }
 0x44e   :  { %5980 = vst [vmem:[#allocation1] ss:$9 sm:$0xff] %v5686_v9  ;;  %v5561_v9 = vadd.f32 %v5317_v42, %v4471_v10  ;;  %v4478_v42 = vmax.f32 %v4233_v62, 0.0 }
 0x44f   :  { %5981 = vst [vmem:[#allocation1 + $0x1] ss:$9 sm:$0xff] %v5687_v51  ;;  %v5320_v51 = vrot.slane %v15470_v14, 1 }
 0x450   :  { %5982 = vst [vmem:[#allocation1 + $0x2] ss:$9 sm:$0xff] %v5688_v60  ;;  %v4091_v60 = vpop.f32.mrf.mxu1 }
 0x451   :  { %5983 = vst [vmem:[#allocation1 + $0x3] ss:$9 sm:$0xff] %v5689_v46  ;;  %v5695_v46 = vmax.f32 %v5559_v35, 0.0  ;;  %v5565_v49 = vadd.f32 %v5320_v51, %v4475_v28  ;;  %v4092_v40 = vadd.f32 %v4091_v60, %v15297_v27  ;;  %v5323_v35 = vrot.slane %v15470_v14, 4 }
 0x452   :  { %5984 = vst [vmem:[#allocation1 + $0x4] ss:$9 sm:$0xff] %v5690_v39  ;;  %v5697_v39 = vmax.f32 %v5561_v9, 0.0  ;;  %v4480_v9 = vmax.f32 %v4235_v1, 0.0  ;;  %v4481_v51 = vmax.f32 %v4236_v4, 0.0 }
 0x453   :  { %5985 = vst [vmem:[#allocation1 + $0x5] ss:$9 sm:$0xff] %v5691_v22  ;;  %v5699_v22 = vmax.f32 %v5563_v47, 0.0  ;;  %v5701_v26 = vmax.f32 %v5565_v49, 0.0  ;;  %v15487_v10 = vadd.f32 %v4144_v38, %v4092_v40  ;;  %v5568_v60 = vadd.f32 %v5323_v35, %v4478_v42 }
 0x454   :  { %5986 = vst [vmem:[#allocation1 + $0x6] ss:$9 sm:$0xff] %v5692_v31  ;;  %v5321_v31 = vrot.slane %v15470_v14, 2  ;;  %v5570_v49 = vadd.f32 %v5325_v54, %v4480_v9  ;;  %v5330_v54 = vrot.slane %v15498_v58, 4 }
 0x455   :  { %5987 = vst [vmem:[#allocation1 + $0x7] ss:$9 sm:$0xff] %v5693_v59  ;;  %v4237_v19 = vrot.slane %v15487_v10, 1  ;;  %v4238_v28 = vrot.slane %v15487_v10, 2  ;;  %v4482_v47 = vmax.f32 %v15487_v10, 0.0  ;;  %v4239_v62 = vrot.slane %v15487_v10, 3 }
 0x456   :  { %v5566_v15 = vadd.f32 %v5321_v31, %v4476_v45  ;;  %v5237_v31 = vpop.f32.mrf.mxu3  ;;  %v4240_v4 = vrot.slane %v15487_v10, 4  ;;  %v4242_v42 = vrot.slane %v15487_v10, 6 }
 0x457   :  { %v4483_v33 = vmax.f32 %v4237_v19, 0.0  ;;  %v5572_v38 = vadd.f32 %v15498_v58, %v4482_v47  ;;  %v5332_v47 = vrot.slane %v15498_v58, 6 }
 0x458   :  { %v4094_v59 = vpop.f32.mrf.mxu1  ;;  %v5702_v16 = vmax.f32 %v5566_v15, 0.0  ;;  %v5706_v15 = vmax.f32 %v5570_v49, 0.0  ;;  %v4486_v9 = vmax.f32 %v4240_v4, 0.0 }
 0x459   :  { %v4095_v32 = vadd.f32 %v4094_v59, %v15313_v52  ;;  %v5329_v52 = vrot.slane %v15498_v58, 3 }
 0x45c   :  { %v15478_v30 = vld [vmem:[#allocation1] sm:$0xff] }
 0x45d   :  { %5989 = vst [vmem:[#allocation1] ss:$9 sm:$0xff] %v5694_v3  ;;  %v5567_v3 = vadd.f32 %v5322_v20, %v4477_v12  ;;  %v4241_v12 = vrot.slane %v15487_v10, 5  ;;  %v5708_v20 = vmax.f32 %v5572_v38, 0.0 }
 0x45e   :  { %5990 = vst [vmem:[#allocation1 + $0x1] ss:$9 sm:$0xff] %v5695_v46 }
 0x45f   :  { %5991 = vst [vmem:[#allocation1 + $0x2] ss:$9 sm:$0xff] %v5696_v55  ;;  %v5569_v55 = vadd.f32 %v5324_v21, %v4479_v61  ;;  %v5703_v45 = vmax.f32 %v5567_v3, 0.0  ;;  %v4243_v61 = vrot.slane %v15487_v10, 7  ;;  %v4485_v21 = vmax.f32 %v4239_v62, 0.0 }
 0x460   :  { %5992 = vst [vmem:[#allocation1 + $0x3] ss:$9 sm:$0xff] %v5697_v39  ;;  %v15504_v46 = vpop.f32.mrf.mxu1  ;;  %v5327_v39 = vrot.slane %v15498_v58, 1  ;;  %v15526_v10 = vadd.f32 %v15403_v43, %v5237_v31 }
 0x461   :  { %5993 = vst [vmem:[#allocation1 + $0x4] ss:$9 sm:$0xff] %v5698_v29  ;;  %v4484_v29 = vmax.f32 %v4238_v28, 0.0  ;;  %v5705_v8 = vmax.f32 %v5569_v55, 0.0  ;;  %v4149_v28 = vpop.f32.mrf.mxu2  ;;  %v5575_v49 = vadd.f32 %v5329_v52, %v4485_v21  ;;  %v11183_v52 = vld [vmem:[#allocation2 + $0x70] sm:$0xf] }
 0x462   :  { %5994 = vst [vmem:[#allocation1 + $0x5] ss:$9 sm:$0xff] %v5699_v22  ;;  %v5328_v22 = vrot.slane %v15498_v58, 2  ;;  %v5573_v40 = vadd.f32 %v5327_v39, %v4483_v33  ;;  %v5239_v33 = vpop.f32.mrf.mxu3  ;;  %v4489_v39 = vmax.f32 %v4243_v61, 0.0 }
 0x463   :  { %5995 = vst [vmem:[#allocation1 + $0x6] ss:$9 sm:$0xff] %v5700_v6  ;;  %v5571_v6 = vadd.f32 %v5326_v41, %v4481_v51  ;;  %v4487_v51 = vmax.f32 %v4241_v12, 0.0  ;;  %v5331_v41 = vrot.slane %v15498_v58, 5 }
 0x464   :  { %5996 = vst [vmem:[#allocation1 + $0x7] ss:$9 sm:$0xff] %v5701_v26  ;;  %v5704_v26 = vmax.f32 %v5568_v60, 0.0  ;;  %v5574_v18 = vadd.f32 %v5328_v22, %v4484_v29  ;;  %v5709_v35 = vmax.f32 %v5573_v40, 0.0  ;;  %v4488_v60 = vmax.f32 %v4242_v42, 0.0 }
 0x465   :  { %v5707_v1 = vmax.f32 %v5571_v6, 0.0  ;;  %v5576_v22 = vadd.f32 %v5330_v54, %v4486_v9  ;;  %v5577_v6 = vadd.f32 %v5331_v41, %v4487_v51  ;;  %v5336_v41 = vrot.slane %v15526_v10, 3 }
 0x466   :  { %v5710_v59 = vmax.f32 %v5574_v18, 0.0  ;;  %v5578_v38 = vadd.f32 %v5332_v47, %v4488_v60  ;;  %v4097_v47 = vadd.f32 %v15504_v46, %v15316_v37 }
 0x468   :  { %v15520_v19 = vpop.f32.mrf.mxu1  ;;  %v5714_v12 = vmax.f32 %v5578_v38, 0.0  ;;  %v5337_v38 = vrot.slane %v15526_v10, 4 }
 0x46a   :  { %v15542_v9 = vpop.f32.mrf.mxu3 }
 0x46b   :  { %v15493_v27 = vld [vmem:[#allocation1] sm:$0xff] }
 0x46c   :  { %5998 = vst [vmem:[#allocation1] ss:$9 sm:$0xff] %v5702_v16  ;;  %v15515_v16 = vadd.f32 %v4147_v48, %v4095_v32  ;;  %v5333_v48 = vrot.slane %v15498_v58, 7  ;;  %v5712_v32 = vmax.f32 %v5576_v22, 0.0  ;;  %v5713_v58 = vmax.f32 %v5577_v6, 0.0 }
 0x46e   :  { %v4244_v3 = vrot.slane %v15515_v16, 1  ;;  %v4245_v55 = vrot.slane %v15515_v16, 2  ;;  %v4490_v29 = vmax.f32 %v15515_v16, 0.0  ;;  %v5579_v40 = vadd.f32 %v5333_v48, %v4489_v39 }
 0x46f   :  { %v4248_v48 = vrot.slane %v15515_v16, 5  ;;  %v4249_v22 = vrot.slane %v15515_v16, 6 }
 0x470   :  { %v4492_v31 = vmax.f32 %v4245_v55, 0.0  ;;  %v5580_v62 = vadd.f32 %v15526_v10, %v4490_v29  ;;  %v15537_v4 = vpop.f32.mrf.mxu1  ;;  %v5715_v61 = vmax.f32 %v5579_v40, 0.0  ;;  %v4247_v55 = vrot.slane %v15515_v16, 4 }
 0x471   :  { %v4495_v46 = vmax.f32 %v4248_v48, 0.0 }
 0x472   :  { %v5716_v21 = vmax.f32 %v5580_v62, 0.0  ;;  %v15558_v37 = vpop.f32.mrf.mxu3  ;;  %v4496_v62 = vmax.f32 %v4249_v22, 0.0 }
 0x473   :  { %v15508_v14 = vld [vmem:[#allocation1] sm:$0xff] }
 0x474   :  { %6000 = vst [vmem:[#allocation1] ss:$9 sm:$0xff] %v5703_v45  ;;  %v4491_v45 = vmax.f32 %v4244_v3, 0.0 }
 0x475   :  { %6001 = vst [vmem:[#allocation1 + $0x1] ss:$9 sm:$0xff] %v5704_v26  ;;  %v5334_v26 = vrot.slane %v15526_v10, 1 }
 0x476   :  { %6002 = vst [vmem:[#allocation1 + $0x2] ss:$9 sm:$0xff] %v5705_v8  ;;  %v5335_v8 = vrot.slane %v15526_v10, 2 }
 0x477   :  { %6003 = vst [vmem:[#allocation1 + $0x3] ss:$9 sm:$0xff] %v5706_v15  ;;  %v5711_v15 = vmax.f32 %v5575_v49, 0.0  ;;  %v15549_v49 = vadd.f32 %v4149_v28, %v4097_v47 }
 0x478   :  { %6004 = vst [vmem:[#allocation1 + $0x4] ss:$9 sm:$0xff] %v5707_v1  ;;  %v5581_v1 = vadd.f32 %v5334_v26, %v4491_v45  ;;  %v5582_v42 = vadd.f32 %v5335_v8, %v4492_v31  ;;  %v15551_v29 = vpop.f32.mrf.mxu1  ;;  %v4250_v45 = vrot.slane %v15515_v16, 7  ;;  %v4494_v26 = vmax.f32 %v4247_v55, 0.0 }
 0x479   :  { %6005 = vst [vmem:[#allocation1 + $0x5] ss:$9 sm:$0xff] %v5708_v20  ;;  %v4246_v20 = vrot.slane %v15515_v16, 3  ;;  %v5338_v8 = vrot.slane %v15526_v10, 5  ;;  %v4251_v28 = vrot.slane %v15549_v49, 1  ;;  %v4252_v16 = vrot.slane %v15549_v49, 2 }
 0x47a   :  { %6006 = vst [vmem:[#allocation1 + $0x6] ss:$9 sm:$0xff] %v5709_v35  ;;  %v15540_v35 = vpop.f32.mrf.mxu2  ;;  %v5717_v54 = vmax.f32 %v5581_v1, 0.0  ;;  %v5718_v3 = vmax.f32 %v5582_v42, 0.0  ;;  %v5340_v1 = vrot.slane %v15526_v10, 7  ;;  %v4498_v42 = vmax.f32 %v15549_v49, 0.0 }
 0x47b   :  { %6007 = vst [vmem:[#allocation1 + $0x7] ss:$9 sm:$0xff] %v5710_v59  ;;  %v12541_v59 = vld [vmem:[#allocation2 + $0x74] sm:$0xf0]  ;;  %v4493_v51 = vmax.f32 %v4246_v20, 0.0  ;;  %v5584_v20 = vadd.f32 %v5337_v38, %v4494_v26  ;;  %v15584_v38 = vpop.f32.mrf.mxu3 }
 0x47c   :  { %v11184_v60 = vor.u32 %v12541_v59, %v11183_v52 }
 0x47d   :  { %v5583_v39 = vadd.f32 %v5336_v41, %v4493_v51 }
 0x47e   :  { %7287 = vmatpush.bf16.msrb.mxu0 %v11184_v60 }
 0x47f   :  { %v5719_v31 = vmax.f32 %v5583_v39, 0.0 }
 0x482   :  { %v15535_v18 = vld [vmem:[#allocation1] sm:$0xff]  ;;  %v15554_v6 = vpop.f32.mrf.mxu2 }
 0x483   :  { %6009 = vst [vmem:[#allocation1] ss:$9 sm:$0xff] %v5711_v15  ;;  %v15565_v15 = vadd.f32 %v15403_v43, %v5239_v33  ;;  %v4500_v33 = vmax.f32 %v4252_v16, 0.0  ;;  %v4256_v16 = vrot.slane %v15549_v49, 6 }
 0x484   :  { %6010 = vst [vmem:[#allocation1 + $0x1] ss:$9 sm:$0xff] %v5712_v32  ;;  %v5339_v32 = vrot.slane %v15526_v10, 6  ;;  %v5720_v10 = vmax.f32 %v5584_v20, 0.0 }
 0x485   :  { %6011 = vst [vmem:[#allocation1 + $0x2] ss:$9 sm:$0xff] %v5713_v58  ;;  %v4497_v58 = vmax.f32 %v4250_v45, 0.0  ;;  %v5341_v52 = vrot.slane %v15565_v15, 1  ;;  %v5342_v59 = vrot.slane %v15565_v15, 2  ;;  %v5343_v41 = vrot.slane %v15565_v15, 3 }
 0x486   :  { %6012 = vst [vmem:[#allocation1 + $0x3] ss:$9 sm:$0xff] %v5714_v12  ;;  %v4253_v12 = vrot.slane %v15549_v49, 3  ;;  %v5586_v43 = vadd.f32 %v5339_v32, %v4496_v62  ;;  %v5588_v60 = vadd.f32 %v15565_v15, %v4498_v42  ;;  %v4100_v45 = vadd.f32 %v15520_v19, %v15333_v7 }
 0x487   :  { %6013 = vst [vmem:[#allocation1 + $0x4] ss:$9 sm:$0xff] %v5715_v61  ;;  %v5585_v61 = vadd.f32 %v5338_v8, %v4495_v46  ;;  %v5590_v26 = vadd.f32 %v5342_v59, %v4500_v33  ;;  %v4254_v46 = vrot.slane %v15549_v49, 4  ;;  %v4257_v7 = vrot.slane %v15549_v49, 7 }
 0x488   :  { %6014 = vst [vmem:[#allocation1 + $0x5] ss:$9 sm:$0xff] %v5716_v21  ;;  %v4499_v21 = vmax.f32 %v4251_v28, 0.0  ;;  %v4501_v51 = vmax.f32 %v4253_v12, 0.0  ;;  %v5722_v22 = vmax.f32 %v5586_v43, 0.0  ;;  %v4255_v28 = vrot.slane %v15549_v49, 5 }
 0x489   :  { %6015 = vst [vmem:[#allocation1 + $0x6] ss:$9 sm:$0xff] %v5717_v54  ;;  %v5587_v54 = vadd.f32 %v5340_v1, %v4497_v58  ;;  %v5721_v55 = vmax.f32 %v5585_v61, 0.0  ;;  %v5724_v62 = vmax.f32 %v5588_v60, 0.0  ;;  %v15589_v32 = vadd.f32 %v15540_v35, %v4100_v45  ;;  %v15613_v45 = vpop.f32.mrf.mxu3 }
 0x48a   :  { %6016 = vst [vmem:[#allocation1 + $0x7] ss:$9 sm:$0xff] %v5718_v3  ;;  %v15575_v3 = vpop.f32.mrf.mxu1  ;;  %v15578_v47 = vpop.f32.mrf.mxu2  ;;  %v5589_v48 = vadd.f32 %v5341_v52, %v4499_v21  ;;  %v5591_v8 = vadd.f32 %v5343_v41, %v4501_v51  ;;  %v5726_v19 = vmax.f32 %v5590_v26, 0.0  ;;  %v4502_v1 = vmax.f32 %v4254_v46, 0.0  ;;  %v15599_v21 = vld [vmem:[%s17732_s7] ss:$0 sm:$0xff] }
 0x48b   :  { %v5344_v12 = vrot.slane %v15565_v15, 4  ;;  %v4503_v42 = vmax.f32 %v4255_v28, 0.0  ;;  %v5345_v61 = vrot.slane %v15565_v15, 5  ;;  %v4258_v35 = vrot.slane %v15589_v32, 1 }
 0x48c   :  { %v5725_v58 = vmax.f32 %v5589_v48, 0.0  ;;  %v5727_v20 = vmax.f32 %v5591_v8, 0.0  ;;  %v15603_v49 = vadd.f32 %v15599_v21, %v15542_v9  ;;  %v4504_v52 = vmax.f32 %v4256_v16, 0.0 }
 0x48d   :  { %v5346_v43 = vrot.slane %v15565_v15, 6  ;;  %v4259_v33 = vrot.slane %v15589_v32, 2  ;;  %v5347_v51 = vrot.slane %v15565_v15, 7  ;;  %v4260_v41 = vrot.slane %v15589_v32, 3 }
 0x48e   :  { %v5592_v60 = vadd.f32 %v5344_v12, %v4502_v1  ;;  %v5593_v48 = vadd.f32 %v5345_v61, %v4503_v42  ;;  %v4507_v9 = vmax.f32 %v4258_v35, 0.0  ;;  %v5349_v46 = vrot.slane %v15603_v49, 2 }
 0x48f   :  { %v5594_v26 = vadd.f32 %v5346_v43, %v4504_v52  ;;  %v4509_v28 = vmax.f32 %v4260_v41, 0.0  ;;  %v5350_v15 = vrot.slane %v15603_v49, 3  ;;  %v4261_v42 = vrot.slane %v15589_v32, 4 }
 0x490   :  { %v5351_v41 = vrot.slane %v15603_v49, 4 }
 0x491   :  { %v15561_v40 = vld [vmem:[#allocation1] sm:$0xff]  ;;  %v5730_v1 = vmax.f32 %v5594_v26, 0.0  ;;  %v5599_v61 = vadd.f32 %v5350_v15, %v4509_v28  ;;  %v4263_v28 = vrot.slane %v15589_v32, 6 }
 0x492   :  { %6018 = vst [vmem:[#allocation1] ss:$9 sm:$0xff] %v5719_v31  ;;  %v5723_v31 = vmax.f32 %v5587_v54, 0.0  ;;  %v4109_v59 = vpop.f32.mrf.mxu1  ;;  %v4505_v54 = vmax.f32 %v4257_v7, 0.0 }
 0x494   :  { %v5595_v8 = vadd.f32 %v5347_v51, %v4505_v54  ;;  %v4510_v51 = vmax.f32 %v4261_v42, 0.0  ;;  %v5354_v42 = vrot.slane %v15603_v49, 7 }
 0x496   :  { %v5600_v26 = vadd.f32 %v5351_v41, %v4510_v51 }
 0x499   :  { %v15580_v39 = vld [vmem:[#allocation1] sm:$0xff] }
 0x49a   :  { %6020 = vst [vmem:[#allocation1] ss:$9 sm:$0xff] %v5720_v10  ;;  %v15609_v10 = vpop.f32.mrf.mxu2  ;;  %v15621_v52 = vpop.f32.mrf.mxu1 }
 0x49b   :  { %6021 = vst [vmem:[#allocation1 + $0x1] ss:$9 sm:$0xff] %v5721_v55  ;;  %v4506_v55 = vmax.f32 %v15589_v32, 0.0 }
 0x49c   :  { %6022 = vst [vmem:[#allocation1 + $0x2] ss:$9 sm:$0xff] %v5722_v22  ;;  %v5348_v22 = vrot.slane %v15603_v49, 1 }
 0x49d   :  { %6023 = vst [vmem:[#allocation1 + $0x3] ss:$9 sm:$0xff] %v5723_v31  ;;  %v4508_v31 = vmax.f32 %v4259_v33, 0.0  ;;  %v5596_v16 = vadd.f32 %v15603_v49, %v4506_v55  ;;  %v15627_v55 = vadd.f32 %v4109_v59, %v15385_v2  ;;  %v4264_v2 = vrot.slane %v15589_v32, 7 }
 0x49e   :  { %6024 = vst [vmem:[#allocation1 + $0x4] ss:$9 sm:$0xff] %v5724_v62  ;;  %v5728_v62 = vmax.f32 %v5592_v60, 0.0  ;;  %v5735_v60 = vmax.f32 %v5599_v61, 0.0  ;;  %v5352_v59 = vrot.slane %v15603_v49, 5 }
 0x49f   :  { %6025 = vst [vmem:[#allocation1 + $0x5] ss:$9 sm:$0xff] %v5725_v58  ;;  %v5729_v58 = vmax.f32 %v5593_v48, 0.0  ;;  %v5598_v12 = vadd.f32 %v5349_v46, %v4508_v31  ;;  %v5732_v35 = vmax.f32 %v5596_v16, 0.0  ;;  %v15629_v48 = vpop.f32.mrf.mxu3  ;;  %v11175_v46 = vld [vmem:[#allocation2 + $0x60] sm:$0xf] }
 0x4a0   :  { %6026 = vst [vmem:[#allocation1 + $0x6] ss:$9 sm:$0xff] %v5726_v19  ;;  %v5597_v19 = vadd.f32 %v5348_v22, %v4507_v9  ;;  %v4102_v9 = vadd.f32 %v15537_v4, %v15350_v17  ;;  %v4262_v22 = vrot.slane %v15589_v32, 5  ;;  %v5736_v4 = vmax.f32 %v5600_v26, 0.0 }
 0x4a1   :  { %6027 = vst [vmem:[#allocation1 + $0x7] ss:$9 sm:$0xff] %v5727_v20  ;;  %v5731_v20 = vmax.f32 %v5595_v8, 0.0  ;;  %v5734_v54 = vmax.f32 %v5598_v12, 0.0  ;;  %v12539_v8 = vld [vmem:[#allocation2 + $0x64] sm:$0xf0] }
 0x4a2   :  { %v5733_v43 = vmax.f32 %v5597_v19, 0.0  ;;  %v15623_v33 = vpop.f32.mrf.mxu2  ;;  %v15635_v31 = vadd.f32 %v15554_v6, %v4102_v9  ;;  %v11176_v15 = vor.u32 %v12539_v8, %v11175_v46  ;;  %v4511_v17 = vmax.f32 %v4262_v22, 0.0 }
 0x4a3   :  { %v15645_v6 = vadd.f32 %v15599_v21, %v15558_v37  ;;  %v4512_v19 = vmax.f32 %v4263_v28, 0.0 }
 0x4a4   :  { %7288 = vmatpush.bf16.msrb.mxu0 %v11176_v15  ;;  %v4265_v16 = vrot.slane %v15635_v31, 1  ;;  %v4266_v32 = vrot.slane %v15635_v31, 2  ;;  %v4267_v61 = vrot.slane %v15635_v31, 3  ;;  %v4268_v37 = vrot.slane %v15635_v31, 4 }
 0x4a5   :  { %v5355_v41 = vrot.slane %v15645_v6, 1  ;;  %v5356_v22 = vrot.slane %v15645_v6, 2  ;;  %v5358_v28 = vrot.slane %v15645_v6, 4 }
 0x4a6   :  { %v4515_v51 = vmax.f32 %v4265_v16, 0.0  ;;  %v4516_v9 = vmax.f32 %v4266_v32, 0.0  ;;  %v4517_v46 = vmax.f32 %v4267_v61, 0.0  ;;  %v4518_v8 = vmax.f32 %v4268_v37, 0.0  ;;  %v12890_v37 = vld [vmem:[%s17730_s5] ss:$0 sm:$0xff] }
 0x4a7   :  { %v4105_v16 = vadd.f32 %v15551_v29, %v15368_v57  ;;  %v4269_v32 = vrot.slane %v15635_v31, 5  ;;  %v4271_v29 = vrot.slane %v15635_v31, 7 }
 0x4a8   :  { %v15618_v7 = vld [vmem:[#allocation1] sm:$0xff] }
 0x4a9   :  { %18067 = vst [vmem:[#allocation28_spill] sm:$0xff] %v15618_v7  ;;  %v15678_v57 = vadd.f32 %v15578_v47, %v4105_v16 }
 0x4aa   :  { %6029 = vst [vmem:[#allocation1] ss:$9 sm:$0xff] %v5728_v62  ;;  %v15640_v62 = vpop.f32.mrf.mxu1 }
 0x4ab   :  { %6030 = vst [vmem:[#allocation1 + $0x1] ss:$9 sm:$0xff] %v5729_v58  ;;  %v15647_v58 = vpop.f32.mrf.mxu2 }
 0x4ac   :  { %6031 = vst [vmem:[#allocation1 + $0x2] ss:$9 sm:$0xff] %v5730_v1  ;;  %v5353_v1 = vrot.slane %v15603_v49, 6  ;;  %v5357_v49 = vrot.slane %v15645_v6, 3 }
 0x4ad   :  { %6032 = vst [vmem:[#allocation1 + $0x3] ss:$9 sm:$0xff] %v5731_v20  ;;  %v4513_v20 = vmax.f32 %v4264_v2, 0.0 }
 0x4ae   :  { %6033 = vst [vmem:[#allocation1 + $0x4] ss:$9 sm:$0xff] %v5732_v35  ;;  %v15655_v35 = vpop.f32.mrf.mxu3 }
 0x4af   :  { %6034 = vst [vmem:[#allocation1 + $0x5] ss:$9 sm:$0xff] %v5733_v43  ;;  %v4514_v43 = vmax.f32 %v15635_v31, 0.0  ;;  %v5603_v26 = vadd.f32 %v5354_v42, %v4513_v20  ;;  %v4270_v20 = vrot.slane %v15635_v31, 6  ;;  %v5607_v42 = vadd.f32 %v5357_v49, %v4517_v46 }
 0x4b0   :  { %6035 = vst [vmem:[#allocation1 + $0x6] ss:$9 sm:$0xff] %v5734_v54  ;;  %v5601_v54 = vadd.f32 %v5352_v59, %v4511_v17  ;;  %v4519_v46 = vmax.f32 %v4269_v32, 0.0  ;;  %v5359_v49 = vrot.slane %v15645_v6, 5  ;;  %v5360_v31 = vrot.slane %v15645_v6, 6 }
 0x4b1   :  { %6036 = vst [vmem:[#allocation1 + $0x7] ss:$9 sm:$0xff] %v5735_v60  ;;  %v5602_v60 = vadd.f32 %v5353_v1, %v4512_v19  ;;  %v5604_v15 = vadd.f32 %v15645_v6, %v4514_v43  ;;  %v5606_v19 = vadd.f32 %v5356_v22, %v4516_v9  ;;  %v5739_v1 = vmax.f32 %v5603_v26, 0.0 }
 0x4b2   :  { %v4116_v2 = vpop.f32.mrf.mxu1  ;;  %v3948_v43 = vadd.f32 %v12890_v37, %v15366_v11  ;;  %v6124_v22 = vsel %vm5788_vm11, %v15409_v50, 0.0  ;;  %v6149_v11 = vpack.c.bf16 %v15413_v44, %v15413_v44  ;;  %v4520_v47 = vmax.f32 %v4270_v20, 0.0 }
 0x4b3   :  { %v5738_v59 = vmax.f32 %v5602_v60, 0.0  ;;  %v15671_v61 = vpop.f32.mrf.mxu2  ;;  %v5742_v26 = vmax.f32 %v5606_v19, 0.0  ;;  %v15694_v50 = vadd.f32 %v15599_v21, %v15584_v38  ;;  %v4521_v44 = vmax.f32 %v4271_v29, 0.0 }
 0x4b4   :  { %v4001_v9 = vadd.f32 %v15370_v63, %v3948_v43  ;;  %v4272_v63 = vrot.slane %v15678_v57, 1  ;;  %v4273_v2 = vrot.slane %v15678_v57, 2  ;;  %v15700_v16 = vunpack.c.l.b16 %v6149_v11 }
 0x4b5   :  { %v4275_v19 = vrot.slane %v15678_v57, 4  ;;  %v5609_v32 = vadd.f32 %v5359_v49, %v4519_v46  ;;  %v5610_v20 = vadd.f32 %v5360_v31, %v4520_v47  ;;  %v5363_v29 = vrot.slane %v15694_v50, 2 }
 0x4b6   :  { %v15681_v60 = vpop.f32.mrf.mxu3  ;;  %v5364_v11 = vrot.slane %v15694_v50, 3  ;;  %v5365_v47 = vrot.slane %v15694_v50, 4 }
 0x4b7   :  { %v4526_v46 = vmax.f32 %v4275_v19, 0.0  ;;  %v5746_v31 = vmax.f32 %v5610_v20, 0.0  ;;  %v5366_v19 = vrot.slane %v15694_v50, 5 }
 0x4b8   :  { %v15650_v12 = vld [vmem:[#allocation1] sm:$0xff] }
 0x4b9   :  { %18068 = vst [vmem:[#allocation29_spill] sm:$0xff] %v15650_v12  ;;  %v5605_v12 = vadd.f32 %v5355_v41, %v4515_v51  ;;  %v5740_v51 = vmax.f32 %v5604_v15, 0.0  ;;  %v5361_v15 = vrot.slane %v15645_v6, 7  ;;  %v5362_v6 = vrot.slane %v15694_v50, 1 }
 0x4ba   :  { %6038 = vst [vmem:[#allocation1] ss:$9 sm:$0xff] %v5736_v4  ;;  %v5737_v4 = vmax.f32 %v5601_v54, 0.0  ;;  %v5608_v54 = vadd.f32 %v5358_v28, %v4518_v8  ;;  %v5743_v8 = vmax.f32 %v5607_v42, 0.0  ;;  %v6148_v28 = vpack.c.bf16 %v6124_v22, %v6124_v22 }
 0x4bb   :  { %v5741_v41 = vmax.f32 %v5605_v12, 0.0  ;;  %v4169_v38 = vpop.f32.mrf.mxu2  ;;  %v4523_v42 = vmax.f32 %v4272_v63, 0.0  ;;  %v4115_v63 = vadd.f32 %v15640_v62, %v15395_v13 }
 0x4bc   :  { %v5744_v12 = vmax.f32 %v5608_v54, 0.0  ;;  %v6188_v43 = vunpack.c.l.b16 %v6148_v28  ;;  %v5611_v54 = vadd.f32 %v5361_v15, %v4521_v44  ;;  %v4277_v28 = vrot.slane %v15678_v57, 6 }
 0x4bd   :  { %v5616_v38 = vadd.f32 %v5365_v47, %v4526_v46 }
 0x4c1   :  { %v15665_v17 = vld [vmem:[#allocation1] sm:$0xff] }
 0x4c2   :  { %18069 = vst [vmem:[#allocation12_spill] sm:$0xff] %v15665_v17 }
 0x4c3   :  { %6040 = vst [vmem:[#allocation1] ss:$9 sm:$0xff] %v5737_v4  ;;  %v4274_v4 = vrot.slane %v15678_v57, 3 }
 0x4c4   :  { %6041 = vst [vmem:[#allocation1 + $0x1] ss:$9 sm:$0xff] %v5738_v59  ;;  %v4054_v59 = vadd.f32 %v15372_v0, %v4001_v9  ;;  %v3953_v0 = vadd.f32 %v12890_v37, %v15383_v23  ;;  %v4276_v9 = vrot.slane %v15678_v57, 5  ;;  %v5747_v23 = vmax.f32 %v5611_v54, 0.0 }
 0x4c5   :  { %6042 = vst [vmem:[#allocation1 + $0x2] ss:$9 sm:$0xff] %v5739_v1  ;;  %v4522_v1 = vmax.f32 %v15678_v57, 0.0  ;;  %v4525_v22 = vmax.f32 %v4274_v4, 0.0  ;;  %v5368_v54 = vrot.slane %v15694_v50, 7 }
 0x4c6   :  { %6043 = vst [vmem:[#allocation1 + $0x3] ss:$9 sm:$0xff] %v5740_v51  ;;  %v4524_v51 = vmax.f32 %v4273_v2, 0.0  ;;  %v4107_v44 = vadd.f32 %v15575_v3, %v4054_v59  ;;  %v4278_v2 = vrot.slane %v15678_v57, 7  ;;  %v4527_v4 = vmax.f32 %v4276_v9, 0.0 }
 0x4c7   :  { %6044 = vst [vmem:[#allocation1 + $0x4] ss:$9 sm:$0xff] %v5741_v41  ;;  %v5259_v41 = vpop.f32.mrf.mxu3  ;;  %v5612_v49 = vadd.f32 %v15694_v50, %v4522_v1  ;;  %v5615_v1 = vadd.f32 %v5364_v11, %v4525_v22  ;;  %v4006_v62 = vadd.f32 %v15387_v5, %v3953_v0  ;;  %v6150_v59 = vpack.c.bf16 %v15416_v53, %v15416_v53 }
 0x4c8   :  { %6045 = vst [vmem:[#allocation1 + $0x5] ss:$9 sm:$0xff] %v5742_v26  ;;  %v15710_v26 = vpack.c.b16 %v15700_v16, %v6188_v43  ;;  %v5614_v15 = vadd.f32 %v5363_v29, %v4524_v51  ;;  %v15723_v13 = vadd.f32 %v15609_v10, %v4107_v44  ;;  %v4528_v57 = vmax.f32 %v4277_v28, 0.0 }
 0x4c9   :  { %6046 = vst [vmem:[#allocation1 + $0x6] ss:$9 sm:$0xff] %v5743_v8  ;;  %v5745_v8 = vmax.f32 %v5609_v32, 0.0  ;;  %v5748_v32 = vmax.f32 %v5612_v49, 0.0  ;;  %v4529_v43 = vmax.f32 %v4278_v2, 0.0  ;;  %v5617_v51 = vadd.f32 %v5366_v19, %v4527_v4 }
 0x4ca   :  { %6047 = vst [vmem:[#allocation1 + $0x7] ss:$9 sm:$0xff] %v5744_v12  ;;  %v5613_v12 = vadd.f32 %v5362_v6, %v4523_v42  ;;  %v6212_v20 = vrot.slane %v15710_v26, 1  ;;  %v5367_v42 = vrot.slane %v15694_v50, 6  ;;  %v5750_v6 = vmax.f32 %v5614_v15, 0.0 }
 0x4cb   :  { %v5751_v10 = vmax.f32 %v5615_v1, 0.0  ;;  %v5752_v29 = vmax.f32 %v5616_v38, 0.0  ;;  %v4279_v5 = vrot.slane %v15723_v13, 1  ;;  %v15733_v41 = vadd.f32 %v15389_v25, %v4006_v62 }
 0x4cc   :  { %v5749_v3 = vmax.f32 %v5613_v12, 0.0  ;;  %v6220_v53 = vrot.slane %v15710_v26, 2  ;;  %v4280_v0 = vrot.slane %v15723_v13, 2  ;;  %v5258_v9 = vadd.f32 %v15599_v21, %v15681_v60 }
 0x4cd   :  { %v6228_v50 = vrot.slane %v15710_v26, 3  ;;  %v15740_v22 = vunpack.c.l.b16 %v6150_v59  ;;  %v15742_v11 = vrot.slane %v6212_v20, 7  ;;  %v15744_v46 = vadd.f32 %v5367_v42, %v4528_v57 }
 0x4ce   :  { %v15746_v47 = vadd.f32 %v5368_v54, %v4529_v43  ;;  %v5753_v25 = vmax.f32 %v5617_v51, 0.0  ;;  %v4281_v49 = vrot.slane %v15723_v13, 3  ;;  %v4282_v60 = vrot.slane %v15723_v13, 4 }
 0x4cf   :  { %18071 = vst [vmem:[#allocation14_spill] sm:$0xff] %v15740_v22  ;;  %v4530_v12 = vmax.f32 %v15723_v13, 0.0  ;;  %v4532_v28 = vmax.f32 %v4280_v0, 0.0  ;;  %v4168_v44 = vadd.f32 %v15671_v61, %v4115_v63  ;;  %v5390_v15 = vrot.slane %v5258_v9, 1 }
 0x4d0   :  { %v5391_v2 = vrot.slane %v5258_v9, 2  ;;  %v5392_v4 = vrot.slane %v5258_v9, 3  ;;  %v5393_v19 = vrot.slane %v5258_v9, 4  ;;  %v5394_v1 = vrot.slane %v5258_v9, 5 }
 0x4d1   :  { %v15716_v37 = vld [vmem:[#allocation1] sm:$0xff]  ;;  %v5395_v38 = vrot.slane %v5258_v9, 6  ;;  %v4301_v62 = vrot.slane %v4168_v44, 2  ;;  %v4303_v20 = vrot.slane %v4168_v44, 4  ;;  %v4305_v59 = vrot.slane %v4168_v44, 6 }
 0x4d2   :  { %18070 = vst [vmem:[#allocation13_spill] sm:$0xff] %v15716_v37  ;;  %v4306_v57 = vrot.slane %v4168_v44, 7  ;;  %v4554_v42 = vmax.f32 %v4168_v44, 0.0  ;;  %v5396_v0 = vrot.slane %v5258_v9, 7 }
 0x4d3   :  { %6049 = vst [vmem:[#allocation1] ss:$9 sm:$0xff] %v5745_v8  ;;  %v15751_v8 = vadd.f32 %v15599_v21, %v15613_v45  ;;  %v4302_v45 = vrot.slane %v4168_v44, 3  ;;  %v4556_v54 = vmax.f32 %v4301_v62, 0.0  ;;  %v4558_v61 = vmax.f32 %v4303_v20, 0.0 }
 0x4d4   :  { %6050 = vst [vmem:[#allocation1 + $0x1] ss:$9 sm:$0xff] %v5746_v31  ;;  %v4283_v31 = vrot.slane %v15723_v13, 5  ;;  %v15760_v37 = vadd.f32 %v5258_v9, %v4554_v42  ;;  %v15778_v9 = vrot.slane %v6220_v53, 6  ;;  %v5754_v53 = vmax.f32 %v15744_v46, 0.0 }
 0x4d5   :  { %6051 = vst [vmem:[#allocation1 + $0x2] ss:$9 sm:$0xff] %v5747_v23  ;;  %v4531_v23 = vmax.f32 %v4279_v5, 0.0  ;;  %v4557_v51 = vmax.f32 %v4302_v45, 0.0  ;;  %v5369_v63 = vrot.slane %v15751_v8, 1  ;;  %v4561_v5 = vmax.f32 %v4306_v57, 0.0 }
 0x4d6   :  { %6052 = vst [vmem:[#allocation1 + $0x3] ss:$9 sm:$0xff] %v5748_v32  ;;  %v4300_v32 = vrot.slane %v4168_v44, 1  ;;  %v15764_v7 = vadd.f32 %v5391_v2, %v4556_v54  ;;  %v5371_v45 = vrot.slane %v15751_v8, 3  ;;  %v5372_v2 = vrot.slane %v15751_v8, 4 }
 0x4d7   :  { %6053 = vst [vmem:[#allocation1 + $0x4] ss:$9 sm:$0xff] %v5749_v3  ;;  %v4304_v3 = vrot.slane %v4168_v44, 5  ;;  %v5370_v44 = vrot.slane %v15751_v8, 2  ;;  %v5621_v57 = vadd.f32 %v5369_v63, %v4531_v23  ;;  %v4284_v42 = vrot.slane %v15723_v13, 6 }
 0x4d8   :  { %6054 = vst [vmem:[#allocation1 + $0x5] ss:$9 sm:$0xff] %v5750_v6  ;;  %v4555_v43 = vmax.f32 %v4300_v32, 0.0  ;;  %v15769_v32 = vadd.f32 %v5393_v19, %v4558_v61  ;;  %v4535_v19 = vmax.f32 %v4283_v31, 0.0  ;;  %v5755_v31 = vmax.f32 %v15746_v47, 0.0 }
 0x4d9   :  { %6055 = vst [vmem:[#allocation1 + $0x6] ss:$9 sm:$0xff] %v5751_v10  ;;  %v4559_v10 = vmax.f32 %v4304_v3, 0.0  ;;  %v15776_v3 = vadd.f32 %v5396_v0, %v4561_v5  ;;  %v15803_v46 = vadd.f32 %v15623_v33, %v15627_v55  ;;  %v6152_v55 = vpack.c.bf16 %v15442_v56, %v15442_v56 }
 0x4da   :  { %6056 = vst [vmem:[#allocation1 + $0x7] ss:$9 sm:$0xff] %v5752_v29  ;;  %v4560_v29 = vmax.f32 %v4305_v59, 0.0  ;;  %v15762_v17 = vadd.f32 %v5390_v15, %v4555_v43  ;;  %v4534_v15 = vmax.f32 %v4282_v60, 0.0  ;;  %v5620_v59 = vadd.f32 %v15751_v8, %v4530_v12 }
 0x4db   :  { %v15771_v62 = vadd.f32 %v5394_v1, %v4559_v10  ;;  %v5373_v1 = vrot.slane %v15751_v8, 5  ;;  %v5622_v60 = vadd.f32 %v5370_v44, %v4532_v28  ;;  %v6308_v12 = vsel %vm18074_vm7, %v15710_v26, %v15742_v11 }
 0x4dc   :  { %v15774_v20 = vadd.f32 %v5395_v38, %v4560_v29  ;;  %v6302_v38 = vsel %vm18073_vm8, %v15710_v26, %v15742_v11  ;;  %v5624_v43 = vadd.f32 %v5372_v2, %v4534_v15  ;;  %v5756_v54 = vmax.f32 %v5620_v59, 0.0 }
 0x4dd   :  { %v6320_v28 = vsel %vm18076_vm3, %v15710_v26, %v15742_v11  ;;  %v5625_v47 = vadd.f32 %v5373_v1, %v4535_v19  ;;  %v6303_v63 = vsel %vm18077_vm14, %v6302_v38, %v15778_v9  ;;  %v6309_v10 = vsel %vm18078_vm2, %v6308_v12, %v15778_v9 }
 0x4de   :  { %v5758_v29 = vmax.f32 %v5622_v60, 0.0  ;;  %v4536_v0 = vmax.f32 %v4284_v42, 0.0  ;;  %v5374_v44 = vrot.slane %v15751_v8, 6  ;;  %v5375_v2 = vrot.slane %v15751_v8, 7 }
 0x4df   :  { %v5761_v59 = vmax.f32 %v5625_v47, 0.0  ;;  %v4287_v56 = vrot.slane %v15803_v46, 2  ;;  %v6321_v19 = vsel %vm18079_vm15, %v6320_v28, %v15778_v9  ;;  %v4288_v1 = vrot.slane %v15803_v46, 3 }
 0x4e0   :  { %vm18081_vm8 = vcmask 1045509   ;;  %v4290_v38 = vrot.slane %v15803_v46, 5  ;;  %v15837_v60 = vunpack.c.l.b16 %v6152_v55  ;;  %v5626_v12 = vadd.f32 %v5374_v44, %v4536_v0 }
 0x4e1   :  { %v15757_v6 = vld [vmem:[#allocation1] sm:$0xff]  ;;  %v4291_v42 = vrot.slane %v15803_v46, 6  ;;  %v4541_v28 = vmax.f32 %v4288_v1, 0.0  ;;  %vm18084_vm7 = vcmask 1041409   ;;  %vm18085_vm14 = vcmask 1042434  }
 0x4e2   :  { %18072 = vst [vmem:[#allocation15_spill] sm:$0xff] %v15757_v6  ;;  %v15767_v6 = vadd.f32 %v5392_v4, %v4557_v51  ;;  %v15782_v4 = vrot.slane %v6228_v50, 5  ;;  %v6127_v50 = vsel %vm5788_vm11, %v15426_v34, 0.0  ;;  %v4285_v34 = vrot.slane %v15723_v13, 7 }
 0x4e3   :  { %6058 = vst [vmem:[#allocation1] ss:$9 sm:$0xff] %v5753_v25  ;;  %v4533_v25 = vmax.f32 %v4281_v49, 0.0  ;;  %v6252_v49 = vpack.c.b16 %v15740_v22, %v15700_v16  ;;  %v5757_v51 = vmax.f32 %v5621_v57, 0.0  ;;  %v6151_v33 = vpack.c.bf16 %v6127_v50, %v6127_v50 }
 0x4e4   :  { %v15819_v13 = vadd.f32 %v15599_v21, %v15629_v48  ;;  %v4537_v15 = vmax.f32 %v4285_v34, 0.0  ;;  %v4289_v57 = vrot.slane %v15803_v46, 4  ;;  %vm18086_vm2 = vcmask 1042433  }
 0x4e5   :  { %v5623_v16 = vadd.f32 %v5371_v45, %v4533_v25  ;;  %v15809_v61 = vrot.slane %v6252_v49, 4  ;;  %v5760_v25 = vmax.f32 %v5624_v43, 0.0  ;;  %v4286_v45 = vrot.slane %v15803_v46, 1 }
 0x4e6   :  { %v6190_v49 = vunpack.c.l.b16 %v6151_v33  ;;  %v4540_v43 = vmax.f32 %v4287_v56, 0.0  ;;  %v4542_v34 = vmax.f32 %v4289_v57, 0.0  ;;  %v5378_v47 = vrot.slane %v15819_v13, 3 }
 0x4e7   :  { %v5759_v5 = vmax.f32 %v5623_v16, 0.0  ;;  %v6304_v48 = vsel %vm18080_vm9, %v15782_v4, %v15809_v61  ;;  %v6310_v8 = vsel %vm18081_vm8, %v15782_v4, %v15809_v61  ;;  %v4539_v50 = vmax.f32 %v4286_v45, 0.0  ;;  %vm18088_vm9 = vmmov %vm18081_vm8 }
 0x4e8   :  { %v5627_v16 = vadd.f32 %v5375_v2, %v4537_v15  ;;  %v4543_v33 = vmax.f32 %v4290_v38, 0.0  ;;  %v5380_v55 = vrot.slane %v15819_v13, 5  ;;  %v15850_v0 = vsel %vm2660_vm12, %v6303_v63, %v6304_v48 }
 0x4e9   :  { %v15853_v44 = vpack.c.b16 %v15837_v60, %v6190_v49  ;;  %v5762_v15 = vmax.f32 %v5626_v12, 0.0  ;;  %v15858_v1 = vsel %vm2670_vm13, %v6309_v10, %v6310_v8  ;;  %v5381_v38 = vrot.slane %v15819_v13, 6  ;;  %v12537_v49 = vld [vmem:[#allocation2 + $0x54] sm:$0xf0] }
 0x4ea   :  { %v15798_v23 = vld [vmem:[#allocation1] sm:$0xff]  ;;  %v5763_v2 = vmax.f32 %v5627_v16, 0.0  ;;  %v5631_v63 = vadd.f32 %v5378_v47, %v4541_v28  ;;  %v5633_v22 = vadd.f32 %v5380_v55, %v4543_v33  ;;  %vm18087_vm15 = vcmask 1044483  }
 0x4eb   :  { %18075 = vst [vmem:[#allocation16_spill] sm:$0xff] %v15798_v23  ;;  %v6213_v8 = vrot.slane %v15853_v44, 1  ;;  %v6221_v16 = vrot.slane %v15853_v44, 2  ;;  %vm18089_vm8 = vcmask 1046534  }
 0x4ec   :  { %6060 = vst [vmem:[#allocation1] ss:$9 sm:$0xff] %v5754_v53  ;;  %v4538_v53 = vmax.f32 %v15803_v46, 0.0  ;;  %v5767_v28 = vmax.f32 %v5631_v63, 0.0 }
 0x4ed   :  { %6061 = vst [vmem:[#allocation1 + $0x1] ss:$9 sm:$0xff] %v5755_v31  ;;  %v5376_v31 = vrot.slane %v15819_v13, 1 }
 0x4ee   :  { %6062 = vst [vmem:[#allocation1 + $0x2] ss:$9 sm:$0xff] %v5756_v54  ;;  %v5377_v54 = vrot.slane %v15819_v13, 2 }
 0x4ef   :  { %6063 = vst [vmem:[#allocation1 + $0x3] ss:$9 sm:$0xff] %v5757_v51  ;;  %v5379_v51 = vrot.slane %v15819_v13, 4  ;;  %v5629_v45 = vadd.f32 %v5376_v31, %v4539_v50  ;;  %v6153_v31 = vpack.c.bf16 %v15453_v24, %v15453_v24 }
 0x4f0   :  { %6064 = vst [vmem:[#allocation1 + $0x4] ss:$9 sm:$0xff] %v5758_v29  ;;  %v6322_v29 = vsel %vm372_vm1, %v15809_v61, %v15782_v4  ;;  %v5630_v56 = vadd.f32 %v5377_v54, %v4540_v43 }
 0x4f1   :  { %6065 = vst [vmem:[#allocation1 + $0x5] ss:$9 sm:$0xff] %v5759_v5  ;;  %v5628_v5 = vadd.f32 %v15819_v13, %v4538_v53  ;;  %v5632_v48 = vadd.f32 %v5379_v51, %v4542_v34  ;;  %v11167_v53 = vld [vmem:[#allocation2 + $0x50] sm:$0xf]  ;;  %v15867_v12 = vsel %vm2688_vm10, %v6321_v19, %v6322_v29  ;;  %v5765_v50 = vmax.f32 %v5629_v45, 0.0 }
 0x4f2   :  { %6066 = vst [vmem:[#allocation1 + $0x6] ss:$9 sm:$0xff] %v5760_v25  ;;  %v4112_v25 = vadd.f32 %v15621_v52, %v15733_v41  ;;  %v11168_v52 = vor.u32 %v12537_v49, %v11167_v53  ;;  %v5766_v43 = vmax.f32 %v5630_v56, 0.0  ;;  %v4292_v19 = vrot.slane %v15803_v46, 7 }
 0x4f3   :  { %6067 = vst [vmem:[#allocation1 + $0x7] ss:$9 sm:$0xff] %v5761_v59  ;;  %v4544_v59 = vmax.f32 %v4291_v42, 0.0  ;;  %v5764_v23 = vmax.f32 %v5628_v5, 0.0  ;;  %v6229_v42 = vrot.slane %v15853_v44, 3  ;;  %v5768_v47 = vmax.f32 %v5632_v48, 0.0 }
 0x4f4   :  { %v15864_v41 = vadd.f32 %v15647_v58, %v4112_v25  ;;  %7289 = vmatpush.bf16.msrb.mxu0 %v11168_v52  ;;  %v5769_v51 = vmax.f32 %v5633_v22, 0.0  ;;  %v15883_v46 = vunpack.c.l.b16 %v6153_v31  ;;  %v15885_v5 = vrot.slane %v6213_v8, 7  ;;  %v11375_v31 = vld [vmem:[#allocation2 + $0x1f0] sm:$0xf]  ;;  %v12603_v58 = vld [vmem:[#allocation2 + $0x264] sm:$0xf0] }
 0x4f5   :  { %v5634_v54 = vadd.f32 %v5381_v38, %v4544_v59  ;;  %v15887_v25 = vrot.slane %v6221_v16, 6  ;;  %v15889_v45 = vrot.slane %v6229_v42, 5  ;;  %v15894_v22 = vsel %vm5788_vm11, %v15478_v30, 0.0  ;;  %v11311_v30 = vld [vmem:[#allocation2 + $0x170] sm:$0xf] }
 0x4f6   :  { %v4293_v24 = vrot.slane %v15864_v41, 1  ;;  %v4294_v29 = vrot.slane %v15864_v41, 2  ;;  %v4296_v33 = vrot.slane %v15864_v41, 4  ;;  %v4297_v55 = vrot.slane %v15864_v41, 5  ;;  %18082 = vst [vmem:[#allocation30_spill] sm:$0xff] %v15883_v46 }
 0x4f7   :  { %v5770_v59 = vmax.f32 %v5634_v54, 0.0  ;;  %v4298_v56 = vrot.slane %v15864_v41, 6  ;;  %v4546_v38 = vmax.f32 %v15864_v41, 0.0  ;;  %v15901_v48 = vadd.f32 %v15599_v21, %v15655_v35  ;;  %v12589_v42 = vld [vmem:[#allocation2 + $0x1f4] sm:$0xf0] }
 0x4f8   :  { %v4547_v63 = vmax.f32 %v4293_v24, 0.0  ;;  %v4548_v53 = vmax.f32 %v4294_v29, 0.0  ;;  %v4550_v52 = vmax.f32 %v4296_v33, 0.0  ;;  %v4551_v8 = vmax.f32 %v4297_v55, 0.0  ;;  %v11303_v33 = vld [vmem:[#allocation2 + $0x160] sm:$0xf] }
 0x4f9   :  { %v4552_v54 = vmax.f32 %v4298_v56, 0.0  ;;  %v5384_v35 = vrot.slane %v15901_v48, 2  ;;  %v5386_v24 = vrot.slane %v15901_v48, 4  ;;  %v5387_v29 = vrot.slane %v15901_v48, 5  ;;  %v12571_v55 = vld [vmem:[#allocation2 + $0x164] sm:$0xf0] }
 0x4fa   :  { %v15860_v57 = vld [vmem:[#allocation1] sm:$0xff]  ;;  %v15916_v56 = vsel %vm2642_vm5, %v15710_v26, %v15742_v11  ;;  %v4299_v10 = vrot.slane %v15864_v41, 7  ;;  %v5636_v34 = vadd.f32 %v15901_v48, %v4546_v38 }
 0x4fb   :  { %6069 = vst [vmem:[#allocation1] ss:$9 sm:$0xff] %v5762_v15  ;;  %v4545_v15 = vmax.f32 %v4292_v19, 0.0  ;;  %v12605_v19 = vld [vmem:[#allocation2 + $0x274] sm:$0xf0] }
 0x4fc   :  { %6070 = vst [vmem:[#allocation1 + $0x1] ss:$9 sm:$0xff] %v5763_v2  ;;  %v5382_v2 = vrot.slane %v15819_v13, 7  ;;  %v6253_v13 = vpack.c.b16 %v15883_v46, %v15837_v60  ;;  %v5388_v60 = vrot.slane %v15901_v48, 6 }
 0x4fd   :  { %6071 = vst [vmem:[#allocation1 + $0x2] ss:$9 sm:$0xff] %v5764_v23  ;;  %v4295_v23 = vrot.slane %v15864_v41, 3 }
 0x4fe   :  { %6072 = vst [vmem:[#allocation1 + $0x3] ss:$9 sm:$0xff] %v5765_v50  ;;  %v12573_v50 = vld [vmem:[#allocation2 + $0x174] sm:$0xf0]  ;;  %v15933_v41 = vadd.f32 %v5388_v60, %v4552_v54 }
 0x4ff   :  { %6073 = vst [vmem:[#allocation1 + $0x4] ss:$9 sm:$0xff] %v5766_v43  ;;  %v4549_v49 = vmax.f32 %v4295_v23, 0.0  ;;  %v11312_v16 = vor.u32 %v12573_v50, %v11311_v30  ;;  %v11439_v43 = vld [vmem:[#allocation2 + $0x270] sm:$0xf]  ;;  %v15921_v30 = vsel %vm2647_vm4, %v15710_v26, %v15742_v11  ;;  %v11304_v50 = vor.u32 %v12571_v55, %v11303_v33 }
 0x500   :  { %6074 = vst [vmem:[#allocation1 + $0x5] ss:$9 sm:$0xff] %v5767_v28  ;;  %v5383_v28 = vrot.slane %v15901_v48, 1  ;;  %v11440_v21 = vor.u32 %v12605_v19, %v11439_v43  ;;  %v6155_v43 = vpack.c.bf16 %v15493_v27, %v15493_v27  ;;  %v5635_v19 = vadd.f32 %v5382_v2, %v4545_v15  ;;  %v11159_v26 = vld [vmem:[#allocation2 + $0x40] sm:$0xf] }
 0x501   :  { %6075 = vst [vmem:[#allocation1 + $0x6] ss:$9 sm:$0xff] %v5768_v47  ;;  %v11376_v47 = vor.u32 %v12589_v42, %v11375_v31  ;;  %7353 = vmatpush.bf16.msra.mxu1 %v11312_v16  ;;  %v11367_v31 = vld [vmem:[#allocation2 + $0x1e0] sm:$0xf]  ;;  %v12587_v16 = vld [vmem:[#allocation2 + $0x1e4] sm:$0xf0]  ;;  %v5638_v33 = vadd.f32 %v5384_v35, %v4548_v53 }
 0x502   :  { %6076 = vst [vmem:[#allocation1 + $0x7] ss:$9 sm:$0xff] %v5769_v51  ;;  %v5385_v51 = vrot.slane %v15901_v48, 3  ;;  %7419 = vmatpush.bf16.msra.mxu3 %v11440_v21  ;;  %v15923_v42 = vrot.slane %v6253_v13, 4  ;;  %v11431_v21 = vld [vmem:[#allocation2 + $0x260] sm:$0xf]  ;;  %v5637_v46 = vadd.f32 %v5383_v28, %v4547_v63  ;;  %v6154_v13 = vpack.c.bf16 %v15894_v22, %v15894_v22 }
 0x503   :  { %7386 = vmatpush.bf16.msra.mxu2 %v11376_v47  ;;  %v11368_v47 = vor.u32 %v12587_v16, %v11367_v31  ;;  %v12535_v11 = vld [vmem:[#allocation2 + $0x44] sm:$0xf0]  ;;  %v11295_v27 = vld [vmem:[#allocation2 + $0x150] sm:$0xf]  ;;  %v12569_v15 = vld [vmem:[#allocation2 + $0x154] sm:$0xf0]  ;;  %v5640_v31 = vadd.f32 %v5386_v24, %v4550_v52  ;;  %v15931_v16 = vadd.f32 %v5387_v29, %v4551_v8  ;;  %v6336_v24 = vsel %vm18084_vm7, %v15853_v44, %v15885_v5 }
 0x504   :  { %v5639_v55 = vadd.f32 %v5385_v51, %v4549_v49  ;;  %v11359_v2 = vld [vmem:[#allocation2 + $0x1d0] sm:$0xf]  ;;  %v11296_v38 = vor.u32 %v12569_v15, %v11295_v27  ;;  %v12585_v63 = vld [vmem:[#allocation2 + $0x1d4] sm:$0xf0]  ;;  %v5771_v22 = vmax.f32 %v5635_v19, 0.0  ;;  %v15937_v35 = vmax.f32 %v4299_v10, 0.0 }
 0x505   :  { %7354 = vmatpush.bf16.msra.mxu1 %v11304_v50  ;;  %v11423_v28 = vld [vmem:[#allocation2 + $0x250] sm:$0xf]  ;;  %v15935_v50 = vunpack.c.l.b16 %v6155_v43  ;;  %v11360_v53 = vor.u32 %v12585_v63, %v11359_v2  ;;  %v5389_v51 = vrot.slane %v15901_v48, 7  ;;  %v5772_v52 = vmax.f32 %v5636_v34, 0.0  ;;  %v11287_v10 = vld [vmem:[#allocation2 + $0x140] sm:$0xf] }
 0x506   :  { %v5773_v8 = vmax.f32 %v5637_v46, 0.0  ;;  %v6192_v54 = vunpack.c.l.b16 %v6154_v13  ;;  %v6338_v29 = vsel %vm18076_vm3, %v15889_v45, %v15923_v42  ;;  %v12567_v43 = vld [vmem:[#allocation2 + $0x144] sm:$0xf0]  ;;  %v5775_v19 = vmax.f32 %v5639_v55, 0.0  ;;  %v11351_v15 = vld [vmem:[#allocation2 + $0x1c0] sm:$0xf]  ;;  %vm18091_vm3 = vmmov %vm18087_vm15 }
 0x507   :  { %7387 = vmatpush.bf16.msra.mxu2 %v11368_v47  ;;  %v5776_v34 = vmax.f32 %v5640_v31, 0.0  ;;  %v5777_v46 = vmax.f32 %v15931_v16, 0.0  ;;  %v5778_v47 = vmax.f32 %v15933_v41, 0.0  ;;  %v6296_v13 = vsel %vm1296_vm6, %v15916_v56, %v15778_v9  ;;  %v12583_v2 = vld [vmem:[#allocation2 + $0x1c4] sm:$0xf0] }
 0x508   :  { %v6337_v55 = vsel %vm18086_vm2, %v6336_v24, %v15887_v25  ;;  %v15962_v27 = vpack.c.b16 %v15935_v50, %v6192_v54  ;;  %v15967_v31 = vsel %vm18087_vm15, %v15921_v30, %v15778_v9  ;;  %v6299_v56 = vsel %vm2647_vm4, %v15782_v4, %v15809_v61  ;;  %v12599_v63 = vld [vmem:[#allocation2 + $0x244] sm:$0xf0]  ;;  %v11343_v54 = vld [vmem:[#allocation2 + $0x1b0] sm:$0xf]  ;;  %v12581_v24 = vld [vmem:[#allocation2 + $0x1b4] sm:$0xf0] }
 0x509   :  { %v15910_v23 = vld [vmem:[#allocation1] sm:$0xff]  ;;  %7355 = vmatpush.bf16.msra.mxu1 %v11296_v38  ;;  %v6344_v16 = vsel %vm18088_vm9, %v15889_v45, %v15923_v42  ;;  %v15976_v41 = vsel %vm2660_vm12, %v6337_v55, %v6338_v29  ;;  %v11415_v38 = vld [vmem:[#allocation2 + $0x240] sm:$0xf]  ;;  %v6350_v9 = vsel %vm18089_vm8, %v15889_v45, %v15923_v42  ;;  %vm18090_vm7 = vcmask 1043458   ;;  %v12579_v48 = vld [vmem:[#allocation2 + $0x1a4] sm:$0xf0] }
 0x50a   :  { %18083 = vst [vmem:[#allocation17_spill] sm:$0xff] %v15910_v23  ;;  %v11160_v23 = vor.u32 %v12535_v11, %v11159_v26  ;;  %v11151_v26 = vld [vmem:[#allocation2 + $0x30] sm:$0xf]  ;;  %v12533_v11 = vld [vmem:[#allocation2 + $0x34] sm:$0xf0]  ;;  %vm18093_vm2 = vcmask 1042432  }
 0x50b   :  { %6078 = vst [vmem:[#allocation1] ss:$9 sm:$0xff] %v5770_v59  ;;  %v11432_v59 = vor.u32 %v12603_v58, %v11431_v21  ;;  %v12601_v58 = vld [vmem:[#allocation2 + $0x254] sm:$0xf0]  ;;  %7388 = vmatpush.bf16.msra.mxu2 %v11360_v53  ;;  %v6342_v21 = vsel %vm18085_vm14, %v15853_v44, %v15885_v5  ;;  %vm18092_vm14 = vmmov %vm18089_vm8  ;;  %vm18094_vm15 = vcmask 1044484   ;;  %vm18096_vm8 = vcmask 1045508  }
 0x50c   :  { %7290 = vmatpush.bf16.msrb.mxu0 %v11160_v23  ;;  %v11424_v49 = vor.u32 %v12601_v58, %v11423_v28  ;;  %v5774_v23 = vmax.f32 %v5638_v33, 0.0  ;;  %v6348_v33 = vsel %vm2647_vm4, %v15853_v44, %v15885_v5  ;;  %v6328_v28 = vsel %vm2642_vm5, %v15853_v44, %v15885_v5  ;;  %v12565_v53 = vld [vmem:[#allocation2 + $0x134] sm:$0xf0]  ;;  %vm18095_vm9 = vmmov %vm18093_vm2 }
 0x50d   :  { %7420 = vmatpush.bf16.msra.mxu3 %v11432_v59  ;;  %v11288_v59 = vor.u32 %v12567_v43, %v11287_v10  ;;  %v6343_v30 = vsel %vm18090_vm7, %v6342_v21, %v15887_v25  ;;  %v11152_v58 = vor.u32 %v12533_v11, %v11151_v26  ;;  %v6214_v10 = vrot.slane %v15962_v27, 1  ;;  %v11143_v26 = vld [vmem:[#allocation2 + $0x20] sm:$0xf]  ;;  %v12531_v11 = vld [vmem:[#allocation2 + $0x24] sm:$0xf0] }
 0x50e   :  { %v15989_v29 = vsel %vm2670_vm13, %v6343_v30, %v6344_v16  ;;  %v6354_v55 = vsel %vm18094_vm15, %v15853_v44, %v15885_v5  ;;  %v12563_v16 = vld [vmem:[#allocation2 + $0x124] sm:$0xf0]  ;;  %v6133_v44 = vsel %vm5788_vm11, %v15535_v18, 0.0  ;;  %v11335_v5 = vld [vmem:[#allocation2 + $0x1a0] sm:$0xf]  ;;  %vm18100_vm7 = vcmask 1041409  }
 0x50f   :  { %7356 = vmatpush.bf16.msra.mxu1 %v11288_v59  ;;  %v11344_v59 = vor.u32 %v12581_v24, %v11343_v54  ;;  %v11135_v30 = vld [vmem:[#allocation2 + $0x10] sm:$0xf]  ;;  %v5780_v24 = vmax.f32 %v15760_v37, 0.0  ;;  %v12593_v37 = vld [vmem:[#allocation2 + $0x214] sm:$0xf0] }
 0x510   :  { %7291 = vmatpush.bf16.msrb.mxu0 %v11152_v58  ;;  %v12529_v58 = vld [vmem:[#allocation2 + $0x14] sm:$0xf0]  ;;  %v11327_v54 = vld [vmem:[#allocation2 + $0x190] sm:$0xf] }
 0x511   :  { %7421 = vmatpush.bf16.msra.mxu3 %v11424_v49  ;;  %v6349_v49 = vsel %vm18091_vm3, %v6348_v33, %v15887_v25  ;;  %v16003_v33 = vsel %vm18093_vm2, %v6296_v13, %v6299_v56  ;;  %v11399_v13 = vld [vmem:[#allocation2 + $0x220] sm:$0xf]  ;;  %v12595_v56 = vld [vmem:[#allocation2 + $0x224] sm:$0xf0]  ;;  %vm18101_vm3 = vcmask 1042434  }
 0x512   :  { %v15946_v60 = vld [vmem:[#allocation1] sm:$0xff]  ;;  %v15997_v21 = vsel %vm2679_vm0, %v6349_v49, %v6350_v9 }
 0x513   :  { %6080 = vst [vmem:[#allocation1] ss:$9 sm:$0xff] %v5771_v22  ;;  %v11279_v22 = vld [vmem:[#allocation2 + $0x130] sm:$0xf] }
 0x514   :  { %6081 = vst [vmem:[#allocation1 + $0x1] ss:$9 sm:$0xff] %v5772_v52  ;;  %v11352_v52 = vor.u32 %v12583_v2, %v11351_v15  ;;  %v11280_v43 = vor.u32 %v12565_v53, %v11279_v22  ;;  %v12597_v15 = vld [vmem:[#allocation2 + $0x234] sm:$0xf0]  ;;  %v11271_v2 = vld [vmem:[#allocation2 + $0x120] sm:$0xf] }
 0x515   :  { %6082 = vst [vmem:[#allocation1 + $0x2] ss:$9 sm:$0xff] %v5773_v8  ;;  %v11416_v8 = vor.u32 %v12599_v63, %v11415_v38  ;;  %v6356_v38 = vsel %vm372_vm1, %v15923_v42, %v15889_v45  ;;  %v6158_v63 = vpack.c.bf16 %v15561_v40, %v15561_v40  ;;  %v11272_v9 = vor.u32 %v12563_v16, %v11271_v2  ;;  %v11263_v22 = vld [vmem:[#allocation2 + $0x110] sm:$0xf] }
 0x516   :  { %6083 = vst [vmem:[#allocation1 + $0x3] ss:$9 sm:$0xff] %v5774_v23  ;;  %v6341_v23 = vrot.slane %v15976_v41, 1  ;;  %7389 = vmatpush.bf16.msra.mxu2 %v11352_v52  ;;  %7357 = vmatpush.bf16.msra.mxu1 %v11280_v43  ;;  %v16029_v53 = vrot.slane %v6214_v10, 7  ;;  %v11336_v52 = vor.u32 %v12579_v48, %v11335_v5  ;;  %v5781_v43 = vmax.f32 %v15762_v17, 0.0 }
 0x517   :  { %6084 = vst [vmem:[#allocation1 + $0x4] ss:$9 sm:$0xff] %v5775_v19  ;;  %v11407_v19 = vld [vmem:[#allocation2 + $0x230] sm:$0xf]  ;;  %7422 = vmatpush.bf16.msra.mxu3 %v11416_v8  ;;  %v12561_v8 = vld [vmem:[#allocation2 + $0x114] sm:$0xf0]  ;;  %v11400_v40 = vor.u32 %v12595_v56, %v11399_v13  ;;  %v16040_v2 = vunpack.c.l.b16 %v6158_v63 }
 0x518   :  { %6085 = vst [vmem:[#allocation1 + $0x5] ss:$9 sm:$0xff] %v5776_v34  ;;  %v6333_v34 = vsel %vm2647_vm4, %v15889_v45, %v15923_v42  ;;  %v6353_v45 = vrot.slane %v15997_v21, 3  ;;  %v6222_v42 = vrot.slane %v15962_v27, 2  ;;  %v11408_v18 = vor.u32 %v12597_v15, %v11407_v19  ;;  %v12577_v19 = vld [vmem:[#allocation2 + $0x194] sm:$0xf0] }
 0x519   :  { %6086 = vst [vmem:[#allocation1 + $0x6] ss:$9 sm:$0xff] %v5777_v46  ;;  %v6316_v46 = vsel %vm18092_vm14, %v15782_v4, %v15809_v61  ;;  %v6330_v4 = vsel %vm1296_vm6, %v6328_v28, %v15887_v25  ;;  %v6347_v61 = vrot.slane %v15989_v29, 2  ;;  %v11144_v28 = vor.u32 %v12531_v11, %v11143_v26  ;;  %v11391_v15 = vld [vmem:[#allocation2 + $0x210] sm:$0xf]  ;;  %vm18103_vm14 = vmmov %vm18094_vm15 }
 0x51a   :  { %6087 = vst [vmem:[#allocation1 + $0x7] ss:$9 sm:$0xff] %v5778_v47  ;;  %v5643_v47 = vadd.f32 %v5389_v51, %v15937_v35  ;;  %v6156_v35 = vpack.c.bf16 %v15508_v14, %v15508_v14  ;;  %v16023_v51 = vsel %vm18095_vm9, %v6330_v4, %v6333_v34  ;;  %7390 = vmatpush.bf16.msra.mxu2 %v11344_v59  ;;  %v5782_v59 = vmax.f32 %v15764_v7, 0.0  ;;  %v12527_v48 = vld [vmem:[#allocation2 + $0x4] sm:$0xf0]  ;;  %vm18105_vm2 = vmmov %vm18103_vm14 }
 0x51b   :  { %v6157_v14 = vpack.c.bf16 %v6133_v44, %v6133_v44  ;;  %7292 = vmatpush.bf16.msrb.mxu0 %v11144_v28  ;;  %7423 = vmatpush.bf16.msra.mxu3 %v11408_v18  ;;  %v11136_v34 = vor.u32 %v12529_v58, %v11135_v30  ;;  %v6355_v26 = vsel %vm18096_vm8, %v6354_v55, %v15887_v25  ;;  %v5783_v17 = vmax.f32 %v15767_v6, 0.0  ;;  %v11127_v25 = vld [vmem:[#allocation2] sm:$0xf]  ;;  %v12559_v56 = vld [vmem:[#allocation2 + $0x104] sm:$0xf0] }
 0x51c   :  { %v5779_v49 = vmax.f32 %v5643_v47, 0.0  ;;  %v16035_v11 = vunpack.c.l.b16 %v6156_v35  ;;  %7358 = vmatpush.bf16.msra.mxu1 %v11272_v9  ;;  %v11264_v47 = vor.u32 %v12561_v8, %v11263_v22  ;;  %v5784_v16 = vmax.f32 %v15769_v32, 0.0  ;;  %v11255_v35 = vld [vmem:[#allocation2 + $0x100] sm:$0xf]  ;;  %v12591_v22 = vld [vmem:[#allocation2 + $0x204] sm:$0xf0] }
 0x51d   :  { %v11328_v4 = vor.u32 %v12577_v19, %v11327_v54  ;;  %v16046_v55 = vsel %vm2679_vm0, %v15967_v31, %v6316_v46  ;;  %v6357_v7 = vsel %vm2688_vm10, %v6355_v26, %v6356_v38  ;;  %v6574_v44 = vunpack.i.h.s16 %v16023_v51  ;;  %v11319_v63 = vld [vmem:[#allocation2 + $0x180] sm:$0xf] }
 0x51e   :  { %18097 = vst [vmem:[#allocation18_spill] sm:$0xff] %v16035_v11  ;;  %7391 = vmatpush.bf16.msra.mxu2 %v11336_v52  ;;  %v6194_v5 = vunpack.c.l.b16 %v6157_v14  ;;  %v6159_v6 = vpack.c.bf16 %v15580_v39, %v15580_v39  ;;  %v11392_v32 = vor.u32 %v12593_v37, %v11391_v15  ;;  %v11128_v13 = vor.u32 %v12527_v48, %v11127_v25  ;;  %v12575_v39 = vld [vmem:[#allocation2 + $0x184] sm:$0xf0]  ;;  %v11383_v18 = vld [vmem:[#allocation2 + $0x200] sm:$0xf] }
 0x51f   :  { %7424 = vmatpush.bf16.msra.mxu3 %v11400_v40  ;;  %7293 = vmatpush.bf16.msrb.mxu0 %v11136_v34  ;;  %v6254_v31 = vpack.c.b16 %v16035_v11, %v15935_v50  ;;  %v6576_v46 = vunpack.i.h.s16 %v6341_v23  ;;  %v6578_v38 = vunpack.i.h.s16 %v6347_v61  ;;  %v11256_v28 = vor.u32 %v12559_v56, %v11255_v35  ;;  %v18104_v37 = vld [vmem:[#allocation29_spill] sm:$0xff] }
 0x520   :  { %7359 = vmatpush.bf16.msra.mxu1 %v11264_v47  ;;  %v6580_v9 = vunpack.i.h.s16 %v6353_v45  ;;  %v16061_v30 = vpack.c.b16 %v16040_v2, %v6194_v5  ;;  %v5785_v58 = vmax.f32 %v15771_v62, 0.0  ;;  %v11320_v50 = vor.u32 %v12575_v39, %v11319_v63 }
 0x521   :  { %v16037_v10 = vld [vmem:[#allocation1] sm:$0xff]  ;;  %v6319_v14 = vrot.slane %v16046_v55, 3  ;;  %v6230_v52 = vrot.slane %v15962_v27, 3  ;;  %v5786_v8 = vmax.f32 %v15774_v20, 0.0  ;;  %v18098_v54 = vrot.slane %v15867_v12, 4  ;;  %v18130_v55 = vld [vmem:[#allocation17_spill] sm:$0xff] }
 0x522   :  { %6089 = vst [vmem:[#allocation1] ss:$9 sm:$0xff] %v5779_v49  ;;  %7392 = vmatpush.bf16.msra.mxu2 %v11328_v4  ;;  %v6359_v49 = vrot.slane %v6357_v7, 4  ;;  %v6269_v62 = vrot.slane %v6222_v42, 6  ;;  %v11384_v40 = vor.u32 %v12591_v22, %v11383_v18  ;;  %v16078_v34 = vpack.i.b16 %v6341_v23, %v6574_v44 }
 0x523   :  { %6090 = vst [vmem:[#allocation1 + $0x1] ss:$9 sm:$0xff] %v5780_v24  ;;  %v16070_v24 = vpack.i.b16 %v16023_v51, %v18098_v54  ;;  %7425 = vmatpush.bf16.msra.mxu3 %v11392_v32  ;;  %7294 = vmatpush.bf16.msrb.mxu0 %v11128_v13  ;;  %v6271_v20 = vrot.slane %v6254_v31, 4  ;;  %v16082_v12 = vpack.i.b16 %v6347_v61, %v6576_v46  ;;  %v6215_v29 = vrot.slane %v16061_v30, 1 }
 0x524   :  { %6091 = vst [vmem:[#allocation1 + $0x2] ss:$9 sm:$0xff] %v5781_v43  ;;  %v16074_v43 = vunpack.c.l.b16 %v6159_v6  ;;  %v6362_v51 = vsel %vm2642_vm5, %v15962_v27, %v16029_v53  ;;  %7360 = vmatpush.bf16.msra.mxu1 %v11256_v28  ;;  %v16089_v42 = vpack.i.b16 %v6353_v45, %v6578_v38  ;;  %v16091_v19 = vpack.i.b16 %v6359_v49, %v6580_v9  ;;  %v18102_v45 = vld [vmem:[#allocation28_spill] sm:$0xff] }
 0x525   :  { %6092 = vst [vmem:[#allocation1 + $0x3] ss:$9 sm:$0xff] %v5782_v59  ;;  %v6370_v41 = vsel %vm18100_vm7, %v15962_v27, %v16029_v53  ;;  %v6270_v23 = vrot.slane %v6230_v52, 5  ;;  %v6376_v61 = vsel %vm18101_vm3, %v15962_v27, %v16029_v53  ;;  %v6382_v21 = vsel %vm2647_vm4, %v15962_v27, %v16029_v53 }
 0x526   :  { %6093 = vst [vmem:[#allocation1 + $0x4] ss:$9 sm:$0xff] %v5783_v17  ;;  %7393 = vmatpush.bf16.msra.mxu2 %v11320_v50  ;;  %v6136_v26 = vsel %vm5788_vm11, %v18102_v45, 0.0  ;;  %v6388_v59 = vsel %vm18103_vm14, %v15962_v27, %v16029_v53  ;;  %v6364_v47 = vsel %vm1296_vm6, %v6362_v51, %v6269_v62  ;;  %v6255_v15 = vpack.c.b16 %v16074_v43, %v16040_v2 }
 0x527   :  { %6094 = vst [vmem:[#allocation1 + $0x5] ss:$9 sm:$0xff] %v5784_v16  ;;  %v6161_v17 = vpack.c.bf16 %v18104_v37, %v18104_v37  ;;  %7426 = vmatpush.bf16.msra.mxu3 %v11384_v40  ;;  %v6367_v16 = vsel %vm2647_vm4, %v6270_v23, %v6271_v20  ;;  %v6372_v4 = vsel %vm18105_vm2, %v6270_v23, %v6271_v20  ;;  %vm18106_vm15 = vcmask 1042433  }
 0x528   :  { %18099 = vst [vmem:[#allocation19_spill] sm:$0xff] %v16074_v43  ;;  %v6371_v25 = vsel %vm18106_vm15, %v6370_v41, %v6269_v62  ;;  %v6223_v7 = vrot.slane %v16061_v30, 2  ;;  %vm18107_vm9 = vcmask 1045509   ;;  %v6231_v27 = vrot.slane %v16061_v30, 3  ;;  %v11393_v43 = vld [vmem:[#allocation2 + $0x218] sm:$0xf0] }
 0x529   :  { %6095 = vst [vmem:[#allocation1 + $0x6] ss:$9 sm:$0xff] %v5785_v58  ;;  %v6378_v44 = vsel %vm18107_vm9, %v6270_v23, %v6271_v20  ;;  %v6272_v53 = vrot.slane %v6215_v29, 7  ;;  %v6160_v5 = vpack.c.bf16 %v6136_v26, %v6136_v26  ;;  %vm18108_vm8 = vcmask 1043458   ;;  %v18114_v58 = vld [vmem:[#allocation12_spill] sm:$0xff] }
 0x52a   :  { %6096 = vst [vmem:[#allocation1 + $0x7] ss:$9 sm:$0xff] %v5786_v8  ;;  %v6377_v2 = vsel %vm18108_vm8, %v6376_v61, %v6269_v62  ;;  %vm18109_vm7 = vcmask 1044483   ;;  %vm18110_vm3 = vcmask 1045508   ;;  %v5787_v6 = vmax.f32 %v15776_v3, 0.0  ;;  %v18120_v61 = vld [vmem:[#allocation15_spill] sm:$0xff] }
 0x52b   :  { %v6383_v48 = vsel %vm18109_vm7, %v6382_v21, %v6269_v62  ;;  %v6389_v35 = vsel %vm18110_vm3, %v6388_v59, %v6269_v62  ;;  %vm18111_vm14 = vcmask 1046534   ;;  %v6390_v13 = vsel %vm372_vm1, %v6271_v20, %v6270_v23 }
 0x52c   :  { %v6384_v32 = vsel %vm18111_vm14, %v6270_v23, %v6271_v20  ;;  %v6275_v56 = vrot.slane %v6255_v15, 4  ;;  %v16126_v63 = vunpack.c.l.b16 %v6161_v17  ;;  %vm18112_vm2 = vcmask 1042432   ;;  %v18118_v20 = vld [vmem:[#allocation13_spill] sm:$0xff] }
 0x52d   :  { %v16131_v46 = vsel %vm18112_vm2, %v6364_v47, %v6367_v16  ;;  %v16134_v38 = vsel %vm2660_vm12, %v6371_v25, %v6372_v4  ;;  %v16137_v28 = vsel %vm2670_vm13, %v6377_v2, %v6378_v44  ;;  %v6273_v39 = vrot.slane %v6223_v7, 6 }
 0x52e   :  { %v6274_v3 = vrot.slane %v6231_v27, 5  ;;  %vm18113_vm15 = vcmask 1041409   ;;  %v6196_v9 = vunpack.c.l.b16 %v6160_v5  ;;  %v6162_v50 = vpack.c.bf16 %v18114_v58, %v18114_v58 }
 0x52f   :  { %v6404_v18 = vsel %vm18113_vm15, %v16061_v30, %v6272_v53  ;;  %v16144_v22 = vsel %vm2679_vm0, %v6383_v48, %v6384_v32  ;;  %v6391_v49 = vsel %vm2688_vm10, %v6389_v35, %v6390_v13  ;;  %vm18115_vm9 = vcmask 1042434  }
 0x530   :  { %v6410_v52 = vsel %vm18115_vm9, %v16061_v30, %v6272_v53  ;;  %v6416_v8 = vsel %vm2647_vm4, %v16061_v30, %v6272_v53  ;;  %vm18116_vm8 = vcmask 1044484   ;;  %vm18117_vm7 = vcmask 1045509  }
 0x531   :  { %v16128_v31 = vld [vmem:[#allocation1] sm:$0xff]  ;;  %v6406_v54 = vsel %vm18116_vm8, %v6274_v3, %v6275_v56  ;;  %v6412_v62 = vsel %vm18117_vm7, %v6274_v3, %v6275_v56  ;;  %v16154_v40 = vpack.c.b16 %v16126_v63, %v6196_v9  ;;  %v6139_v51 = vsel %vm5788_vm11, %v18118_v20, 0.0  ;;  %vm18123_vm9 = vmmov %vm18116_vm8 }
 0x532   :  { %6098 = vst [vmem:[#allocation1] ss:$9 sm:$0xff] %v5787_v6  ;;  %v6396_v41 = vsel %vm2642_vm5, %v16061_v30, %v6272_v53  ;;  %vm18119_vm3 = vcmask 1042433   ;;  %v6418_v23 = vsel %vm18111_vm14, %v6274_v3, %v6275_v56  ;;  %v6164_v21 = vpack.c.bf16 %v18120_v61, %v18120_v61 }
 0x533   :  { %v6405_v29 = vsel %vm18119_vm3, %v6404_v18, %v6273_v39  ;;  %vm18121_vm2 = vcmask 1043458   ;;  %vm18122_vm15 = vcmask 1044483   ;;  %v6422_v59 = vsel %vm18123_vm9, %v16061_v30, %v6272_v53 }
 0x534   :  { %v6411_v45 = vsel %vm18121_vm2, %v6410_v52, %v6273_v39  ;;  %v6417_v26 = vsel %vm18122_vm15, %v6416_v8, %v6273_v39  ;;  %v16169_v47 = vunpack.c.l.b16 %v6162_v50  ;;  %v6401_v15 = vsel %vm2647_vm4, %v6274_v3, %v6275_v56  ;;  %v18129_v52 = vld [vmem:[#allocation16_spill] sm:$0xff]  ;;  %vm18134_vm2 = vmmov %vm18123_vm9 }
 0x535   :  { %v6407_v37 = vsel %vm2660_vm12, %v6405_v29, %v6406_v54  ;;  %v16174_v17 = vsel %vm2670_vm13, %v6411_v45, %v6412_v62  ;;  %v6163_v16 = vpack.c.bf16 %v6139_v51, %v6139_v51  ;;  %v6375_v4 = vrot.slane %v16134_v38, 1 }
 0x536   :  { %18124 = vst [vmem:[#allocation20_spill] sm:$0xff] %v16169_v47  ;;  %v16178_v25 = vsel %vm2679_vm0, %v6417_v26, %v6418_v23  ;;  %v6424_v7 = vsel %vm372_vm1, %v6275_v56, %v6274_v3  ;;  %v6216_v44 = vrot.slane %v16154_v40, 1  ;;  %v6381_v27 = vrot.slane %v16137_v28, 2 }
 0x537   :  { %v6398_v53 = vsel %vm1296_vm6, %v6396_v41, %v6273_v39  ;;  %vm18125_vm8 = vcmask 1045508   ;;  %v16187_v2 = vunpack.c.l.b16 %v6164_v21  ;;  %vm18126_vm7 = vcmask 1042432  }
 0x538   :  { %v6423_v5 = vsel %vm18125_vm8, %v6422_v59, %v6273_v39  ;;  %v6402_v48 = vsel %vm18126_vm7, %v6398_v53, %v6401_v15  ;;  %v6409_v35 = vrot.slane %v6407_v37, 1  ;;  %v6415_v6 = vrot.slane %v16174_v17, 2 }
 0x539   :  { %v16182_v30 = vld [vmem:[#allocation1] sm:$0xff]  ;;  %v6256_v32 = vpack.c.b16 %v16169_v47, %v16126_v63  ;;  %v18127_v13 = vrot.slane %v15850_v0, 1  ;;  %v6421_v56 = vrot.slane %v16178_v25, 3  ;;  %v16198_v3 = vsel %vm2688_vm10, %v6423_v5, %v6424_v7 }
 0x53a   :  { %6759 = vst [vmem:[#allocation1] ss:$9 sm:$0xff] %v16003_v33  ;;  %v6224_v39 = vrot.slane %v16154_v40, 2  ;;  %v6198_v18 = vunpack.c.l.b16 %v6163_v16  ;;  %v18128_v33 = vrot.slane %v15858_v1, 2  ;;  %v6387_v9 = vrot.slane %v16144_v22, 3 }
 0x53b   :  { %6762 = vst [vmem:[#allocation1 + $0x1] ss:$9 sm:$0xff] %v18127_v13  ;;  %v6393_v58 = vrot.slane %v6391_v49, 4  ;;  %v6232_v50 = vrot.slane %v16154_v40, 3  ;;  %v6276_v63 = vrot.slane %v6216_v44, 7  ;;  %v6592_v0 = vunpack.i.h.s16 %v6402_v48 }
 0x53c   :  { %6765 = vst [vmem:[#allocation1 + $0x2] ss:$9 sm:$0xff] %v18128_v33  ;;  %v6165_v8 = vpack.c.bf16 %v18129_v52, %v18129_v52  ;;  %v16210_v54 = vpack.c.b16 %v16187_v2, %v6198_v18  ;;  %v6142_v1 = vsel %vm5788_vm11, %v15860_v57, 0.0  ;;  %v6427_v49 = vrot.slane %v16198_v3, 4 }
 0x53d   :  { %6768 = vst [vmem:[#allocation1 + $0x3] ss:$9 sm:$0xff] %v6319_v14  ;;  %v16217_v62 = vpack.i.b16 %v6402_v48, %v6393_v58  ;;  %v6279_v20 = vrot.slane %v6256_v32, 4  ;;  %v6167_v14 = vpack.c.bf16 %v18130_v55, %v18130_v55  ;;  %v6594_v51 = vunpack.i.h.s16 %v6409_v35 }
 0x53e   :  { %6771 = vst [vmem:[#allocation1 + $0x4] ss:$9 sm:$0xff] %v16070_v24  ;;  %v6596_v41 = vunpack.i.h.s16 %v6415_v6  ;;  %v16222_v29 = vunpack.i.h.s16 %v6421_v56  ;;  %v6277_v23 = vrot.slane %v6224_v39, 6  ;;  %v6278_v57 = vrot.slane %v6232_v50, 5 }
 0x53f   :  { %6774 = vst [vmem:[#allocation1 + $0x5] ss:$9 sm:$0xff] %v16078_v34  ;;  %vm18131_vm3 = vcmask 1041409   ;;  %vm18132_vm14 = vcmask 1042434   ;;  %v6166_v21 = vpack.c.bf16 %v6142_v1, %v6142_v1  ;;  %v16230_v45 = vpack.i.b16 %v6409_v35, %v6592_v0 }
 0x540   :  { %6777 = vst [vmem:[#allocation1 + $0x6] ss:$9 sm:$0xff] %v16082_v12  ;;  %v6438_v24 = vsel %vm18131_vm3, %v16154_v40, %v6276_v63  ;;  %v6444_v61 = vsel %vm18132_vm14, %v16154_v40, %v6276_v63  ;;  %v6450_v34 = vsel %vm2647_vm4, %v16154_v40, %v6276_v63  ;;  %v16234_v26 = vunpack.c.l.b16 %v6165_v8  ;;  %vm18140_vm14 = vmmov %vm18134_vm2 }
 0x541   :  { %6780 = vst [vmem:[#allocation1 + $0x7] ss:$9 sm:$0xff] %v16089_v42  ;;  %v6217_v59 = vrot.slane %v16210_v54, 1  ;;  %v6440_v12 = vsel %vm18134_vm2, %v6278_v57, %v6279_v20  ;;  %vm18135_vm15 = vcmask 1045509   ;;  %v6168_v37 = vpack.c.bf16 %v15946_v60, %v15946_v60 }
 0x542   :  { %18133 = vst [vmem:[#allocation21_spill] sm:$0xff] %v16234_v26  ;;  %v6446_v15 = vsel %vm18135_vm15, %v6278_v57, %v6279_v20  ;;  %v6201_v17 = vunpack.c.l.b16 %v6167_v14  ;;  %v6430_v42 = vsel %vm2642_vm5, %v16154_v40, %v6276_v63  ;;  %vm18136_vm9 = vcmask 1042433  }
 0x543   :  { %v6439_v16 = vsel %vm18136_vm9, %v6438_v24, %v6277_v23  ;;  %vm18137_vm8 = vcmask 1043458   ;;  %vm18138_vm7 = vcmask 1046534   ;;  %vm18139_vm3 = vcmask 1044483  }
 0x544   :  { %v6445_v25 = vsel %vm18137_vm8, %v6444_v61, %v6277_v23  ;;  %v6452_v7 = vsel %vm18138_vm7, %v6278_v57, %v6279_v20  ;;  %v6451_v44 = vsel %vm18139_vm3, %v6450_v34, %v6277_v23  ;;  %v6456_v53 = vsel %vm18140_vm14, %v16154_v40, %v6276_v63 }
 0x545   :  { %v6225_v5 = vrot.slane %v16210_v54, 2  ;;  %v6200_v48 = vunpack.c.l.b16 %v6166_v21  ;;  %v16251_v60 = vsel %vm2660_vm12, %v6439_v16, %v6440_v12  ;;  %v16254_v35 = vsel %vm2670_vm13, %v6445_v25, %v6446_v15 }
 0x546   :  { %v6257_v32 = vpack.c.b16 %v16234_v26, %v16187_v2  ;;  %v6280_v13 = vrot.slane %v6217_v59, 7  ;;  %v11112_v39 = vpack.i.b16 %v6415_v6, %v6594_v51  ;;  %v16259_v18 = vsel %vm2679_vm0, %v6451_v44, %v6452_v7 }
 0x547   :  { %v16261_v33 = vpack.c.b16 %v6201_v17, %v6200_v48  ;;  %v16263_v40 = vunpack.c.l.b16 %v6168_v37  ;;  %v16265_v58 = vpack.i.b16 %v6421_v56, %v6596_v41  ;;  %v16268_v50 = vsel %vm1296_vm6, %v6430_v42, %v6277_v23  ;;  %v12557_v48 = vld [vmem:[#allocation2 + $0xf4] sm:$0xf0] }
 0x548   :  { %vm18142_vm2 = vcmask 1045508   ;;  %v6233_v0 = vrot.slane %v16210_v54, 3  ;;  %v16272_v52 = vld [vmem:[#allocation1] sm:$0xff]  ;;  %v16274_v2 = vld [vmem:[#allocation1 + $0x9] sm:$0xff]  ;;  %v16276_v6 = vld [vmem:[#allocation1 + $0x12] sm:$0xff]  ;;  %v16279_v8 = vsel %vm2647_vm4, %v6278_v57, %v6279_v20  ;;  %v6443_v1 = vrot.slane %v16251_v60, 1 }
 0x549   :  { %18141 = vst [vmem:[#allocation22_spill] sm:$0xff] %v16263_v40  ;;  %v6457_v63 = vsel %vm18142_vm2, %v6456_v53, %v6277_v23  ;;  %v6449_v56 = vrot.slane %v16254_v35, 2  ;;  %v16283_v55 = vrot.slane %v6225_v5, 6  ;;  %7295 = vmatmul.bf16.vlgmr.msrb.gmra.mxu0 %v16272_v52  ;;  %7361 = vmatmul.bf16.vlgmr.msra.gmra.mxu1 %v16276_v6  ;;  %v16287_v14 = vld [vmem:[#allocation1 + $0x1b] sm:$0xff]  ;;  %v16289_v51 = vld [vmem:[#allocation1 + $0x24] sm:$0xff]  ;;  %v6455_v41 = vrot.slane %v16259_v18, 3 }
 0x54a   :  { %v6458_v23 = vsel %vm372_vm1, %v6279_v20, %v6278_v57  ;;  %v6283_v24 = vrot.slane %v6257_v32, 4  ;;  %v6464_v61 = vsel %vm2642_vm5, %v16210_v54, %v6280_v13  ;;  %7394 = vmatmul.bf16.vlgmr.msra.gmra.mxu2 %v16287_v14  ;;  %7427 = vmatmul.bf16.vlgmr.msra.gmra.mxu3 %v16289_v51  ;;  %6787 = vst [vmem:[#allocation1] ss:$9 sm:$0xff] %v16091_v19  ;;  %vm18143_vm15 = vcmask 1041409   ;;  %v11247_v5 = vld [vmem:[#allocation2 + $0xf0] sm:$0xf] }
 0x54b   :  { %v6472_v21 = vsel %vm18143_vm15, %v16210_v54, %v6280_v13  ;;  %v6218_v34 = vrot.slane %v16261_v33, 1  ;;  %v6258_v59 = vpack.c.b16 %v16263_v40, %v6201_v17  ;;  %v6145_v20 = vsel %vm5788_vm11, %v16037_v10, 0.0  ;;  %6789 = vst [vmem:[#allocation1 + $0x1] ss:$9 sm:$0xff] %v16131_v46  ;;  %vm18145_vm11 = vmmov %vm18140_vm14 }
 0x54c   :  { %v6282_v57 = vrot.slane %v6233_v0, 5  ;;  %vm18144_vm9 = vcmask 1042434   ;;  %v6234_v15 = vrot.slane %v16261_v33, 3  ;;  %v6170_v19 = vpack.c.bf16 %v16128_v31, %v16128_v31  ;;  %6791 = vst [vmem:[#allocation1 + $0x2] ss:$9 sm:$0xff] %v6375_v4  ;;  %vm18146_vm8 = vmmov %vm18145_vm11 }
 0x54d   :  { %v6478_v12 = vsel %vm18144_vm9, %v16210_v54, %v6280_v13  ;;  %v16314_v37 = vsel %vm2688_vm10, %v6457_v63, %v6458_v23  ;;  %v6484_v36 = vsel %vm2647_vm4, %v16210_v54, %v6280_v13  ;;  %v6490_v10 = vsel %vm18145_vm11, %v16210_v54, %v6280_v13  ;;  %6793 = vst [vmem:[#allocation1 + $0x3] ss:$9 sm:$0xff] %v6381_v27  ;;  %vm18153_vm11 = vmmov %vm18146_vm8 }
 0x54e   :  { %v6466_v46 = vsel %vm1296_vm6, %v6464_v61, %v16283_v55  ;;  %v6474_v31 = vsel %vm18146_vm8, %v6282_v57, %v6283_v24  ;;  %vm18147_vm7 = vcmask 1042433   ;;  %v6226_v4 = vrot.slane %v16261_v33, 2  ;;  %6795 = vst [vmem:[#allocation1 + $0x4] ss:$9 sm:$0xff] %v6387_v9 }
 0x54f   :  { %v6473_v38 = vsel %vm18147_vm7, %v6472_v21, %v16283_v55  ;;  %v6169_v17 = vpack.c.bf16 %v6145_v20, %v6145_v20  ;;  %vm18148_vm3 = vcmask 1045509   ;;  %vm18149_vm14 = vcmask 1043458   ;;  %6797 = vst [vmem:[#allocation1 + $0x5] ss:$9 sm:$0xff] %v16217_v62 }
 0x550   :  { %v6480_v42 = vsel %vm18148_vm3, %v6282_v57, %v6283_v24  ;;  %v6479_v54 = vsel %vm18149_vm14, %v6478_v12, %v16283_v55  ;;  %v16333_v16 = vrot.slane %v6218_v34, 7  ;;  %v16335_v28 = vrot.slane %v6258_v59, 4  ;;  %6799 = vst [vmem:[#allocation1 + $0x6] ss:$9 sm:$0xff] %v16230_v45  ;;  %vm18155_vm7 = vmmov %vm18148_vm3 }
 0x551   :  { %vm18150_vm2 = vcmask 1044483   ;;  %v16340_v25 = vrot.slane %v6234_v15, 5  ;;  %v16342_v7 = vunpack.c.l.b16 %v6170_v19  ;;  %v6171_v22 = vpack.c.bf16 %v16182_v30, %v16182_v30  ;;  %6801 = vst [vmem:[#allocation1 + $0x7] ss:$9 sm:$0xff] %v11112_v39 }
 0x552   :  { %v6485_v27 = vsel %vm18150_vm2, %v6484_v36, %v16283_v55  ;;  %v6469_v9 = vsel %vm2647_vm4, %v6282_v57, %v6283_v24  ;;  %vm18151_vm15 = vcmask 1046534   ;;  %v6492_v53 = vsel %vm372_vm1, %v6283_v24, %v6282_v57 }
 0x553   :  { %v6486_v44 = vsel %vm18151_vm15, %v6282_v57, %v6283_v24  ;;  %v16351_v62 = vsel %vm2660_vm12, %v6473_v38, %v6474_v31  ;;  %v16353_v32 = vrot.slane %v6226_v4, 6  ;;  %v16356_v13 = vsel %vm2670_vm13, %v6479_v54, %v6480_v42  ;;  %vm18156_vm3 = vmmov %vm18151_vm15 }
 0x554   :  { %v6202_v30 = vunpack.c.l.b16 %v6169_v17  ;;  %v11248_v63 = vor.u32 %v12557_v48, %v11247_v5  ;;  %vm18152_vm9 = vcmask 1041409   ;;  %v6508_v0 = vsel %vm18153_vm11, %v16340_v25, %v16335_v28 }
 0x555   :  { %v6506_v45 = vsel %vm18152_vm9, %v16261_v33, %v16333_v16  ;;  %vm18154_vm8 = vcmask 1042434   ;;  %v6518_v23 = vsel %vm2647_vm4, %v16261_v33, %v16333_v16  ;;  %v6514_v24 = vsel %vm18155_vm7, %v16340_v25, %v16335_v28 }
 0x556   :  { %v6512_v39 = vsel %vm18154_vm8, %v16261_v33, %v16333_v16  ;;  %v6520_v61 = vsel %vm18156_vm3, %v16340_v25, %v16335_v28  ;;  %v16377_v21 = vpack.c.b16 %v16342_v7, %v6202_v30  ;;  %v16379_v34 = vunpack.c.l.b16 %v6171_v22  ;;  %7320 = vmatpush.bf16.msra.mxu0 %v11248_v63 }
 0x557   :  { %vm18158_vm14 = vcmask 1045508   ;;  %vm18159_vm2 = vcmask 1042432   ;;  %v6477_v57 = vrot.slane %v16351_v62, 1  ;;  %v6483_v12 = vrot.slane %v16356_v13, 2  ;;  %v11239_v13 = vld [vmem:[#allocation2 + $0xe0] sm:$0xf] }
 0x558   :  { %18157 = vst [vmem:[#allocation23_spill] sm:$0xff] %v16379_v34  ;;  %v6491_v59 = vsel %vm18158_vm14, %v6490_v10, %v16283_v55  ;;  %v6470_v20 = vsel %vm18159_vm2, %v6466_v46, %v6469_v9  ;;  %v16387_v15 = vsel %vm2679_vm0, %v6485_v27, %v6486_v44  ;;  %vm18160_vm15 = vcmask 1042433   ;;  %v16412_v27 = vld [vmem:[#allocation1] sm:$0xff]  ;;  %v16414_v22 = vld [vmem:[#allocation1 + $0x9] sm:$0xff]  ;;  %v16416_v9 = vld [vmem:[#allocation1 + $0x12] sm:$0xff] }
 0x559   :  { %v6507_v19 = vsel %vm18160_vm15, %v6506_v45, %v16353_v32  ;;  %vm18161_vm9 = vcmask 1043458   ;;  %vm18162_vm11 = vcmask 1044483   ;;  %v16396_v55 = vsel %vm2688_vm10, %v6491_v59, %v6492_v53  ;;  %vm18163_vm8 = vmmov %vm18159_vm2  ;;  %7300 = vmatmul.bf16.gmra.mxu0 %v16412_v27  ;;  %7366 = vmatmul.bf16.gmra.mxu1 %v16416_v9  ;;  %v16430_v48 = vld [vmem:[#allocation1 + $0x24] sm:$0xff] }
 0x55a   :  { %v6513_v36 = vsel %vm18161_vm9, %v6512_v39, %v16353_v32  ;;  %v6519_v31 = vsel %vm18162_vm11, %v6518_v23, %v16353_v32  ;;  %v16399_v10 = vsel %vm2660_vm12, %v6507_v19, %v6508_v0  ;;  %v6219_v4 = vrot.slane %v16377_v21, 1  ;;  %7432 = vmatmul.bf16.gmra.mxu3 %v16430_v48 }
 0x55b   :  { %v16402_v46 = vsel %vm2670_vm13, %v6513_v36, %v6514_v24  ;;  %v16405_v38 = vsel %vm2679_vm0, %v6519_v31, %v6520_v61  ;;  %v6227_v17 = vrot.slane %v16377_v21, 2  ;;  %v6235_v42 = vrot.slane %v16377_v21, 3  ;;  %v11249_v61 = vld [vmem:[#allocation2 + $0xf8] sm:$0xf0]  ;;  %v12572_v36 = vld [vmem:[#allocation2 + $0x174] sm:$0xf] }
 0x55c   :  { %v6259_v54 = vpack.c.b16 %v16379_v34, %v16342_v7  ;;  %v11114_v44 = vpack.i.b16 %v6427_v49, %v16222_v29  ;;  %v6436_v53 = vsel %vm18163_vm8, %v16268_v50, %v16279_v8  ;;  %v6461_v62 = vrot.slane %v16314_v37, 4  ;;  %v16428_v7 = vld [vmem:[#allocation1 + $0x1b] sm:$0xff]  ;;  %v12555_v50 = vld [vmem:[#allocation2 + $0xe4] sm:$0xf0]  ;;  %v11313_v31 = vld [vmem:[#allocation2 + $0x178] sm:$0xf0] }
 0x55d   :  { %v6489_v5 = vrot.slane %v16387_v15, 3  ;;  %v6495_v3 = vrot.slane %v16396_v55, 4  ;;  %v6610_v49 = vunpack.i.h.s16 %v6470_v20  ;;  %v6612_v29 = vunpack.i.h.s16 %v6477_v57  ;;  %7399 = vmatmul.bf16.gmra.mxu2 %v16428_v7  ;;  %6808 = vst [vmem:[#allocation1] ss:$9 sm:$0xff] %v16265_v58  ;;  %v12556_v58 = vld [vmem:[#allocation2 + $0xf4] sm:$0xf] }
 0x55e   :  { %v6614_v30 = vunpack.i.h.s16 %v6483_v12  ;;  %v6511_v8 = vrot.slane %v16399_v10, 1  ;;  %v6517_v37 = vrot.slane %v16402_v46, 2  ;;  %v6523_v63 = vrot.slane %v16405_v38, 3  ;;  %6810 = vst [vmem:[#allocation1 + $0x1] ss:$9 sm:$0xff] %v11114_v44 }
 0x55f   :  { %v11240_v45 = vor.u32 %v12555_v50, %v11239_v13  ;;  %v16439_v0 = vrot.slane %v6219_v4, 7  ;;  %v16441_v39 = vrot.slane %v6227_v17, 6  ;;  %v16443_v23 = vrot.slane %v6235_v42, 5  ;;  %6812 = vst [vmem:[#allocation1 + $0x2] ss:$9 sm:$0xff] %v6436_v53 }
 0x560   :  { %v16445_v24 = vrot.slane %v6259_v54, 4  ;;  %6814 = vst [vmem:[#allocation1 + $0x3] ss:$9 sm:$0xff] %v6443_v1  ;;  %v11115_v59 = vpack.i.b16 %v6470_v20, %v6461_v62  ;;  %v11252_v19 = vor.u32 %v12556_v58, %v11249_v61  ;;  %v11116_v4 = vpack.i.b16 %v6477_v57, %v6610_v49  ;;  %v12588_v42 = vld [vmem:[#allocation2 + $0x1f4] sm:$0xf] }
 0x561   :  { %7321 = vmatpush.bf16.msra.mxu0 %v11240_v45  ;;  %6816 = vst [vmem:[#allocation1 + $0x4] ss:$9 sm:$0xff] %v6449_v56  ;;  %v11316_v17 = vor.u32 %v12572_v36, %v11313_v31  ;;  %v11377_v54 = vld [vmem:[#allocation2 + $0x1f8] sm:$0xf0]  ;;  %v16453_v44 = vpack.i.b16 %v6483_v12, %v6612_v29  ;;  %v16457_v60 = vpack.i.b16 %v6489_v5, %v6614_v30  ;;  %v12554_v1 = vld [vmem:[#allocation2 + $0xe4] sm:$0xf] }
 0x562   :  { %6818 = vst [vmem:[#allocation1 + $0x5] ss:$9 sm:$0xff] %v6455_v41  ;;  %7485 = vmatpush.bf16.msrb.mxu1 %v11252_v19  ;;  %v11380_v35 = vor.u32 %v12588_v42, %v11377_v54  ;;  %v11241_v56 = vld [vmem:[#allocation2 + $0xe8] sm:$0xf0]  ;;  %vm18164_vm7 = vcmask 1044484   ;;  %v6526_v18 = vsel %vm372_vm1, %v16335_v28, %v16340_v25  ;;  %vm18165_vm3 = vcmask 1041409  }
 0x563   :  { %6820 = vst [vmem:[#allocation1 + $0x6] ss:$9 sm:$0xff] %v11115_v59  ;;  %v6524_v20 = vsel %vm18164_vm7, %v16261_v33, %v16333_v16  ;;  %7518 = vmatpush.bf16.msrb.mxu2 %v11316_v17  ;;  %v11244_v41 = vor.u32 %v12554_v1, %v11241_v56  ;;  %v12570_v57 = vld [vmem:[#allocation2 + $0x164] sm:$0xf]  ;;  %v11305_v12 = vld [vmem:[#allocation2 + $0x168] sm:$0xf0]  ;;  %v6540_v53 = vsel %vm18165_vm3, %v16377_v21, %v16439_v0  ;;  %vm18167_vm2 = vmmov %vm18164_vm7 }
 0x564   :  { %6822 = vst [vmem:[#allocation1 + $0x7] ss:$9 sm:$0xff] %v11116_v4  ;;  %vm18166_vm14 = vcmask 1042434   ;;  %v6552_v13 = vsel %vm2647_vm4, %v16377_v21, %v16439_v0  ;;  %7551 = vmatpush.bf16.msrb.mxu3 %v11380_v35  ;;  %v11308_v49 = vor.u32 %v12570_v57, %v11305_v12  ;;  %v12586_v29 = vld [vmem:[#allocation2 + $0x1e4] sm:$0xf]  ;;  %v6542_v45 = vsel %vm18167_vm2, %v16443_v23, %v16445_v24 }
 0x565   :  { %v6546_v62 = vsel %vm18166_vm14, %v16377_v21, %v16439_v0  ;;  %v11369_v30 = vld [vmem:[#allocation2 + $0x1e8] sm:$0xf0]  ;;  %v11231_v50 = vld [vmem:[#allocation2 + $0xd0] sm:$0xf]  ;;  %vm18168_vm15 = vcmask 1045509   ;;  %vm18169_vm9 = vcmask 1046534   ;;  %v6498_v4 = vsel %vm2642_vm5, %v16261_v33, %v16333_v16 }
 0x566   :  { %v6548_v58 = vsel %vm18168_vm15, %v16443_v23, %v16445_v24  ;;  %v6554_v61 = vsel %vm18169_vm9, %v16443_v23, %v16445_v24  ;;  %v11372_v59 = vor.u32 %v12586_v29, %v11369_v30  ;;  %v12553_v19 = vld [vmem:[#allocation2 + $0xd4] sm:$0xf0]  ;;  %v12552_v36 = vld [vmem:[#allocation2 + $0xd4] sm:$0xf]  ;;  %v11233_v31 = vld [vmem:[#allocation2 + $0xd8] sm:$0xf0]  ;;  %7486 = vmatpush.bf16.msrb.mxu1 %v11244_v41  ;;  %v6616_v30 = vunpack.i.h.s16 %v6489_v5 }
 0x567   :  { %vm18170_vm11 = vcmask 1045508   ;;  %v11232_v42 = vor.u32 %v12553_v19, %v11231_v50  ;;  %v11236_v54 = vor.u32 %v12552_v36, %v11233_v31  ;;  %v12568_v35 = vld [vmem:[#allocation2 + $0x154] sm:$0xf]  ;;  %v11297_v1 = vld [vmem:[#allocation2 + $0x158] sm:$0xf0]  ;;  %vm18171_vm8 = vcmask 1042433   ;;  %7519 = vmatpush.bf16.msrb.mxu2 %v11308_v49 }
 0x568   :  { %v6525_v17 = vsel %vm18170_vm11, %v6524_v20, %v16353_v32  ;;  %v12584_v56 = vld [vmem:[#allocation2 + $0x1d4] sm:$0xf]  ;;  %v6541_v12 = vsel %vm18171_vm8, %v6540_v53, %v16441_v39  ;;  %vm18172_vm7 = vcmask 1043458   ;;  %vm18173_vm3 = vcmask 1044483   ;;  %v11361_v16 = vld [vmem:[#allocation2 + $0x1d8] sm:$0xf0]  ;;  %7552 = vmatpush.bf16.msrb.mxu3 %v11372_v59  ;;  %vm18204_vm8 = vmmov %vm18166_vm14 }
 0x569   :  { %v16489_v57 = vsel %vm2688_vm10, %v6525_v17, %v6526_v18  ;;  %v6547_v29 = vsel %vm18172_vm7, %v6546_v62, %v16441_v39  ;;  %v6553_v33 = vsel %vm18173_vm3, %v6552_v13, %v16441_v39  ;;  %v11223_v20 = vld [vmem:[#allocation2 + $0xc0] sm:$0xf]  ;;  %v12551_v41 = vld [vmem:[#allocation2 + $0xc4] sm:$0xf0]  ;;  %v16500_v50 = vsel %vm2660_vm12, %v6541_v12, %v6542_v45  ;;  %7322 = vmatpush.bf16.msra.mxu0 %v11232_v42  ;;  %v12550_v62 = vld [vmem:[#allocation2 + $0xc4] sm:$0xf] }
 0x56a   :  { %v16503_v18 = vsel %vm2670_vm13, %v6547_v29, %v6548_v58  ;;  %v16506_v53 = vsel %vm2679_vm0, %v6553_v33, %v6554_v61  ;;  %v11225_v13 = vld [vmem:[#allocation2 + $0xc8] sm:$0xf0]  ;;  %v12566_v49 = vld [vmem:[#allocation2 + $0x144] sm:$0xf]  ;;  %v6500_v19 = vsel %vm1296_vm6, %v6498_v4, %v16353_v32  ;;  %v6503_v15 = vsel %vm2647_vm4, %v16340_v25, %v16335_v28  ;;  %7487 = vmatpush.bf16.msrb.mxu1 %v11236_v54  ;;  %v11215_v33 = vld [vmem:[#allocation2 + $0xb0] sm:$0xf] }
 0x56b   :  { %v11300_v5 = vor.u32 %v12568_v35, %v11297_v1  ;;  %v11364_v45 = vor.u32 %v12584_v56, %v11361_v16  ;;  %v11289_v36 = vld [vmem:[#allocation2 + $0x148] sm:$0xf0]  ;;  %v12582_v58 = vld [vmem:[#allocation2 + $0x1c4] sm:$0xf]  ;;  %v6529_v61 = vrot.slane %v16489_v57, 4  ;;  %v6532_v59 = vsel %vm2642_vm5, %v16377_v21, %v16439_v0  ;;  %v16517_v17 = vld [vmem:[#allocation1] sm:$0xff] }
 0x56c   :  { %v11353_v31 = vld [vmem:[#allocation2 + $0x1c8] sm:$0xf0]  ;;  %v16519_v42 = vld [vmem:[#allocation1 + $0x9] sm:$0xff]  ;;  %v11224_v4 = vor.u32 %v12551_v41, %v11223_v20  ;;  %v11228_v28 = vor.u32 %v12550_v62, %v11225_v13  ;;  %v6537_v25 = vsel %vm2647_vm4, %v16443_v23, %v16445_v24  ;;  %v6545_v35 = vrot.slane %v16500_v50, 1  ;;  %7305 = vmatmul.bf16.gmra.mxu0 %v16517_v17  ;;  %v16531_v57 = vld [vmem:[#allocation1 + $0x1b] sm:$0xff] }
 0x56d   :  { %v16521_v32 = vld [vmem:[#allocation1 + $0x12] sm:$0xff]  ;;  %v6551_v1 = vrot.slane %v16503_v18, 2  ;;  %v16533_v12 = vld [vmem:[#allocation1 + $0x24] sm:$0xff]  ;;  %vm18174_vm0 = vcmask 1042432   ;;  %v11119_v29 = vpack.i.b16 %v6495_v3, %v6616_v30  ;;  %7404 = vmatmul.bf16.gmra.mxu2 %v16531_v57  ;;  %v12549_v16 = vld [vmem:[#allocation2 + $0xb4] sm:$0xf0]  ;;  %v6534_v20 = vsel %vm1296_vm6, %v6532_v59, %v16441_v39  ;;  %7553 = vmatpush.bf16.msrb.mxu3 %v11364_v45 }
 0x56e   :  { %7371 = vmatmul.bf16.gmra.mxu1 %v16521_v32  ;;  %v6504_v54 = vsel %vm18174_vm0, %v6500_v19, %v6503_v15  ;;  %7437 = vmatmul.bf16.gmra.mxu3 %v16533_v12  ;;  %6829 = vst [vmem:[#allocation1] ss:$9 sm:$0xff] %v16453_v44  ;;  %v11292_v41 = vor.u32 %v12566_v49, %v11289_v36  ;;  %v12548_v13 = vld [vmem:[#allocation2 + $0xb4] sm:$0xf]  ;;  %v11217_v55 = vld [vmem:[#allocation2 + $0xb8] sm:$0xf0]  ;;  %vm18175_vm12 = vmmov %vm18174_vm0 }
 0x56f   :  { %6831 = vst [vmem:[#allocation1 + $0x1] ss:$9 sm:$0xff] %v16457_v60  ;;  %7520 = vmatpush.bf16.msrb.mxu2 %v11300_v5  ;;  %v11356_v62 = vor.u32 %v12582_v58, %v11353_v31  ;;  %v16545_v3 = vsel %vm18175_vm12, %v6534_v20, %v6537_v25  ;;  %7323 = vmatpush.bf16.msra.mxu0 %v11224_v4  ;;  %v12564_v19 = vld [vmem:[#allocation2 + $0x134] sm:$0xf]  ;;  %v11281_v15 = vld [vmem:[#allocation2 + $0x138] sm:$0xf0]  ;;  %vm18176_vm6 = vmmov %vm18167_vm2 }
 0x570   :  { %6833 = vst [vmem:[#allocation1 + $0x2] ss:$9 sm:$0xff] %v11119_v29  ;;  %7488 = vmatpush.bf16.msrb.mxu1 %v11228_v28  ;;  %v11216_v44 = vor.u32 %v12549_v16, %v11215_v33  ;;  %v11220_v30 = vor.u32 %v12548_v13, %v11217_v55  ;;  %v12580_v59 = vld [vmem:[#allocation2 + $0x1b4] sm:$0xf]  ;;  %v11345_v56 = vld [vmem:[#allocation2 + $0x1b8] sm:$0xf0]  ;;  %v11120_v5 = vpack.i.b16 %v16545_v3, %v6529_v61  ;;  %vm18177_vm13 = vmmov %vm18170_vm11 }
 0x571   :  { %6835 = vst [vmem:[#allocation1 + $0x3] ss:$9 sm:$0xff] %v6504_v54  ;;  %v11207_v60 = vld [vmem:[#allocation2 + $0xa0] sm:$0xf]  ;;  %v12547_v49 = vld [vmem:[#allocation2 + $0xa4] sm:$0xf0]  ;;  %7554 = vmatpush.bf16.msrb.mxu3 %v11356_v62  ;;  %v11284_v45 = vor.u32 %v12564_v19, %v11281_v15  ;;  %v11348_v36 = vor.u32 %v12580_v59, %v11345_v56  ;;  %v6558_v46 = vsel %vm18176_vm6, %v16377_v21, %v16439_v0  ;;  %vm18206_vm3 = vmmov %vm18204_vm8 }
 0x572   :  { %6837 = vst [vmem:[#allocation1 + $0x4] ss:$9 sm:$0xff] %v6511_v8  ;;  %v12546_v58 = vld [vmem:[#allocation2 + $0xa4] sm:$0xf]  ;;  %v11209_v31 = vld [vmem:[#allocation2 + $0xa8] sm:$0xf0]  ;;  %v11208_v10 = vor.u32 %v12547_v49, %v11207_v60  ;;  %v6560_v38 = vsel %vm372_vm1, %v16445_v24, %v16443_v23  ;;  %v6630_v23 = vunpack.i.h.s16 %v6545_v35  ;;  %vm18207_vm0 = vmmov %vm18167_vm2 }
 0x573   :  { %6839 = vst [vmem:[#allocation1 + $0x5] ss:$9 sm:$0xff] %v6517_v37  ;;  %7521 = vmatpush.bf16.msrb.mxu2 %v11292_v41  ;;  %7324 = vmatpush.bf16.msra.mxu0 %v11216_v44  ;;  %v11212_v8 = vor.u32 %v12546_v58, %v11209_v31  ;;  %v12562_v4 = vld [vmem:[#allocation2 + $0x124] sm:$0xf]  ;;  %v11273_v28 = vld [vmem:[#allocation2 + $0x128] sm:$0xf0]  ;;  %v6628_v41 = vunpack.i.h.s16 %v16545_v3  ;;  %v6559_v44 = vsel %vm18177_vm13, %v6558_v46, %v16441_v39  ;;  %v6632_v3 = vunpack.i.h.s16 %v6551_v1  ;;  %vm18210_vm12 = vmmov %vm18168_vm15 }
 0x574   :  { %6841 = vst [vmem:[#allocation1 + $0x6] ss:$9 sm:$0xff] %v6523_v63  ;;  %7489 = vmatpush.bf16.msrb.mxu1 %v11220_v30  ;;  %v12578_v61 = vld [vmem:[#allocation2 + $0x1a4] sm:$0xf]  ;;  %v11337_v25 = vld [vmem:[#allocation2 + $0x1a8] sm:$0xf0]  ;;  %v11276_v63 = vor.u32 %v12562_v4, %v11273_v28  ;;  %v6561_v15 = vsel %vm2688_vm10, %v6559_v44, %v6560_v38  ;;  %v11122_v46 = vpack.i.b16 %v6551_v1, %v6630_v23  ;;  %vm18211_vm6 = vmmov %vm18169_vm9 }
 0x575   :  { %6843 = vst [vmem:[#allocation1 + $0x7] ss:$9 sm:$0xff] %v11120_v5  ;;  %v11199_v37 = vld [vmem:[#allocation2 + $0x90] sm:$0xf]  ;;  %v12545_v56 = vld [vmem:[#allocation2 + $0x94] sm:$0xf0]  ;;  %7555 = vmatpush.bf16.msrb.mxu3 %v11348_v36  ;;  %v11340_v29 = vor.u32 %v12578_v61, %v11337_v25  ;;  %v11121_v31 = vpack.i.b16 %v6545_v35, %v6628_v41  ;;  %vm18212_vm13 = vmmov %vm18207_vm0 }
 0x576   :  { %v12544_v54 = vld [vmem:[#allocation2 + $0x94] sm:$0xf]  ;;  %v11201_v33 = vld [vmem:[#allocation2 + $0x98] sm:$0xf0]  ;;  %v11200_v62 = vor.u32 %v12545_v56, %v11199_v37  ;;  %v11191_v55 = vld [vmem:[#allocation2 + $0x80] sm:$0xf] }
 0x577   :  { %7522 = vmatpush.bf16.msrb.mxu2 %v11284_v45  ;;  %v12560_v16 = vld [vmem:[#allocation2 + $0x114] sm:$0xf]  ;;  %v11265_v20 = vld [vmem:[#allocation2 + $0x118] sm:$0xf0]  ;;  %7325 = vmatpush.bf16.msra.mxu0 %v11208_v10  ;;  %v11204_v21 = vor.u32 %v12544_v54, %v11201_v33  ;;  %v12543_v24 = vld [vmem:[#allocation2 + $0x84] sm:$0xf0] }
 0x578   :  { %7490 = vmatpush.bf16.msrb.mxu1 %v11212_v8  ;;  %v12576_v0 = vld [vmem:[#allocation2 + $0x194] sm:$0xf]  ;;  %v11329_v13 = vld [vmem:[#allocation2 + $0x198] sm:$0xf0]  ;;  %v12542_v30 = vld [vmem:[#allocation2 + $0x84] sm:$0xf]  ;;  %v11268_v5 = vor.u32 %v12560_v16, %v11265_v20  ;;  %v11192_v28 = vor.u32 %v12543_v24, %v11191_v55 }
 0x579   :  { %v11193_v19 = vld [vmem:[#allocation2 + $0x88] sm:$0xf0]  ;;  %v12558_v59 = vld [vmem:[#allocation2 + $0x104] sm:$0xf]  ;;  %v18178_v60 = vrot.slane %v16506_v53, 3  ;;  %7556 = vmatpush.bf16.msrb.mxu3 %v11340_v29  ;;  %v11332_v45 = vor.u32 %v12576_v0, %v11329_v13  ;;  %v6563_v25 = vrot.slane %v6561_v15, 4 }
 0x57a   :  { %v11257_v39 = vld [vmem:[#allocation2 + $0x108] sm:$0xf0]  ;;  %v12574_v36 = vld [vmem:[#allocation2 + $0x184] sm:$0xf]  ;;  %v11196_v61 = vor.u32 %v12542_v30, %v11193_v19  ;;  %v12540_v33 = vld [vmem:[#allocation2 + $0x74] sm:$0xf] }
 0x57b   :  { %v6634_v49 = vunpack.i.h.s16 %v18178_v60  ;;  %7523 = vmatpush.bf16.msrb.mxu2 %v11276_v63  ;;  %v11321_v58 = vld [vmem:[#allocation2 + $0x188] sm:$0xf0]  ;;  %7326 = vmatpush.bf16.msra.mxu0 %v11200_v62  ;;  %v18179_v37 = vmov %v18178_v60  ;;  %v11260_v18 = vor.u32 %v12558_v59, %v11257_v39  ;;  %v11185_v16 = vld [vmem:[#allocation2 + $0x78] sm:$0xf0]  ;;  %v12538_v41 = vld [vmem:[#allocation2 + $0x64] sm:$0xf] }
 0x57c   :  { %v16572_v10 = vld [vmem:[#allocation1] sm:$0xff]  ;;  %v16574_v8 = vld [vmem:[#allocation1 + $0x9] sm:$0xff]  ;;  %v16576_v4 = vld [vmem:[#allocation1 + $0x12] sm:$0xff]  ;;  %7491 = vmatpush.bf16.msrb.mxu1 %v11204_v21  ;;  %v11123_v56 = vpack.i.b16 %v18179_v37, %v6632_v3  ;;  %v11324_v1 = vor.u32 %v12574_v36, %v11321_v58  ;;  %v11188_v20 = vor.u32 %v12540_v33, %v11185_v16  ;;  %vm18202_vm10 = vcmask 1041409  }
 0x57d   :  { %7310 = vmatmul.bf16.gmra.mxu0 %v16572_v10  ;;  %v16582_v50 = vld [vmem:[#allocation1 + $0x1b] sm:$0xff]  ;;  %v16584_v35 = vld [vmem:[#allocation1 + $0x24] sm:$0xff]  ;;  %v11124_v54 = vpack.i.b16 %v6563_v25, %v6634_v49  ;;  %7557 = vmatpush.bf16.msrb.mxu3 %v11332_v45  ;;  %v11177_v62 = vld [vmem:[#allocation2 + $0x68] sm:$0xf0] }
 0x57e   :  { %7376 = vmatmul.bf16.gmra.mxu1 %v16576_v4  ;;  %7409 = vmatmul.bf16.gmra.mxu2 %v16582_v50  ;;  %6850 = vst [vmem:[#allocation1] ss:$9 sm:$0xff] %v11121_v31  ;;  %v11180_v21 = vor.u32 %v12538_v41, %v11177_v62  ;;  %v11161_v13 = vld [vmem:[#allocation2 + $0x48] sm:$0xf0]  ;;  %v12530_v44 = vld [vmem:[#allocation2 + $0x24] sm:$0xf]  ;;  %vm18203_vm11 = vmmov %vm18202_vm10 }
 0x57f   :  { %7442 = vmatmul.bf16.gmra.mxu3 %v16584_v35  ;;  %6852 = vst [vmem:[#allocation1 + $0x1] ss:$9 sm:$0xff] %v11122_v46  ;;  %7524 = vmatpush.bf16.msrb.mxu2 %v11268_v5  ;;  %v11145_v23 = vld [vmem:[#allocation2 + $0x28] sm:$0xf0]  ;;  %v12528_v30 = vld [vmem:[#allocation2 + $0x14] sm:$0xf]  ;;  %vm18205_vm7 = vmmov %vm18202_vm10 }
 0x580   :  { %6854 = vst [vmem:[#allocation1 + $0x2] ss:$9 sm:$0xff] %v11123_v56  ;;  %7327 = vmatpush.bf16.msra.mxu0 %v11192_v28  ;;  %7492 = vmatpush.bf16.msrb.mxu1 %v11196_v61  ;;  %v11148_v24 = vor.u32 %v12530_v44, %v11145_v23  ;;  %v11137_v19 = vld [vmem:[#allocation2 + $0x18] sm:$0xf0]  ;;  %v12604_v41 = vld [vmem:[#allocation2 + $0x274] sm:$0xf] }
 0x581   :  { %6856 = vst [vmem:[#allocation1 + $0x3] ss:$9 sm:$0xff] %v11124_v54  ;;  %7558 = vmatpush.bf16.msrb.mxu3 %v11324_v1  ;;  %v11140_v15 = vor.u32 %v12528_v30, %v11137_v19  ;;  %v11441_v62 = vld [vmem:[#allocation2 + $0x278] sm:$0xf0]  ;;  %v12592_v34 = vld [vmem:[#allocation2 + $0x214] sm:$0xf] }
 0x583   :  { %7525 = vmatpush.bf16.msrb.mxu2 %v11260_v18 }
 0x584   :  { %7452 = vmatpush.bf16.msrb.mxu0 %v11188_v20 }
 0x588   :  { %v16590_v38 = vld [vmem:[#allocation1] sm:$0xff]  ;;  %v16592_v53 = vld [vmem:[#allocation1 + $0x12] sm:$0xff]  ;;  %7453 = vmatpush.bf16.msrb.mxu0 %v11180_v21 }
 0x589   :  { %v16596_v63 = vld [vmem:[#allocation1 + $0x1b] sm:$0xff]  ;;  %v16598_v29 = vld [vmem:[#allocation1 + $0x24] sm:$0xff] }
 0x58d   :  { %7315 = vmatmul.bf16.gmra.mxu0 %v16590_v38 }
 0x58e   :  { %7381 = vmatmul.bf16.gmra.mxu1 %v16592_v53  ;;  %7414 = vmatmul.bf16.gmra.mxu2 %v16596_v63 }
 0x58f   :  { %7447 = vmatmul.bf16.gmra.mxu3 %v16598_v29 }
 0x59d   :  { %7328 = vmatmul.bf16.vlgmr.msra.gmra.mxu0 %v16274_v2 }
 0x59e   :  { %7493 = vmatmul.bf16.vlgmr.msrb.gmra.mxu1 %v16274_v2  ;;  %7526 = vmatmul.bf16.vlgmr.msrb.gmra.mxu2 %v16276_v6  ;;  %v12536_v2 = vld [vmem:[#allocation2 + $0x54] sm:$0xf]  ;;  %v11169_v6 = vld [vmem:[#allocation2 + $0x58] sm:$0xf0] }
 0x59f   :  { %7559 = vmatmul.bf16.vlgmr.msrb.gmra.mxu3 %v16287_v14  ;;  %v11172_v0 = vor.u32 %v12536_v2, %v11169_v6  ;;  %v12534_v14 = vld [vmem:[#allocation2 + $0x44] sm:$0xf]  ;;  %v11444_v2 = vor.u32 %v12604_v41, %v11441_v62  ;;  %v11417_v62 = vld [vmem:[#allocation2 + $0x248] sm:$0xf0] }
 0x5a0   :  { %v11164_v55 = vor.u32 %v12534_v14, %v11161_v13  ;;  %v12598_v41 = vld [vmem:[#allocation2 + $0x244] sm:$0xf] }
 0x5a1   :  { %7454 = vmatpush.bf16.msrb.mxu0 %v11172_v0 }
 0x5a5   :  { %7455 = vmatpush.bf16.msrb.mxu0 %v11164_v55 }
 0x5ad   :  { %7333 = vmatmul.bf16.gmra.mxu0 %v16414_v22 }
 0x5ae   :  { %7498 = vmatmul.bf16.gmra.mxu1 %v16414_v22  ;;  %7531 = vmatmul.bf16.gmra.mxu2 %v16416_v9  ;;  %v12532_v22 = vld [vmem:[#allocation2 + $0x34] sm:$0xf]  ;;  %v11153_v9 = vld [vmem:[#allocation2 + $0x38] sm:$0xf0] }
 0x5af   :  { %7564 = vmatmul.bf16.gmra.mxu3 %v16428_v7  ;;  %v11156_v7 = vor.u32 %v12532_v22, %v11153_v9  ;;  %v12602_v9 = vld [vmem:[#allocation2 + $0x264] sm:$0xf] }
 0x5b1   :  { %7456 = vmatpush.bf16.msrb.mxu0 %v11156_v7  ;;  %v11433_v7 = vld [vmem:[#allocation2 + $0x268] sm:$0xf0] }
 0x5b5   :  { %7457 = vmatpush.bf16.msrb.mxu0 %v11148_v24  ;;  %v11436_v24 = vor.u32 %v12602_v9, %v11433_v7  ;;  %v11420_v7 = vor.u32 %v12598_v41, %v11417_v62  ;;  %v11396_v41 = vor.u32 %v12592_v34, %v11393_v43 }
 0x5b9   :  { %7458 = vmatpush.bf16.msrb.mxu0 %v11140_v15 }
 0x5bd   :  { %7338 = vmatmul.bf16.gmra.mxu0 %v16519_v42 }
 0x5be   :  { %7503 = vmatmul.bf16.gmra.mxu1 %v16519_v42  ;;  %7536 = vmatmul.bf16.gmra.mxu2 %v16521_v32  ;;  %v12526_v42 = vld [vmem:[#allocation2 + $0x4] sm:$0xf]  ;;  %v11129_v32 = vld [vmem:[#allocation2 + $0x8] sm:$0xf0] }
 0x5bf   :  { %7569 = vmatmul.bf16.gmra.mxu3 %v16531_v57  ;;  %v11132_v57 = vor.u32 %v12526_v42, %v11129_v32  ;;  %v12600_v42 = vld [vmem:[#allocation2 + $0x254] sm:$0xf] }
 0x5c1   :  { %7459 = vmatpush.bf16.msrb.mxu0 %v11132_v57 }
 0x5c5   :  { %7584 = vmatpush.bf16.msra.mxu0 %v11444_v2  ;;  %v12596_v2 = vld [vmem:[#allocation2 + $0x234] sm:$0xf] }
 0x5c6   :  { %v16614_v3 = vpop.f32.mrf.mxu0  ;;  %v16616_v59 = vpop.f32.mrf.mxu1 }
 0x5c9   :  { %7585 = vmatpush.bf16.msra.mxu0 %v11436_v24 }
 0x5cd   :  { %7343 = vmatmul.bf16.gmra.mxu0 %v16574_v8  ;;  %v16622_v60 = vpop.f32.mrf.mxu2  ;;  %v16624_v49 = vpop.f32.mrf.mxu3 }
 0x5ce   :  { %7508 = vmatmul.bf16.gmra.mxu1 %v16574_v8  ;;  %7541 = vmatmul.bf16.gmra.mxu2 %v16576_v4  ;;  %v16626_v5 = vpop.f32.mrf.mxu0  ;;  %v16628_v45 = vpop.f32.mrf.mxu1  ;;  %v6858_v8 = vld [vmem:[#allocation1 + $0x9] sm:$0xff]  ;;  %v16641_v4 = vld [vmem:[%s17734_s9] sm:$0x3] }
 0x5cf   :  { %7574 = vmatmul.bf16.gmra.mxu3 %v16582_v50  ;;  %v16646_v28 = vperm.slane %v16641_v4, 0 }
 0x5d5   :  { %v16630_v39 = vpop.f32.mrf.mxu2  ;;  %v16632_v36 = vpop.f32.mrf.mxu3 }
 0x5d6   :  { %v16634_v58 = vpop.f32.mrf.mxu0  ;;  %v16636_v31 = vpop.f32.mrf.mxu1 }
 0x5d7   :  { %v7302_v43 = vadd.f32 %v16634_v58, %v16646_v28 }
 0x5dd   :  { %7348 = vmatmul.bf16.gmra.mxu0 %v6858_v8  ;;  %v16650_v25 = vpop.f32.mrf.mxu3 }
 0x5de   :  { %7513 = vmatmul.bf16.gmra.mxu1 %v6858_v8  ;;  %7546 = vmatmul.bf16.gmra.mxu2 %v16592_v53  ;;  %v7303_v46 = vpop.f32.mrf.mxu0  ;;  %v16652_v50 = vpop.f32.mrf.mxu1 }
 0x5df   :  { %7579 = vmatmul.bf16.gmra.mxu3 %v16596_v63  ;;  %v16655_v37 = vadd.f32 %v7303_v46, %v16646_v28 }
 0x5e0   :  { %v16648_v61 = vpop.f32.mrf.mxu2 }
 0x5e5   :  { %v16659_v54 = vpop.f32.mrf.mxu3 }
 0x5e8   :  { %v16657_v56 = vpop.f32.mrf.mxu2 }
 0x5e9   :  { %v7306_v18 = vpop.f32.mrf.mxu0 }
 0x5ea   :  { %v16664_v53 = vadd.f32 %v7306_v18, %v16646_v28 }
 0x5eb   :  { %v16661_v1 = vpop.f32.mrf.mxu1 }
 0x5ed   :  { %7460 = vmatmul.bf16.vlgmr.msrb.gmra.mxu0 %v16272_v52 }
 0x5f0   :  { %v16667_v63 = vpop.f32.mrf.mxu2 }
 0x5f1   :  { %v16669_v33 = vpop.f32.mrf.mxu3  ;;  %v7308_v16 = vpop.f32.mrf.mxu0 }
 0x5f2   :  { %v16674_v21 = vadd.f32 %v7308_v16, %v16646_v28 }
 0x5f3   :  { %v16671_v20 = vpop.f32.mrf.mxu1 }
 0x5f8   :  { %v16676_v6 = vpop.f32.mrf.mxu2 }
 0x5f9   :  { %v16678_v0 = vpop.f32.mrf.mxu3 }
 0x5fa   :  { %18180 = vst [vmem:[#allocation24_spill] sm:$0xff] %v16678_v0  ;;  %v7311_v14 = vpop.f32.mrf.mxu0 }
 0x5fb   :  { %v16680_v52 = vpop.f32.mrf.mxu1  ;;  %v16683_v13 = vadd.f32 %v7311_v14, %v16646_v28 }
 0x5fc   :  { %18181 = vst [vmem:[#allocation25_spill] sm:$0xff] %v16680_v52 }
 0x5fd   :  { %7465 = vmatmul.bf16.gmra.mxu0 %v16412_v27  ;;  %v11425_v27 = vld [vmem:[#allocation2 + $0x258] sm:$0xf0] }
 0x5fe   :  { %v11428_v8 = vor.u32 %v12600_v42, %v11425_v27  ;;  %v7297_v42 = vadd.f32 %v16614_v3, %v16646_v28  ;;  %v7299_v3 = vadd.f32 %v16626_v5, %v16646_v28 }
 0x600   :  { %7586 = vmatpush.bf16.msra.mxu0 %v11428_v8  ;;  %v11401_v8 = vld [vmem:[#allocation2 + $0x228] sm:$0xf0] }
 0x601   :  { %v16686_v55 = vpop.f32.mrf.mxu2 }
 0x602   :  { %18182 = vst [vmem:[#allocation26_spill] sm:$0xff] %v16686_v55  ;;  %v16688_v22 = vpop.f32.mrf.mxu3  ;;  %v7313_v44 = vpop.f32.mrf.mxu0 }
 0x603   :  { %18183 = vst [vmem:[#allocation27_spill] sm:$0xff] %v16688_v22  ;;  %v16690_v23 = vpop.f32.mrf.mxu1  ;;  %v16693_v30 = vadd.f32 %v7313_v44, %v16646_v28  ;;  %v11409_v44 = vld [vmem:[#allocation2 + $0x238] sm:$0xf0] }
 0x604   :  { %18184 = vst [vmem:[#allocation28_spill] sm:$0xff] %v16690_v23  ;;  %7587 = vmatpush.bf16.msra.mxu0 %v11420_v7  ;;  %v11412_v24 = vor.u32 %v12596_v2, %v11409_v44  ;;  %v11385_v7 = vld [vmem:[#allocation2 + $0x208] sm:$0xf0] }
 0x605   :  { %18185 = vst [vmem:[#allocation29_spill] sm:$0xff] %v16693_v30 }
 0x608   :  { %7588 = vmatpush.bf16.msra.mxu0 %v11412_v24 }
 0x609   :  { %v16695_v19 = vpop.f32.mrf.mxu2 }
 0x60a   :  { %18186 = vst [vmem:[#allocation12_spill] sm:$0xff] %v16695_v19  ;;  %v16697_v15 = vpop.f32.mrf.mxu3  ;;  %v7316_v32 = vpop.f32.mrf.mxu0 }
 0x60b   :  { %18187 = vst [vmem:[#allocation13_spill] sm:$0xff] %v16697_v15  ;;  %v16699_v57 = vpop.f32.mrf.mxu1  ;;  %v16702_v46 = vadd.f32 %v7316_v32, %v16646_v28 }
 0x60c   :  { %18188 = vst [vmem:[#allocation15_spill] sm:$0xff] %v16699_v57 }
 0x60d   :  { %7470 = vmatmul.bf16.gmra.mxu0 %v16517_v17  ;;  %v12594_v17 = vld [vmem:[#allocation2 + $0x224] sm:$0xf] }
 0x60e   :  { %v11404_v47 = vor.u32 %v12594_v17, %v11401_v8 }
 0x610   :  { %7589 = vmatpush.bf16.msra.mxu0 %v11404_v47 }
 0x611   :  { %v16705_v18 = vpop.f32.mrf.mxu2 }
 0x612   :  { %18189 = vst [vmem:[#allocation16_spill] sm:$0xff] %v16705_v18  ;;  %v16707_v16 = vpop.f32.mrf.mxu3  ;;  %v7318_v14 = vpop.f32.mrf.mxu0 }
 0x613   :  { %18190 = vst [vmem:[#allocation17_spill] sm:$0xff] %v16707_v16  ;;  %v7384_v9 = vpop.f32.mrf.mxu1 }
 0x614   :  { %7590 = vmatpush.bf16.msra.mxu0 %v11396_v41  ;;  %v12590_v9 = vld [vmem:[#allocation2 + $0x204] sm:$0xf] }
 0x619   :  { %v7417_v27 = vpop.f32.mrf.mxu2 }
 0x61a   :  { %v7450_v32 = vpop.f32.mrf.mxu3  ;;  %v7329_v40 = vpop.f32.mrf.mxu0  ;;  %v11388_v27 = vor.u32 %v12590_v9, %v11385_v7 }
 0x61b   :  { %v16711_v26 = vpop.f32.mrf.mxu1  ;;  %v16713_v14 = vadd.f32 %v7329_v40, %v7297_v42 }
 0x61c   :  { %7591 = vmatpush.bf16.msra.mxu0 %v11388_v27 }
 0x61d   :  { %7475 = vmatmul.bf16.gmra.mxu0 %v16572_v10 }
 0x621   :  { %v16718_v62 = vpop.f32.mrf.mxu2 }
 0x622   :  { %v16720_v2 = vpop.f32.mrf.mxu3  ;;  %v7331_v44 = vpop.f32.mrf.mxu0 }
 0x623   :  { %v16722_v24 = vpop.f32.mrf.mxu1  ;;  %v16724_v40 = vadd.f32 %v7331_v44, %v7299_v3 }
 0x629   :  { %v16728_v47 = vpop.f32.mrf.mxu2 }
 0x62a   :  { %v16730_v34 = vpop.f32.mrf.mxu3  ;;  %v7334_v10 = vpop.f32.mrf.mxu0 }
 0x62b   :  { %v16732_v5 = vpop.f32.mrf.mxu1  ;;  %v16734_v42 = vadd.f32 %v7334_v10, %v7302_v43 }
 0x62d   :  { %7480 = vmatmul.bf16.gmra.mxu0 %v16590_v38 }
 0x631   :  { %v16737_v32 = vpop.f32.mrf.mxu2 }
 0x632   :  { %v16739_v17 = vpop.f32.mrf.mxu3  ;;  %v7336_v8 = vpop.f32.mrf.mxu0 }
 0x633   :  { %v16741_v41 = vpop.f32.mrf.mxu1  ;;  %v16744_v58 = vadd.f32 %v7336_v8, %v16655_v37 }
 0x639   :  { %v16746_v28 = vpop.f32.mrf.mxu2 }
 0x63a   :  { %v16748_v3 = vpop.f32.mrf.mxu3  ;;  %v7339_v9 = vpop.f32.mrf.mxu0 }
 0x63b   :  { %v16750_v7 = vpop.f32.mrf.mxu1  ;;  %v16753_v44 = vadd.f32 %v7339_v9, %v16664_v53 }
 0x63d   :  { %7592 = vmatmul.bf16.vlgmr.msra.gmra.mxu0 %v16289_v51 }
 0x641   :  { %v16756_v38 = vpop.f32.mrf.mxu2 }
 0x642   :  { %v16758_v27 = vpop.f32.mrf.mxu3  ;;  %v7341_v43 = vpop.f32.mrf.mxu0 }
 0x643   :  { %v16760_v10 = vpop.f32.mrf.mxu1  ;;  %v16763_v37 = vadd.f32 %v7341_v43, %v16674_v21 }
 0x649   :  { %v16765_v8 = vpop.f32.mrf.mxu2 }
 0x64a   :  { %v16767_v11 = vpop.f32.mrf.mxu3  ;;  %v7344_v16 = vpop.f32.mrf.mxu0 }
 0x64b   :  { %v16769_v18 = vpop.f32.mrf.mxu1  ;;  %v16772_v53 = vadd.f32 %v7344_v16, %v16683_v13 }
 0x64d   :  { %7597 = vmatmul.bf16.gmra.mxu0 %v16430_v48 }
 0x651   :  { %v16775_v51 = vpop.f32.mrf.mxu2 }
 0x652   :  { %v16777_v9 = vpop.f32.mrf.mxu3  ;;  %v16779_v15 = vpop.f32.mrf.mxu0 }
 0x653   :  { %18191 = vst [vmem:[#allocation31_spill] sm:$0xff] %v16777_v9  ;;  %v16781_v21 = vpop.f32.mrf.mxu1 }
 0x654   :  { %18192 = vst [vmem:[#allocation32_spill] sm:$0xff] %v16779_v15 }
 0x655   :  { %18193 = vst [vmem:[#allocation33_spill] sm:$0xff] %v16781_v21 }
 0x659   :  { %v16783_v43 = vpop.f32.mrf.mxu2 }
 0x65a   :  { %18194 = vst [vmem:[#allocation34_spill] sm:$0xff] %v16783_v43  ;;  %v16785_v57 = vpop.f32.mrf.mxu3  ;;  %v7349_v19 = vpop.f32.mrf.mxu0 }
 0x65b   :  { %18195 = vst [vmem:[#allocation35_spill] sm:$0xff] %v16785_v57  ;;  %v16787_v23 = vpop.f32.mrf.mxu1  ;;  %v16790_v13 = vadd.f32 %v7349_v19, %v16702_v46  ;;  %v16800_v19 = vperm.slane %v16641_v4, 1 }
 0x65c   :  { %18196 = vst [vmem:[#allocation36_spill] sm:$0xff] %v16787_v23 }
 0x65d   :  { %18197 = vst [vmem:[#allocation37_spill] sm:$0xff] %v16790_v13  ;;  %7602 = vmatmul.bf16.gmra.mxu0 %v16533_v12 }
 0x661   :  { %v16793_v48 = vpop.f32.mrf.mxu2 }
 0x662   :  { %18198 = vst [vmem:[#allocation38_spill] sm:$0xff] %v16793_v48  ;;  %v16795_v16 = vpop.f32.mrf.mxu3  ;;  %v7351_v22 = vpop.f32.mrf.mxu0  ;;  %v7363_v48 = vadd.f32 %v16616_v59, %v16713_v14 }
 0x663   :  { %18199 = vst [vmem:[#allocation39_spill] sm:$0xff] %v16795_v16  ;;  %v7516_v15 = vpop.f32.mrf.mxu1 }
 0x664   :  { %v7396_v9 = vadd.f32 %v16622_v60, %v7363_v48 }
 0x669   :  { %v7549_v30 = vpop.f32.mrf.mxu2 }
 0x66a   :  { %v7582_v21 = vpop.f32.mrf.mxu3  ;;  %v7461_v55 = vpop.f32.mrf.mxu0 }
 0x66d   :  { %7607 = vmatmul.bf16.gmra.mxu0 %v16584_v35 }
 0x672   :  { %v7463_v57 = vpop.f32.mrf.mxu0 }
 0x673   :  { %v7464_v13 = vadd.f32 %v7463_v57, %v16800_v19  ;;  %v7365_v57 = vadd.f32 %v16628_v45, %v16724_v40 }
 0x675   :  { %v7398_v52 = vadd.f32 %v16630_v39, %v7365_v57 }
 0x67a   :  { %v7466_v43 = vpop.f32.mrf.mxu0 }
 0x67b   :  { %v7467_v59 = vadd.f32 %v7466_v43, %v16800_v19 }
 0x67d   :  { %7612 = vmatmul.bf16.gmra.mxu0 %v16598_v29  ;;  %v7462_v29 = vadd.f32 %v7461_v55, %v16800_v19  ;;  %v7500_v43 = vadd.f32 %v16732_v5, %v7467_v59  ;;  %v7368_v5 = vadd.f32 %v16636_v31, %v16734_v42 }
 0x67f   :  { %v7495_v4 = vadd.f32 %v16711_v26, %v7462_v29  ;;  %v7429_v26 = vadd.f32 %v16624_v49, %v7396_v9 }
 0x681   :  { %v7528_v0 = vadd.f32 %v16718_v62, %v7495_v4 }
 0x682   :  { %v7468_v23 = vpop.f32.mrf.mxu0 }
 0x683   :  { %v7469_v59 = vadd.f32 %v7468_v23, %v16800_v19  ;;  %v7370_v23 = vadd.f32 %v16652_v50, %v16744_v58 }
 0x685   :  { %v7502_v31 = vadd.f32 %v16741_v41, %v7469_v59  ;;  %v7403_v50 = vadd.f32 %v16657_v56, %v7370_v23 }
 0x68a   :  { %v7471_v12 = vpop.f32.mrf.mxu0 }
 0x68b   :  { %v16803_v46 = vadd.f32 %v7471_v12, %v16800_v19 }
 0x692   :  { %v16805_v16 = vpop.f32.mrf.mxu0 }
 0x69a   :  { %v7476_v22 = vpop.f32.mrf.mxu0 }
 0x69b   :  { %v16808_v30 = vadd.f32 %v7476_v22, %v16800_v19  ;;  %v7497_v22 = vadd.f32 %v16722_v24, %v7464_v13 }
 0x6a2   :  { %v16810_v15 = vpop.f32.mrf.mxu0 }
 0x6a3   :  { %18200 = vst [vmem:[#allocation40_spill] sm:$0xff] %v16810_v15  ;;  %v7561_v15 = vadd.f32 %v16720_v2, %v7528_v0 }
 0x6aa   :  { %v7481_v35 = vpop.f32.mrf.mxu0 }
 0x6ab   :  { %v16813_v21 = vadd.f32 %v7481_v35, %v16800_v19 }
 0x6ad   :  { %18201 = vst [vmem:[#allocation41_spill] sm:$0xff] %v16813_v21  ;;  %v7530_v21 = vadd.f32 %v16728_v47, %v7497_v22 }
 0x6af   :  { %v7563_v14 = vadd.f32 %v16730_v34, %v7530_v21 }
 0x6b2   :  { %v7483_v12 = vpop.f32.mrf.mxu0 }
 0x6ba   :  { %v7593_v35 = vpop.f32.mrf.mxu0 }
 0x6bb   :  { %v7594_v55 = vadd.f32 %v7593_v35, %v7561_v15 }
 0x6bd   :  { %v7635_v29 = vrot.slane %v7594_v55, 7 }
 0x6bf   :  { %v7644_v62 = vsel %vm2642_vm5, %v7429_v26, %v7635_v29  ;;  %v7645_v60 = vsel %vm18202_vm10, %v7429_v26, %v7635_v29  ;;  %v7647_v0 = vsel %vm18166_vm14, %v7429_v26, %v7635_v29  ;;  %v7649_v2 = vsel %vm2647_vm4, %v7429_v26, %v7635_v29  ;;  %vm18213_vm10 = vmmov %vm18210_vm12 }
 0x6c0   :  { %v7646_v24 = vrot.slane %v7645_v60, 1  ;;  %v7648_v47 = vrot.slane %v7647_v0, 2  ;;  %v7650_v13 = vrot.slane %v7649_v2, 3  ;;  %v7651_v49 = vsel %vm18167_vm2, %v7429_v26, %v7635_v29  ;;  %vm18214_vm14 = vmmov %vm18211_vm6 }
 0x6c1   :  { %v7652_v9 = vrot.slane %v7651_v49, 4  ;;  %v7653_v45 = vsel %vm18168_vm15, %v7429_v26, %v7635_v29  ;;  %v7655_v40 = vsel %vm18169_vm9, %v7429_v26, %v7635_v29  ;;  %v7657_v34 = vsel %vm372_vm1, %v7635_v29, %v7429_v26  ;;  %vm18215_vm2 = vmmov %vm18205_vm7 }
 0x6c2   :  { %v7654_v48 = vrot.slane %v7653_v45, 5  ;;  %v7656_v15 = vrot.slane %v7655_v40, 6  ;;  %v7851_v21 = vmax.f32 %v7644_v62, 0.0  ;;  %v7595_v4 = vpop.f32.mrf.mxu0  ;;  %v7658_v12 = vrot.slane %v7657_v34, 7  ;;  %vm18216_vm15 = vmmov %vm18206_vm3 }
 0x6c3   :  { %v7852_v22 = vmax.f32 %v7646_v24, 0.0  ;;  %v7853_v35 = vmax.f32 %v7648_v47, 0.0  ;;  %v7854_v55 = vmax.f32 %v7650_v13, 0.0  ;;  %v7855_v60 = vmax.f32 %v7652_v9, 0.0  ;;  %vm18219_vm9 = vmmov %vm18207_vm0 }
 0x6c4   :  { %7995 = vst [vmem:[#allocation1] ss:$9 sm:$0xff] %v7851_v21  ;;  %v7856_v0 = vmax.f32 %v7654_v48, 0.0  ;;  %v7596_v2 = vadd.f32 %v7595_v4, %v7563_v14  ;;  %v7857_v49 = vmax.f32 %v7656_v15, 0.0  ;;  %v7858_v26 = vmax.f32 %v7658_v12, 0.0 }
 0x6c5   :  { %7997 = vst [vmem:[#allocation1 + $0x1] ss:$9 sm:$0xff] %v7852_v22  ;;  %v7533_v29 = vadd.f32 %v16737_v32, %v7500_v43  ;;  %v7431_v14 = vadd.f32 %v16632_v36, %v7398_v52  ;;  %v7401_v47 = vadd.f32 %v16648_v61, %v7368_v5  ;;  %v7535_v45 = vadd.f32 %v16746_v28, %v7502_v31 }
 0x6c6   :  { %7999 = vst [vmem:[#allocation1 + $0x2] ss:$9 sm:$0xff] %v7853_v35  ;;  %v7636_v62 = vrot.slane %v7596_v2, 7  ;;  %v7505_v43 = vadd.f32 %v16750_v7, %v16803_v46 }
 0x6c7   :  { %8001 = vst [vmem:[#allocation1 + $0x3] ss:$9 sm:$0xff] %v7854_v55  ;;  %v7566_v39 = vadd.f32 %v16739_v17, %v7533_v29  ;;  %v7434_v32 = vadd.f32 %v16650_v25, %v7401_v47  ;;  %v7568_v4 = vadd.f32 %v16748_v3, %v7535_v45  ;;  %v7474_v3 = vadd.f32 %v16805_v16, %v16800_v19 }
 0x6c8   :  { %8003 = vst [vmem:[#allocation1 + $0x4] ss:$9 sm:$0xff] %v7855_v60  ;;  %v7659_v42 = vsel %vm2642_vm5, %v7431_v14, %v7636_v62  ;;  %v7660_v25 = vsel %vm18205_vm7, %v7431_v14, %v7636_v62  ;;  %v7662_v41 = vsel %vm18206_vm3, %v7431_v14, %v7636_v62  ;;  %v7664_v21 = vsel %vm2647_vm4, %v7431_v14, %v7636_v62  ;;  %vm18222_vm7 = vmmov %vm18215_vm2 }
 0x6c9   :  { %8005 = vst [vmem:[#allocation1 + $0x5] ss:$9 sm:$0xff] %v7856_v0  ;;  %v7859_v9 = vmax.f32 %v7659_v42, 0.0  ;;  %v7661_v12 = vrot.slane %v7660_v25, 1  ;;  %v7663_v22 = vrot.slane %v7662_v41, 2  ;;  %v7666_v35 = vsel %vm18212_vm13, %v7431_v14, %v7636_v62  ;;  %vm18228_vm13 = vmmov %vm18215_vm2 }
 0x6ca   :  { %8007 = vst [vmem:[#allocation1 + $0x6] ss:$9 sm:$0xff] %v7857_v49  ;;  %v7598_v24 = vpop.f32.mrf.mxu0  ;;  %v7668_v7 = vsel %vm18213_vm10, %v7431_v14, %v7636_v62  ;;  %v7670_v46 = vsel %vm18214_vm14, %v7431_v14, %v7636_v62  ;;  %v7436_v60 = vadd.f32 %v16659_v54, %v7403_v50  ;;  %v7373_v0 = vadd.f32 %v16661_v1, %v16753_v44  ;;  %vm18234_vm14 = vmmov %vm18207_vm0 }
 0x6cb   :  { %8009 = vst [vmem:[#allocation1 + $0x7] ss:$9 sm:$0xff] %v7858_v26  ;;  %v7599_v57 = vadd.f32 %v7598_v24, %v7566_v39  ;;  %v7665_v2 = vrot.slane %v7664_v21, 3  ;;  %v7538_v49 = vadd.f32 %v16756_v38, %v7505_v43  ;;  %v7667_v5 = vrot.slane %v7666_v35, 4 }
 0x6cc   :  { %v7672_v26 = vsel %vm372_vm1, %v7636_v62, %v7431_v14  ;;  %v7669_v59 = vrot.slane %v7668_v7, 5  ;;  %v7671_v24 = vrot.slane %v7670_v46, 6  ;;  %v7860_v47 = vmax.f32 %v7661_v12, 0.0 }
 0x6cd   :  { %v7637_v13 = vrot.slane %v7599_v57, 7  ;;  %v7861_v39 = vmax.f32 %v7663_v22, 0.0  ;;  %v7673_v14 = vrot.slane %v7672_v26, 7  ;;  %v7862_v42 = vmax.f32 %v7665_v2, 0.0  ;;  %v11535_v2 = vld [vmem:[#allocation4 + $0x70] sm:$0xf] }
 0x6ce   :  { %v7863_v23 = vmax.f32 %v7667_v5, 0.0  ;;  %v7406_v45 = vadd.f32 %v16667_v63, %v7373_v0  ;;  %v7864_v50 = vmax.f32 %v7669_v59, 0.0  ;;  %v7571_v25 = vadd.f32 %v16758_v27, %v7538_v49  ;;  %v18224_v49 = vld [vmem:[#allocation25_spill] sm:$0xff]  ;;  %v18225_v5 = vld [vmem:[#allocation40_spill] sm:$0xff] }
 0x6cf   :  { %v16854_v36 = vsel %vm2642_vm5, %v7434_v32, %v7637_v13  ;;  %v16857_v61 = vsel %vm18203_vm11, %v7434_v32, %v7637_v13  ;;  %v16860_v52 = vsel %vm18204_vm8, %v7434_v32, %v7637_v13  ;;  %v16863_v17 = vsel %vm2647_vm4, %v7434_v32, %v7637_v13  ;;  %vm18220_vm11 = vmmov %vm18213_vm10 }
 0x6d0   :  { %v16869_v58 = vsel %vm18207_vm0, %v7434_v32, %v7637_v13  ;;  %v16878_v48 = vsel %vm18210_vm12, %v7434_v32, %v7637_v13  ;;  %v16881_v56 = vsel %vm18211_vm6, %v7434_v32, %v7637_v13  ;;  %v16884_v15 = vsel %vm372_vm1, %v7637_v13, %v7434_v32  ;;  %vm18221_vm8 = vmmov %vm18211_vm6 }
 0x6d1   :  { %v7507_v41 = vadd.f32 %v16760_v10, %v7474_v3  ;;  %v7866_v43 = vmax.f32 %v7673_v14, 0.0  ;;  %v7439_v12 = vadd.f32 %v16669_v33, %v7406_v45  ;;  %v7510_v22 = vadd.f32 %v16769_v18, %v16808_v30  ;;  %vm18223_vm12 = vmmov %vm18213_vm10  ;;  %v12619_v45 = vld [vmem:[#allocation4 + $0x64] sm:$0xf0] }
 0x6d2   :  { %v7600_v28 = vpop.f32.mrf.mxu0  ;;  %v16871_v40 = vld [vmem:[#allocation1] sm:$0xff]  ;;  %v16873_v34 = vld [vmem:[#allocation1 + $0x9] sm:$0xff]  ;;  %v7375_v27 = vadd.f32 %v16671_v20, %v16763_v37  ;;  %v7378_v3 = vadd.f32 %v18224_v49, %v16772_v53  ;;  %v7479_v26 = vadd.f32 %v18225_v5, %v16800_v19  ;;  %vm18229_vm10 = vmmov %vm18206_vm3 }
 0x6d3   :  { %18208 = vst [vmem:[#allocation42_spill] sm:$0xff] %v16871_v40  ;;  %v7601_v55 = vadd.f32 %v7600_v28, %v7568_v4  ;;  %v7865_v28 = vmax.f32 %v7671_v24, 0.0  ;;  %v7867_v4 = vmax.f32 %v16854_v36, 0.0  ;;  %v7540_v10 = vadd.f32 %v16765_v8, %v7507_v41  ;;  %v12621_v24 = vld [vmem:[#allocation4 + $0x74] sm:$0xf0] }
 0x6d4   :  { %18209 = vst [vmem:[#allocation43_spill] sm:$0xff] %v16873_v34  ;;  %v7543_v46 = vadd.f32 %v16775_v51, %v7510_v22  ;;  %v12653_v49 = vld [vmem:[#allocation4 + $0x174] sm:$0xf0] }
 0x6d5   :  { %8012 = vst [vmem:[#allocation1] ss:$9 sm:$0xff] %v7859_v9  ;;  %v7638_v29 = vrot.slane %v7601_v55, 7  ;;  %v7408_v55 = vadd.f32 %v16676_v6, %v7375_v27  ;;  %v11536_v6 = vor.u32 %v12621_v24, %v11535_v2  ;;  %v11663_v2 = vld [vmem:[#allocation4 + $0x170] sm:$0xf]  ;;  %v18241_v24 = vld [vmem:[#allocation36_spill] sm:$0xff] }
 0x6d6   :  { %v12669_v5 = vld [vmem:[#allocation4 + $0x1f4] sm:$0xf0] }
 0x6d7   :  { %v16899_v31 = vsel %vm2642_vm5, %v7436_v60, %v7638_v29  ;;  %v16902_v54 = vsel %vm18215_vm2, %v7436_v60, %v7638_v29  ;;  %v16905_v1 = vsel %vm18216_vm15, %v7436_v60, %v7638_v29  ;;  %v16908_v44 = vsel %vm2647_vm4, %v7436_v60, %v7638_v29  ;;  %9489 = vmatpush.bf16.msra.mxu1 %v11536_v6  ;;  %vm18235_vm2 = vmmov %vm18220_vm11  ;;  %v18262_v34 = vld [vmem:[#allocation15_spill] sm:$0xff] }
 0x6d8   :  { %v16915_v57 = vsel %vm18219_vm9, %v7436_v60, %v7638_v29  ;;  %v16918_v32 = vsel %vm18220_vm11, %v7436_v60, %v7638_v29  ;;  %v16921_v13 = vsel %vm18221_vm8, %v7436_v60, %v7638_v29  ;;  %v16924_v9 = vsel %vm372_vm1, %v7638_v29, %v7436_v60  ;;  %v18226_v29 = vld [vmem:[#allocation31_spill] sm:$0xff]  ;;  %vm18237_vm15 = vmmov %vm18211_vm6 }
 0x6d9   :  { %v7573_v60 = vadd.f32 %v16767_v11, %v7540_v10  ;;  %v7576_v59 = vadd.f32 %v18226_v29, %v7543_v46  ;;  %v11527_v11 = vld [vmem:[#allocation4 + $0x60] sm:$0xf]  ;;  %v12635_v46 = vld [vmem:[#allocation4 + $0xe4] sm:$0xf0]  ;;  %v12617_v29 = vld [vmem:[#allocation4 + $0x54] sm:$0xf0] }
 0x6da   :  { %v7603_v38 = vpop.f32.mrf.mxu0  ;;  %vm18246_vm9 = vmmov %vm18222_vm7 }
 0x6db   :  { %v7604_v21 = vadd.f32 %v7603_v38, %v7571_v25  ;;  %v18227_v38 = vld [vmem:[#allocation24_spill] sm:$0xff]  ;;  %v11528_v25 = vor.u32 %v12619_v45, %v11527_v11  ;;  %v18244_v11 = vld [vmem:[#allocation34_spill] sm:$0xff]  ;;  %vm18248_vm11 = vmmov %vm18206_vm3 }
 0x6dc   :  { %v16910_v16 = vld [vmem:[#allocation1] sm:$0xff]  ;;  %v16912_v62 = vld [vmem:[#allocation1 + $0x9] sm:$0xff]  ;;  %v7441_v14 = vadd.f32 %v18227_v38, %v7408_v55  ;;  %vm18251_vm8 = vmmov %vm18207_vm0 }
 0x6dd   :  { %18217 = vst [vmem:[#allocation44_spill] sm:$0xff] %v16910_v16  ;;  %v7639_v63 = vrot.slane %v7604_v21, 7  ;;  %9490 = vmatpush.bf16.msra.mxu1 %v11528_v25  ;;  %v11647_v16 = vld [vmem:[#allocation4 + $0x150] sm:$0xf] }
 0x6de   :  { %18218 = vst [vmem:[#allocation45_spill] sm:$0xff] %v16912_v62 }
 0x6df   :  { %8015 = vst [vmem:[#allocation1] ss:$9 sm:$0xff] %v7860_v47  ;;  %v16937_v7 = vsel %vm2642_vm5, %v7439_v12, %v7639_v63  ;;  %v16940_v36 = vsel %vm18222_vm7, %v7439_v12, %v7639_v63  ;;  %v16943_v33 = vsel %vm18206_vm3, %v7439_v12, %v7639_v63  ;;  %v16946_v18 = vsel %vm2647_vm4, %v7439_v12, %v7639_v63  ;;  %v11599_v47 = vld [vmem:[#allocation4 + $0xf0] sm:$0xf]  ;;  %vm18254_vm7 = vmmov %vm18235_vm2 }
 0x6e0   :  { %8016 = vst [vmem:[#allocation1 + $0x1] ss:$9 sm:$0xff] %v7861_v39  ;;  %v16949_v30 = vsel %vm18207_vm0, %v7439_v12, %v7639_v63  ;;  %v16952_v20 = vsel %vm18223_vm12, %v7439_v12, %v7639_v63  ;;  %v16955_v37 = vsel %vm18211_vm6, %v7439_v12, %v7639_v63  ;;  %v16958_v8 = vsel %vm372_vm1, %v7639_v63, %v7439_v12  ;;  %v12637_v39 = vld [vmem:[#allocation4 + $0xf4] sm:$0xf0]  ;;  %v18232_v12 = vld [vmem:[#allocation32_spill] sm:$0xff]  ;;  %v18233_v63 = vld [vmem:[#allocation33_spill] sm:$0xff] }
 0x6e1   :  { %8017 = vst [vmem:[#allocation1 + $0x2] ss:$9 sm:$0xff] %v7862_v42  ;;  %v7512_v27 = vadd.f32 %v18233_v63, %v7479_v26  ;;  %v11519_v26 = vld [vmem:[#allocation4 + $0x50] sm:$0xf]  ;;  %vm18256_vm3 = vmmov %vm18211_vm6 }
 0x6e2   :  { %8018 = vst [vmem:[#allocation1 + $0x3] ss:$9 sm:$0xff] %v7863_v23  ;;  %v7605_v35 = vpop.f32.mrf.mxu0  ;;  %v11600_v23 = vor.u32 %v12637_v39, %v11599_v47  ;;  %v18242_v39 = vld [vmem:[#allocation27_spill] sm:$0xff]  ;;  %vm18266_vm0 = vmmov %vm18246_vm9 }
 0x6e3   :  { %8019 = vst [vmem:[#allocation1 + $0x4] ss:$9 sm:$0xff] %v7864_v50  ;;  %v7606_v0 = vadd.f32 %v7605_v35, %v7573_v60  ;;  %v11591_v35 = vld [vmem:[#allocation4 + $0xe0] sm:$0xf]  ;;  %v7545_v45 = vadd.f32 %v18244_v11, %v7512_v27  ;;  %vm18267_vm12 = vmmov %vm18229_vm10 }
 0x6e4   :  { %8020 = vst [vmem:[#allocation1 + $0x5] ss:$9 sm:$0xff] %v7865_v28  ;;  %9502 = vmatpush.bf16.msra.mxu2 %v11600_v23  ;;  %v11511_v11 = vld [vmem:[#allocation4 + $0x40] sm:$0xf]  ;;  %vm18269_vm6 = vmmov %vm18251_vm8 }
 0x6e5   :  { %8021 = vst [vmem:[#allocation1 + $0x6] ss:$9 sm:$0xff] %v7866_v43  ;;  %v7640_v51 = vrot.slane %v7606_v0, 7  ;;  %v18230_v43 = vld [vmem:[#allocation26_spill] sm:$0xff] }
 0x6e6   :  { %8022 = vst [vmem:[#allocation1 + $0x7] ss:$9 sm:$0xff] %v7867_v4  ;;  %v7411_v21 = vadd.f32 %v18230_v43, %v7378_v3  ;;  %v18231_v4 = vld [vmem:[#allocation29_spill] sm:$0xff]  ;;  %v11727_v3 = vld [vmem:[#allocation4 + $0x1f0] sm:$0xf] }
 0x6e7   :  { %v16970_v53 = vsel %vm2642_vm5, %v7441_v14, %v7640_v51  ;;  %v16973_v19 = vsel %vm18228_vm13, %v7441_v14, %v7640_v51  ;;  %v16976_v41 = vsel %vm18229_vm10, %v7441_v14, %v7640_v51  ;;  %v16979_v28 = vsel %vm2647_vm4, %v7441_v14, %v7640_v51  ;;  %vm18270_vm13 = vmmov %vm18235_vm2 }
 0x6e8   :  { %v7347_v22 = vadd.f32 %v18232_v12, %v18231_v4  ;;  %v16986_v10 = vsel %vm18234_vm14, %v7441_v14, %v7640_v51  ;;  %v16989_v55 = vsel %vm18235_vm2, %v7441_v14, %v7640_v51  ;;  %v16992_v60 = vsel %vm18237_vm15, %v7441_v14, %v7640_v51  ;;  %vm18271_vm10 = vmmov %vm18256_vm3 }
 0x6e9   :  { %18236 = vst [vmem:[#allocation25_spill] sm:$0xff] %v16989_v55  ;;  %v16995_v0 = vsel %vm372_vm1, %v7640_v51, %v7441_v14  ;;  %v7444_v38 = vadd.f32 %v18242_v39, %v7411_v21  ;;  %v11592_v14 = vor.u32 %v12635_v46, %v11591_v35  ;;  %v11664_v51 = vor.u32 %v12653_v49, %v11663_v2  ;;  %v11583_v35 = vld [vmem:[#allocation4 + $0xd0] sm:$0xf]  ;;  %v12633_v46 = vld [vmem:[#allocation4 + $0xd4] sm:$0xf0]  ;;  %vm18275_vm14 = vmmov %vm18266_vm0 }
 0x6ea   :  { %v7608_v42 = vpop.f32.mrf.mxu0  ;;  %18238 = vst [vmem:[#allocation40_spill] sm:$0xff] %v16992_v60  ;;  %v11728_v4 = vor.u32 %v12669_v5, %v11727_v3  ;;  %v11520_v12 = vor.u32 %v12617_v29, %v11519_v26  ;;  %v11655_v5 = vld [vmem:[#allocation4 + $0x160] sm:$0xf]  ;;  %v12651_v26 = vld [vmem:[#allocation4 + $0x164] sm:$0xf0]  ;;  %vm18277_vm2 = vmmov %vm18248_vm11 }
 0x6eb   :  { %v7609_v50 = vadd.f32 %v7608_v42, %v7576_v59  ;;  %18239 = vst [vmem:[#allocation31_spill] sm:$0xff] %v16995_v0  ;;  %v18240_v59 = vld [vmem:[#allocation41_spill] sm:$0xff]  ;;  %v18243_v42 = vld [vmem:[#allocation28_spill] sm:$0xff]  ;;  %9503 = vmatpush.bf16.msra.mxu2 %v11592_v14  ;;  %9515 = vmatpush.bf16.msra.mxu3 %v11664_v51  ;;  %v11503_v0 = vld [vmem:[#allocation4 + $0x30] sm:$0xf] }
 0x6ec   :  { %v7515_v47 = vadd.f32 %v18241_v24, %v18240_v59  ;;  %v7380_v6 = vadd.f32 %v18243_v42, %v7347_v22  ;;  %v18253_v22 = vld [vmem:[#allocation38_spill] sm:$0xff]  ;;  %9528 = vmatpush.bf16.msrb.mxu0 %v11728_v4  ;;  %9491 = vmatpush.bf16.msra.mxu1 %v11520_v12  ;;  %v11719_v29 = vld [vmem:[#allocation4 + $0x1e0] sm:$0xf]  ;;  %v12667_v42 = vld [vmem:[#allocation4 + $0x1e4] sm:$0xf0] }
 0x6ed   :  { %v7641_v23 = vrot.slane %v7609_v50, 7  ;;  %v18259_v59 = vld [vmem:[#allocation12_spill] sm:$0xff]  ;;  %v12615_v14 = vld [vmem:[#allocation4 + $0x44] sm:$0xf0]  ;;  %v12649_v12 = vld [vmem:[#allocation4 + $0x154] sm:$0xf0] }
 0x6ee   :  { %v7548_v27 = vadd.f32 %v18253_v22, %v7515_v47  ;;  %v7413_v24 = vadd.f32 %v18259_v59, %v7380_v6  ;;  %v18260_v47 = vld [vmem:[#allocation35_spill] sm:$0xff]  ;;  %v11575_v51 = vld [vmem:[#allocation4 + $0xc0] sm:$0xf]  ;;  %v12631_v22 = vld [vmem:[#allocation4 + $0xc4] sm:$0xf0]  ;;  %v11720_v6 = vor.u32 %v12667_v42, %v11719_v29  ;;  %v11512_v59 = vor.u32 %v12615_v14, %v11511_v11 }
 0x6ef   :  { %v17003_v63 = vsel %vm2642_vm5, %v7444_v38, %v7641_v23  ;;  %v17006_v62 = vsel %vm18246_vm9, %v7444_v38, %v7641_v23  ;;  %v17009_v25 = vsel %vm18248_vm11, %v7444_v38, %v7641_v23  ;;  %v17012_v21 = vsel %vm2647_vm4, %v7444_v38, %v7641_v23  ;;  %v12613_v60 = vld [vmem:[#allocation4 + $0x34] sm:$0xf0]  ;;  %v11703_v42 = vld [vmem:[#allocation4 + $0x1c0] sm:$0xf]  ;;  %v12663_v11 = vld [vmem:[#allocation4 + $0x1c4] sm:$0xf0] }
 0x6f0   :  { %18245 = vst [vmem:[#allocation24_spill] sm:$0xff] %v17003_v63  ;;  %v17015_v50 = vsel %vm18251_vm8, %v7444_v38, %v7641_v23  ;;  %v17019_v2 = vsel %vm18254_vm7, %v7444_v38, %v7641_v23  ;;  %v17022_v49 = vsel %vm18256_vm3, %v7444_v38, %v7641_v23  ;;  %v17025_v3 = vsel %vm372_vm1, %v7641_v23, %v7444_v38  ;;  %v18261_v63 = vld [vmem:[#allocation37_spill] sm:$0xff]  ;;  %v18263_v23 = vld [vmem:[#allocation39_spill] sm:$0xff]  ;;  %v11495_v14 = vld [vmem:[#allocation4 + $0x20] sm:$0xf] }
 0x6f1   :  { %18247 = vst [vmem:[#allocation26_spill] sm:$0xff] %v17006_v62  ;;  %v7578_v39 = vadd.f32 %v18260_v47, %v7545_v45  ;;  %v7383_v40 = vadd.f32 %v18262_v34, %v18261_v63  ;;  %v7581_v4 = vadd.f32 %v18263_v23, %v7548_v27  ;;  %v18264_v45 = vld [vmem:[#allocation13_spill] sm:$0xff]  ;;  %v11576_v62 = vor.u32 %v12631_v22, %v11575_v51  ;;  %v11559_v22 = vld [vmem:[#allocation4 + $0xa0] sm:$0xf]  ;;  %vm18280_vm15 = vmmov %vm18269_vm6 }
 0x6f2   :  { %v7610_v43 = vpop.f32.mrf.mxu0  ;;  %18249 = vst [vmem:[#allocation29_spill] sm:$0xff] %v17009_v25  ;;  %v7446_v47 = vadd.f32 %v18264_v45, %v7413_v24  ;;  %v11648_v34 = vor.u32 %v12649_v12, %v11647_v16  ;;  %9529 = vmatpush.bf16.msrb.mxu0 %v11720_v6  ;;  %9492 = vmatpush.bf16.msra.mxu1 %v11512_v59  ;;  %v12611_v51 = vld [vmem:[#allocation4 + $0x24] sm:$0xf0]  ;;  %vm18282_vm9 = vmmov %vm18254_vm7 }
 0x6f3   :  { %18250 = vst [vmem:[#allocation32_spill] sm:$0xff] %v17012_v21  ;;  %v7611_v38 = vadd.f32 %v7610_v43, %v7578_v39  ;;  %v11704_v6 = vor.u32 %v12663_v11, %v11703_v42  ;;  %v11496_v59 = vor.u32 %v12611_v51, %v11495_v14  ;;  %vm18284_vm11 = vmmov %vm18256_vm3  ;;  %v12609_v42 = vld [vmem:[#allocation4 + $0x14] sm:$0xf0]  ;;  %v11551_v11 = vld [vmem:[#allocation4 + $0x90] sm:$0xf] }
 0x6f4   :  { %18252 = vst [vmem:[#allocation33_spill] sm:$0xff] %v17015_v50  ;;  %v11656_v50 = vor.u32 %v12651_v26, %v11655_v5  ;;  %v11567_v5 = vld [vmem:[#allocation4 + $0xb0] sm:$0xf]  ;;  %v12629_v26 = vld [vmem:[#allocation4 + $0xb4] sm:$0xf0]  ;;  %vm18315_vm8 = vmmov %vm18266_vm0 }
 0x6f5   :  { %18255 = vst [vmem:[#allocation41_spill] sm:$0xff] %v17019_v2  ;;  %v11584_v2 = vor.u32 %v12633_v46, %v11583_v35  ;;  %v7642_v21 = vrot.slane %v7611_v38, 7  ;;  %v12625_v14 = vld [vmem:[#allocation4 + $0x94] sm:$0xf0]  ;;  %v12643_v51 = vld [vmem:[#allocation4 + $0x124] sm:$0xf0]  ;;  %vm18316_vm7 = vmmov %vm18266_vm0 }
 0x6f6   :  { %18257 = vst [vmem:[#allocation36_spill] sm:$0xff] %v17022_v49  ;;  %v12665_v49 = vld [vmem:[#allocation4 + $0x1d4] sm:$0xf0]  ;;  %9516 = vmatpush.bf16.msra.mxu3 %v11656_v50  ;;  %v11504_v50 = vor.u32 %v12613_v60, %v11503_v0  ;;  %v12627_v60 = vld [vmem:[#allocation4 + $0xa4] sm:$0xf0]  ;;  %vm18317_vm3 = vmmov %vm18266_vm0 }
 0x6f7   :  { %18258 = vst [vmem:[#allocation27_spill] sm:$0xff] %v17025_v3  ;;  %v11711_v3 = vld [vmem:[#allocation4 + $0x1d0] sm:$0xf]  ;;  %9504 = vmatpush.bf16.msra.mxu2 %v11584_v2  ;;  %v17034_v63 = vsel %vm2642_vm5, %v7446_v47, %v7642_v21  ;;  %v17037_v27 = vsel %vm18266_vm0, %v7446_v47, %v7642_v21  ;;  %v17040_v35 = vsel %vm18267_vm12, %v7446_v47, %v7642_v21  ;;  %v18273_v0 = vld [vmem:[#allocation17_spill] sm:$0xff]  ;;  %vm18318_vm12 = vmmov %vm18266_vm0 }
 0x6f8   :  { %v11712_v43 = vor.u32 %v12665_v49, %v11711_v3  ;;  %18265 = vst [vmem:[#allocation28_spill] sm:$0xff] %v17034_v63  ;;  %v17043_v46 = vsel %vm2647_vm4, %v7446_v47, %v7642_v21  ;;  %v17047_v16 = vsel %vm18269_vm6, %v7446_v47, %v7642_v21  ;;  %v11639_v49 = vld [vmem:[#allocation4 + $0x140] sm:$0xf]  ;;  %v12647_v3 = vld [vmem:[#allocation4 + $0x144] sm:$0xf0]  ;;  %v17050_v29 = vsel %vm18270_vm13, %v7446_v47, %v7642_v21  ;;  %vm18319_vm6 = vmmov %vm18266_vm0 }
 0x6f9   :  { %v17053_v24 = vsel %vm18271_vm10, %v7446_v47, %v7642_v21  ;;  %v17056_v39 = vsel %vm372_vm1, %v7642_v21, %v7446_v47  ;;  %9493 = vmatpush.bf16.msra.mxu1 %v11504_v50  ;;  %v11640_v12 = vor.u32 %v12647_v3, %v11639_v49  ;;  %v11560_v21 = vor.u32 %v12627_v60, %v11559_v22  ;;  %v12661_v49 = vld [vmem:[#allocation4 + $0x1b4] sm:$0xf0]  ;;  %v11487_v3 = vld [vmem:[#allocation4 + $0x10] sm:$0xf]  ;;  %v11687_v22 = vld [vmem:[#allocation4 + $0x1a0] sm:$0xf] }
 0x6fa   :  { %v7613_v25 = vpop.f32.mrf.mxu0  ;;  %18272 = vst [vmem:[#allocation34_spill] sm:$0xff] %v17056_v39  ;;  %9517 = vmatpush.bf16.msra.mxu3 %v11648_v34  ;;  %9530 = vmatpush.bf16.msrb.mxu0 %v11712_v43  ;;  %v11631_v43 = vld [vmem:[#allocation4 + $0x130] sm:$0xf]  ;;  %v12659_v60 = vld [vmem:[#allocation4 + $0x1a4] sm:$0xf0]  ;;  %vm18320_vm13 = vmmov %vm18266_vm0 }
 0x6fb   :  { %v7614_v55 = vadd.f32 %v7613_v25, %v7581_v4  ;;  %v18268_v25 = vld [vmem:[#allocation16_spill] sm:$0xff]  ;;  %9505 = vmatpush.bf16.msra.mxu2 %v11576_v62  ;;  %v12641_v63 = vld [vmem:[#allocation4 + $0x114] sm:$0xf0]  ;;  %vm18321_vm10 = vmmov %vm18266_vm0 }
 0x6fc   :  { %v7416_v2 = vadd.f32 %v18268_v25, %v7383_v40  ;;  %v11568_v40 = vor.u32 %v12629_v26, %v11567_v5  ;;  %v12645_v5 = vld [vmem:[#allocation4 + $0x134] sm:$0xf0]  ;;  %v11695_v26 = vld [vmem:[#allocation4 + $0x1b0] sm:$0xf] }
 0x6fd   :  { %v7643_v23 = vrot.slane %v7614_v55, 7  ;;  %9494 = vmatpush.bf16.msra.mxu1 %v11496_v59  ;;  %v12685_v59 = vld [vmem:[#allocation4 + $0x274] sm:$0xf0] }
 0x6fe   :  { %v7449_v38 = vadd.f32 %v18273_v0, %v7416_v2  ;;  %9518 = vmatpush.bf16.msra.mxu3 %v11640_v12  ;;  %9531 = vmatpush.bf16.msrb.mxu0 %v11704_v6  ;;  %v11632_v0 = vor.u32 %v12645_v5, %v11631_v43  ;;  %v12607_v12 = vld [vmem:[#allocation4 + $0x4] sm:$0xf0]  ;;  %v11543_v6 = vld [vmem:[#allocation4 + $0x80] sm:$0xf]  ;;  %v11679_v5 = vld [vmem:[#allocation4 + $0x190] sm:$0xf] }
 0x6ff   :  { %9506 = vmatpush.bf16.msra.mxu2 %v11568_v40  ;;  %v11623_v40 = vld [vmem:[#allocation4 + $0x120] sm:$0xf]  ;;  %v12657_v39 = vld [vmem:[#allocation4 + $0x194] sm:$0xf0] }
 0x700   :  { %v17060_v45 = vsel %vm2642_vm5, %v7449_v38, %v7643_v23  ;;  %v17063_v62 = vsel %vm18275_vm14, %v7449_v38, %v7643_v23  ;;  %v17066_v47 = vsel %vm18277_vm2, %v7449_v38, %v7643_v23  ;;  %v17069_v34 = vsel %vm2647_vm4, %v7449_v38, %v7643_v23  ;;  %vm18323_vm14 = vmmov %vm18266_vm0 }
 0x701   :  { %18274 = vst [vmem:[#allocation38_spill] sm:$0xff] %v17060_v45  ;;  %v17072_v55 = vsel %vm18280_vm15, %v7449_v38, %v7643_v23  ;;  %v17075_v25 = vsel %vm18282_vm9, %v7449_v38, %v7643_v23  ;;  %v17078_v2 = vsel %vm18284_vm11, %v7449_v38, %v7643_v23  ;;  %v17081_v50 = vsel %vm372_vm1, %v7643_v23, %v7449_v38  ;;  %v12623_v38 = vld [vmem:[#allocation4 + $0x84] sm:$0xf0]  ;;  %v11791_v23 = vld [vmem:[#allocation4 + $0x270] sm:$0xf]  ;;  %vm18324_vm2 = vmmov %vm18266_vm0 }
 0x702   :  { %v7615_v4 = vpop.f32.mrf.mxu0  ;;  %18276 = vst [vmem:[#allocation12_spill] sm:$0xff] %v17063_v62  ;;  %v11696_v45 = vor.u32 %v12661_v49, %v11695_v26  ;;  %9519 = vmatpush.bf16.msra.mxu3 %v11632_v0  ;;  %v11615_v62 = vld [vmem:[#allocation4 + $0x110] sm:$0xf]  ;;  %v11544_v43 = vor.u32 %v12623_v38, %v11543_v6  ;;  %v11792_v26 = vor.u32 %v12685_v59, %v11791_v23  ;;  %v12697_v38 = vld [vmem:[#allocation4 + $0x2d4] sm:$0xf0]  ;;  %vm18325_vm15 = vcmask 1042434  }
 0x703   :  { %18278 = vst [vmem:[#allocation35_spill] sm:$0xff] %v17066_v47  ;;  %9507 = vmatpush.bf16.msra.mxu2 %v11560_v21  ;;  %v11479_v4 = vld [vmem:[#allocation4] sm:$0xf]  ;;  %v11688_v21 = vor.u32 %v12659_v60, %v11687_v22  ;;  %v12655_v60 = vld [vmem:[#allocation4 + $0x184] sm:$0xf0]  ;;  %vm18326_vm9 = vmmov %vm18325_vm15  ;;  %vm18327_vm11 = vcmask 1044484  }
 0x704   :  { %18279 = vst [vmem:[#allocation37_spill] sm:$0xff] %v17069_v34  ;;  %v12701_v34 = vld [vmem:[#allocation4 + $0x2f4] sm:$0xf0]  ;;  %9532 = vmatpush.bf16.msrb.mxu0 %v11696_v45  ;;  %v11480_v47 = vor.u32 %v12607_v12, %v11479_v4  ;;  %v11680_v45 = vor.u32 %v12657_v39, %v11679_v5  ;;  %v11671_v22 = vld [vmem:[#allocation4 + $0x180] sm:$0xf] }
 0x705   :  { %18281 = vst [vmem:[#allocation15_spill] sm:$0xff] %v17072_v55  ;;  %v11855_v55 = vld [vmem:[#allocation4 + $0x2f0] sm:$0xf]  ;;  %v12717_v4 = vld [vmem:[#allocation4 + $0x374] sm:$0xf0]  ;;  %v11672_v39 = vor.u32 %v12655_v60, %v11671_v22 }
 0x706   :  { %18283 = vst [vmem:[#allocation39_spill] sm:$0xff] %v17075_v25  ;;  %v11552_v25 = vor.u32 %v12625_v14, %v11551_v11  ;;  %v11856_v49 = vor.u32 %v12701_v34, %v11855_v55  ;;  %v11616_v11 = vor.u32 %v12641_v63, %v11615_v62  ;;  %v11607_v14 = vld [vmem:[#allocation4 + $0x100] sm:$0xf]  ;;  %v11919_v0 = vld [vmem:[#allocation4 + $0x370] sm:$0xf] }
 0x707   :  { %18285 = vst [vmem:[#allocation13_spill] sm:$0xff] %v17078_v2  ;;  %v11488_v2 = vor.u32 %v12609_v42, %v11487_v3  ;;  %v11783_v3 = vld [vmem:[#allocation4 + $0x260] sm:$0xf]  ;;  %v12683_v42 = vld [vmem:[#allocation4 + $0x264] sm:$0xf0] }
 0x708   :  { %18286 = vst [vmem:[#allocation16_spill] sm:$0xff] %v17081_v50  ;;  %v11624_v50 = vor.u32 %v12643_v51, %v11623_v40  ;;  %9508 = vmatpush.bf16.msra.mxu2 %v11552_v25  ;;  %v11847_v40 = vld [vmem:[#allocation4 + $0x2e0] sm:$0xf]  ;;  %v12699_v51 = vld [vmem:[#allocation4 + $0x2e4] sm:$0xf0]  ;;  %9533 = vmatpush.bf16.msrb.mxu0 %v11688_v21  ;;  %v11784_v25 = vor.u32 %v12683_v42, %v11783_v3 }
 0x709   :  { %9495 = vmatpush.bf16.msra.mxu1 %v11488_v2  ;;  %v12639_v2 = vld [vmem:[#allocation4 + $0x104] sm:$0xf0]  ;;  %v11983_v12 = vld [vmem:[#allocation4 + $0x3f0] sm:$0xf]  ;;  %v11848_v34 = vor.u32 %v12699_v51, %v11847_v40  ;;  %v12733_v55 = vld [vmem:[#allocation4 + $0x3f4] sm:$0xf0] }
 0x70a   :  { %9520 = vmatpush.bf16.msra.mxu3 %v11624_v50  ;;  %v11775_v50 = vld [vmem:[#allocation4 + $0x250] sm:$0xf]  ;;  %v12681_v63 = vld [vmem:[#allocation4 + $0x254] sm:$0xf0]  ;;  %v11608_v62 = vor.u32 %v12639_v2, %v11607_v14  ;;  %v11984_v23 = vor.u32 %v12733_v55, %v11983_v12  ;;  %v11911_v21 = vld [vmem:[#allocation4 + $0x360] sm:$0xf] }
 0x70b   :  { %v11839_v6 = vld [vmem:[#allocation4 + $0x2d0] sm:$0xf]  ;;  %v11776_v59 = vor.u32 %v12681_v63, %v11775_v50  ;;  %v11975_v5 = vld [vmem:[#allocation4 + $0x3e0] sm:$0xf]  ;;  %v12679_v42 = vld [vmem:[#allocation4 + $0x244] sm:$0xf0] }
 0x70c   :  { %9509 = vmatpush.bf16.msra.mxu2 %v11544_v43  ;;  %9534 = vmatpush.bf16.msrb.mxu0 %v11680_v45  ;;  %v12715_v43 = vld [vmem:[#allocation4 + $0x364] sm:$0xf0]  ;;  %v11767_v3 = vld [vmem:[#allocation4 + $0x240] sm:$0xf]  ;;  %v7676_v14 = vrot.slane %v16857_v61, 1  ;;  %v7678_v63 = vrot.slane %v16860_v52, 2 }
 0x70d   :  { %9496 = vmatpush.bf16.msra.mxu1 %v11480_v47  ;;  %v11920_v47 = vor.u32 %v12717_v4, %v11919_v0  ;;  %v11831_v40 = vld [vmem:[#allocation4 + $0x2c0] sm:$0xf]  ;;  %v11912_v51 = vor.u32 %v12715_v43, %v11911_v21  ;;  %v11768_v2 = vor.u32 %v12679_v42, %v11767_v3  ;;  %v11903_v22 = vld [vmem:[#allocation4 + $0x350] sm:$0xf]  ;;  %v12713_v60 = vld [vmem:[#allocation4 + $0x354] sm:$0xf0] }
 0x70e   :  { %9521 = vmatpush.bf16.msra.mxu3 %v11616_v11  ;;  %v12695_v11 = vld [vmem:[#allocation4 + $0x2c4] sm:$0xf0]  ;;  %v12729_v4 = vld [vmem:[#allocation4 + $0x3d4] sm:$0xf0]  ;;  %v11759_v12 = vld [vmem:[#allocation4 + $0x230] sm:$0xf] }
 0x70f   :  { %v11832_v0 = vor.u32 %v12695_v11, %v11831_v40  ;;  %v11823_v55 = vld [vmem:[#allocation4 + $0x2b0] sm:$0xf]  ;;  %v12693_v50 = vld [vmem:[#allocation4 + $0x2b4] sm:$0xf0]  ;;  %v7868_v61 = vmax.f32 %v7676_v14, 0.0  ;;  %v7680_v42 = vrot.slane %v16863_v17, 3 }
 0x710   :  { %9554 = vmatpush.bf16.msrb.mxu2 %v11856_v49  ;;  %v12731_v49 = vld [vmem:[#allocation4 + $0x3e4] sm:$0xf0]  ;;  %9535 = vmatpush.bf16.msrb.mxu0 %v11672_v39  ;;  %v11959_v21 = vld [vmem:[#allocation4 + $0x3c0] sm:$0xf]  ;;  %v11824_v43 = vor.u32 %v12693_v50, %v11823_v55  ;;  %v7682_v40 = vrot.slane %v16869_v58, 4  ;;  %v7684_v11 = vrot.slane %v16878_v48, 5 }
 0x711   :  { %9541 = vmatpush.bf16.msrb.mxu1 %v11792_v26  ;;  %v11840_v26 = vor.u32 %v12697_v38, %v11839_v6  ;;  %v11976_v45 = vor.u32 %v12731_v49, %v11975_v5  ;;  %v17085_v6 = vld [vmem:[#allocation1] sm:$0xff]  ;;  %v17087_v38 = vld [vmem:[#allocation1 + $0x9] sm:$0xff]  ;;  %v7686_v17 = vrot.slane %v16881_v56, 6  ;;  %v7688_v58 = vrot.slane %v16884_v15, 7 }
 0x712   :  { %9522 = vmatpush.bf16.msra.mxu3 %v11608_v62  ;;  %v11904_v62 = vor.u32 %v12713_v60, %v11903_v22  ;;  %v12727_v5 = vld [vmem:[#allocation4 + $0x3c4] sm:$0xf0]  ;;  %v11815_v52 = vld [vmem:[#allocation4 + $0x2a0] sm:$0xf]  ;;  %8025 = vst [vmem:[#allocation1] ss:$9 sm:$0xff] %v7868_v61 }
 0x713   :  { %v12675_v49 = vld [vmem:[#allocation4 + $0x224] sm:$0xf0]  ;;  %v12709_v22 = vld [vmem:[#allocation4 + $0x334] sm:$0xf0]  ;;  %v11951_v60 = vld [vmem:[#allocation4 + $0x3b0] sm:$0xf] }
 0x714   :  { %9555 = vmatpush.bf16.msrb.mxu2 %v11848_v34  ;;  %9580 = vmatpush.bf16.msra.mxu0 %v11984_v23  ;;  %v12677_v34 = vld [vmem:[#allocation4 + $0x234] sm:$0xf0]  ;;  %v11895_v23 = vld [vmem:[#allocation4 + $0x340] sm:$0xf]  ;;  %v12691_v3 = vld [vmem:[#allocation4 + $0x2a4] sm:$0xf0] }
 0x715   :  { %9542 = vmatpush.bf16.msrb.mxu1 %v11784_v25  ;;  %v11967_v25 = vld [vmem:[#allocation4 + $0x3d0] sm:$0xf]  ;;  %v12689_v48 = vld [vmem:[#allocation4 + $0x294] sm:$0xf0]  ;;  %v7869_v55 = vmax.f32 %v7678_v63, 0.0  ;;  %v7870_v50 = vmax.f32 %v7680_v42, 0.0 }
 0x716   :  { %9567 = vmatpush.bf16.msrb.mxu3 %v11920_v47  ;;  %v11968_v39 = vor.u32 %v12729_v4, %v11967_v25  ;;  %v11760_v47 = vor.u32 %v12677_v34, %v11759_v12  ;;  %v11816_v25 = vor.u32 %v12691_v3, %v11815_v52  ;;  %v11743_v4 = vld [vmem:[#allocation4 + $0x210] sm:$0xf]  ;;  %v12673_v12 = vld [vmem:[#allocation4 + $0x214] sm:$0xf0]  ;;  %v12671_v15 = vld [vmem:[#allocation4 + $0x204] sm:$0xf0] }
 0x717   :  { %v11807_v34 = vld [vmem:[#allocation4 + $0x290] sm:$0xf]  ;;  %v11799_v52 = vld [vmem:[#allocation4 + $0x280] sm:$0xf]  ;;  %v12687_v3 = vld [vmem:[#allocation4 + $0x284] sm:$0xf0] }
 0x718   :  { %9556 = vmatpush.bf16.msrb.mxu2 %v11840_v26  ;;  %9581 = vmatpush.bf16.msra.mxu0 %v11976_v45  ;;  %v11751_v26 = vld [vmem:[#allocation4 + $0x220] sm:$0xf]  ;;  %v11808_v56 = vor.u32 %v12689_v48, %v11807_v34  ;;  %v7873_v42 = vmax.f32 %v7686_v17, 0.0 }
 0x719   :  { %9543 = vmatpush.bf16.msrb.mxu1 %v11776_v59  ;;  %v12711_v59 = vld [vmem:[#allocation4 + $0x344] sm:$0xf0]  ;;  %v11752_v45 = vor.u32 %v12675_v49, %v11751_v26  ;;  %v7872_v26 = vmax.f32 %v7684_v11, 0.0  ;;  %v17094_v49 = vld [vmem:[#allocation1] sm:$0xff] }
 0x71a   :  { %9568 = vmatpush.bf16.msrb.mxu3 %v11912_v51  ;;  %v11896_v14 = vor.u32 %v12711_v59, %v11895_v23  ;;  %v11960_v51 = vor.u32 %v12727_v5, %v11959_v21  ;;  %v11744_v23 = vor.u32 %v12673_v12, %v11743_v4  ;;  %v11943_v59 = vld [vmem:[#allocation4 + $0x3a0] sm:$0xf]  ;;  %v12723_v21 = vld [vmem:[#allocation4 + $0x3a4] sm:$0xf0]  ;;  %v7871_v5 = vmax.f32 %v7682_v40, 0.0 }
 0x71b   :  { %v17096_v63 = vld [vmem:[#allocation1 + $0x9] sm:$0xff]  ;;  %v11944_v40 = vor.u32 %v12723_v21, %v11943_v59  ;;  %v7875_v4 = vmax.f32 %v16899_v31, 0.0  ;;  %v7695_v31 = vrot.slane %v16908_v44, 3  ;;  %v7708_v44 = vrot.slane %v16943_v33, 2 }
 0x71c   :  { %9557 = vmatpush.bf16.msrb.mxu2 %v11832_v0  ;;  %9582 = vmatpush.bf16.msra.mxu0 %v11968_v39  ;;  %v12725_v0 = vld [vmem:[#allocation4 + $0x3b4] sm:$0xf0]  ;;  %v12707_v39 = vld [vmem:[#allocation4 + $0x324] sm:$0xf0]  ;;  %8028 = vst [vmem:[#allocation1] ss:$9 sm:$0xff] %v7869_v55 }
 0x71d   :  { %9544 = vmatpush.bf16.msrb.mxu1 %v11768_v2  ;;  %v11887_v2 = vld [vmem:[#allocation4 + $0x330] sm:$0xf]  ;;  %8029 = vst [vmem:[#allocation1 + $0x1] ss:$9 sm:$0xff] %v7870_v50  ;;  %v7697_v50 = vrot.slane %v16915_v57, 4  ;;  %v7712_v33 = vrot.slane %v16949_v30, 4 }
 0x71e   :  { %9569 = vmatpush.bf16.msrb.mxu3 %v11904_v62  ;;  %v11888_v61 = vor.u32 %v12709_v22, %v11887_v2  ;;  %v11879_v62 = vld [vmem:[#allocation4 + $0x320] sm:$0xf]  ;;  %v11871_v2 = vld [vmem:[#allocation4 + $0x310] sm:$0xf]  ;;  %v12705_v22 = vld [vmem:[#allocation4 + $0x314] sm:$0xf0] }
 0x71f   :  { %8030 = vst [vmem:[#allocation1 + $0x2] ss:$9 sm:$0xff] %v7871_v5  ;;  %v7725_v30 = vrot.slane %v16979_v28, 3 }
 0x720   :  { %9558 = vmatpush.bf16.msrb.mxu2 %v11824_v43  ;;  %9583 = vmatpush.bf16.msra.mxu0 %v11960_v51  ;;  %v11735_v43 = vld [vmem:[#allocation4 + $0x200] sm:$0xf]  ;;  %v7691_v51 = vrot.slane %v16902_v54, 1  ;;  %8031 = vst [vmem:[#allocation1 + $0x3] ss:$9 sm:$0xff] %v7872_v26  ;;  %v11872_v54 = vor.u32 %v12705_v22, %v11871_v2  ;;  %v7710_v26 = vrot.slane %v16946_v18, 3 }
 0x721   :  { %9545 = vmatpush.bf16.msrb.mxu1 %v11760_v47  ;;  %v11952_v47 = vor.u32 %v12725_v0, %v11951_v60  ;;  %v11736_v11 = vor.u32 %v12671_v15, %v11735_v43  ;;  %v11800_v60 = vor.u32 %v12687_v3, %v11799_v52  ;;  %v12721_v0 = vld [vmem:[#allocation4 + $0x394] sm:$0xf0]  ;;  %8032 = vst [vmem:[#allocation1 + $0x4] ss:$9 sm:$0xff] %v7873_v42  ;;  %v7706_v43 = vrot.slane %v16940_v36, 1 }
 0x722   :  { %9570 = vmatpush.bf16.msrb.mxu3 %v11896_v14  ;;  %v7874_v14 = vmax.f32 %v7688_v58, 0.0  ;;  %v7876_v12 = vmax.f32 %v7691_v51, 0.0  ;;  %8034 = vst [vmem:[#allocation1 + $0x6] ss:$9 sm:$0xff] %v7875_v4  ;;  %v7693_v58 = vrot.slane %v16905_v1, 2  ;;  %v7879_v1 = vmax.f32 %v7697_v50, 0.0 }
 0x723   :  { %v7714_v52 = vrot.slane %v16952_v20, 5  ;;  %v7718_v3 = vrot.slane %v16958_v8, 7  ;;  %v7887_v42 = vmax.f32 %v7712_v33, 0.0  ;;  %v7721_v51 = vrot.slane %v16973_v19, 1  ;;  %v18289_v4 = vld [vmem:[#allocation31_spill] sm:$0xff]  ;;  %v18293_v50 = vld [vmem:[#allocation33_spill] sm:$0xff] }
 0x724   :  { %9559 = vmatpush.bf16.msrb.mxu2 %v11816_v25  ;;  %9584 = vmatpush.bf16.msra.mxu0 %v11952_v47  ;;  %v11935_v25 = vld [vmem:[#allocation4 + $0x390] sm:$0xf]  ;;  %8033 = vst [vmem:[#allocation1 + $0x5] ss:$9 sm:$0xff] %v7874_v14  ;;  %v7877_v34 = vmax.f32 %v7693_v58, 0.0  ;;  %v7878_v47 = vmax.f32 %v7695_v31, 0.0 }
 0x725   :  { %9546 = vmatpush.bf16.msrb.mxu1 %v11752_v45  ;;  %v11880_v45 = vor.u32 %v12707_v39, %v11879_v62  ;;  %v11936_v17 = vor.u32 %v12721_v0, %v11935_v25  ;;  %8035 = vst [vmem:[#allocation1 + $0x7] ss:$9 sm:$0xff] %v7876_v12  ;;  %v7701_v62 = vrot.slane %v16921_v13, 6  ;;  %v7703_v39 = vrot.slane %v16924_v9, 7  ;;  %v18288_v25 = vld [vmem:[#allocation40_spill] sm:$0xff]  ;;  %v18290_v12 = vld [vmem:[#allocation26_spill] sm:$0xff] }
 0x726   :  { %9571 = vmatpush.bf16.msrb.mxu3 %v11888_v61  ;;  %v7699_v61 = vrot.slane %v16918_v32, 5  ;;  %v7883_v32 = vmax.f32 %v16937_v7, 0.0  ;;  %v7884_v13 = vmax.f32 %v7706_v43, 0.0  ;;  %v7885_v9 = vmax.f32 %v7708_v44, 0.0  ;;  %v18292_v58 = vld [vmem:[#allocation32_spill] sm:$0xff]  ;;  %v18298_v44 = vld [vmem:[#allocation43_spill] sm:$0xff] }
 0x727   :  { %v7881_v5 = vmax.f32 %v7701_v62, 0.0  ;;  %v7882_v57 = vmax.f32 %v7703_v39, 0.0  ;;  %v7716_v7 = vrot.slane %v16955_v37, 6  ;;  %v7888_v14 = vmax.f32 %v7714_v52, 0.0  ;;  %v18294_v62 = vld [vmem:[#allocation41_spill] sm:$0xff] }
 0x728   :  { %9560 = vmatpush.bf16.msrb.mxu2 %v11808_v56  ;;  %9585 = vmatpush.bf16.msra.mxu0 %v11944_v40  ;;  %v7880_v21 = vmax.f32 %v7699_v61, 0.0  ;;  %v7886_v56 = vmax.f32 %v7710_v26, 0.0  ;;  %v7890_v2 = vmax.f32 %v7718_v3, 0.0  ;;  %v7891_v20 = vmax.f32 %v16970_v53, 0.0  ;;  %v18291_v53 = vld [vmem:[#allocation29_spill] sm:$0xff] }
 0x729   :  { %9547 = vmatpush.bf16.msrb.mxu1 %v11744_v23  ;;  %v7889_v40 = vmax.f32 %v7716_v7, 0.0  ;;  %v7892_v37 = vmax.f32 %v7721_v51, 0.0  ;;  %v7894_v19 = vmax.f32 %v7725_v30, 0.0  ;;  %v7727_v22 = vrot.slane %v16986_v10, 4 }
 0x72a   :  { %9572 = vmatpush.bf16.msrb.mxu3 %v11880_v45  ;;  %v7731_v0 = vrot.slane %v18288_v25, 6  ;;  %v7733_v28 = vrot.slane %v18289_v4, 7  ;;  %v7742_v61 = vrot.slane %v18293_v50, 4  ;;  %v7744_v39 = vrot.slane %v18294_v62, 5  ;;  %v18302_v4 = vld [vmem:[#allocation12_spill] sm:$0xff] }
 0x72b   :  { %v7895_v31 = vmax.f32 %v7727_v22, 0.0 }
 0x72c   :  { %9561 = vmatpush.bf16.msrb.mxu2 %v11800_v60  ;;  %9586 = vmatpush.bf16.msra.mxu0 %v11936_v17  ;;  %v17101_v48 = vld [vmem:[#allocation1] sm:$0xff]  ;;  %v17103_v55 = vld [vmem:[#allocation1 + $0x9] sm:$0xff]  ;;  %v7738_v17 = vrot.slane %v18291_v53, 2  ;;  %v17157_v51 = vmax.f32 %v7742_v61, 0.0 }
 0x72d   :  { %9548 = vmatpush.bf16.msrb.mxu1 %v11736_v11  ;;  %8038 = vst [vmem:[#allocation1] ss:$9 sm:$0xff] %v7877_v34  ;;  %v7723_v11 = vrot.slane %v16976_v41, 2  ;;  %v18287_v60 = vld [vmem:[#allocation25_spill] sm:$0xff]  ;;  %v7740_v34 = vrot.slane %v18292_v58, 3 }
 0x72e   :  { %9573 = vmatpush.bf16.msrb.mxu3 %v11872_v54  ;;  %v7729_v41 = vrot.slane %v18287_v60, 5  ;;  %v7736_v54 = vrot.slane %v18290_v12, 1  ;;  %v7901_v7 = vmax.f32 %v7738_v17, 0.0  ;;  %v18301_v60 = vld [vmem:[#allocation28_spill] sm:$0xff]  ;;  %v18305_v17 = vld [vmem:[#allocation15_spill] sm:$0xff]  ;;  %v18307_v61 = vld [vmem:[#allocation13_spill] sm:$0xff] }
 0x72f   :  { %v7893_v8 = vmax.f32 %v7723_v11, 0.0  ;;  %v17152_v3 = vmax.f32 %v7740_v34, 0.0  ;;  %v7753_v11 = vrot.slane %v17040_v35, 2  ;;  %v7772_v58 = vrot.slane %v18305_v17, 4 }
 0x730   :  { %v7776_v62 = vrot.slane %v18307_v61, 6 }
 0x734   :  { %v17110_v23 = vld [vmem:[#allocation1] sm:$0xff]  ;;  %v17112_v59 = vld [vmem:[#allocation1 + $0x9] sm:$0xff] }
 0x735   :  { %8041 = vst [vmem:[#allocation1] ss:$9 sm:$0xff] %v7878_v47  ;;  %v7896_v47 = vmax.f32 %v7729_v41, 0.0 }
 0x736   :  { %8042 = vst [vmem:[#allocation1 + $0x1] ss:$9 sm:$0xff] %v7879_v1  ;;  %v18295_v1 = vld [vmem:[#allocation36_spill] sm:$0xff] }
 0x737   :  { %8043 = vst [vmem:[#allocation1 + $0x2] ss:$9 sm:$0xff] %v7880_v21  ;;  %v7746_v10 = vrot.slane %v18295_v1, 6  ;;  %v18296_v21 = vld [vmem:[#allocation27_spill] sm:$0xff] }
 0x738   :  { %8044 = vst [vmem:[#allocation1 + $0x3] ss:$9 sm:$0xff] %v7881_v5  ;;  %v7748_v43 = vrot.slane %v18296_v21, 7  ;;  %v18297_v5 = vld [vmem:[#allocation42_spill] sm:$0xff] }
 0x739   :  { %8045 = vst [vmem:[#allocation1 + $0x4] ss:$9 sm:$0xff] %v7882_v57  ;;  %v8138_v57 = vpack.c.bf16 %v18298_v44, %v18297_v5  ;;  %v17163_v30 = vmax.f32 %v7746_v10, 0.0 }
 0x73a   :  { %8046 = vst [vmem:[#allocation1 + $0x5] ss:$9 sm:$0xff] %v7883_v32  ;;  %v7897_v32 = vmax.f32 %v7731_v0, 0.0  ;;  %v17182_v0 = vmax.f32 %v7753_v11, 0.0 }
 0x73b   :  { %8047 = vst [vmem:[#allocation1 + $0x6] ss:$9 sm:$0xff] %v7884_v13  ;;  %v7898_v13 = vmax.f32 %v7733_v28, 0.0  ;;  %v17173_v22 = vunpack.c.h.b16 %v8138_v57  ;;  %v18303_v28 = vld [vmem:[#allocation35_spill] sm:$0xff] }
 0x73c   :  { %8048 = vst [vmem:[#allocation1 + $0x7] ss:$9 sm:$0xff] %v7885_v9  ;;  %v18299_v9 = vld [vmem:[#allocation24_spill] sm:$0xff] }
 0x73d   :  { %v7899_v26 = vmax.f32 %v18299_v9, 0.0 }
 0x743   :  { %v17118_v36 = vld [vmem:[#allocation1] sm:$0xff]  ;;  %v17120_v15 = vld [vmem:[#allocation1 + $0x9] sm:$0xff] }
 0x744   :  { %8051 = vst [vmem:[#allocation1] ss:$9 sm:$0xff] %v7886_v56  ;;  %v7900_v56 = vmax.f32 %v7736_v54, 0.0  ;;  %v18304_v54 = vld [vmem:[#allocation37_spill] sm:$0xff] }
 0x745   :  { %v7770_v53 = vrot.slane %v18304_v54, 3 }
 0x74b   :  { %v17127_v45 = vld [vmem:[#allocation1] sm:$0xff]  ;;  %v17129_v18 = vld [vmem:[#allocation1 + $0x9] sm:$0xff] }
 0x74c   :  { %8054 = vst [vmem:[#allocation1] ss:$9 sm:$0xff] %v7887_v42  ;;  %v7751_v42 = vrot.slane %v17037_v27, 1  ;;  %v7759_v27 = vrot.slane %v17050_v29, 5  ;;  %v7766_v29 = vrot.slane %v18302_v4, 1 }
 0x74d   :  { %8055 = vst [vmem:[#allocation1 + $0x1] ss:$9 sm:$0xff] %v7888_v14  ;;  %v8140_v14 = vpack.c.bf16 %v17087_v38, %v17085_v6  ;;  %v7761_v6 = vrot.slane %v17053_v24, 6  ;;  %v18300_v38 = vld [vmem:[#allocation34_spill] sm:$0xff]  ;;  %v7768_v24 = vrot.slane %v18303_v28, 2  ;;  %v17222_v28 = vmax.f32 %v7776_v62, 0.0 }
 0x74e   :  { %8056 = vst [vmem:[#allocation1 + $0x2] ss:$9 sm:$0xff] %v7889_v40  ;;  %v17159_v40 = vmax.f32 %v7744_v39, 0.0  ;;  %v17176_v41 = vmax.f32 %v7751_v42, 0.0  ;;  %v18308_v39 = vld [vmem:[#allocation16_spill] sm:$0xff]  ;;  %v17199_v5 = vmax.f32 %v7759_v27, 0.0 }
 0x74f   :  { %8057 = vst [vmem:[#allocation1 + $0x3] ss:$9 sm:$0xff] %v7890_v2  ;;  %v7755_v2 = vrot.slane %v17043_v46, 3  ;;  %v17178_v46 = vunpack.c.l.b16 %v8140_v14  ;;  %v17180_v25 = vunpack.c.h.b16 %v8140_v14  ;;  %v7778_v1 = vrot.slane %v18308_v39, 7  ;;  %v18309_v14 = vld [vmem:[#allocation38_spill] sm:$0xff] }
 0x750   :  { %8058 = vst [vmem:[#allocation1 + $0x4] ss:$9 sm:$0xff] %v7891_v20  ;;  %v17165_v20 = vmax.f32 %v7748_v43, 0.0  ;;  %v8179_v43 = vpack.c.b16 %v17173_v22, %v17173_v22  ;;  %v17201_v44 = vmax.f32 %v7761_v6, 0.0  ;;  %v17214_v27 = vmax.f32 %v7770_v53, 0.0 }
 0x751   :  { %8059 = vst [vmem:[#allocation1 + $0x5] ss:$9 sm:$0xff] %v7892_v37  ;;  %v7757_v37 = vrot.slane %v17047_v16, 4  ;;  %v17184_v16 = vmax.f32 %v7755_v2, 0.0  ;;  %v8181_v9 = vpack.c.b16 %v17180_v25, %v17180_v25  ;;  %v17210_v2 = vmax.f32 %v7766_v29, 0.0 }
 0x752   :  { %8060 = vst [vmem:[#allocation1 + $0x6] ss:$9 sm:$0xff] %v7893_v8  ;;  %v17168_v8 = vunpack.c.l.b16 %v8138_v57  ;;  %v8180_v57 = vpack.c.b16 %v17178_v46, %v17178_v46  ;;  %v17216_v6 = vmax.f32 %v7772_v58, 0.0  ;;  %v8195_v29 = vrot.slane %v8179_v43, 1 }
 0x753   :  { %8061 = vst [vmem:[#allocation1 + $0x7] ss:$9 sm:$0xff] %v7894_v19  ;;  %v7763_v19 = vrot.slane %v18300_v38, 7  ;;  %v17188_v12 = vmax.f32 %v7757_v37, 0.0  ;;  %v17212_v37 = vmax.f32 %v7768_v24, 0.0  ;;  %v8197_v54 = vrot.slane %v8181_v9, 1 }
 0x754   :  { %v8178_v34 = vpack.c.b16 %v17168_v8, %v17168_v8  ;;  %18311 = vst [vmem:[#allocation25_spill] sm:$0xff] %v17222_v28  ;;  %v11445_v24 = vunpack.i.l.s16 %v17168_v8  ;;  %v8212_v53 = vrot.slane %v8180_v57, 2  ;;  %v8211_v58 = vrot.slane %v8179_v43, 2 }
 0x755   :  { %v17207_v42 = vmax.f32 %v7763_v19, 0.0  ;;  %v17224_v19 = vmax.f32 %v7778_v1, 0.0  ;;  %v11449_v62 = vunpack.i.l.s16 %v17178_v46  ;;  %v8213_v39 = vrot.slane %v8181_v9, 2 }
 0x756   :  { %v8210_v17 = vrot.slane %v8178_v34, 2  ;;  %v11450_v8 = vunpack.i.l.s16 %v17180_v25  ;;  %v8451_v1 = vunpack.c.l.b16 %v8195_v29  ;;  %v8461_v11 = vunpack.c.l.b16 %v8197_v54 }
 0x757   :  { %18312 = vst [vmem:[#allocation40_spill] sm:$0xff] %v17224_v19  ;;  %v8141_v46 = vpack.c.bf16 %v17096_v63, %v17094_v49  ;;  %v8453_v35 = vunpack.c.l.b16 %v8211_v58 }
 0x758   :  { %v8543_v25 = vrot.slane %v11450_v8, 7 }
 0x759   :  { %v8253_v8 = vunpack.c.h.b16 %v8141_v46 }
 0x75a   :  { %v17148_v33 = vld [vmem:[#allocation1] sm:$0xff]  ;;  %v17150_v52 = vld [vmem:[#allocation1 + $0x9] sm:$0xff] }
 0x75b   :  { %8064 = vst [vmem:[#allocation1] ss:$9 sm:$0xff] %v7895_v31  ;;  %v18306_v31 = vld [vmem:[#allocation39_spill] sm:$0xff] }
 0x75c   :  { %v7774_v50 = vrot.slane %v18306_v31, 5  ;;  %v18313_v31 = vld [vmem:[#allocation44_spill] sm:$0xff] }
 0x75e   :  { %v17220_v4 = vmax.f32 %v7774_v50, 0.0  ;;  %v18314_v50 = vld [vmem:[#allocation45_spill] sm:$0xff] }
 0x75f   :  { %v8139_v61 = vpack.c.bf16 %v18314_v50, %v18313_v31  ;;  %v8462_v31 = vunpack.c.l.b16 %v8212_v53  ;;  %v8452_v50 = vunpack.c.l.b16 %v8210_v17  ;;  %v8252_v53 = vunpack.c.l.b16 %v8141_v46 }
 0x760   :  { %18310 = vst [vmem:[#allocation17_spill] sm:$0xff] %v17220_v4 }
 0x761   :  { %v8251_v19 = vunpack.c.h.b16 %v8139_v61 }
 0x762   :  { %v8065_v10 = vld [vmem:[#allocation1] sm:$0xff]  ;;  %v8066_v21 = vld [vmem:[#allocation1 + $0x9] sm:$0xff] }
 0x763   :  { %8067 = vst [vmem:[#allocation1] ss:$9 sm:$0xff] %v7896_v47  ;;  %v8194_v47 = vrot.slane %v8178_v34, 1  ;;  %v17218_v38 = vpack.c.bf16 %v8066_v21, %v8065_v10  ;;  %v8227_v10 = vrot.slane %v8179_v43, 3 }
 0x764   :  { %8068 = vst [vmem:[#allocation1 + $0x1] ss:$9 sm:$0xff] %v7897_v32  ;;  %v8196_v32 = vrot.slane %v8180_v57, 1 }
 0x765   :  { %8069 = vst [vmem:[#allocation1 + $0x2] ss:$9 sm:$0xff] %v7898_v13  ;;  %v11446_v13 = vunpack.i.l.s16 %v17173_v22  ;;  %v8142_v22 = vpack.c.bf16 %v17103_v55, %v17101_v48  ;;  %v8455_v43 = vunpack.c.l.b16 %v8227_v10  ;;  %v8571_v48 = vrot.slane %v8461_v11, 7 }
 0x766   :  { %8070 = vst [vmem:[#allocation1 + $0x3] ss:$9 sm:$0xff] %v7899_v26  ;;  %v8450_v26 = vunpack.c.l.b16 %v8194_v47  ;;  %v8460_v21 = vunpack.c.l.b16 %v8196_v32  ;;  %v8250_v47 = vunpack.c.l.b16 %v8139_v61  ;;  %v8585_v55 = vrot.slane %v8462_v31, 7 }
 0x767   :  { %8071 = vst [vmem:[#allocation1 + $0x4] ss:$9 sm:$0xff] %v7900_v56  ;;  %v8226_v56 = vrot.slane %v8178_v34, 3  ;;  %v8528_v34 = vrot.slane %v11449_v62, 7  ;;  %v8166_v28 = vunpack.c.l.b16 %v8142_v22  ;;  %v8167_v32 = vunpack.c.h.b16 %v8142_v22 }
 0x768   :  { %8072 = vst [vmem:[#allocation1 + $0x5] ss:$9 sm:$0xff] %v7901_v7  ;;  %v8228_v7 = vrot.slane %v8180_v57, 3  ;;  %v8557_v4 = vrot.slane %v8460_v21, 7  ;;  %v8143_v61 = vpack.c.bf16 %v17112_v59, %v17110_v23  ;;  %v17247_v62 = vunpack.i.l.s16 %v8251_v19 }
 0x769   :  { %8073 = vst [vmem:[#allocation1 + $0x6] ss:$9 sm:$0xff] %v17152_v3  ;;  %v8229_v3 = vrot.slane %v8181_v9, 3  ;;  %v8454_v29 = vunpack.c.l.b16 %v8226_v56  ;;  %v11447_v9 = vunpack.i.l.s16 %v8250_v47  ;;  %v17243_v63 = vsel %vm18315_vm8, %v8528_v34, %v11445_v24  ;;  %vm18328_vm8 = vmmov %vm18327_vm11 }
 0x76a   :  { %8074 = vst [vmem:[#allocation1 + $0x7] ss:$9 sm:$0xff] %v17157_v51  ;;  %v8463_v51 = vunpack.c.l.b16 %v8213_v39  ;;  %v8464_v57 = vunpack.c.l.b16 %v8228_v7  ;;  %v17251_v11 = vsel %vm18316_vm7, %v8543_v25, %v11446_v13  ;;  %v8145_v56 = vpack.c.bf16 %v17129_v18, %v17127_v45 }
 0x76b   :  { %v8465_v54 = vunpack.c.l.b16 %v8229_v3  ;;  %v17255_v7 = vpack.c.b16 %v8166_v28, %v8166_v28  ;;  %v17258_v24 = vsel %vm18317_vm3, %v8557_v4, %v8450_v26  ;;  %v17261_v10 = vsel %vm18266_vm0, %v8571_v48, %v8451_v1  ;;  %vm18331_vm0 = vmmov %vm18326_vm9 }
 0x76c   :  { %v8599_v58 = vrot.slane %v8463_v51, 7  ;;  %v8613_v39 = vrot.slane %v8464_v57, 7  ;;  %v17264_v23 = vsel %vm18318_vm12, %v8585_v55, %v8452_v50  ;;  %v11453_v59 = vunpack.i.l.s16 %v8166_v28  ;;  %vm18332_vm12 = vmmov %vm18331_vm0 }
 0x76d   :  { %v8627_v19 = vrot.slane %v8465_v54, 7  ;;  %v11451_v13 = vunpack.i.l.s16 %v8252_v53  ;;  %v11454_v22 = vunpack.i.l.s16 %v8167_v32  ;;  %v8254_v18 = vunpack.c.l.b16 %v8143_v61 }
 0x76e   :  { %v17269_v45 = vsel %vm18319_vm6, %v8599_v58, %v8453_v35  ;;  %v8255_v21 = vunpack.c.h.b16 %v8143_v61  ;;  %v17272_v4 = vsel %vm18320_vm13, %v8613_v39, %v8454_v29  ;;  %v8256_v26 = vunpack.c.l.b16 %v8145_v56  ;;  %vm18333_vm6 = vmmov %vm18331_vm0 }
 0x76f   :  { %v8257_v1 = vunpack.c.h.b16 %v8145_v56  ;;  %v11452_v31 = vunpack.i.l.s16 %v8253_v8  ;;  %v8144_v50 = vpack.c.bf16 %v17120_v15, %v17118_v36  ;;  %v8198_v28 = vrot.slane %v17255_v7, 1  ;;  %vm18334_vm13 = vmmov %vm18331_vm0 }
 0x770   :  { %v8258_v3 = vunpack.c.l.b16 %v17218_v38  ;;  %v8259_v46 = vunpack.c.h.b16 %v17218_v38  ;;  %v17279_v47 = vrot.slane %v11453_v59, 6  ;;  %v17283_v34 = vsel %vm18321_vm10, %v8627_v19, %v8455_v43  ;;  %vm18335_vm10 = vmmov %vm18331_vm0 }
 0x771   :  { %v17238_v17 = vld [vmem:[#allocation1] sm:$0xff]  ;;  %v17240_v49 = vld [vmem:[#allocation1 + $0x9] sm:$0xff]  ;;  %v8641_v51 = vrot.slane %v11451_v13, 7  ;;  %v8545_v57 = vrot.slane %v11454_v22, 6  ;;  %v8214_v48 = vrot.slane %v17255_v7, 2  ;;  %v11455_v36 = vunpack.i.l.s16 %v8254_v18 }
 0x772   :  { %8077 = vst [vmem:[#allocation1] ss:$9 sm:$0xff] %v17159_v40  ;;  %v17266_v40 = vpack.c.b16 %v8167_v32, %v8167_v32  ;;  %v11456_v15 = vunpack.i.l.s16 %v8255_v21  ;;  %v11459_v38 = vunpack.i.l.s16 %v8256_v26  ;;  %v11460_v32 = vunpack.i.l.s16 %v8257_v1 }
 0x773   :  { %v8655_v54 = vrot.slane %v11452_v31, 7  ;;  %v17289_v53 = vunpack.c.l.b16 %v8144_v50  ;;  %v8470_v43 = vunpack.c.l.b16 %v8198_v28  ;;  %v11463_v58 = vunpack.i.l.s16 %v8258_v3 }
 0x774   :  { %v8199_v35 = vrot.slane %v17266_v40, 1  ;;  %v8215_v55 = vrot.slane %v17266_v40, 2  ;;  %v11464_v61 = vunpack.i.l.s16 %v8259_v46  ;;  %v18322_v39 = vmax.f32 %v18301_v60, 0.0 }
 0x775   :  { %v8230_v8 = vrot.slane %v17255_v7, 3  ;;  %v8642_v59 = vsel %vm18323_vm14, %v8641_v51, %v11447_v9  ;;  %v8169_v19 = vunpack.c.h.b16 %v8144_v50  ;;  %v8472_v13 = vunpack.c.l.b16 %v8214_v48  ;;  %vm18336_vm14 = vmmov %vm18331_vm0 }
 0x776   :  { %v17293_v56 = vunpack.c.l.b16 %v8199_v35  ;;  %v8657_v22 = vrot.slane %v11456_v15, 6  ;;  %v8645_v21 = vrot.slane %v11459_v38, 5  ;;  %v8659_v60 = vrot.slane %v11460_v32, 5 }
 0x777   :  { %v17302_v7 = vpack.c.b16 %v17289_v53, %v17289_v53  ;;  %v8473_v1 = vunpack.c.l.b16 %v8215_v55  ;;  %v8647_v9 = vrot.slane %v11463_v58, 4  ;;  %v8661_v31 = vrot.slane %v11464_v61, 4 }
 0x778   :  { %v8185_v3 = vpack.c.b16 %v8169_v19, %v8169_v19  ;;  %vm18329_vm7 = vcmask 1045509   ;;  %v8531_v32 = vsel %vm18331_vm0, %v17279_v47, %v17243_v63  ;;  %v11458_v58 = vunpack.i.l.s16 %v8169_v19 }
 0x779   :  { %v8078_v25 = vld [vmem:[#allocation1] sm:$0xff]  ;;  %v8079_v29 = vld [vmem:[#allocation1 + $0x9] sm:$0xff]  ;;  %v8200_v48 = vrot.slane %v17302_v7, 1  ;;  %vm18330_vm3 = vmmov %vm18329_vm7 }
 0x77a   :  { %8080 = vst [vmem:[#allocation1] ss:$9 sm:$0xff] %v17163_v30  ;;  %v8149_v30 = vpack.c.bf16 %v8079_v29, %v8078_v25  ;;  %v8233_v19 = vrot.slane %v8185_v3, 3 }
 0x77b   :  { %8081 = vst [vmem:[#allocation1 + $0x1] ss:$9 sm:$0xff] %v17165_v20  ;;  %v8643_v20 = vrot.slane %v11455_v36, 6  ;;  %v8474_v36 = vunpack.c.l.b16 %v8230_v8 }
 0x77c   :  { %8082 = vst [vmem:[#allocation1 + $0x2] ss:$9 sm:$0xff] %v18322_v39  ;;  %v8260_v18 = vunpack.c.l.b16 %v8149_v30  ;;  %v8261_v26 = vunpack.c.h.b16 %v8149_v30  ;;  %v8601_v39 = vrot.slane %v8473_v1, 6  ;;  %v8480_v30 = vunpack.c.l.b16 %v8200_v48 }
 0x77d   :  { %8083 = vst [vmem:[#allocation1 + $0x3] ss:$9 sm:$0xff] %v17176_v41  ;;  %v8231_v41 = vrot.slane %v17266_v40, 3  ;;  %v8644_v46 = vsel %vm18325_vm15, %v8643_v20, %v8642_v59  ;;  %v8146_v40 = vpack.c.bf16 %v17150_v52, %v17148_v33  ;;  %v8546_v33 = vsel %vm18332_vm12, %v8545_v57, %v17251_v11  ;;  %vm18338_vm15 = vmmov %vm18331_vm0 }
 0x77e   :  { %8084 = vst [vmem:[#allocation1 + $0x4] ss:$9 sm:$0xff] %v17182_v0  ;;  %v11467_v50 = vunpack.i.l.s16 %v8260_v18  ;;  %v11468_v28 = vunpack.i.l.s16 %v8261_v26  ;;  %v8656_v0 = vsel %vm18324_vm2, %v8655_v54, %v17247_v62  ;;  %v8646_v51 = vsel %vm2647_vm4, %v8645_v21, %v8644_v46  ;;  %vm18337_vm2 = vmmov %vm18331_vm0 }
 0x77f   :  { %8085 = vst [vmem:[#allocation1 + $0x5] ss:$9 sm:$0xff] %v17184_v16  ;;  %v8559_v16 = vrot.slane %v8470_v43, 6  ;;  %v8658_v35 = vsel %vm18326_vm9, %v8657_v22, %v8656_v0  ;;  %v8648_v62 = vsel %vm18327_vm11, %v8647_v9, %v8646_v51  ;;  %v8475_v15 = vunpack.c.l.b16 %v8231_v41  ;;  %vm18340_vm9 = vmmov %vm18328_vm8 }
 0x780   :  { %8086 = vst [vmem:[#allocation1 + $0x6] ss:$9 sm:$0xff] %v17188_v12  ;;  %v8649_v25 = vrot.slane %v11467_v50, 3  ;;  %v8660_v12 = vsel %vm2647_vm4, %v8659_v60, %v8658_v35  ;;  %v8663_v29 = vrot.slane %v11468_v28, 3  ;;  %v8573_v52 = vrot.slane %v17293_v56, 6  ;;  %vm18343_vm11 = vmmov %vm18328_vm8 }
 0x781   :  { %8087 = vst [vmem:[#allocation1 + $0x7] ss:$9 sm:$0xff] %v17199_v5  ;;  %v8662_v5 = vsel %vm18328_vm8, %v8661_v31, %v8660_v12  ;;  %v8587_v54 = vrot.slane %v8472_v13, 6  ;;  %v11457_v43 = vunpack.i.l.s16 %v17289_v53  ;;  %v8560_v61 = vsel %vm18333_vm6, %v8559_v16, %v17258_v24  ;;  %v11927_v50 = vld [vmem:[#allocation4 + $0x380] sm:$0xf] }
 0x782   :  { %v17319_v55 = vsel %vm18329_vm7, %v8649_v25, %v8648_v62  ;;  %v17322_v38 = vsel %vm18330_vm3, %v8663_v29, %v8662_v5  ;;  %v8170_v8 = vunpack.c.l.b16 %v8146_v40  ;;  %v8201_v59 = vrot.slane %v8185_v3, 1  ;;  %vm18344_vm7 = vmmov %vm18328_vm8 }
 0x783   :  { %v8216_v20 = vrot.slane %v17302_v7, 2  ;;  %v8171_v47 = vunpack.c.h.b16 %v8146_v40  ;;  %v8217_v18 = vrot.slane %v8185_v3, 2  ;;  %v8615_v11 = vrot.slane %v8474_v36, 6  ;;  %v12719_v3 = vld [vmem:[#allocation4 + $0x384] sm:$0xf0]  ;;  %vm18345_vm3 = vmmov %vm18344_vm7 }
 0x784   :  { %v8629_v57 = vrot.slane %v8475_v15, 6  ;;  %v8148_v53 = vpack.c.bf16 %v17240_v49, %v17238_v17  ;;  %v8574_v24 = vsel %vm18334_vm13, %v8573_v52, %v17261_v10  ;;  %v8232_v56 = vrot.slane %v17302_v7, 3  ;;  %v11863_v17 = vld [vmem:[#allocation4 + $0x300] sm:$0xf]  ;;  %v12703_v49 = vld [vmem:[#allocation4 + $0x304] sm:$0xf0]  ;;  %vm18346_vm0 = vmmov %vm18345_vm3 }
 0x785   :  { %v8532_v13 = vrot.slane %v11457_v43, 5  ;;  %v8547_v21 = vrot.slane %v11458_v58, 5  ;;  %v8588_v26 = vsel %vm18335_vm10, %v8587_v54, %v17264_v23  ;;  %v8602_v60 = vsel %vm18336_vm14, %v8601_v39, %v17269_v45  ;;  %vm18347_vm12 = vmmov %vm18346_vm0 }
 0x786   :  { %v8186_v1 = vpack.c.b16 %v8170_v8, %v8170_v8  ;;  %v8561_v9 = vrot.slane %v8480_v30, 5  ;;  %v8482_v31 = vunpack.c.l.b16 %v8216_v20  ;;  %v8187_v41 = vpack.c.b16 %v8171_v47, %v8171_v47 }
 0x787   :  { %v8483_v10 = vunpack.c.l.b16 %v8217_v18  ;;  %v8616_v7 = vsel %vm18337_vm2, %v8615_v11, %v17272_v4  ;;  %v8630_v28 = vsel %vm18338_vm15, %v8629_v57, %v17283_v34  ;;  %v17348_v0 = vunpack.c.l.b16 %v8148_v53 }
 0x788   :  { %v8088_v22 = vld [vmem:[#allocation1] sm:$0xff]  ;;  %v8089_v63 = vld [vmem:[#allocation1 + $0x9] sm:$0xff]  ;;  %v11461_v23 = vunpack.i.l.s16 %v8170_v8  ;;  %v8484_v45 = vunpack.c.l.b16 %v8232_v56  ;;  %v8485_v16 = vunpack.c.l.b16 %v8233_v19  ;;  %v8533_v46 = vsel %vm2647_vm4, %v8532_v13, %v8531_v32 }
 0x789   :  { %8090 = vst [vmem:[#allocation1] ss:$9 sm:$0xff] %v17201_v44  ;;  %v8481_v44 = vunpack.c.l.b16 %v8201_v59  ;;  %v17351_v35 = vunpack.c.h.b16 %v8148_v53  ;;  %v11864_v51 = vor.u32 %v12703_v49, %v11863_v17  ;;  %v11928_v25 = vor.u32 %v12719_v3, %v11927_v50  ;;  %v18341_v19 = vld [vmem:[#allocation17_spill] sm:$0xff] }
 0x78a   :  { %v8548_v12 = vsel %vm2647_vm4, %v8547_v21, %v8546_v33  ;;  %v8202_v29 = vrot.slane %v8186_v1, 1  ;;  %v8589_v4 = vrot.slane %v8482_v31, 5  ;;  %v11462_v62 = vunpack.i.l.s16 %v8171_v47 }
 0x78b   :  { %v8575_v40 = vrot.slane %v8481_v44, 5  ;;  %9574 = vmatpush.bf16.msrb.mxu3 %v11864_v51  ;;  %9587 = vmatpush.bf16.msra.mxu0 %v11928_v25  ;;  %v8562_v5 = vsel %vm2647_vm4, %v8561_v9, %v8560_v61  ;;  %v8203_v36 = vrot.slane %v8187_v41, 1  ;;  %v8603_v15 = vrot.slane %v8483_v10, 5 }
 0x78c   :  { %v8188_v32 = vpack.c.b16 %v17348_v0, %v17348_v0  ;;  %v8534_v33 = vrot.slane %v11461_v23, 4  ;;  %v8617_v52 = vrot.slane %v8484_v45, 5  ;;  %v8631_v54 = vrot.slane %v8485_v16, 5 }
 0x78d   :  { %v18339_v43 = vmax.f32 %v18309_v14, 0.0  ;;  %v17366_v58 = vpack.c.b16 %v17351_v35, %v17351_v35  ;;  %v8218_v39 = vrot.slane %v8186_v1, 2  ;;  %v8219_v8 = vrot.slane %v8187_v41, 2 }
 0x78e   :  { %v8234_v61 = vrot.slane %v8186_v1, 3  ;;  %v8150_v30 = vpack.c.bf16 %v8089_v63, %v8088_v22  ;;  %v8576_v59 = vsel %vm2647_vm4, %v8575_v40, %v8574_v24  ;;  %v8235_v20 = vrot.slane %v8187_v41, 3 }
 0x78f   :  { %v8549_v47 = vrot.slane %v11462_v62, 4  ;;  %v8491_v18 = vunpack.c.l.b16 %v8203_v36  ;;  %v8590_v14 = vsel %vm2647_vm4, %v8589_v4, %v8588_v26  ;;  %v8604_v11 = vsel %vm2647_vm4, %v8603_v15, %v8602_v60  ;;  %v18342_v60 = vld [vmem:[#allocation25_spill] sm:$0xff]  ;;  %v17403_v4 = vld [vmem:[#allocation4 + $0x470] sm:$0xf] }
 0x790   :  { %v17354_v48 = vld [vmem:[#allocation1] sm:$0xff]  ;;  %v17356_v34 = vld [vmem:[#allocation1 + $0x9] sm:$0xff]  ;;  %v8535_v57 = vsel %vm18340_vm9, %v8534_v33, %v8533_v46  ;;  %v8204_v53 = vrot.slane %v8188_v32, 1  ;;  %v17377_v22 = vsel %vm2647_vm4, %v8631_v54, %v8630_v28  ;;  %v8492_v63 = vunpack.c.l.b16 %v8218_v39 }
 0x791   :  { %8093 = vst [vmem:[#allocation1] ss:$9 sm:$0xff] %v17207_v42  ;;  %v8490_v42 = vunpack.c.l.b16 %v8202_v29  ;;  %v8493_v24 = vunpack.c.l.b16 %v8219_v8  ;;  %v8494_v56 = vunpack.c.l.b16 %v8234_v61  ;;  %v8174_v13 = vunpack.c.l.b16 %v8150_v30 }
 0x792   :  { %8094 = vst [vmem:[#allocation1 + $0x1] ss:$9 sm:$0xff] %v18339_v43  ;;  %v8175_v21 = vunpack.c.h.b16 %v8150_v30  ;;  %v17382_v26 = vunpack.c.l.b16 %v8235_v20  ;;  %v11465_v1 = vunpack.i.l.s16 %v17348_v0  ;;  %v11466_v9 = vunpack.i.l.s16 %v17351_v35  ;;  %v17414_v43 = vld [vmem:[#allocation4 + $0x474] sm:$0xf0]  ;;  %v18349_v30 = vld [vmem:[#allocation40_spill] sm:$0xff] }
 0x793   :  { %8095 = vst [vmem:[#allocation1 + $0x2] ss:$9 sm:$0xff] %v17210_v2  ;;  %v8618_v2 = vsel %vm2647_vm4, %v8617_v52, %v8616_v7  ;;  %v8577_v44 = vrot.slane %v8491_v18, 4  ;;  %v8500_v31 = vunpack.c.l.b16 %v8204_v53  ;;  %v8220_v41 = vrot.slane %v8188_v32, 2  ;;  %v12111_v20 = vld [vmem:[#allocation4 + $0x4f0] sm:$0xf] }
 0x794   :  { %8096 = vst [vmem:[#allocation1 + $0x3] ss:$9 sm:$0xff] %v17212_v37  ;;  %v8205_v37 = vrot.slane %v17366_v58, 1  ;;  %v8221_v17 = vrot.slane %v17366_v58, 2  ;;  %v8236_v49 = vrot.slane %v8188_v32, 3  ;;  %v8591_v10 = vrot.slane %v8492_v63, 4 }
 0x795   :  { %8097 = vst [vmem:[#allocation1 + $0x4] ss:$9 sm:$0xff] %v17214_v27  ;;  %v8563_v27 = vrot.slane %v8490_v42, 4  ;;  %v8605_v7 = vrot.slane %v8493_v24, 4  ;;  %v8619_v28 = vrot.slane %v8494_v56, 4  ;;  %v17389_v23 = vpack.c.b16 %v8174_v13, %v8174_v13 }
 0x796   :  { %8098 = vst [vmem:[#allocation1 + $0x5] ss:$9 sm:$0xff] %v17216_v6  ;;  %v8550_v6 = vsel %vm18343_vm11, %v8549_v47, %v8548_v12  ;;  %v8501_v50 = vunpack.c.l.b16 %v8205_v37  ;;  %v17391_v3 = vpack.c.b16 %v8175_v21, %v8175_v21  ;;  %v8633_v45 = vrot.slane %v17382_v26, 4  ;;  %v12765_v37 = vld [vmem:[#allocation4 + $0x4f4] sm:$0xf0] }
 0x797   :  { %8099 = vst [vmem:[#allocation1 + $0x6] ss:$9 sm:$0xff] %v18341_v19  ;;  %v8564_v0 = vsel %vm18328_vm8, %v8563_v27, %v8562_v5  ;;  %v8536_v16 = vrot.slane %v11465_v1, 3  ;;  %v8551_v46 = vrot.slane %v11466_v9, 3  ;;  %v8578_v35 = vsel %vm18344_vm7, %v8577_v44, %v8576_v59  ;;  %v17430_v24 = vld [vmem:[#allocation4 + $0x460] sm:$0xf] }
 0x798   :  { %8100 = vst [vmem:[#allocation1 + $0x7] ss:$9 sm:$0xff] %v18342_v60  ;;  %v8237_v51 = vrot.slane %v17366_v58, 3  ;;  %v8565_v25 = vrot.slane %v8500_v31, 3  ;;  %v17397_v12 = vunpack.c.l.b16 %v8220_v41  ;;  %v17399_v29 = vunpack.c.l.b16 %v8221_v17  ;;  %v17432_v56 = vld [vmem:[#allocation4 + $0x464] sm:$0xf0] }
 0x799   :  { %v17401_v40 = vunpack.c.l.b16 %v8236_v49  ;;  %v8579_v62 = vrot.slane %v8501_v50, 3  ;;  %v17406_v5 = vsel %vm18345_vm3, %v8591_v10, %v8590_v14  ;;  %v17409_v36 = vsel %vm18346_vm0, %v8605_v7, %v8604_v11  ;;  %v17438_v44 = vld [vmem:[#allocation4 + $0x4e0] sm:$0xf]  ;;  %v17442_v17 = vld [vmem:[#allocation4 + $0x4e4] sm:$0xf0]  ;;  %vm18358_vm3 = vmmov %vm18346_vm0 }
 0x79a   :  { %v17412_v15 = vsel %vm18347_vm12, %v8619_v28, %v8618_v2  ;;  %v11469_v52 = vunpack.i.l.s16 %v8174_v13  ;;  %vm8541_vm6 = vcmask 1047559   ;;  %v11470_v54 = vunpack.i.l.s16 %v8175_v21  ;;  %v17444_v49 = vld [vmem:[#allocation4 + $0x74] sm:$0xf] }
 0x79b   :  { %v8206_v58 = vrot.slane %v17389_v23, 1  ;;  %v8207_v39 = vrot.slane %v17391_v3, 1  ;;  %vm18348_vm13 = vcmask 1045509   ;;  %v17421_v59 = vunpack.c.l.b16 %v8237_v51 }
 0x79c   :  { %v8537_v61 = vsel %vm18348_vm13, %v8536_v16, %v8535_v57  ;;  %vm18350_vm10 = vmmov %vm18348_vm13  ;;  %v8593_v18 = vrot.slane %v17397_v12, 3  ;;  %v8607_v14 = vrot.slane %v17399_v29, 3  ;;  %v8621_v11 = vrot.slane %v17401_v40, 3  ;;  %v12632_v12 = vld [vmem:[#allocation4 + $0xd4] sm:$0xf] }
 0x79d   :  { %v8552_v42 = vsel %vm18350_vm10, %v8551_v46, %v8550_v6  ;;  %vm18351_vm14 = vmmov %vm18350_vm10  ;;  %v12048_v57 = vor.u32 %v17414_v43, %v17403_v4  ;;  %v8538_v19 = vrot.slane %v11469_v52, 2  ;;  %v8553_v13 = vrot.slane %v11470_v54, 2  ;;  %v17450_v46 = vld [vmem:[#allocation4 + $0x78] sm:$0xf0]  ;;  %v12636_v54 = vld [vmem:[#allocation4 + $0xf4] sm:$0xf] }
 0x79e   :  { %v8566_v47 = vsel %vm18351_vm14, %v8565_v25, %v8564_v0  ;;  %vm18352_vm2 = vmmov %vm18350_vm10  ;;  %v8510_v21 = vunpack.c.l.b16 %v8206_v58  ;;  %v8511_v27 = vunpack.c.l.b16 %v8207_v39  ;;  %v12112_v31 = vor.u32 %v12765_v37, %v12111_v20  ;;  %v11601_v43 = vld [vmem:[#allocation4 + $0xf8] sm:$0xf0]  ;;  %v17464_v20 = vld [vmem:[#allocation4 + $0x450] sm:$0xf] }
 0x79f   :  { %v8101_v32 = vld [vmem:[#allocation1] sm:$0xff]  ;;  %v8102_v33 = vld [vmem:[#allocation1 + $0x9] sm:$0xff]  ;;  %v8580_v63 = vsel %vm18352_vm2, %v8579_v62, %v8578_v35  ;;  %v12040_v41 = vor.u32 %v17432_v56, %v17430_v24  ;;  %v8222_v50 = vrot.slane %v17389_v23, 2  ;;  %v8223_v10 = vrot.slane %v17391_v3, 2  ;;  %vm18357_vm7 = vmmov %vm18352_vm2 }
 0x7a0   :  { %v8152_v8 = vpack.c.bf16 %v8102_v33, %v8101_v32  ;;  %8103 = vst [vmem:[#allocation1] ss:$9 sm:$0xff] %v18349_v30  ;;  %vm18353_vm15 = vcmask 1046534   ;;  %v8567_v25 = vrot.slane %v8510_v21, 2  ;;  %v8581_v4 = vrot.slane %v8511_v27, 2  ;;  %vm18359_vm0 = vmmov %vm18352_vm2 }
 0x7a1   :  { %v8539_v35 = vsel %vm18353_vm15, %v8538_v19, %v8537_v61  ;;  %vm18354_vm9 = vmmov %vm18353_vm15  ;;  %v11540_v61 = vor.u32 %v17444_v49, %v17450_v46  ;;  %v12745_v21 = vld [vmem:[#allocation4 + $0x454] sm:$0xf0]  ;;  %v12095_v27 = vld [vmem:[#allocation4 + $0x4d0] sm:$0xf]  ;;  %v8608_v56 = vsel %vm18359_vm0, %v8607_v14, %v17409_v36  ;;  %v8151_v29 = vpack.c.bf16 %v17356_v34, %v17354_v48 }
 0x7a2   :  { %v8176_v53 = vunpack.c.l.b16 %v8152_v8  ;;  %v8177_v2 = vunpack.c.h.b16 %v8152_v8  ;;  %v8554_v51 = vsel %vm18354_vm9, %v8553_v13, %v8552_v42  ;;  %v12104_v8 = vor.u32 %v17442_v17, %v17438_v44  ;;  %vm18355_vm11 = vmmov %vm18354_vm9  ;;  %v12618_v49 = vld [vmem:[#allocation4 + $0x64] sm:$0xf]  ;;  %v11593_v46 = vld [vmem:[#allocation4 + $0xe8] sm:$0xf0] }
 0x7a3   :  { %v8568_v37 = vsel %vm18355_vm11, %v8567_v25, %v8566_v47  ;;  %vm18356_vm8 = vmmov %vm18354_vm9  ;;  %v11604_v13 = vor.u32 %v12636_v54, %v11601_v43  ;;  %v8238_v47 = vrot.slane %v17389_v23, 3  ;;  %v8635_v25 = vrot.slane %v17421_v59, 3  ;;  %v11521_v54 = vld [vmem:[#allocation4 + $0x58] sm:$0xf0] }
 0x7a4   :  { %v17434_v60 = vpack.c.b16 %v8176_v53, %v8176_v53  ;;  %v11473_v1 = vunpack.i.l.s16 %v8176_v53  ;;  %v17436_v9 = vpack.c.b16 %v8177_v2, %v8177_v2  ;;  %v11474_v6 = vunpack.i.l.s16 %v8177_v2  ;;  %vm18360_vm12 = vmmov %vm18359_vm0 }
 0x7a5   :  { %v8582_v19 = vsel %vm18356_vm8, %v8581_v4, %v8580_v63  ;;  %v12032_v23 = vor.u32 %v12745_v21, %v17464_v20  ;;  %v12743_v4 = vld [vmem:[#allocation4 + $0x444] sm:$0xf0]  ;;  %v8514_v43 = vunpack.c.l.b16 %v8238_v47  ;;  %vm18361_vm13 = vmmov %vm18359_vm0 }
 0x7a6   :  { %v8540_v7 = vrot.slane %v11473_v1, 1  ;;  %v8555_v28 = vrot.slane %v11474_v6, 1  ;;  %v8208_v0 = vrot.slane %v17434_v60, 1  ;;  %v8209_v16 = vrot.slane %v17436_v9, 1  ;;  %v12761_v1 = vld [vmem:[#allocation4 + $0x4d4] sm:$0xf0]  ;;  %vm18362_vm10 = vmmov %vm18356_vm8 }
 0x7a7   :  { %v8224_v53 = vrot.slane %v17434_v60, 2  ;;  %v8225_v2 = vrot.slane %v17436_v9, 2  ;;  %v17472_v6 = vunpack.c.l.b16 %v8222_v50  ;;  %v8240_v50 = vrot.slane %v17434_v60, 3  ;;  %vm18363_vm14 = vmmov %vm18356_vm8 }
 0x7a8   :  { %v8542_v62 = vsel %vm8541_vm6, %v8540_v7, %v8539_v35  ;;  %v8556_v32 = vsel %vm8541_vm6, %v8555_v28, %v8554_v51  ;;  %v8520_v33 = vunpack.c.l.b16 %v8208_v0  ;;  %v8521_v52 = vunpack.c.l.b16 %v8209_v16  ;;  %v11529_v7 = vld [vmem:[#allocation4 + $0x68] sm:$0xf0]  ;;  %v12634_v16 = vld [vmem:[#allocation4 + $0xe4] sm:$0xf]  ;;  %vm18364_vm2 = vmmov %vm18356_vm8 }
 0x7a9   :  { %v17456_v58 = vpack.c.b16 %v8542_v62, %v8542_v62  ;;  %v17458_v39 = vpack.c.b16 %v8556_v32, %v8556_v32  ;;  %v17476_v28 = vunpack.c.l.b16 %v8223_v10  ;;  %v8523_v35 = vunpack.c.l.b16 %v8225_v2  ;;  %v12023_v10 = vld [vmem:[#allocation4 + $0x440] sm:$0xf]  ;;  %vm18365_vm15 = vmmov %vm18364_vm2 }
 0x7aa   :  { %v8569_v30 = vrot.slane %v8520_v33, 1  ;;  %v8583_v42 = vrot.slane %v8521_v52, 1  ;;  %v8241_v51 = vrot.slane %v17436_v9, 3  ;;  %v12087_v62 = vld [vmem:[#allocation4 + $0x4c0] sm:$0xf]  ;;  %v8634_v60 = vsel %vm18358_vm3, %v8633_v45, %v17377_v22  ;;  %vm18366_vm9 = vmmov %vm18364_vm2 }
 0x7ab   :  { %9497 = vmatmul.bf16.vlgmr.msra.gmra.mxu1 %v17456_v58  ;;  %9510 = vmatmul.bf16.vlgmr.msra.gmra.mxu2 %v17458_v39  ;;  %v12096_v59 = vor.u32 %v12761_v1, %v12095_v27  ;;  %v11532_v9 = vor.u32 %v12618_v49, %v11529_v7  ;;  %v11596_v32 = vor.u32 %v12634_v16, %v11593_v46  ;;  %v12759_v33 = vld [vmem:[#allocation4 + $0x4c4] sm:$0xf0]  ;;  %v12616_v52 = vld [vmem:[#allocation4 + $0x54] sm:$0xf]  ;;  %v8595_v26 = vrot.slane %v17472_v6, 2  ;;  %vm18367_vm11 = vmmov %vm18364_vm2 }
 0x7ac   :  { %9593 = vmatpush.bf16.msra.mxu1 %v12048_v57  ;;  %9606 = vmatpush.bf16.msra.mxu2 %v12112_v31  ;;  %v8570_v44 = vsel %vm8541_vm6, %v8569_v30, %v8568_v37  ;;  %v8584_v17 = vsel %vm8541_vm6, %v8583_v42, %v8582_v19  ;;  %v8239_v57 = vrot.slane %v17391_v3, 3  ;;  %v8522_v31 = vunpack.c.l.b16 %v8224_v53  ;;  %v12741_v30 = vld [vmem:[#allocation4 + $0x434] sm:$0xf0]  ;;  %v12079_v42 = vld [vmem:[#allocation4 + $0x4b0] sm:$0xf] }
 0x7ad   :  { %v17479_v0 = vpack.c.b16 %v8570_v44, %v8570_v44  ;;  %v17481_v63 = vpack.c.b16 %v8584_v17, %v8584_v17  ;;  %v8594_v3 = vsel %vm18357_vm7, %v8593_v18, %v17406_v5  ;;  %v11585_v5 = vld [vmem:[#allocation4 + $0xd8] sm:$0xf0]  ;;  %v8609_v22 = vrot.slane %v17476_v28, 2  ;;  %v12757_v53 = vld [vmem:[#allocation4 + $0x4b4] sm:$0xf0] }
 0x7ae   :  { %v8524_v45 = vunpack.c.l.b16 %v8240_v50  ;;  %v8515_v18 = vunpack.c.l.b16 %v8239_v57  ;;  %v8597_v24 = vrot.slane %v8522_v31, 1  ;;  %v12024_v20 = vor.u32 %v12743_v4, %v12023_v10  ;;  %v8104_v19 = vld [vmem:[#allocation1] sm:$0xff]  ;;  %v12614_v27 = vld [vmem:[#allocation4 + $0x44] sm:$0xf]  ;;  %v11513_v1 = vld [vmem:[#allocation4 + $0x48] sm:$0xf0] }
 0x7af   :  { %9523 = vmatmul.bf16.vlgmr.msra.gmra.mxu3 %v17479_v0  ;;  %9536 = vmatmul.bf16.vlgmr.msrb.gmra.mxu0 %v17481_v63  ;;  %v8622_v2 = vsel %vm18360_vm12, %v8621_v11, %v17412_v15  ;;  %v8636_v37 = vsel %vm18361_vm13, %v8635_v25, %v8634_v60  ;;  %v12088_v36 = vor.u32 %v12759_v33, %v12087_v62  ;;  %v8623_v6 = vrot.slane %v8514_v43, 2  ;;  %v12630_v11 = vld [vmem:[#allocation4 + $0xc4] sm:$0xf]  ;;  %v11577_v44 = vld [vmem:[#allocation4 + $0xc8] sm:$0xf0]  ;;  %vm18378_vm12 = vmmov %vm18364_vm2 }
 0x7b0   :  { %9594 = vmatpush.bf16.msra.mxu1 %v12040_v41  ;;  %9607 = vmatpush.bf16.msra.mxu2 %v12104_v8  ;;  %v8611_v41 = vrot.slane %v8523_v35, 1  ;;  %v12015_v8 = vld [vmem:[#allocation4 + $0x430] sm:$0xf]  ;;  %v11524_v14 = vor.u32 %v12616_v52, %v11521_v54  ;;  %v11588_v21 = vor.u32 %v12632_v12, %v11585_v5  ;;  %v8596_v40 = vsel %vm18362_vm10, %v8595_v26, %v8594_v3  ;;  %v12739_v25 = vld [vmem:[#allocation4 + $0x424] sm:$0xf0] }
 0x7b1   :  { %9619 = vmatpush.bf16.msra.mxu3 %v11540_v61  ;;  %9632 = vmatpush.bf16.msrb.mxu0 %v11604_v13  ;;  %v8525_v61 = vunpack.c.l.b16 %v8241_v51  ;;  %v8105_v13 = vld [vmem:[#allocation1 + $0x9] sm:$0xff]  ;;  %v8610_v15 = vsel %vm18363_vm14, %v8609_v22, %v8608_v56  ;;  %v8625_v17 = vrot.slane %v8524_v45, 1  ;;  %v8637_v49 = vrot.slane %v8515_v18, 2  ;;  %v12612_v60 = vld [vmem:[#allocation4 + $0x34] sm:$0xf]  ;;  %vm18381_vm14 = vmmov %vm18358_vm3 }
 0x7b2   :  { %v8598_v48 = vsel %vm8541_vm6, %v8597_v24, %v8596_v40  ;;  %v8612_v34 = vsel %vm8541_vm6, %v8611_v41, %v8610_v15  ;;  %v8153_v28 = vpack.c.bf16 %v8105_v13, %v8104_v19  ;;  %v12016_v47 = vor.u32 %v12741_v30, %v12015_v8  ;;  %v12007_v51 = vld [vmem:[#allocation4 + $0x420] sm:$0xf]  ;;  %v12755_v3 = vld [vmem:[#allocation4 + $0x4a4] sm:$0xf0]  ;;  %v12628_v33 = vld [vmem:[#allocation4 + $0xb4] sm:$0xf] }
 0x7b3   :  { %v8639_v7 = vrot.slane %v8525_v61, 1  ;;  %v12080_v16 = vor.u32 %v12757_v53, %v12079_v42  ;;  %v8262_v46 = vunpack.c.l.b16 %v8151_v29  ;;  %v8263_v50 = vunpack.c.h.b16 %v8151_v29  ;;  %v11569_v52 = vld [vmem:[#allocation4 + $0xb8] sm:$0xf0]  ;;  %v11999_v18 = vld [vmem:[#allocation4 + $0x410] sm:$0xf] }
 0x7b4   :  { %9595 = vmatpush.bf16.msra.mxu1 %v12032_v23  ;;  %9608 = vmatpush.bf16.msra.mxu2 %v12096_v59  ;;  %v11516_v57 = vor.u32 %v12614_v27, %v11513_v1  ;;  %v11580_v31 = vor.u32 %v12630_v11, %v11577_v44  ;;  %v8624_v35 = vsel %vm18364_vm2, %v8623_v6, %v8622_v2  ;;  %v12071_v23 = vld [vmem:[#allocation4 + $0x4a0] sm:$0xf]  ;;  %v11505_v59 = vld [vmem:[#allocation4 + $0x38] sm:$0xf0]  ;;  %v8264_v54 = vunpack.c.l.b16 %v8153_v28  ;;  %v12737_v24 = vld [vmem:[#allocation4 + $0x414] sm:$0xf0] }
 0x7b5   :  { %9620 = vmatpush.bf16.msra.mxu3 %v11532_v9  ;;  %9633 = vmatpush.bf16.msrb.mxu0 %v11596_v32  ;;  %v17519_v10 = vpack.c.b16 %v8598_v48, %v8598_v48  ;;  %v17521_v4 = vpack.c.b16 %v8612_v34, %v8612_v34  ;;  %v8638_v62 = vsel %vm18365_vm15, %v8637_v49, %v8636_v37  ;;  %v8265_v43 = vunpack.c.h.b16 %v8153_v28  ;;  %v12063_v30 = vld [vmem:[#allocation4 + $0x490] sm:$0xf]  ;;  %v12753_v42 = vld [vmem:[#allocation4 + $0x494] sm:$0xf0]  ;;  %v12610_v61 = vld [vmem:[#allocation4 + $0x24] sm:$0xf] }
 0x7b6   :  { %v8626_v9 = vsel %vm8541_vm6, %v8625_v17, %v8624_v35  ;;  %v8640_v32 = vsel %vm8541_vm6, %v8639_v7, %v8638_v62  ;;  %v11471_v12 = vunpack.i.l.s16 %v8262_v46  ;;  %v11472_v5 = vunpack.i.l.s16 %v8263_v50  ;;  %v12626_v53 = vld [vmem:[#allocation4 + $0xa4] sm:$0xf]  ;;  %v11561_v2 = vld [vmem:[#allocation4 + $0xa8] sm:$0xf0]  ;;  %v11991_v13 = vld [vmem:[#allocation4 + $0x400] sm:$0xf] }
 0x7b7   :  { %v12008_v26 = vor.u32 %v12739_v25, %v12007_v51  ;;  %v12072_v22 = vor.u32 %v12755_v3, %v12071_v23  ;;  %v11508_v45 = vor.u32 %v12612_v60, %v11505_v59  ;;  %v17528_v56 = vpack.c.b16 %v8626_v9, %v8626_v9  ;;  %v12735_v27 = vld [vmem:[#allocation4 + $0x404] sm:$0xf0]  ;;  %v12055_v1 = vld [vmem:[#allocation4 + $0x480] sm:$0xf]  ;;  %v12608_v11 = vld [vmem:[#allocation4 + $0x14] sm:$0xf] }
 0x7b8   :  { %9596 = vmatpush.bf16.msra.mxu1 %v12024_v20  ;;  %9609 = vmatpush.bf16.msra.mxu2 %v12088_v36  ;;  %v17530_v41 = vpack.c.b16 %v8640_v32, %v8640_v32  ;;  %v11572_v8 = vor.u32 %v12628_v33, %v11569_v52  ;;  %v11497_v20 = vld [vmem:[#allocation4 + $0x28] sm:$0xf0]  ;;  %v11475_v37 = vunpack.i.l.s16 %v8264_v54  ;;  %v11476_v19 = vunpack.i.l.s16 %v8265_v43  ;;  %v12751_v6 = vld [vmem:[#allocation4 + $0x484] sm:$0xf0]  ;;  %v11489_v44 = vld [vmem:[#allocation4 + $0x18] sm:$0xf0] }
 0x7b9   :  { %9621 = vmatpush.bf16.msra.mxu3 %v11524_v14  ;;  %9634 = vmatpush.bf16.msrb.mxu0 %v11588_v21  ;;  %v8651_v29 = vrot.slane %v11471_v12, 2  ;;  %v8665_v36 = vrot.slane %v11472_v5, 2  ;;  %v12000_v14 = vor.u32 %v12737_v24, %v11999_v18  ;;  %v12064_v21 = vor.u32 %v12753_v42, %v12063_v30  ;;  %v12624_v17 = vld [vmem:[#allocation4 + $0x94] sm:$0xf]  ;;  %v11553_v49 = vld [vmem:[#allocation4 + $0x98] sm:$0xf0]  ;;  %vm18382_vm2 = vmmov %vm18359_vm0 }
 0x7ba   :  { %v11500_v40 = vor.u32 %v12610_v61, %v11497_v20  ;;  %v11564_v15 = vor.u32 %v12626_v53, %v11561_v2  ;;  %v12652_v48 = vld [vmem:[#allocation4 + $0x174] sm:$0xf]  ;;  %v8653_v34 = vrot.slane %v11475_v37, 1  ;;  %v8667_v7 = vrot.slane %v11476_v19, 1  ;;  %v11665_v28 = vld [vmem:[#allocation4 + $0x178] sm:$0xf0]  ;;  %vm18383_vm15 = vmmov %vm18366_vm9 }
 0x7bb   :  { %9549 = vmatmul.bf16.vlgmr.msrb.gmra.mxu1 %v17519_v10  ;;  %9562 = vmatmul.bf16.vlgmr.msrb.gmra.mxu2 %v17521_v4  ;;  %v11992_v46 = vor.u32 %v12735_v27, %v11991_v13  ;;  %v12056_v50 = vor.u32 %v12751_v6, %v12055_v1  ;;  %v11556_v35 = vor.u32 %v12624_v17, %v11553_v49  ;;  %v12606_v25 = vld [vmem:[#allocation4 + $0x4] sm:$0xf]  ;;  %v11481_v23 = vld [vmem:[#allocation4 + $0x8] sm:$0xf0]  ;;  %v12684_v43 = vld [vmem:[#allocation4 + $0x274] sm:$0xf] }
 0x7bc   :  { %9597 = vmatpush.bf16.msra.mxu1 %v12016_v47  ;;  %9610 = vmatpush.bf16.msra.mxu2 %v12080_v16  ;;  %v12668_v47 = vld [vmem:[#allocation4 + $0x1f4] sm:$0xf]  ;;  %v11729_v16 = vld [vmem:[#allocation4 + $0x1f8] sm:$0xf0]  ;;  %v8666_v51 = vsel %vm18367_vm11, %v8665_v36, %v17322_v38  ;;  %v12622_v62 = vld [vmem:[#allocation4 + $0x84] sm:$0xf]  ;;  %v11668_v3 = vor.u32 %v12652_v48, %v11665_v28  ;;  %v11484_v12 = vor.u32 %v12606_v25, %v11481_v23 }
 0x7bd   :  { %9622 = vmatpush.bf16.msra.mxu3 %v11516_v57  ;;  %9635 = vmatpush.bf16.msrb.mxu0 %v11580_v31  ;;  %v8652_v57 = vsel %vm18366_vm9, %v8651_v29, %v17319_v55  ;;  %v11492_v31 = vor.u32 %v12608_v11, %v11489_v44  ;;  %v11732_v60 = vor.u32 %v12668_v47, %v11729_v16  ;;  %v11545_v32 = vld [vmem:[#allocation4 + $0x88] sm:$0xf0]  ;;  %v12650_v33 = vld [vmem:[#allocation4 + $0x164] sm:$0xf]  ;;  %v11793_v5 = vld [vmem:[#allocation4 + $0x278] sm:$0xf0] }
 0x7be   :  { %v8654_v59 = vsel %vm8541_vm6, %v8653_v34, %v8652_v57  ;;  %v8668_v9 = vsel %vm8541_vm6, %v8667_v7, %v8666_v51  ;;  %v11657_v52 = vld [vmem:[#allocation4 + $0x168] sm:$0xf0]  ;;  %v12666_v55 = vld [vmem:[#allocation4 + $0x1e4] sm:$0xf]  ;;  %v12700_v38 = vld [vmem:[#allocation4 + $0x2f4] sm:$0xf]  ;;  %v11548_v18 = vor.u32 %v12622_v62, %v11545_v32  ;;  %v11796_v61 = vor.u32 %v12684_v43, %v11793_v5 }
 0x7bf   :  { %9575 = vmatmul.bf16.vlgmr.msrb.gmra.mxu3 %v17528_v56  ;;  %9588 = vmatmul.bf16.vlgmr.msra.gmra.mxu0 %v17530_v41  ;;  %v11721_v54 = vld [vmem:[#allocation4 + $0x1e8] sm:$0xf0]  ;;  %v11660_v24 = vor.u32 %v12650_v33, %v11657_v52  ;;  %v12648_v30 = vld [vmem:[#allocation4 + $0x154] sm:$0xf]  ;;  %v11649_v42 = vld [vmem:[#allocation4 + $0x158] sm:$0xf0] }
 0x7c0   :  { %9598 = vmatpush.bf16.msra.mxu1 %v12008_v26  ;;  %9611 = vmatpush.bf16.msra.mxu2 %v12072_v22  ;;  %v11857_v26 = vld [vmem:[#allocation4 + $0x2f8] sm:$0xf0]  ;;  %v17540_v22 = vpack.c.b16 %v8654_v59, %v8654_v59  ;;  %v12664_v53 = vld [vmem:[#allocation4 + $0x1d4] sm:$0xf]  ;;  %v12682_v37 = vld [vmem:[#allocation4 + $0x264] sm:$0xf]  ;;  %v11652_v36 = vor.u32 %v12648_v30, %v11649_v42 }
 0x7c1   :  { %9623 = vmatpush.bf16.msra.mxu3 %v11508_v45  ;;  %9636 = vmatpush.bf16.msrb.mxu0 %v11572_v8  ;;  %v17542_v45 = vpack.c.b16 %v8668_v9, %v8668_v9  ;;  %v11724_v8 = vor.u32 %v12666_v55, %v11721_v54  ;;  %v11860_v20 = vor.u32 %v12700_v38, %v11857_v26  ;;  %v11713_v2 = vld [vmem:[#allocation4 + $0x1d8] sm:$0xf0]  ;;  %v11785_v19 = vld [vmem:[#allocation4 + $0x268] sm:$0xf0]  ;;  %v12698_v13 = vld [vmem:[#allocation4 + $0x2e4] sm:$0xf] }
 0x7c2   :  { %v11849_v29 = vld [vmem:[#allocation4 + $0x2e8] sm:$0xf0]  ;;  %v11788_v1 = vor.u32 %v12682_v37, %v11785_v19  ;;  %v12680_v11 = vld [vmem:[#allocation4 + $0x254] sm:$0xf]  ;;  %v11777_v44 = vld [vmem:[#allocation4 + $0x258] sm:$0xf0] }
 0x7c3   :  { %v11641_v27 = vld [vmem:[#allocation4 + $0x148] sm:$0xf0]  ;;  %v11852_v6 = vor.u32 %v12698_v13, %v11849_v29  ;;  %v12696_v17 = vld [vmem:[#allocation4 + $0x2d4] sm:$0xf]  ;;  %v11841_v49 = vld [vmem:[#allocation4 + $0x2d8] sm:$0xf0]  ;;  %v11780_v47 = vor.u32 %v12680_v11, %v11777_v44 }
 0x7c4   :  { %9599 = vmatpush.bf16.msra.mxu1 %v12000_v14  ;;  %9612 = vmatpush.bf16.msra.mxu2 %v12064_v21  ;;  %v11716_v14 = vor.u32 %v12664_v53, %v11713_v2  ;;  %v12646_v21 = vld [vmem:[#allocation4 + $0x144] sm:$0xf]  ;;  %v12644_v7 = vld [vmem:[#allocation4 + $0x134] sm:$0xf]  ;;  %v11633_v28 = vld [vmem:[#allocation4 + $0x138] sm:$0xf0]  ;;  %v11844_v16 = vor.u32 %v12696_v17, %v11841_v49 }
 0x7c5   :  { %9624 = vmatpush.bf16.msra.mxu3 %v11500_v40  ;;  %9637 = vmatpush.bf16.msrb.mxu0 %v11564_v15  ;;  %v12662_v40 = vld [vmem:[#allocation4 + $0x1c4] sm:$0xf]  ;;  %v11705_v15 = vld [vmem:[#allocation4 + $0x1c8] sm:$0xf0]  ;;  %v11644_v48 = vor.u32 %v12646_v21, %v11641_v27  ;;  %v12676_v9 = vld [vmem:[#allocation4 + $0x234] sm:$0xf] }
 0x7c6   :  { %v11708_v34 = vor.u32 %v12662_v40, %v11705_v15  ;;  %v12678_v57 = vld [vmem:[#allocation4 + $0x244] sm:$0xf]  ;;  %v11625_v23 = vld [vmem:[#allocation4 + $0x128] sm:$0xf0]  ;;  %v11761_v32 = vld [vmem:[#allocation4 + $0x238] sm:$0xf0] }
 0x7c7   :  { %v12642_v25 = vld [vmem:[#allocation4 + $0x124] sm:$0xf]  ;;  %v11689_v59 = vld [vmem:[#allocation4 + $0x1a8] sm:$0xf0]  ;;  %v12692_v33 = vld [vmem:[#allocation4 + $0x2b4] sm:$0xf]  ;;  %v11764_v5 = vor.u32 %v12676_v9, %v11761_v32 }
 0x7c8   :  { %9600 = vmatpush.bf16.msra.mxu1 %v11992_v46  ;;  %9613 = vmatpush.bf16.msra.mxu2 %v12056_v50  ;;  %v12660_v46 = vld [vmem:[#allocation4 + $0x1b4] sm:$0xf]  ;;  %v11697_v50 = vld [vmem:[#allocation4 + $0x1b8] sm:$0xf0]  ;;  %v11628_v55 = vor.u32 %v12642_v25, %v11625_v23  ;;  %v12690_v30 = vld [vmem:[#allocation4 + $0x2a4] sm:$0xf] }
 0x7c9   :  { %9625 = vmatpush.bf16.msra.mxu3 %v11492_v31  ;;  %9638 = vmatpush.bf16.msrb.mxu0 %v11556_v35  ;;  %v11769_v31 = vld [vmem:[#allocation4 + $0x248] sm:$0xf0]  ;;  %v11700_v51 = vor.u32 %v12660_v46, %v11697_v50  ;;  %v11825_v52 = vld [vmem:[#allocation4 + $0x2b8] sm:$0xf0]  ;;  %v12640_v43 = vld [vmem:[#allocation4 + $0x114] sm:$0xf] }
 0x7ca   :  { %v11833_v35 = vld [vmem:[#allocation4 + $0x2c8] sm:$0xf0]  ;;  %v11772_v62 = vor.u32 %v12678_v57, %v11769_v31  ;;  %v11828_v38 = vor.u32 %v12692_v33, %v11825_v52  ;;  %v12656_v26 = vld [vmem:[#allocation4 + $0x194] sm:$0xf]  ;;  %v12638_v53 = vld [vmem:[#allocation4 + $0x104] sm:$0xf] }
 0x7cb   :  { %9601 = vmatmul.bf16.vlgmr.msra.gmra.mxu1 %v17540_v22  ;;  %9614 = vmatmul.bf16.vlgmr.msra.gmra.mxu2 %v17542_v45  ;;  %v11817_v42 = vld [vmem:[#allocation4 + $0x2a8] sm:$0xf0]  ;;  %v12654_v37 = vld [vmem:[#allocation4 + $0x184] sm:$0xf]  ;;  %v12688_v21 = vld [vmem:[#allocation4 + $0x294] sm:$0xf] }
 0x7cc   :  { %9645 = vmatpush.bf16.msrb.mxu1 %v11668_v3  ;;  %9658 = vmatpush.bf16.msrb.mxu2 %v11732_v60  ;;  %v12658_v60 = vld [vmem:[#allocation4 + $0x1a4] sm:$0xf]  ;;  %v11609_v2 = vld [vmem:[#allocation4 + $0x108] sm:$0xf0]  ;;  %v11820_v13 = vor.u32 %v12690_v30, %v11817_v42  ;;  %v11809_v27 = vld [vmem:[#allocation4 + $0x298] sm:$0xf0] }
 0x7cd   :  { %9626 = vmatpush.bf16.msra.mxu3 %v11484_v12  ;;  %9639 = vmatpush.bf16.msrb.mxu0 %v11548_v18  ;;  %v11692_v54 = vor.u32 %v12658_v60, %v11689_v59  ;;  %v11617_v12 = vld [vmem:[#allocation4 + $0x118] sm:$0xf0]  ;;  %v11673_v29 = vld [vmem:[#allocation4 + $0x188] sm:$0xf0]  ;;  %v12732_v40 = vld [vmem:[#allocation4 + $0x3f4] sm:$0xf]  ;;  %v11612_v11 = vor.u32 %v12638_v53, %v11609_v2  ;;  %v11812_v49 = vor.u32 %v12688_v21, %v11809_v27 }
 0x7ce   :  { %v11681_v18 = vld [vmem:[#allocation4 + $0x198] sm:$0xf0]  ;;  %v11676_v44 = vor.u32 %v12654_v37, %v11673_v29  ;;  %v12714_v46 = vld [vmem:[#allocation4 + $0x364] sm:$0xf]  ;;  %v11913_v50 = vld [vmem:[#allocation4 + $0x368] sm:$0xf0] }
 0x7cf   :  { %v11985_v15 = vld [vmem:[#allocation4 + $0x3f8] sm:$0xf0]  ;;  %v12730_v57 = vld [vmem:[#allocation4 + $0x3e4] sm:$0xf]  ;;  %v11977_v31 = vld [vmem:[#allocation4 + $0x3e8] sm:$0xf0] }
 0x7d0   :  { %9646 = vmatpush.bf16.msrb.mxu1 %v11660_v24  ;;  %9659 = vmatpush.bf16.msrb.mxu2 %v11724_v8  ;;  %v12674_v24 = vld [vmem:[#allocation4 + $0x224] sm:$0xf]  ;;  %v11753_v8 = vld [vmem:[#allocation4 + $0x228] sm:$0xf0]  ;;  %v12712_v60 = vld [vmem:[#allocation4 + $0x354] sm:$0xf] }
 0x7d1   :  { %9671 = vmatpush.bf16.msrb.mxu3 %v11796_v61  ;;  %9684 = vmatpush.bf16.msra.mxu0 %v11860_v20  ;;  %v11620_v61 = vor.u32 %v12640_v43, %v11617_v12  ;;  %v11684_v20 = vor.u32 %v12656_v26, %v11681_v18  ;;  %v11756_v19 = vor.u32 %v12674_v24, %v11753_v8  ;;  %v11905_v59 = vld [vmem:[#allocation4 + $0x358] sm:$0xf0]  ;;  %v12728_v33 = vld [vmem:[#allocation4 + $0x3d4] sm:$0xf]  ;;  %v12762_v43 = vld [vmem:[#allocation4 + $0x4e4] sm:$0xf] }
 0x7d2   :  { %9627 = vmatmul.bf16.vlgmr.msra.gmra.mxu3 %v17456_v58  ;;  %9640 = vmatmul.bf16.vlgmr.msrb.gmra.mxu0 %v17458_v39  ;;  %v12694_v58 = vld [vmem:[#allocation4 + $0x2c4] sm:$0xf]  ;;  %v11636_v39 = vor.u32 %v12644_v7, %v11633_v28  ;;  %v11969_v52 = vld [vmem:[#allocation4 + $0x3d8] sm:$0xf0]  ;;  %v12105_v12 = vld [vmem:[#allocation4 + $0x4e8] sm:$0xf0] }
 0x7d3   :  { %v11836_v3 = vor.u32 %v12694_v58, %v11833_v35  ;;  %v12686_v7 = vld [vmem:[#allocation4 + $0x284] sm:$0xf]  ;;  %v12748_v58 = vld [vmem:[#allocation4 + $0x474] sm:$0xf]  ;;  %v12049_v35 = vld [vmem:[#allocation4 + $0x478] sm:$0xf0] }
 0x7d4   :  { %9647 = vmatpush.bf16.msrb.mxu1 %v11652_v36  ;;  %9660 = vmatpush.bf16.msrb.mxu2 %v11716_v14  ;;  %v12672_v36 = vld [vmem:[#allocation4 + $0x214] sm:$0xf]  ;;  %v11745_v14 = vld [vmem:[#allocation4 + $0x218] sm:$0xf0]  ;;  %v12052_v9 = vor.u32 %v12748_v58, %v12049_v35  ;;  %v12710_v26 = vld [vmem:[#allocation4 + $0x344] sm:$0xf] }
 0x7d5   :  { %9672 = vmatpush.bf16.msrb.mxu3 %v11788_v1  ;;  %9685 = vmatpush.bf16.msra.mxu0 %v11852_v6  ;;  %v12716_v1 = vld [vmem:[#allocation4 + $0x374] sm:$0xf]  ;;  %v11921_v6 = vld [vmem:[#allocation4 + $0x378] sm:$0xf0]  ;;  %v11748_v17 = vor.u32 %v12672_v36, %v11745_v14  ;;  %v11897_v18 = vld [vmem:[#allocation4 + $0x348] sm:$0xf0] }
 0x7d6   :  { %v11924_v28 = vor.u32 %v12716_v1, %v11921_v6  ;;  %v12726_v24 = vld [vmem:[#allocation4 + $0x3c4] sm:$0xf]  ;;  %v11961_v8 = vld [vmem:[#allocation4 + $0x3c8] sm:$0xf0]  ;;  %v12744_v30 = vld [vmem:[#allocation4 + $0x454] sm:$0xf]  ;;  %v11900_v53 = vor.u32 %v12710_v26, %v11897_v18 }
 0x7d7   :  { %v12033_v42 = vld [vmem:[#allocation4 + $0x458] sm:$0xf0]  ;;  %v11964_v2 = vor.u32 %v12726_v24, %v11961_v8  ;;  %v12708_v37 = vld [vmem:[#allocation4 + $0x334] sm:$0xf]  ;;  %v12742_v21 = vld [vmem:[#allocation4 + $0x444] sm:$0xf] }
 0x7d8   :  { %9648 = vmatpush.bf16.msrb.mxu1 %v11644_v48  ;;  %9661 = vmatpush.bf16.msrb.mxu2 %v11708_v34  ;;  %v12670_v48 = vld [vmem:[#allocation4 + $0x204] sm:$0xf]  ;;  %v11737_v34 = vld [vmem:[#allocation4 + $0x208] sm:$0xf0]  ;;  %v12724_v36 = vld [vmem:[#allocation4 + $0x3b4] sm:$0xf] }
 0x7d9   :  { %9673 = vmatpush.bf16.msrb.mxu3 %v11780_v47  ;;  %9686 = vmatpush.bf16.msra.mxu0 %v11844_v16  ;;  %v11988_v47 = vor.u32 %v12732_v40, %v11985_v15  ;;  %v11801_v16 = vld [vmem:[#allocation4 + $0x288] sm:$0xf0]  ;;  %v11740_v25 = vor.u32 %v12670_v48, %v11737_v34  ;;  %v11953_v14 = vld [vmem:[#allocation4 + $0x3b8] sm:$0xf0]  ;;  %v12706_v40 = vld [vmem:[#allocation4 + $0x324] sm:$0xf] }
 0x7da   :  { %v11804_v23 = vor.u32 %v12686_v7, %v11801_v16  ;;  %v12025_v27 = vld [vmem:[#allocation4 + $0x448] sm:$0xf0]  ;;  %v11956_v6 = vor.u32 %v12724_v36, %v11953_v14  ;;  %v12740_v48 = vld [vmem:[#allocation4 + $0x434] sm:$0xf]  ;;  %v12017_v34 = vld [vmem:[#allocation4 + $0x438] sm:$0xf0] }
 0x7db   :  { %v12089_v1 = vld [vmem:[#allocation4 + $0x4c8] sm:$0xf0]  ;;  %v12756_v7 = vld [vmem:[#allocation4 + $0x4b4] sm:$0xf]  ;;  %v11937_v35 = vld [vmem:[#allocation4 + $0x398] sm:$0xf0] }
 0x7dc   :  { %9649 = vmatpush.bf16.msrb.mxu1 %v11636_v39  ;;  %9662 = vmatpush.bf16.msrb.mxu2 %v11700_v51  ;;  %v12764_v39 = vld [vmem:[#allocation4 + $0x4f4] sm:$0xf]  ;;  %v12113_v51 = vld [vmem:[#allocation4 + $0x4f8] sm:$0xf0]  ;;  %v11881_v15 = vld [vmem:[#allocation4 + $0x328] sm:$0xf0] }
 0x7dd   :  { %9674 = vmatpush.bf16.msrb.mxu3 %v11772_v62  ;;  %9687 = vmatpush.bf16.msra.mxu0 %v11836_v3  ;;  %v11916_v62 = vor.u32 %v12714_v46, %v11913_v50  ;;  %v11980_v3 = vor.u32 %v12730_v57, %v11977_v31  ;;  %v12116_v32 = vor.u32 %v12764_v39, %v12113_v51  ;;  %v12704_v46 = vld [vmem:[#allocation4 + $0x314] sm:$0xf]  ;;  %v11873_v50 = vld [vmem:[#allocation4 + $0x318] sm:$0xf0]  ;;  %v12738_v39 = vld [vmem:[#allocation4 + $0x424] sm:$0xf] }
 0x7de   :  { %v12020_v57 = vor.u32 %v12740_v48, %v12017_v34  ;;  %v12720_v58 = vld [vmem:[#allocation4 + $0x394] sm:$0xf]  ;;  %v12009_v51 = vld [vmem:[#allocation4 + $0x428] sm:$0xf0]  ;;  %v12185_v18 = vld [vmem:[#allocation6 + $0x78] sm:$0xf0] }
 0x7df   :  { %v12780_v26 = vld [vmem:[#allocation6 + $0x74] sm:$0xf]  ;;  %v12151_v48 = vld [vmem:[#allocation6 + $0x30] sm:$0xf]  ;;  %v12773_v34 = vld [vmem:[#allocation6 + $0x34] sm:$0xf0] }
 0x7e0   :  { %9650 = vmatpush.bf16.msrb.mxu1 %v11628_v55  ;;  %9663 = vmatpush.bf16.msrb.mxu2 %v11692_v54  ;;  %v12746_v55 = vld [vmem:[#allocation4 + $0x464] sm:$0xf]  ;;  %v12041_v54 = vld [vmem:[#allocation4 + $0x468] sm:$0xf0]  ;;  %vm18376_vm8 = vcmask 1041409   ;;  %vm18377_vm7 = vcmask 1042434  }
 0x7e1   :  { %9675 = vmatpush.bf16.msrb.mxu3 %v11764_v5  ;;  %9688 = vmatpush.bf16.msra.mxu0 %v11828_v38  ;;  %v11908_v5 = vor.u32 %v12712_v60, %v11905_v59  ;;  %v11972_v38 = vor.u32 %v12728_v33, %v11969_v52  ;;  %v12702_v60 = vld [vmem:[#allocation4 + $0x304] sm:$0xf]  ;;  %v11865_v59 = vld [vmem:[#allocation4 + $0x308] sm:$0xf0]  ;;  %vm18379_vm13 = vmmov %vm18376_vm8 }
 0x7e2   :  { %v11929_v52 = vld [vmem:[#allocation4 + $0x388] sm:$0xf0]  ;;  %vm18380_vm10 = vmmov %vm18377_vm7 }
 0x7e3   :  { %vm18384_vm9 = vmmov %vm18376_vm8 }
 0x7e4   :  { %9651 = vmatpush.bf16.msrb.mxu1 %v11620_v61  ;;  %9664 = vmatpush.bf16.msrb.mxu2 %v11684_v20  ;;  %v12760_v61 = vld [vmem:[#allocation4 + $0x4d4] sm:$0xf]  ;;  %v12097_v20 = vld [vmem:[#allocation4 + $0x4d8] sm:$0xf0]  ;;  %vm18385_vm11 = vmmov %vm18377_vm7 }
 0x7e5   :  { %9676 = vmatpush.bf16.msrb.mxu3 %v11756_v19  ;;  %9689 = vmatpush.bf16.msra.mxu0 %v11820_v13  ;;  %v11889_v19 = vld [vmem:[#allocation4 + $0x338] sm:$0xf0]  ;;  %v12036_v13 = vor.u32 %v12744_v30, %v12033_v42  ;;  %v12100_v29 = vor.u32 %v12760_v61, %v12097_v20  ;;  %v12734_v30 = vld [vmem:[#allocation4 + $0x404] sm:$0xf]  ;;  %v11993_v42 = vld [vmem:[#allocation4 + $0x408] sm:$0xf0]  ;;  %v12188_v20 = vor.u32 %v12780_v26, %v12185_v18 }
 0x7e6   :  { %v11996_v36 = vor.u32 %v12734_v30, %v11993_v42  ;;  %v18375_v26 = vld [vmem:[#allocation23_spill] sm:$0xff]  ;;  %v12127_v42 = vld [vmem:[#allocation6] sm:$0xf] }
 0x7e7   :  { %v12124_v18 = vunpack.i.l.s16 %v18375_v26 }
 0x7e8   :  { %9652 = vmatpush.bf16.msrb.mxu1 %v11612_v11  ;;  %9665 = vmatpush.bf16.msrb.mxu2 %v11676_v44  ;;  %v12028_v11 = vor.u32 %v12742_v21, %v12025_v27 }
 0x7e9   :  { %9677 = vmatpush.bf16.msrb.mxu3 %v11748_v17  ;;  %9690 = vmatpush.bf16.msra.mxu0 %v11812_v49  ;;  %v12722_v17 = vld [vmem:[#allocation4 + $0x3a4] sm:$0xf]  ;;  %v11945_v49 = vld [vmem:[#allocation4 + $0x3a8] sm:$0xf0] }
 0x7ea   :  { %v11948_v16 = vor.u32 %v12722_v17, %v11945_v49  ;;  %v12774_v17 = vld [vmem:[#allocation6 + $0x44] sm:$0xf]  ;;  %v12161_v49 = vld [vmem:[#allocation6 + $0x48] sm:$0xf0] }
 0x7eb   :  { %9653 = vmatmul.bf16.vlgmr.msrb.gmra.mxu1 %v17479_v0  ;;  %9666 = vmatmul.bf16.vlgmr.msrb.gmra.mxu2 %v17481_v63  ;;  %v12044_v0 = vor.u32 %v12746_v55, %v12041_v54  ;;  %v12108_v63 = vor.u32 %v12762_v43, %v12105_v12  ;;  %v12736_v55 = vld [vmem:[#allocation4 + $0x414] sm:$0xf]  ;;  %v12001_v54 = vld [vmem:[#allocation4 + $0x418] sm:$0xf0] }
 0x7ec   :  { %9697 = vmatpush.bf16.msra.mxu1 %v11924_v28  ;;  %9710 = vmatpush.bf16.msra.mxu2 %v11988_v47  ;;  %v12081_v28 = vld [vmem:[#allocation4 + $0x4b8] sm:$0xf0]  ;;  %v11884_v47 = vor.u32 %v12706_v40, %v11881_v15  ;;  %v12752_v43 = vld [vmem:[#allocation4 + $0x494] sm:$0xf]  ;;  %v12004_v24 = vor.u32 %v12736_v55, %v12001_v54  ;;  %v12769_v54 = vld [vmem:[#allocation6 + $0x14] sm:$0xf0] }
 0x7ed   :  { %9678 = vmatpush.bf16.msrb.mxu3 %v11740_v25  ;;  %9691 = vmatpush.bf16.msra.mxu0 %v11804_v23  ;;  %v12084_v31 = vor.u32 %v12756_v7, %v12081_v28  ;;  %v12754_v25 = vld [vmem:[#allocation4 + $0x4a4] sm:$0xf]  ;;  %v12073_v23 = vld [vmem:[#allocation4 + $0x4a8] sm:$0xf0]  ;;  %v12065_v12 = vld [vmem:[#allocation4 + $0x498] sm:$0xf0] }
 0x7ee   :  { %v12076_v33 = vor.u32 %v12754_v25, %v12073_v23  ;;  %v12068_v8 = vor.u32 %v12752_v43, %v12065_v12  ;;  %v12772_v7 = vld [vmem:[#allocation6 + $0x34] sm:$0xf]  ;;  %v12153_v28 = vld [vmem:[#allocation6 + $0x38] sm:$0xf0]  ;;  %v18371_v25 = vld [vmem:[#allocation20_spill] sm:$0xff] }
 0x7ef   :  { %v12121_v23 = vunpack.i.l.s16 %v18371_v25  ;;  %v12768_v43 = vld [vmem:[#allocation6 + $0x14] sm:$0xf]  ;;  %v12137_v12 = vld [vmem:[#allocation6 + $0x18] sm:$0xf0] }
 0x7f0   :  { %9698 = vmatpush.bf16.msra.mxu1 %v11916_v62  ;;  %9711 = vmatpush.bf16.msra.mxu2 %v11980_v3  ;;  %v11876_v62 = vor.u32 %v12704_v46, %v11873_v50  ;;  %v11940_v3 = vor.u32 %v12720_v58, %v11937_v35  ;;  %v18369_v46 = vld [vmem:[#allocation18_spill] sm:$0xff]  ;;  %v12143_v58 = vld [vmem:[#allocation6 + $0x20] sm:$0xf]  ;;  %v12770_v35 = vld [vmem:[#allocation6 + $0x24] sm:$0xf]  ;;  %v12140_v30 = vor.u32 %v12768_v43, %v12137_v12 }
 0x7f1   :  { %9723 = vmatpush.bf16.msra.mxu3 %v12052_v9  ;;  %9736 = vmatpush.bf16.msrb.mxu0 %v12116_v32  ;;  %v12718_v9 = vld [vmem:[#allocation4 + $0x384] sm:$0xf]  ;;  %v12012_v32 = vor.u32 %v12738_v39, %v12009_v51  ;;  %v12119_v50 = vunpack.i.l.s16 %v18369_v46  ;;  %v18370_v39 = vld [vmem:[#allocation19_spill] sm:$0xff] }
 0x7f2   :  { %9679 = vmatmul.bf16.vlgmr.msrb.gmra.mxu3 %v17519_v10  ;;  %9692 = vmatmul.bf16.vlgmr.msra.gmra.mxu0 %v17521_v4  ;;  %v12758_v10 = vld [vmem:[#allocation4 + $0x4c4] sm:$0xf]  ;;  %v11892_v4 = vor.u32 %v12708_v37, %v11889_v19  ;;  %v12175_v37 = vld [vmem:[#allocation6 + $0x60] sm:$0xf]  ;;  %v12779_v19 = vld [vmem:[#allocation6 + $0x64] sm:$0xf0]  ;;  %v12120_v51 = vunpack.i.l.s16 %v18370_v39 }
 0x7f3   :  { %v12092_v44 = vor.u32 %v12758_v10, %v12089_v1  ;;  %v12176_v21 = vor.u32 %v12779_v19, %v12175_v37  ;;  %v12167_v10 = vld [vmem:[#allocation6 + $0x50] sm:$0xf]  ;;  %v12777_v1 = vld [vmem:[#allocation6 + $0x54] sm:$0xf0]  ;;  %v12129_v37 = vld [vmem:[#allocation6 + $0x8] sm:$0xf0] }
 0x7f4   :  { %9699 = vmatpush.bf16.msra.mxu1 %v11908_v5  ;;  %9712 = vmatpush.bf16.msra.mxu2 %v11972_v38  ;;  %v12183_v5 = vld [vmem:[#allocation6 + $0x70] sm:$0xf]  ;;  %v12781_v38 = vld [vmem:[#allocation6 + $0x74] sm:$0xf0]  ;;  %v12168_v40 = vor.u32 %v12777_v1, %v12167_v10 }
 0x7f5   :  { %9724 = vmatpush.bf16.msra.mxu3 %v12044_v0  ;;  %9737 = vmatpush.bf16.msrb.mxu0 %v12108_v63  ;;  %v11868_v0 = vor.u32 %v12702_v60, %v11865_v59  ;;  %v11932_v63 = vor.u32 %v12718_v9, %v11929_v52  ;;  %v12184_v61 = vor.u32 %v12781_v38, %v12183_v5  ;;  %v12135_v9 = vld [vmem:[#allocation6 + $0x10] sm:$0xf] }
 0x7f6   :  { %v18373_v52 = vld [vmem:[#allocation22_spill] sm:$0xff] }
 0x7f7   :  { %v12123_v55 = vunpack.i.l.s16 %v18373_v52  ;;  %v18374_v5 = vld [vmem:[#allocation14_spill] sm:$0xff] }
 0x7f8   :  { %9700 = vmatpush.bf16.msra.mxu1 %v11900_v53  ;;  %9713 = vmatpush.bf16.msra.mxu2 %v11964_v2  ;;  %v12750_v53 = vld [vmem:[#allocation4 + $0x484] sm:$0xf]  ;;  %v12057_v2 = vld [vmem:[#allocation4 + $0x488] sm:$0xf0]  ;;  %v12117_v38 = vunpack.i.l.s16 %v18374_v5 }
 0x7f9   :  { %9725 = vmatpush.bf16.msra.mxu3 %v12036_v13  ;;  %9738 = vmatpush.bf16.msrb.mxu0 %v12100_v29  ;;  %v12778_v13 = vld [vmem:[#allocation6 + $0x64] sm:$0xf]  ;;  %v12177_v29 = vld [vmem:[#allocation6 + $0x68] sm:$0xf0]  ;;  %v12060_v14 = vor.u32 %v12750_v53, %v12057_v2  ;;  %v12767_v53 = vld [vmem:[#allocation6 + $0x4] sm:$0xf0] }
 0x7fa   :  { %v12180_v27 = vor.u32 %v12778_v13, %v12177_v29  ;;  %v12766_v2 = vld [vmem:[#allocation6 + $0x4] sm:$0xf]  ;;  %v9833_v29 = vrot.slane %v12124_v18, 1 }
 0x7fc   :  { %9701 = vmatpush.bf16.msra.mxu1 %v11892_v4  ;;  %9714 = vmatpush.bf16.msra.mxu2 %v11956_v6  ;;  %v12776_v4 = vld [vmem:[#allocation6 + $0x54] sm:$0xf]  ;;  %v12169_v6 = vld [vmem:[#allocation6 + $0x58] sm:$0xf0] }
 0x7fd   :  { %9726 = vmatpush.bf16.msra.mxu3 %v12028_v11  ;;  %9739 = vmatpush.bf16.msrb.mxu0 %v12092_v44  ;;  %v12172_v15 = vor.u32 %v12776_v4, %v12169_v6  ;;  %v12159_v11 = vld [vmem:[#allocation6 + $0x40] sm:$0xf]  ;;  %v12775_v44 = vld [vmem:[#allocation6 + $0x44] sm:$0xf0]  ;;  %v8442_v6 = vld [vmem:[%s17736_s11] sm:$0x3] }
 0x7fe   :  { %s18399_s11 = sld [smem:[#allocation47_spill]] }
 0x800   :  { %9702 = vmatpush.bf16.msra.mxu1 %v11884_v47  ;;  %9715 = vmatpush.bf16.msra.mxu2 %v11948_v16  ;;  %v18368_v47 = vld [vmem:[#allocation30_spill] sm:$0xff] }
 0x801   :  { %9727 = vmatpush.bf16.msra.mxu3 %v12020_v57  ;;  %9740 = vmatpush.bf16.msrb.mxu0 %v12084_v31  ;;  %v12118_v16 = vunpack.i.l.s16 %v18368_v47  ;;  %v12152_v57 = vor.u32 %v12773_v34, %v12151_v48  ;;  %v12156_v31 = vor.u32 %v12772_v7, %v12153_v28 }
 0x804   :  { %9703 = vmatpush.bf16.msra.mxu1 %v11876_v62  ;;  %9716 = vmatpush.bf16.msra.mxu2 %v11940_v3  ;;  %v9821_v62 = vrot.slane %v12118_v16, 7  ;;  %v9823_v3 = vrot.slane %v12119_v50, 6 }
 0x805   :  { %9728 = vmatpush.bf16.msra.mxu3 %v12012_v32  ;;  %9741 = vmatpush.bf16.msrb.mxu0 %v12076_v33  ;;  %v18372_v32 = vld [vmem:[#allocation21_spill] sm:$0xff] }
 0x806   :  { %v12122_v33 = vunpack.i.l.s16 %v18372_v32  ;;  %v8445_v32 = vperm.slane %v8442_v6, 1 }
 0x808   :  { %9704 = vmatpush.bf16.msra.mxu1 %v11868_v0  ;;  %9717 = vmatpush.bf16.msra.mxu2 %v11932_v63  ;;  %v9825_v0 = vrot.slane %v12120_v51, 5  ;;  %v9822_v63 = vsel %vm18376_vm8, %v9821_v62, %v12117_v38  ;;  %vm18386_vm8 = vmmov %vm18358_vm3 }
 0x809   :  { %9729 = vmatpush.bf16.msra.mxu3 %v12004_v24  ;;  %9742 = vmatpush.bf16.msrb.mxu0 %v12068_v8  ;;  %v9827_v24 = vrot.slane %v12121_v23, 4  ;;  %v12136_v8 = vor.u32 %v12769_v54, %v12135_v9  ;;  %v9824_v19 = vsel %vm18377_vm7, %v9823_v3, %v9822_v63  ;;  %vm18387_vm7 = vmmov %vm18359_vm0 }
 0x80a   :  { %v9826_v13 = vsel %vm2647_vm4, %v9825_v0, %v9824_v19 }
 0x80b   :  { %9705 = vmatmul.bf16.vlgmr.msra.gmra.mxu1 %v17528_v56  ;;  %9718 = vmatmul.bf16.vlgmr.msra.gmra.mxu2 %v17530_v41  ;;  %v12160_v56 = vor.u32 %v12775_v44, %v12159_v11  ;;  %v12164_v41 = vor.u32 %v12774_v17, %v12161_v49 }
 0x80c   :  { %9917 = vmatpush.bf16.msrb.mxu1 %v12184_v61  ;;  %9930 = vmatpush.bf16.msrb.mxu2 %v12188_v20  ;;  %v9829_v61 = vrot.slane %v12122_v33, 3  ;;  %v9831_v20 = vrot.slane %v12123_v55, 2 }
 0x80d   :  { %9730 = vmatpush.bf16.msra.mxu3 %v11996_v36  ;;  %9743 = vmatpush.bf16.msrb.mxu0 %v12060_v14  ;;  %v9828_v36 = vsel %vm18358_vm3, %v9827_v24, %v9826_v13  ;;  %v12128_v14 = vor.u32 %v12767_v53, %v12127_v42  ;;  %v12804_v42 = vld [vmem:[#allocation7 + $0xb0] sm:$0xf0]  ;;  %v12359_v13 = vld [vmem:[#allocation7 + $0x150] sm:$0xf]  ;;  %vm18388_vm3 = vmmov %vm18378_vm12 }
 0x80e   :  { %v12828_v53 = vld [vmem:[#allocation7 + $0x170] sm:$0xf0] }
 0x810   :  { %9918 = vmatpush.bf16.msrb.mxu1 %v12176_v21  ;;  %9931 = vmatpush.bf16.msrb.mxu2 %v12180_v27  ;;  %v12132_v21 = vor.u32 %v12766_v2, %v12129_v37  ;;  %v9830_v27 = vsel %vm18359_vm0, %v9829_v61, %v9828_v36  ;;  %v12371_v61 = vld [vmem:[#allocation7 + $0x168] sm:$0xf]  ;;  %v12263_v2 = vld [vmem:[#allocation7 + $0x90] sm:$0xf]  ;;  %v12801_v37 = vld [vmem:[#allocation7 + $0x98] sm:$0xf0] }
 0x811   :  { %9731 = vmatmul.bf16.vlgmr.msra.gmra.mxu3 %v17540_v22  ;;  %9744 = vmatmul.bf16.vlgmr.msrb.gmra.mxu0 %v17542_v45  ;;  %v12771_v22 = vld [vmem:[#allocation6 + $0x24] sm:$0xf0]  ;;  %v12145_v45 = vld [vmem:[#allocation6 + $0x28] sm:$0xf0]  ;;  %v9832_v10 = vsel %vm18378_vm12, %v9831_v20, %v9830_v27  ;;  %v12372_v19 = vor.u32 %v12828_v53, %v12371_v61  ;;  %v12264_v36 = vor.u32 %v12801_v37, %v12263_v2  ;;  %v12798_v27 = vld [vmem:[#allocation7 + $0x80] sm:$0xf0] }
 0x812   :  { %v12144_v60 = vor.u32 %v12771_v22, %v12143_v58  ;;  %v12148_v59 = vor.u32 %v12770_v35, %v12145_v45  ;;  %v9834_v1 = vsel %vm8541_vm6, %v9833_v29, %v9832_v10  ;;  %v12825_v29 = vld [vmem:[#allocation7 + $0x158] sm:$0xf0]  ;;  %v12347_v10 = vld [vmem:[#allocation7 + $0x138] sm:$0xf]  ;;  %v12786_v2 = vld [vmem:[#allocation7 + $0x20] sm:$0xf0] }
 0x813   :  { %v9835_v4 = vpack.c.b16 %v9834_v1, %v9834_v1  ;;  %10446 = vmatpush.bf16.msra.mxu0 %v12372_v19  ;;  %v12822_v1 = vld [vmem:[#allocation7 + $0x140] sm:$0xf0]  ;;  %v12203_v61 = vld [vmem:[#allocation7 + $0x18] sm:$0xf]  ;;  %vm18391_vm0 = vmmov %vm18386_vm8 }
 0x814   :  { %9919 = vmatpush.bf16.msrb.mxu1 %v12168_v40  ;;  %9932 = vmatpush.bf16.msrb.mxu2 %v12172_v15  ;;  %v8444_v15 = vperm.slane %v8442_v6, 0  ;;  %v12348_v6 = vor.u32 %v12822_v1, %v12347_v10  ;;  %v12299_v37 = vld [vmem:[#allocation7 + $0xd8] sm:$0xf]  ;;  %v12810_v19 = vld [vmem:[#allocation7 + $0xe0] sm:$0xf0]  ;;  %vm18392_vm12 = vmmov %vm18382_vm2 }
 0x815   :  { %v12300_v10 = vor.u32 %v12810_v19, %v12299_v37  ;;  %v12193_v37 = vld [vmem:[#allocation7 + $0xc] sm:$0xf0]  ;;  %v12806_v19 = vld [vmem:[#allocation7 + $0xc4] sm:$0xf] }
 0x818   :  { %9920 = vmatpush.bf16.msrb.mxu1 %v12160_v56  ;;  %9933 = vmatpush.bf16.msrb.mxu2 %v12164_v41 }
 0x81c   :  { %9921 = vmatpush.bf16.msrb.mxu1 %v12152_v57  ;;  %9934 = vmatpush.bf16.msrb.mxu2 %v12156_v31 }
 0x820   :  { %9922 = vmatpush.bf16.msrb.mxu1 %v12144_v60  ;;  %9935 = vmatpush.bf16.msrb.mxu2 %v12148_v59 }
 0x824   :  { %9923 = vmatpush.bf16.msrb.mxu1 %v12136_v8  ;;  %9936 = vmatpush.bf16.msrb.mxu2 %v12140_v30  ;;  %v12275_v30 = vld [vmem:[#allocation7 + $0xa8] sm:$0xf] }
 0x825   :  { %v12276_v20 = vor.u32 %v12804_v42, %v12275_v30  ;;  %v12821_v30 = vld [vmem:[#allocation7 + $0x13c] sm:$0xf]  ;;  %v12349_v42 = vld [vmem:[#allocation7 + $0x144] sm:$0xf0] }
 0x826   :  { %v12352_v53 = vor.u32 %v12821_v30, %v12349_v42  ;;  %v12799_v30 = vld [vmem:[#allocation7 + $0x88] sm:$0xf0]  ;;  %v12355_v42 = vld [vmem:[#allocation7 + $0x140] sm:$0xf] }
 0x827   :  { %10433 = vmatpush.bf16.msrb.mxu3 %v12276_v20 }
 0x828   :  { %9924 = vmatpush.bf16.msrb.mxu1 %v12128_v14  ;;  %9937 = vmatpush.bf16.msrb.mxu2 %v12132_v21  ;;  %v9498_v40 = vpop.f32.mrf.mxu1  ;;  %v12360_v14 = vor.u32 %v12825_v29, %v12359_v13  ;;  %v12251_v21 = vld [vmem:[#allocation7 + $0x78] sm:$0xf] }
 0x829   :  { %v9499_v44 = vadd.f32 %v9498_v40, %v8444_v15  ;;  %v12239_v15 = vld [vmem:[#allocation7 + $0x60] sm:$0xf] }
 0x82a   :  { %10447 = vmatpush.bf16.msra.mxu0 %v12360_v14  ;;  %v12794_v14 = vld [vmem:[#allocation7 + $0x64] sm:$0xf] }
 0x82b   :  { %9925 = vmatmul.bf16.vlgmr.msrb.gmra.mxu1 %v9835_v4  ;;  %9938 = vmatmul.bf16.vlgmr.msrb.gmra.mxu2 %v9835_v4  ;;  %v12252_v4 = vor.u32 %v12798_v27, %v12251_v21  ;;  %v12241_v21 = vld [vmem:[#allocation7 + $0x6c] sm:$0xf0]  ;;  %v12818_v27 = vld [vmem:[#allocation7 + $0x124] sm:$0xf] }
 0x82c   :  { %v9537_v11 = vpop.f32.mrf.mxu0  ;;  %10434 = vmatpush.bf16.msrb.mxu3 %v12264_v36  ;;  %v12204_v36 = vor.u32 %v12786_v2, %v12203_v61  ;;  %v12244_v1 = vor.u32 %v12794_v14, %v12241_v21  ;;  %v12823_v61 = vld [vmem:[#allocation7 + $0x148] sm:$0xf0]  ;;  %v12782_v2 = vld [vmem:[#allocation7 + $0x4] sm:$0xf]  ;;  %v12796_v14 = vld [vmem:[#allocation7 + $0x70] sm:$0xf0] }
 0x82e   :  { %v9511_v17 = vpop.f32.mrf.mxu2  ;;  %10448 = vmatpush.bf16.msra.mxu0 %v12348_v6  ;;  %v12191_v6 = vld [vmem:[#allocation7] sm:$0xf] }
 0x82f   :  { %v9512_v49 = vadd.f32 %v9511_v17, %v9499_v44  ;;  %v12335_v44 = vld [vmem:[#allocation7 + $0x120] sm:$0xf] }
 0x830   :  { %v9500_v56 = vpop.f32.mrf.mxu1  ;;  %10435 = vmatpush.bf16.msrb.mxu3 %v12252_v4  ;;  %v12337_v4 = vld [vmem:[#allocation7 + $0x12c] sm:$0xf0] }
 0x832   :  { %v9524_v41 = vpop.f32.mrf.mxu3 }
 0x833   :  { %v9525_v48 = vadd.f32 %v9524_v41, %v9512_v49  ;;  %v12819_v41 = vld [vmem:[#allocation7 + $0x128] sm:$0xf0] }
 0x834   :  { %v9539_v34 = vpop.f32.mrf.mxu0 }
 0x835   :  { %v9538_v7 = vadd.f32 %v9537_v11, %v9525_v48  ;;  %v12795_v11 = vld [vmem:[#allocation7 + $0x68] sm:$0xf0]  ;;  %v12277_v34 = vld [vmem:[#allocation7 + $0xb4] sm:$0xf0] }
 0x836   :  { %v9513_v28 = vpop.f32.mrf.mxu2  ;;  %v12240_v56 = vor.u32 %v12795_v11, %v12239_v15  ;;  %v12803_v48 = vld [vmem:[#allocation7 + $0xac] sm:$0xf]  ;;  %v12340_v11 = vor.u32 %v12818_v27, %v12337_v4  ;;  %v12343_v27 = vld [vmem:[#allocation7 + $0x128] sm:$0xf]  ;;  %v9799_v4 = vld [vmem:[%s17738_s13] sm:$0x3] }
 0x837   :  { %v12280_v28 = vor.u32 %v12803_v48, %v12277_v34  ;;  %s13004_s13 = smov 127  }
 0x838   :  { %v9550_v47 = vpop.f32.mrf.mxu1  ;;  %10436 = vmatpush.bf16.msrb.mxu3 %v12240_v56  ;;  %v12229_v56 = vld [vmem:[#allocation7 + $0x54] sm:$0xf0] }
 0x839   :  { %v9551_v16 = vadd.f32 %v9550_v47, %v9538_v7  ;;  %v12336_v7 = vor.u32 %v12819_v41, %v12335_v44  ;;  %v12827_v47 = vld [vmem:[#allocation7 + $0x16c] sm:$0xf]  ;;  %10459 = vmatpush.bf16.msra.mxu1 %v12280_v28  ;;  %v12287_v44 = vld [vmem:[#allocation7 + $0xc0] sm:$0xf]  ;;  %v12325_v28 = vld [vmem:[#allocation7 + $0x114] sm:$0xf0] }
 0x83a   :  { %v9526_v46 = vpop.f32.mrf.mxu3  ;;  %v12815_v41 = vld [vmem:[#allocation7 + $0x10c] sm:$0xf] }
 0x83b   :  { %10449 = vmatpush.bf16.msra.mxu0 %v12336_v7 }
 0x83c   :  { %v9589_v50 = vpop.f32.mrf.mxu0 }
 0x83e   :  { %v9563_v57 = vpop.f32.mrf.mxu2 }
 0x83f   :  { %v9564_v31 = vadd.f32 %v9563_v57, %v9551_v16  ;;  %v12373_v16 = vld [vmem:[#allocation7 + $0x174] sm:$0xf0] }
 0x840   :  { %v9552_v58 = vpop.f32.mrf.mxu1 }
 0x842   :  { %v9576_v22 = vpop.f32.mrf.mxu3 }
 0x843   :  { %v9577_v35 = vadd.f32 %v9576_v22, %v9564_v31  ;;  %v12227_v22 = vld [vmem:[#allocation7 + $0x48] sm:$0xf] }
 0x844   :  { %v9591_v45 = vpop.f32.mrf.mxu0 }
 0x845   :  { %v9590_v39 = vadd.f32 %v9589_v50, %v9577_v35  ;;  %v12376_v50 = vor.u32 %v12827_v47, %v12373_v16  ;;  %v12792_v35 = vld [vmem:[#allocation7 + $0x50] sm:$0xf0]  ;;  %v12323_v45 = vld [vmem:[#allocation7 + $0x108] sm:$0xf]  ;;  %v12283_v47 = vld [vmem:[#allocation7 + $0xb0] sm:$0xf] }
 0x846   :  { %v9565_v51 = vpop.f32.mrf.mxu2  ;;  %v12805_v16 = vld [vmem:[#allocation7 + $0xb8] sm:$0xf0] }
 0x847   :  { %10472 = vmatpush.bf16.msra.mxu2 %v12376_v50 }
 0x848   :  { %v9602_v25 = vpop.f32.mrf.mxu1 }
 0x849   :  { %v9603_v23 = vadd.f32 %v9602_v25, %v9590_v39  ;;  %v12228_v25 = vor.u32 %v12792_v35, %v12227_v22  ;;  %v12379_v22 = vld [vmem:[#allocation7 + $0x170] sm:$0xf]  ;;  %v12829_v35 = vld [vmem:[#allocation7 + $0x178] sm:$0xf0] }
 0x84a   :  { %v9578_v62 = vpop.f32.mrf.mxu3 }
 0x84b   :  { %v12800_v62 = vld [vmem:[#allocation7 + $0x94] sm:$0xf]  ;;  %10437 = vmatpush.bf16.msrb.mxu3 %v12228_v25 }
 0x84e   :  { %v9615_v60 = vpop.f32.mrf.mxu2 }
 0x84f   :  { %v9641_v3 = vpop.f32.mrf.mxu0  ;;  %v17574_v59 = vadd.f32 %v9615_v60, %v9603_v23  ;;  %v12816_v23 = vld [vmem:[#allocation7 + $0x110] sm:$0xf0] }
 0x850   :  { %v9604_v9 = vpop.f32.mrf.mxu1  ;;  %v12324_v60 = vor.u32 %v12816_v23, %v12323_v45  ;;  %v12284_v45 = vor.u32 %v12805_v16, %v12283_v47 }
 0x852   :  { %10450 = vmatpush.bf16.msra.mxu0 %v12324_v60  ;;  %v12812_v60 = vld [vmem:[#allocation7 + $0xf4] sm:$0xf] }
 0x855   :  { %v9628_v33 = vpop.f32.mrf.mxu3 }
 0x856   :  { %v9629_v52 = vadd.f32 %v9628_v33, %v8445_v32  ;;  %v9617_v54 = vpop.f32.mrf.mxu2  ;;  %v12824_v32 = vld [vmem:[#allocation7 + $0x154] sm:$0xf]  ;;  %v12361_v33 = vld [vmem:[#allocation7 + $0x15c] sm:$0xf0] }
 0x857   :  { %v9643_v55 = vpop.f32.mrf.mxu0  ;;  %v12215_v54 = vld [vmem:[#allocation7 + $0x30] sm:$0xf] }
 0x858   :  { %v9642_v43 = vadd.f32 %v9641_v3, %v9629_v52  ;;  %v12265_v3 = vld [vmem:[#allocation7 + $0x9c] sm:$0xf0]  ;;  %v12364_v55 = vor.u32 %v12824_v32, %v12361_v33  ;;  %v12271_v32 = vld [vmem:[#allocation7 + $0x98] sm:$0xf] }
 0x859   :  { %v12268_v9 = vor.u32 %v12800_v62, %v12265_v3  ;;  %v12380_v3 = vor.u32 %v12829_v35, %v12379_v22 }
 0x85a   :  { %10473 = vmatpush.bf16.msra.mxu2 %v12364_v55  ;;  %v12367_v55 = vld [vmem:[#allocation7 + $0x158] sm:$0xf] }
 0x85b   :  { %10460 = vmatpush.bf16.msra.mxu1 %v12268_v9  ;;  %v12313_v9 = vld [vmem:[#allocation7 + $0xfc] sm:$0xf0] }
 0x85d   :  { %v9630_v12 = vpop.f32.mrf.mxu3 }
 0x85e   :  { %v12311_v12 = vld [vmem:[#allocation7 + $0xf0] sm:$0xf]  ;;  %10474 = vmatpush.bf16.msra.mxu2 %v12352_v53 }
 0x862   :  { %10475 = vmatpush.bf16.msra.mxu2 %v12340_v11 }
 0x868   :  { %v9654_v5 = vpop.f32.mrf.mxu1 }
 0x869   :  { %v9655_v40 = vadd.f32 %v9654_v5, %v9642_v43  ;;  %v12789_v43 = vld [vmem:[#allocation7 + $0x38] sm:$0xf0] }
 0x86e   :  { %v9667_v26 = vpop.f32.mrf.mxu2 }
 0x86f   :  { %v9693_v38 = vpop.f32.mrf.mxu0  ;;  %v9668_v17 = vadd.f32 %v9667_v26, %v9655_v40  ;;  %v12813_v26 = vld [vmem:[#allocation7 + $0xf8] sm:$0xf0]  ;;  %v12783_v40 = vld [vmem:[#allocation7 + $0x8] sm:$0xf0] }
 0x870   :  { %v9656_v18 = vpop.f32.mrf.mxu1  ;;  %v12192_v7 = vor.u32 %v12783_v40, %v12191_v6 }
 0x871   :  { %v12797_v18 = vld [vmem:[#allocation7 + $0x7c] sm:$0xf] }
 0x875   :  { %v9680_v0 = vpop.f32.mrf.mxu3 }
 0x876   :  { %v9669_v24 = vpop.f32.mrf.mxu2  ;;  %v9681_v46 = vadd.f32 %v9680_v0, %v9668_v17  ;;  %v12253_v0 = vld [vmem:[#allocation7 + $0x84] sm:$0xf0]  ;;  %v12807_v17 = vld [vmem:[#allocation7 + $0xc8] sm:$0xf0] }
 0x877   :  { %v9695_v63 = vpop.f32.mrf.mxu0  ;;  %v12312_v24 = vor.u32 %v12813_v26, %v12311_v12  ;;  %v12785_v26 = vld [vmem:[#allocation7 + $0x1c] sm:$0xf] }
 0x878   :  { %v9694_v31 = vadd.f32 %v9693_v38, %v9681_v46  ;;  %v12216_v38 = vor.u32 %v12789_v43, %v12215_v54  ;;  %v12826_v54 = vld [vmem:[#allocation7 + $0x160] sm:$0xf0] }
 0x879   :  { %10451 = vmatpush.bf16.msra.mxu0 %v12312_v24  ;;  %v12301_v24 = vld [vmem:[#allocation7 + $0xe4] sm:$0xf0] }
 0x87a   :  { %10438 = vmatpush.bf16.msrb.mxu3 %v12216_v38 }
 0x87d   :  { %v9682_v8 = vpop.f32.mrf.mxu3  ;;  %10452 = vmatpush.bf16.msra.mxu0 %v12300_v10  ;;  %v12820_v10 = vld [vmem:[#allocation7 + $0x130] sm:$0xf0] }
 0x87e   :  { %v12256_v8 = vor.u32 %v12797_v18, %v12253_v0  ;;  %10439 = vmatpush.bf16.msrb.mxu3 %v12204_v36  ;;  %v12205_v18 = vld [vmem:[#allocation7 + $0x24] sm:$0xf0]  ;;  %v12809_v0 = vld [vmem:[#allocation7 + $0xdc] sm:$0xf]  ;;  %v12344_v11 = vor.u32 %v12820_v10, %v12343_v27 }
 0x87f   :  { %v12247_v36 = vld [vmem:[#allocation7 + $0x68] sm:$0xf] }
 0x880   :  { %10461 = vmatpush.bf16.msra.mxu1 %v12256_v8  ;;  %v12259_v8 = vld [vmem:[#allocation7 + $0x80] sm:$0xf]  ;;  %v12248_v40 = vor.u32 %v12796_v14, %v12247_v36 }
 0x881   :  { %v12260_v53 = vor.u32 %v12799_v30, %v12259_v8 }
 0x882   :  { %10440 = vmatpush.bf16.msrb.mxu3 %v12192_v7 }
 0x884   :  { %10462 = vmatpush.bf16.msra.mxu1 %v12244_v1  ;;  %v12196_v1 = vor.u32 %v12782_v2, %v12193_v37 }
 0x886   :  { %10485 = vmatpush.bf16.msra.mxu3 %v12284_v45 }
 0x888   :  { %v9706_v49 = vpop.f32.mrf.mxu1 }
 0x889   :  { %v9707_v39 = vadd.f32 %v9706_v49, %v9694_v31  ;;  %v12791_v49 = vld [vmem:[#allocation7 + $0x4c] sm:$0xf] }
 0x88a   :  { %v12232_v31 = vor.u32 %v12791_v49, %v12229_v56 }
 0x88c   :  { %10463 = vmatpush.bf16.msra.mxu1 %v12232_v31 }
 0x88e   :  { %v9745_v57 = vpop.f32.mrf.mxu0  ;;  %v9719_v58 = vpop.f32.mrf.mxu2 }
 0x88f   :  { %v9720_v52 = vadd.f32 %v9719_v58, %v9707_v39  ;;  %v12328_v58 = vor.u32 %v12815_v41, %v12325_v28  ;;  %v12788_v39 = vld [vmem:[#allocation7 + $0x34] sm:$0xf] }
 0x890   :  { %v9708_v51 = vpop.f32.mrf.mxu1 }
 0x891   :  { %v12217_v51 = vld [vmem:[#allocation7 + $0x3c] sm:$0xf0]  ;;  %10476 = vmatpush.bf16.msra.mxu2 %v12328_v58 }
 0x892   :  { %v12220_v12 = vor.u32 %v12788_v39, %v12217_v51 }
 0x894   :  { %v9732_v5 = vpop.f32.mrf.mxu3  ;;  %10464 = vmatpush.bf16.msra.mxu1 %v12220_v12 }
 0x895   :  { %v9733_v63 = vadd.f32 %v9732_v5, %v9720_v52  ;;  %v12802_v52 = vld [vmem:[#allocation7 + $0xa0] sm:$0xf0]  ;;  %v12316_v5 = vor.u32 %v12812_v60, %v12313_v9 }
 0x896   :  { %v9747_v20 = vpop.f32.mrf.mxu0  ;;  %v9721_v29 = vpop.f32.mrf.mxu2  ;;  %v12272_v38 = vor.u32 %v12802_v52, %v12271_v32 }
 0x897   :  { %v9746_v13 = vadd.f32 %v9745_v57, %v9733_v63  ;;  %v12288_v57 = vor.u32 %v12807_v17, %v12287_v44  ;;  %v12368_v63 = vor.u32 %v12826_v54, %v12367_v55  ;;  %10477 = vmatpush.bf16.msra.mxu2 %v12316_v5  ;;  %v12304_v20 = vor.u32 %v12809_v0, %v12301_v24  ;;  %v12289_v29 = vld [vmem:[#allocation7 + $0xcc] sm:$0xf0] }
 0x898   :  { %10486 = vmatpush.bf16.msra.mxu3 %v12272_v38  ;;  %v12292_v6 = vor.u32 %v12806_v19, %v12289_v29  ;;  %v9801_v17 = vperm.slane %v9799_v4, 0 }
 0x899   :  { %v9751_v15 = vrot.slane %v9746_v13, 7  ;;  %10453 = vmatpush.bf16.msra.mxu0 %v12288_v57  ;;  %v12356_v13 = vor.u32 %v12823_v61, %v12355_v42 }
 0x89b   :  { %v17578_v48 = vsel %vm2642_vm5, %v17574_v59, %v9751_v15  ;;  %v17582_v34 = vsel %vm18379_vm13, %v17574_v59, %v9751_v15  ;;  %v17586_v46 = vsel %vm18380_vm10, %v17574_v59, %v9751_v15  ;;  %v17590_v25 = vsel %vm2647_vm4, %v17574_v59, %v9751_v15  ;;  %10478 = vmatpush.bf16.msra.mxu2 %v12304_v20  ;;  %vm18393_vm13 = vmmov %vm18388_vm3 }
 0x89c   :  { %v9734_v50 = vpop.f32.mrf.mxu3  ;;  %v17594_v23 = vsel %vm18381_vm14, %v17574_v59, %v9751_v15  ;;  %v17598_v62 = vsel %vm18382_vm2, %v17574_v59, %v9751_v15  ;;  %v17602_v33 = vsel %vm18383_vm15, %v17574_v59, %v9751_v15  ;;  %v17606_v43 = vsel %vm372_vm1, %v9751_v15, %v17574_v59  ;;  %10487 = vmatpush.bf16.msra.mxu3 %v12260_v53  ;;  %vm18396_vm2 = vmmov %vm18391_vm0 }
 0x89d   :  { %10498 = vmatpush.bf16.msrb.mxu0 %v12380_v3  ;;  %v12208_v59 = vor.u32 %v12785_v26, %v12205_v18  ;;  %v9802_v15 = vperm.slane %v9799_v4, 1  ;;  %v9754_v44 = vrot.slane %v17582_v34, 1  ;;  %v9756_v49 = vrot.slane %v17586_v46, 2  ;;  %vm18397_vm15 = vmmov %vm18387_vm7 }
 0x89e   :  { %v9758_v56 = vrot.slane %v17590_v25, 3  ;;  %v9760_v7 = vrot.slane %v17594_v23, 4  ;;  %v9762_v28 = vrot.slane %v17598_v62, 5  ;;  %v9764_v47 = vrot.slane %v17602_v33, 6 }
 0x89f   :  { %10465 = vmatpush.bf16.msra.mxu1 %v12208_v59  ;;  %10479 = vmatpush.bf16.msra.mxu2 %v12292_v6  ;;  %v9766_v16 = vrot.slane %v17606_v43, 7  ;;  %v9775_v34 = vmax.f32 %v17578_v48, 0.0  ;;  %v9776_v57 = vmax.f32 %v9754_v44, 0.0  ;;  %v9777_v22 = vmax.f32 %v9756_v49, 0.0 }
 0x8a0   :  { %10488 = vmatpush.bf16.msra.mxu3 %v12248_v40  ;;  %v9778_v35 = vmax.f32 %v9758_v56, 0.0  ;;  %v9779_v45 = vmax.f32 %v9760_v7, 0.0  ;;  %v9780_v39 = vmax.f32 %v9762_v28, 0.0  ;;  %v9781_v51 = vmax.f32 %v9764_v47, 0.0 }
 0x8a1   :  { %10499 = vmatpush.bf16.msrb.mxu0 %v12368_v63  ;;  %v9782_v25 = vmax.f32 %v9766_v16, 0.0 }
 0x8a3   :  { %10466 = vmatpush.bf16.msra.mxu1 %v12196_v1 }
 0x8a5   :  { %10500 = vmatpush.bf16.msrb.mxu0 %v12356_v13 }
 0x8a8   :  { %v9926_v21 = vpop.f32.mrf.mxu1 }
 0x8a9   :  { %10501 = vmatpush.bf16.msrb.mxu0 %v12344_v11  ;;  %v9927_v46 = vadd.f32 %v9926_v21, %v9801_v17 }
 0x8ae   :  { %v9939_v41 = vpop.f32.mrf.mxu2 }
 0x8af   :  { %v9940_v50 = vadd.f32 %v9939_v41, %v9802_v15 }
 0x8b0   :  { %v9928_v31 = vpop.f32.mrf.mxu1 }
 0x8b1   :  { %v9945_v58 = vrot.slane %v9940_v50, 7 }
 0x8b3   :  { %v9946_v23 = vsel %vm2642_vm5, %v9927_v46, %v9945_v58  ;;  %v9947_v62 = vsel %vm18384_vm9, %v9927_v46, %v9945_v58  ;;  %v9949_v3 = vsel %vm18385_vm11, %v9927_v46, %v9945_v58  ;;  %v9951_v60 = vsel %vm2647_vm4, %v9927_v46, %v9945_v58  ;;  %vm18390_vm5 = vmmov %vm18380_vm10 }
 0x8b4   :  { %v9948_v9 = vrot.slane %v9947_v62, 1  ;;  %v9950_v48 = vrot.slane %v9949_v3, 2  ;;  %v9952_v32 = vrot.slane %v9951_v60, 3  ;;  %v9953_v33 = vsel %vm18386_vm8, %v9927_v46, %v9945_v58  ;;  %vm18395_vm14 = vmmov %vm18390_vm5 }
 0x8b5   :  { %v9954_v52 = vrot.slane %v9953_v33, 4  ;;  %v9955_v55 = vsel %vm18387_vm7, %v9927_v46, %v9945_v58  ;;  %v9957_v54 = vsel %vm18388_vm3, %v9927_v46, %v9945_v58  ;;  %v9959_v43 = vsel %vm372_vm1, %v9945_v58, %v9927_v46  ;;  %vm18389_vm1 = vmmov %vm18384_vm9 }
 0x8b6   :  { %v9941_v12 = vpop.f32.mrf.mxu2  ;;  %v9956_v5 = vrot.slane %v9955_v55, 5  ;;  %v9958_v38 = vrot.slane %v9957_v54, 6  ;;  %v9960_v26 = vrot.slane %v9959_v43, 7  ;;  %v9969_v18 = vadd.f32 %v9946_v23, %v9775_v34  ;;  %vm18394_vm10 = vmmov %vm18389_vm1 }
 0x8b7   :  { %v9970_v0 = vadd.f32 %v9948_v9, %v9776_v57  ;;  %v9971_v63 = vadd.f32 %v9950_v48, %v9777_v22  ;;  %v9972_v24 = vadd.f32 %v9952_v32, %v9778_v35  ;;  %v9973_v8 = vadd.f32 %v9954_v52, %v9779_v45  ;;  %v12845_v12 = vld [vmem:[%s17741_s16 + $0x78] sm:$0xff] }
 0x8b8   :  { %v9974_v30 = vadd.f32 %v9956_v5, %v9780_v39  ;;  %v9975_v42 = vadd.f32 %v9958_v38, %v9781_v51  ;;  %v9976_v61 = vadd.f32 %v9960_v26, %v9782_v25  ;;  %v9977_v59 = vmax.f32 %v9969_v18, 0.0  ;;  %v12837_v5 = vld [vmem:[%s17741_s16 + $0x38] sm:$0xff]  ;;  %10726 = vmatpush.bf16.msrb.mxu2 %v12845_v12 }
 0x8b9   :  { %v9978_v20 = vmax.f32 %v9970_v0, 0.0  ;;  %v9979_v53 = vmax.f32 %v9971_v63, 0.0  ;;  %v9980_v2 = vmax.f32 %v9972_v24, 0.0  ;;  %v9981_v37 = vmax.f32 %v9973_v8, 0.0  ;;  %10713 = vmatpush.bf16.msrb.mxu1 %v12837_v5  ;;  %v12834_v5 = vld [vmem:[%s17741_s16 + $0x20] sm:$0xff] }
 0x8ba   :  { %v9982_v19 = vmax.f32 %v9974_v30, 0.0  ;;  %v9983_v13 = vmax.f32 %v9975_v42, 0.0  ;;  %v9984_v29 = vmax.f32 %v9976_v61, 0.0  ;;  %v9993_v36 = vperm.slane %v9977_v59, 0  ;;  %v12844_v42 = vld [vmem:[%s17741_s16 + $0x70] sm:$0xff] }
 0x8bb   :  { %v9995_v14 = vperm.slane %v9978_v20, 0  ;;  %v9997_v21 = vperm.slane %v9979_v53, 0  ;;  %v9999_v27 = vperm.slane %v9980_v2, 0  ;;  %v10001_v10 = vperm.slane %v9981_v37, 0  ;;  %v12836_v61 = vld [vmem:[%s17741_s16 + $0x30] sm:$0xff] }
 0x8bc   :  { %v10003_v1 = vperm.slane %v9982_v19, 0  ;;  %v10005_v4 = vperm.slane %v9983_v13, 0  ;;  %v10007_v6 = vperm.slane %v9984_v29, 0  ;;  %v10025_v40 = vpack.c.bf16 %v9993_v36, %v9993_v36  ;;  %10727 = vmatpush.bf16.msrb.mxu2 %v12844_v42  ;;  %v12851_v42 = vld [vmem:[%s17741_s16 + $0xa8] sm:$0xff] }
 0x8bd   :  { %v10027_v15 = vpack.c.bf16 %v9995_v14, %v9995_v14  ;;  %v10029_v11 = vpack.c.bf16 %v9997_v21, %v9997_v21  ;;  %v10031_v44 = vpack.c.bf16 %v9999_v27, %v9999_v27  ;;  %v10033_v17 = vpack.c.bf16 %v10001_v10, %v10001_v10  ;;  %v12331_v14 = vld [vmem:[#allocation7 + $0x110] sm:$0xf]  ;;  %v12817_v21 = vld [vmem:[#allocation7 + $0x118] sm:$0xf0]  ;;  %v12223_v27 = vld [vmem:[#allocation7 + $0x38] sm:$0xf]  ;;  %10714 = vmatpush.bf16.msrb.mxu1 %v12836_v61 }
 0x8be   :  { %v10035_v49 = vpack.c.bf16 %v10003_v1, %v10003_v1  ;;  %v10037_v56 = vpack.c.bf16 %v10005_v4, %v10005_v4  ;;  %v10039_v41 = vpack.c.bf16 %v10007_v6, %v10007_v6  ;;  %v10129_v50 = vunpack.c.l.b16 %v10025_v40  ;;  %v12790_v40 = vld [vmem:[#allocation7 + $0x40] sm:$0xf0]  ;;  %v12838_v61 = vld [vmem:[%s17741_s16 + $0x40] sm:$0xff] }
 0x8bf   :  { %v10131_v7 = vunpack.c.l.b16 %v10027_v15  ;;  %v10133_v28 = vunpack.c.l.b16 %v10029_v11  ;;  %v10135_v47 = vunpack.c.l.b16 %v10031_v44  ;;  %v10137_v16 = vunpack.c.l.b16 %v10033_v17  ;;  %v12319_v15 = vld [vmem:[#allocation7 + $0xf8] sm:$0xf]  ;;  %v12814_v17 = vld [vmem:[#allocation7 + $0x100] sm:$0xf0] }
 0x8c0   :  { %v10139_v34 = vunpack.c.l.b16 %v10035_v49  ;;  %v10141_v57 = vunpack.c.l.b16 %v10037_v56  ;;  %v10143_v31 = vunpack.c.l.b16 %v10039_v41  ;;  %v9994_v35 = vperm.slane %v9977_v59, 1  ;;  %v12843_v49 = vld [vmem:[%s17741_s16 + $0x68] sm:$0xff] }
 0x8c1   :  { %v10145_v46 = vrot.slane %v10131_v7, 7  ;;  %v10147_v58 = vrot.slane %v10133_v28, 6  ;;  %v10149_v22 = vrot.slane %v10135_v47, 5  ;;  %v10151_v45 = vrot.slane %v10137_v16, 4  ;;  %v12835_v56 = vld [vmem:[%s17741_s16 + $0x28] sm:$0xff]  ;;  %10728 = vmatpush.bf16.msrb.mxu2 %v12843_v49 }
 0x8c2   :  { %v10153_v39 = vrot.slane %v10139_v34, 3  ;;  %v10155_v51 = vrot.slane %v10141_v57, 2  ;;  %v9996_v25 = vperm.slane %v9978_v20, 1  ;;  %v9998_v62 = vperm.slane %v9979_v53, 1  ;;  %10715 = vmatpush.bf16.msrb.mxu1 %v12835_v56 }
 0x8c3   :  { %v10146_v23 = vsel %vm18389_vm1, %v10145_v46, %v10129_v50  ;;  %v10000_v3 = vperm.slane %v9980_v2, 1  ;;  %v10002_v60 = vperm.slane %v9981_v37, 1  ;;  %v10004_v48 = vperm.slane %v9982_v19, 1  ;;  %v12235_v37 = vld [vmem:[#allocation7 + $0x50] sm:$0xf] }
 0x8c4   :  { %v10148_v9 = vsel %vm18390_vm5, %v10147_v58, %v10146_v23  ;;  %v10006_v32 = vperm.slane %v9983_v13, 1  ;;  %v10008_v33 = vperm.slane %v9984_v29, 1  ;;  %v10026_v55 = vpack.c.bf16 %v9994_v35, %v9994_v35  ;;  %v12793_v19 = vld [vmem:[#allocation7 + $0x58] sm:$0xf0]  ;;  %v12211_v58 = vld [vmem:[#allocation7 + $0x20] sm:$0xf] }
 0x8c5   :  { %v10150_v52 = vsel %vm2647_vm4, %v10149_v22, %v10148_v9  ;;  %v10028_v54 = vpack.c.bf16 %v9996_v25, %v9996_v25  ;;  %v10030_v43 = vpack.c.bf16 %v9998_v62, %v9998_v62  ;;  %v10032_v26 = vpack.c.bf16 %v10000_v3, %v10000_v3  ;;  %v12787_v22 = vld [vmem:[#allocation7 + $0x28] sm:$0xf0]  ;;  %v12842_v25 = vld [vmem:[%s17741_s16 + $0x60] sm:$0xff] }
 0x8c6   :  { %v10152_v38 = vsel %vm18391_vm0, %v10151_v45, %v10150_v52  ;;  %v10034_v18 = vpack.c.bf16 %v10002_v60, %v10002_v60  ;;  %v10036_v0 = vpack.c.bf16 %v10004_v48, %v10004_v48  ;;  %v10157_v24 = vrot.slane %v10143_v31, 1  ;;  %v12784_v52 = vld [vmem:[#allocation7 + $0x10] sm:$0xf0]  ;;  %10729 = vmatpush.bf16.msrb.mxu2 %v12842_v25  ;;  %10716 = vmatpush.bf16.msrb.mxu1 %v12834_v5 }
 0x8c7   :  { %v10154_v63 = vsel %vm18392_vm12, %v10153_v39, %v10152_v38  ;;  %v10038_v8 = vpack.c.bf16 %v10006_v32, %v10006_v32  ;;  %v10040_v30 = vpack.c.bf16 %v10008_v33, %v10008_v33  ;;  %v10132_v20 = vunpack.c.l.b16 %v10028_v54  ;;  %v12307_v39 = vld [vmem:[#allocation7 + $0xe0] sm:$0xf]  ;;  %v12199_v32 = vld [vmem:[#allocation7 + $0x8] sm:$0xf]  ;;  %v12808_v54 = vld [vmem:[#allocation7 + $0xd0] sm:$0xf0] }
 0x8c8   :  { %v10156_v59 = vsel %vm18393_vm13, %v10155_v51, %v10154_v63  ;;  %v10134_v53 = vunpack.c.l.b16 %v10030_v43  ;;  %v10136_v2 = vunpack.c.l.b16 %v10032_v26  ;;  %v10130_v29 = vunpack.c.l.b16 %v10026_v55  ;;  %v12811_v51 = vld [vmem:[#allocation7 + $0xe8] sm:$0xf0]  ;;  %v12295_v55 = vld [vmem:[#allocation7 + $0xc8] sm:$0xf]  ;;  %v12841_v38 = vld [vmem:[%s17741_s16 + $0x58] sm:$0xff] }
 0x8c9   :  { %v10158_v13 = vsel %vm8541_vm6, %v10157_v24, %v10156_v59  ;;  %v10138_v36 = vunpack.c.l.b16 %v10034_v18  ;;  %v10140_v1 = vunpack.c.l.b16 %v10036_v0  ;;  %v10159_v4 = vrot.slane %v10132_v20, 7  ;;  %v12853_v26 = vld [vmem:[%s17741_s16 + $0xb8] sm:$0xff]  ;;  %v12840_v0 = vld [vmem:[%s17741_s16 + $0x50] sm:$0xff]  ;;  %v12830_v59 = vld [vmem:[%s17741_s16] sm:$0xff] }
 0x8ca   :  { %v10173_v10 = vpack.c.b16 %v10158_v13, %v10158_v13  ;;  %v10161_v6 = vrot.slane %v10134_v53, 6  ;;  %v10142_v11 = vunpack.c.l.b16 %v10038_v8  ;;  %v10144_v44 = vunpack.c.l.b16 %v10040_v30  ;;  %10730 = vmatpush.bf16.msrb.mxu2 %v12841_v38  ;;  %v12833_v18 = vld [vmem:[%s17741_s16 + $0x18] sm:$0xff]  ;;  %v12832_v63 = vld [vmem:[%s17741_s16 + $0x10] sm:$0xff]  ;;  %v12839_v8 = vld [vmem:[%s17741_s16 + $0x48] sm:$0xff] }
 0x8cb   :  { %v10160_v41 = vsel %vm18394_vm10, %v10159_v4, %v10130_v29  ;;  %v10163_v7 = vrot.slane %v10136_v2, 5  ;;  %v12236_v28 = vor.u32 %v12793_v19, %v12235_v37  ;;  %v12332_v47 = vor.u32 %v12817_v21, %v12331_v14  ;;  %10717 = vmatpush.bf16.msrb.mxu1 %v12833_v18  ;;  %v12852_v24 = vld [vmem:[%s17741_s16 + $0xb0] sm:$0xff]  ;;  %v12831_v30 = vld [vmem:[%s17741_s16 + $0x8] sm:$0xff]  ;;  %v12850_v20 = vld [vmem:[%s17741_s16 + $0xa0] sm:$0xff] }
 0x8cc   :  { %10441 = vmatmul.bf16.vlgmr.msrb.gmra.mxu3 %v10173_v10  ;;  %10467 = vmatmul.bf16.vlgmr.msra.gmra.mxu1 %v10173_v10  ;;  %v10162_v16 = vsel %vm18395_vm14, %v10161_v6, %v10160_v41  ;;  %v10165_v50 = vrot.slane %v10138_v36, 4  ;;  %v10167_v57 = vrot.slane %v10140_v1, 3  ;;  %v12224_v31 = vor.u32 %v12790_v40, %v12223_v27  ;;  %v12849_v53 = vld [vmem:[%s17741_s16 + $0x98] sm:$0xff]  ;;  %v10105_v37 = vld [vmem:[%s17740_s15] sm:$0x7]  ;;  %v12848_v19 = vld [vmem:[%s17741_s16 + $0x90] sm:$0xff] }
 0x8cd   :  { %v10164_v34 = vsel %vm2647_vm4, %v10163_v7, %v10162_v16  ;;  %10489 = vmatpush.bf16.msra.mxu3 %v12236_v28  ;;  %10502 = vmatpush.bf16.msrb.mxu0 %v12332_v47  ;;  %v12320_v46 = vor.u32 %v12814_v17, %v12319_v15  ;;  %v10169_v45 = vrot.slane %v10142_v11, 2  ;;  %v10171_v62 = vrot.slane %v10144_v44, 1  ;;  %vm18398_vm4 = vmmov %vm18388_vm3  ;;  %v12847_v29 = vld [vmem:[%s17741_s16 + $0x88] sm:$0xff]  ;;  %v12846_v27 = vld [vmem:[%s17741_s16 + $0x80] sm:$0xff] }
 0x8ce   :  { %v10166_v35 = vsel %vm18396_vm2, %v10165_v50, %v10164_v34  ;;  %v12212_v9 = vor.u32 %v12787_v22, %v12211_v58  ;;  %v12308_v48 = vor.u32 %v12811_v51, %v12307_v39  ;;  %v12200_v43 = vor.u32 %v12784_v52, %v12199_v32  ;;  %10731 = vmatpush.bf16.msrb.mxu2 %v12840_v0  ;;  %v12869_v39 = vld [vmem:[%s17742_s17] ss:$0 sm:$0xff] }
 0x8cf   :  { %v10168_v23 = vsel %vm18397_vm15, %v10167_v57, %v10166_v35  ;;  %v12296_v12 = vor.u32 %v12808_v54, %v12295_v55  ;;  %10718 = vmatpush.bf16.msrb.mxu1 %v12832_v63  ;;  %v10107_v13 = vperm.slane %v10105_v37, 0  ;;  %v10108_v1 = vperm.slane %v10105_v37, 1 }
 0x8d0   :  { %v10170_v3 = vsel %vm18398_vm4, %v10169_v45, %v10168_v23  ;;  %v10109_v56 = vperm.slane %v10105_v37, 2 }
 0x8d1   :  { %v10172_v60 = vsel %vm8541_vm6, %v10171_v62, %v10170_v3  ;;  %10490 = vmatpush.bf16.msra.mxu3 %v12224_v31  ;;  %10503 = vmatpush.bf16.msrb.mxu0 %v12320_v46  ;;  %v10752_v3 = vld [vmem:[%s18399_s11] sm:$0xff]  ;;  %vm10764_vm6 = vcmask 7168  }
 0x8d2   :  { %v10174_v33 = vpack.c.b16 %v10172_v60, %v10172_v60  ;;  %10732 = vmatpush.bf16.msrb.mxu2 %v12839_v8 }
 0x8d3   :  { %10719 = vmatpush.bf16.msrb.mxu1 %v12831_v30 }
 0x8d4   :  { %10454 = vmatmul.bf16.vlgmr.msra.gmra.mxu0 %v10174_v33  ;;  %10480 = vmatmul.bf16.vlgmr.msra.gmra.mxu2 %v10174_v33 }
 0x8d5   :  { %10491 = vmatpush.bf16.msra.mxu3 %v12212_v9  ;;  %10504 = vmatpush.bf16.msrb.mxu0 %v12308_v48 }
 0x8d6   :  { %10733 = vmatpush.bf16.msrb.mxu2 %v12838_v61 }
 0x8d7   :  { %10720 = vmatpush.bf16.msrb.mxu1 %v12830_v59 }
 0x8d9   :  { %10492 = vmatpush.bf16.msra.mxu3 %v12200_v43  ;;  %10505 = vmatpush.bf16.msrb.mxu0 %v12296_v12 }
 0x8dc   :  { %10493 = vmatmul.bf16.vlgmr.msra.gmra.mxu3 %v10173_v10 }
 0x8dd   :  { %10739 = vmatpush.bf16.msrb.mxu3 %v12853_v26 }
 0x8e1   :  { %10740 = vmatpush.bf16.msrb.mxu3 %v12852_v24 }
 0x8e4   :  { %10506 = vmatmul.bf16.vlgmr.msrb.gmra.mxu0 %v10174_v33 }
 0x8e5   :  { %10741 = vmatpush.bf16.msrb.mxu3 %v12851_v42 }
 0x8e9   :  { %10742 = vmatpush.bf16.msrb.mxu3 %v12850_v20 }
 0x8ed   :  { %10743 = vmatpush.bf16.msrb.mxu3 %v12849_v53 }
 0x8f1   :  { %10744 = vmatpush.bf16.msrb.mxu3 %v12848_v19 }
 0x8f5   :  { %10745 = vmatpush.bf16.msrb.mxu3 %v12847_v29 }
 0x8f9   :  { %10746 = vmatpush.bf16.msrb.mxu3 %v12846_v27 }
 0x949   :  { %v10468_v2 = vpop.f32.mrf.mxu1 }
 0x94a   :  { %v10469_v6 = vadd.f32 %v10468_v2, %v10108_v1 }
 0x94f   :  { %v10442_v36 = vpop.f32.mrf.mxu3 }
 0x950   :  { %v10443_v14 = vadd.f32 %v10442_v36, %v10107_v13 }
 0x951   :  { %v10470_v21 = vpop.f32.mrf.mxu1  ;;  %v10455_v10 = vpop.f32.mrf.mxu0 }
 0x952   :  { %v10456_v4 = vadd.f32 %v10455_v10, %v10443_v14 }
 0x954   :  { %12870 = vtanh.f32 %v10456_v4 }
 0x957   :  { %v10444_v40 = vpop.f32.mrf.mxu3  ;;  %v10481_v15 = vpop.f32.mrf.mxu2 }
 0x958   :  { %v10482_v11 = vadd.f32 %v10481_v15, %v10469_v6 }
 0x959   :  { %v10457_v44 = vpop.f32.mrf.mxu0 }
 0x95a   :  { %v12871_v17 = vpop.eup %12870  ;;  %12872 = vtanh.f32 %v10482_v11 }
 0x95b   :  { %v10514_v49 = vpack.c.bf16 %v12871_v17, %v12871_v17 }
 0x95d   :  { %10721 = vmatmul.bf16.vlgmr.msrb.gmra.mxu1 %v10514_v49 }
 0x95f   :  { %v10483_v41 = vpop.f32.mrf.mxu2  ;;  %v10494_v7 = vpop.f32.mrf.mxu3 }
 0x960   :  { %v12873_v28 = vpop.eup %12872  ;;  %v10495_v47 = vadd.f32 %v10494_v7, %v10109_v56 }
 0x961   :  { %v10515_v16 = vpack.c.bf16 %v12873_v28, %v12873_v28  ;;  %v10507_v50 = vpop.f32.mrf.mxu0 }
 0x962   :  { %v10508_v34 = vadd.f32 %v10507_v50, %v10495_v47 }
 0x963   :  { %10734 = vmatmul.bf16.vlgmr.msrb.gmra.mxu2 %v10515_v16 }
 0x964   :  { %12874 = vtanh.f32 %v10508_v34 }
 0x967   :  { %v10496_v57 = vpop.f32.mrf.mxu3 }
 0x969   :  { %v10509_v31 = vpop.f32.mrf.mxu0 }
 0x96a   :  { %v12875_v46 = vpop.eup %12874 }
 0x96b   :  { %v10516_v58 = vpack.c.bf16 %v12875_v46, %v12875_v46 }
 0x96d   :  { %10747 = vmatmul.bf16.vlgmr.msrb.gmra.mxu3 %v10516_v58 }
 0x9da   :  { %v10722_v22 = vpop.f32.mrf.mxu1 }
 0x9db   :  { %v10723_v51 = vadd.f32 %v12869_v39, %v10722_v22 }
 0x9e2   :  { %v10724_v35 = vpop.f32.mrf.mxu1 }
 0x9e6   :  { %v10735_v45 = vpop.f32.mrf.mxu2 }
 0x9e7   :  { %v10736_v23 = vadd.f32 %v10735_v45, %v10723_v51 }
 0x9ee   :  { %v10737_v25 = vpop.f32.mrf.mxu2 }
 0x9f0   :  { %v10748_v62 = vpop.f32.mrf.mxu3 }
 0x9f1   :  { %v10749_v60 = vadd.f32 %v10748_v62, %v10736_v23 }
 0x9f3   :  { %v10753_v9 = vmul.f32 %v10752_v3, %v10749_v60 }
 0x9f5   :  { %10760 = vrot.lane.b32.xlu2 %v10753_v9, %s13003_s27  ;;  %10756 = vrot.lane.b32.xlu1 %v10753_v9, %s13004_s13 }
 0x9f8   :  { %v10750_v48 = vpop.f32.mrf.mxu3 }
 0xa4f   :  { %v10761_v52 = vpop.permute.xlu2 %10760 }
 0xa67   :  { %v10757_v32 = vpop.permute.xlu1 %10756 }
 0xa68   :  { %v10759_v33 = vadd.f32 %v10757_v32, %v10753_v9 }
 0xa6a   :  { %v10763_v55 = vadd.f32 %v10761_v52, %v10759_v33 }
 0xa6c   :  { %10765 = vst.msk [vmem:[%s17743_s18] sm:$0xff] %vm10764_vm6, %v10763_v55 }
 0xa6d   :  { %10770 = vsyncpa [#allocation3], 1 }
 0xa6e   :  { %10771 = vsyncpa [#allocation5], 1 }
 0xa6f   :  { %10772 = vsyncpa [#allocation8], 1 }

</bundles_post_ra>
